<compile_context>
chip_gen: v7x
topology: tpu7x:2x2x1
jax: 0.10.0
libtpu: 0.0.40
codegen_flags: <defaults>
</compile_context>

<pallas_src>
import functools

import jax
import jax.numpy as jnp
from jax.experimental import pallas as pl
from jax.experimental.pallas import tpu as pltpu

EPS = 0.003        # fc4 weight init range, as in the PyTorch module
BN_EPS = 1e-5      # nn.BatchNorm2d default eps

# conv1: 3->32, k=12, s=4 : 64x64 -> 14x14 ; conv2: 32->64, k=8, s=2 : 14x14 -> 4x4
_H1 = 14           # conv1 output spatial size
_H2 = 4            # conv2 output spatial size
_K2 = 8            # conv2 kernel size
_C1 = 32           # conv1 output channels
_C2 = 64           # conv2 output channels


# ------------------------------ Pallas kernel -------------------------------

def _bn_relu(y, gamma, beta):
    """Training-mode BatchNorm (batch stats over rows) folded to scale/shift, then ReLU."""
    r = y.shape[0]
    s1 = jnp.sum(y, axis=0, keepdims=True)
    s2 = jnp.sum(y * y, axis=0, keepdims=True)
    mean = s1 * (1.0 / r)
    var = s2 * (1.0 / r) - mean * mean            # biased variance (PyTorch training norm)
    scale = gamma * jax.lax.rsqrt(var + BN_EPS)
    shift = beta - mean * scale
    return jnp.maximum(y * scale + shift, 0.0)


def _actor_kernel(action_lim, n_batch,
                  p1_ref, w1_ref, g1_ref, be1_ref,
                  w2_ref, g2_ref, be2_ref,
                  we_ref, benc_ref, wf1_ref, bf1_ref, wf2_ref, bf2_ref,
                  wf3_ref, bf3_ref, wf4_ref, bf4_ref,
                  o_ref,
                  y1_ref, yw_ref, p2_ref, z2_ref, feat_ref):
    # ---- conv1 (one matmul over im2col patches) + BN + ReLU -----------------
    # conv bias omitted: exactly cancelled by the batch-mean subtraction in BN.
    # p1 rows are ordered (w1, n, h1%2, h1//2); cols (kh, kw, cin).
    y = jnp.dot(p1_ref[...], w1_ref[...], preferred_element_type=jnp.float32)   # [N*196, 32]
    y1_ref[...] = _bn_relu(y, g1_ref[...], be1_ref[...])

    # ---- re-layout conv1 activations into a width-dense slab ----------------
    # yw rows = (n, hp, hh) with h1 = 2*hh + hp ; cols = (w1, c).  14 contiguous copies.
    rows_per_w = _H1 * n_batch
    for w in range(_H1):
        yw_ref[:, w * _C1:(w + 1) * _C1] = y1_ref[w * rows_per_w:(w + 1) * rows_per_w, :]

    # ---- in-kernel im2col for conv2 ------------------------------------------
    # For kernel row i (hp=i%2, hh0=i//2) and output column wo, the data needed by all
    # 4 output rows ho is the contiguous [4, 8*32] block
    #     yw[(n*2+hp)*7 + hh0 : +4 , wo*64 : wo*64+256]
    # which lands in p2 rows (n, wo, ho) and the 128-aligned column block (i*256 : +256)
    # with column order (kh, kw, cin) matching w_conv2's row layout.
    for i in range(_K2):
        hp, hh0 = i % 2, i // 2
        for b in range(n_batch):
            src = (b * 2 + hp) * 7 + hh0
            for wo in range(_H2):
                dst = (b * _H2 + wo) * _H2
                p2_ref[dst:dst + _H2, i * 256:(i + 1) * 256] = \
                    yw_ref[src:src + _H2, wo * 64:wo * 64 + 256]

    # ---- conv2 (one matmul) + BN + ReLU --------------------------------------
    z = jnp.dot(p2_ref[...], w2_ref[...], preferred_element_type=jnp.float32)    # [N*16, 64]
    z2_ref[...] = _bn_relu(z, g2_ref[...], be2_ref[...])

    # ---- flatten [N*16, 64] -> [N, 1024]; PyTorch's NCHW flatten order is
    # absorbed into w_enc's row order at init (rows stored (wo, ho, c)). -------
    for b in range(n_batch):
        for s in range(_H2 * _H2):
            feat_ref[b:b + 1, s * _C2:(s + 1) * _C2] = \
                z2_ref[b * _H2 * _H2 + s:b * _H2 * _H2 + s + 1, :]

    # ---- encoder Linear + fc1..fc3 (ReLU) + fc4 (tanh) * action_lim ----------
    x = feat_ref[...]
    st = jnp.dot(x, we_ref[...], preferred_element_type=jnp.float32) + benc_ref[...]
    h = jnp.maximum(jnp.dot(st, wf1_ref[...], preferred_element_type=jnp.float32) + bf1_ref[...], 0.0)
    h = jnp.maximum(jnp.dot(h, wf2_ref[...], preferred_element_type=jnp.float32) + bf2_ref[...], 0.0)
    h = jnp.maximum(jnp.dot(h, wf3_ref[...], preferred_element_type=jnp.float32) + bf3_ref[...], 0.0)
    a = jnp.tanh(jnp.dot(h, wf4_ref[...], preferred_element_type=jnp.float32) + bf4_ref[...])
    o_ref[...] = a * action_lim


# ------------------------------ XLA-side glue --------------------------------

def _conv1_patches(image_nchw):
    """im2col for conv1 (k=12, s=4) on [N, 3, 64, 64].

    Row order : (w1, n, h1%2, h1//2) over conv1 output positions (h1, w1).
    Col order : (kh, kw, cin)  -- matches w_conv1's row layout.
    Only 9 static slices + 2 stacks + 1 transpose of the 48 KB image.
    """
    n = image_nchw.shape[0]
    xs = image_nchw.reshape(n, 3, 16, 4, 16, 4)            # (n, c, H16, ri, W16, rj); h = 4*H16 + ri
    outer = []
    for a in range(3):
        inner = []
        for b in range(3):
            inner.append(xs[:, :, a:a + 14, :, b:b + 14, :])   # (n, c, h1, ri, w1, rj)
        outer.append(jnp.stack(inner, 0))
    p = jnp.stack(outer, 0)                                 # (a, b, n, c, h1, ri, w1, rj)
    p = p.reshape(3, 3, n, 3, 7, 2, 4, 14, 4)               # (a, b, n, c, hh, hp, ri, w1, rj)
    p = p.transpose(7, 2, 5, 4, 0, 6, 1, 8, 3)              # (w1, n, hp, hh, a, ri, b, rj, c)
    return p.reshape(14 * n * 2 * 7, 432)                   # [N*196, 432]


def small_image_actor_forward(image, params, action_lim):
    n, c, h, w = image.shape
    assert c == 3 and h == 64 and w == 64, "SmallImageActor expects 3x64x64 images (flatten == 1024)"
    state_dim = params["w_enc"].shape[1]
    action_dim = params["w_fc4"].shape[1]

    p1 = _conv1_patches(image)                              # [N*196, 432]

    args = (p1, params["w_conv1"], params["g_bn1"], params["beta_bn1"],
            params["w_conv2"], params["g_bn2"], params["beta_bn2"],
            params["w_enc"], params["b_enc"], params["w_fc1"], params["b_fc1"],
            params["w_fc2"], params["b_fc2"], params["w_fc3"], params["b_fc3"],
            params["w_fc4"], params["b_fc4"])

    flops = 2 * (n * 196 * 432 * _C1 + n * 16 * 2048 * _C2
                 + n * (1024 * state_dim + state_dim * 256 + 256 * 128 + 128 * 64 + 64 * action_dim))
    bytes_accessed = 4 * (sum(int(a.size) for a in args) + n * action_dim)

    return pl.pallas_call(
        functools.partial(_actor_kernel, float(action_lim), n),
        out_shape=jax.ShapeDtypeStruct((n, action_dim), jnp.float32),
        scratch_shapes=[
            pltpu.VMEM((n * 196, _C1), jnp.float32),        # conv1 activations (rows: w1, n, hp, hh)
            pltpu.VMEM((n * _H1, _H1 * _C1), jnp.float32),  # width-dense slab (rows: n, hp, hh)
            pltpu.VMEM((n * 16, _K2 * _K2 * _C1), jnp.float32),  # conv2 im2col slab [N*16, 2048]
            pltpu.VMEM((n * 16, _C2), jnp.float32),         # conv2 activations (rows: n, wo, ho)
            pltpu.VMEM((n, 1024), jnp.float32),             # flattened features ((wo, ho, c) order)
        ],
        cost_estimate=pl.CostEstimate(flops=flops,
                                      transcendentals=n * action_dim + 96,
                                      bytes_accessed=bytes_accessed),
    )(*args)


# ------------------------------- param init ----------------------------------

def init_params(key, state_dim, action_dim):
    ks = jax.random.split(key, 12)

    def unif(k, shape, bound):
        return jax.random.uniform(k, shape, jnp.float32, -bound, bound)

    p = {}
    fan1 = 3 * 12 * 12
    # torch conv1.weight [32,3,12,12] stored permuted to (kh, kw, cin, cout), reshaped to [432, 32]
    p["w_conv1"] = unif(ks[0], (12, 12, 3, _C1), 1.0 / fan1 ** 0.5).reshape(432, _C1)
    # conv biases omitted: mathematically cancelled by training-mode BatchNorm
    p["g_bn1"] = jnp.ones((1, _C1), jnp.float32)
    p["beta_bn1"] = jnp.zeros((1, _C1), jnp.float32)

    fan2 = _C1 * _K2 * _K2
    # torch conv2.weight [64,32,8,8] stored permuted to (kh, kw, cin, cout), reshaped to [2048, 64]
    p["w_conv2"] = unif(ks[1], (_K2, _K2, _C1, _C2), 1.0 / fan2 ** 0.5).reshape(2048, _C2)
    p["g_bn2"] = jnp.ones((1, _C2), jnp.float32)
    p["beta_bn2"] = jnp.zeros((1, _C2), jnp.float32)

    def linear(kw, kb, fin, fout):
        bound = 1.0 / fin ** 0.5
        return unif(kw, (fin, fout), bound), unif(kb, (1, fout), bound)

    # encoder Linear(1024 -> state_dim): rows stored in the kernel's (wo, ho, c) flatten
    # order, i.e. torch weight columns permuted from the NCHW (c, ho, wo) flatten order --
    # absorbs the runtime flatten permutation at init time.
    p["w_enc"], p["b_enc"] = linear(ks[2], ks[3], 1024, state_dim)
    p["w_fc1"], p["b_fc1"] = linear(ks[4], ks[5], state_dim, 256)
    p["w_fc2"], p["b_fc2"] = linear(ks[6], ks[7], 256, 128)
    p["w_fc3"], p["b_fc3"] = linear(ks[8], ks[9], 128, 64)
    # fc4.weight.uniform_(-EPS, EPS); bias keeps default init
    p["w_fc4"] = unif(ks[10], (64, action_dim), EPS)
    p["b_fc4"] = unif(ks[11], (1, action_dim), 1.0 / 64 ** 0.5)
    return p


# ---------------------------------- main --------------------------------------

if __name__ == "__main__":
    STATE_DIM = 32
    ACTION_DIM = 4
    ACTION_LIM = 2.0
    IMAGE_SIZE = 64   # required so the flatten size is 1024 (64ch * 4 * 4)

    key = jax.random.PRNGKey(0)
    k_img, k_par = jax.random.split(key)
    image = jax.random.normal(k_img, (2, 3, IMAGE_SIZE, IMAGE_SIZE), jnp.float32)
    params = init_params(k_par, STATE_DIM, ACTION_DIM)

    fwd = jax.jit(functools.partial(small_image_actor_forward, action_lim=ACTION_LIM))
    action = jax.block_until_ready(fwd(image, params))

    assert action.shape == (2, ACTION_DIM)
    assert bool(jnp.all(jnp.isfinite(action)))
    assert bool(jnp.all(jnp.abs(action) <= ACTION_LIM + 1e-5))
    print("KERNEL_OK")
</pallas_src>

<mosaic_0001>
module attributes {stable_mosaic.version = 11 : i64} {
  func.func @_actor_kernel(%arg0: memref<392x432xf32, #tpu.memory_space<vmem>>, %arg1: memref<432x32xf32, #tpu.memory_space<vmem>>, %arg2: memref<1x32xf32, #tpu.memory_space<vmem>>, %arg3: memref<1x32xf32, #tpu.memory_space<vmem>>, %arg4: memref<2048x64xf32, #tpu.memory_space<vmem>>, %arg5: memref<1x64xf32, #tpu.memory_space<vmem>>, %arg6: memref<1x64xf32, #tpu.memory_space<vmem>>, %arg7: memref<1024x32xf32, #tpu.memory_space<vmem>>, %arg8: memref<1x32xf32, #tpu.memory_space<vmem>>, %arg9: memref<32x256xf32, #tpu.memory_space<vmem>>, %arg10: memref<1x256xf32, #tpu.memory_space<vmem>>, %arg11: memref<256x128xf32, #tpu.memory_space<vmem>>, %arg12: memref<1x128xf32, #tpu.memory_space<vmem>>, %arg13: memref<128x64xf32, #tpu.memory_space<vmem>>, %arg14: memref<1x64xf32, #tpu.memory_space<vmem>>, %arg15: memref<64x4xf32, #tpu.memory_space<vmem>>, %arg16: memref<1x4xf32, #tpu.memory_space<vmem>>, %arg17: memref<2x4xf32, #tpu.memory_space<vmem>>, %arg18: memref<392x32xf32, #tpu.memory_space<vmem>>, %arg19: memref<28x448xf32, #tpu.memory_space<vmem>>, %arg20: memref<32x2048xf32, #tpu.memory_space<vmem>>, %arg21: memref<32x64xf32, #tpu.memory_space<vmem>>, %arg22: memref<2x1024xf32, #tpu.memory_space<vmem>>) attributes {dimension_semantics = [], scalar_prefetch = 0 : i64, scratch_operands = 5 : i64, tpu.core_type = #tpu.core_type<tc>} {
    %c0 = arith.constant 0 : index
    %c0_0 = arith.constant 0 : index
    %0 = vector.load %arg0[%c0, %c0_0] : memref<392x432xf32, #tpu.memory_space<vmem>>, vector<392x432xf32>
    %c0_1 = arith.constant 0 : index
    %c0_2 = arith.constant 0 : index
    %1 = vector.load %arg1[%c0_1, %c0_2] : memref<432x32xf32, #tpu.memory_space<vmem>>, vector<432x32xf32>
    %cst = arith.constant dense<0.000000e+00> : vector<392x32xf32>
    %2 = tpu.matmul %0, %1, %cst {dimension_numbers = #tpu.dot_dimension_numbers<[1], [0], [0], [1], [0, 0, 1, 1], [], []>} : vector<392x432xf32>, vector<432x32xf32>, vector<392x32xf32> -> vector<392x32xf32>
    %c0_3 = arith.constant 0 : index
    %c0_4 = arith.constant 0 : index
    %3 = vector.load %arg2[%c0_3, %c0_4] : memref<1x32xf32, #tpu.memory_space<vmem>>, vector<1x32xf32>
    %c0_5 = arith.constant 0 : index
    %c0_6 = arith.constant 0 : index
    %4 = vector.load %arg3[%c0_5, %c0_6] : memref<1x32xf32, #tpu.memory_space<vmem>>, vector<1x32xf32>
    %cst_7 = arith.constant dense<0.000000e+00> : vector<32xf32>
    %5 = vector.multi_reduction <add>, %2, %cst_7 [0] : vector<392x32xf32> to vector<32xf32>
    %6 = vector.shape_cast %5 : vector<32xf32> to vector<1x32xf32>
    %7 = arith.mulf %2, %2 : vector<392x32xf32>
    %cst_8 = arith.constant dense<0.000000e+00> : vector<32xf32>
    %8 = vector.multi_reduction <add>, %7, %cst_8 [0] : vector<392x32xf32> to vector<32xf32>
    %9 = vector.shape_cast %8 : vector<32xf32> to vector<1x32xf32>
    %cst_9 = arith.constant 0.00255102036 : f32
    %10 = vector.broadcast %cst_9 : f32 to vector<1x32xf32>
    %11 = arith.mulf %6, %10 : vector<1x32xf32>
    %cst_10 = arith.constant 0.00255102036 : f32
    %12 = vector.broadcast %cst_10 : f32 to vector<1x32xf32>
    %13 = arith.mulf %9, %12 : vector<1x32xf32>
    %14 = arith.mulf %11, %11 : vector<1x32xf32>
    %15 = arith.subf %13, %14 : vector<1x32xf32>
    %cst_11 = arith.constant 9.99999974E-6 : f32
    %16 = vector.broadcast %cst_11 : f32 to vector<1x32xf32>
    %17 = arith.addf %15, %16 : vector<1x32xf32>
    %18 = math.rsqrt %17 : vector<1x32xf32>
    %19 = arith.mulf %3, %18 : vector<1x32xf32>
    %20 = arith.mulf %11, %19 : vector<1x32xf32>
    %21 = arith.subf %4, %20 : vector<1x32xf32>
    %22 = vector.broadcast %19 : vector<1x32xf32> to vector<392x32xf32>
    %23 = arith.mulf %2, %22 : vector<392x32xf32>
    %24 = vector.broadcast %21 : vector<1x32xf32> to vector<392x32xf32>
    %25 = arith.addf %23, %24 : vector<392x32xf32>
    %cst_12 = arith.constant 0.000000e+00 : f32
    %26 = vector.broadcast %cst_12 : f32 to vector<392x32xf32>
    %27 = arith.maximumf %25, %26 : vector<392x32xf32>
    %c0_13 = arith.constant 0 : index
    %c0_14 = arith.constant 0 : index
    %28 = vector.load %arg18[%c0_13, %c0_14] : memref<392x32xf32, #tpu.memory_space<vmem>>, vector<392x32xf32>
    tpu.vector_store %arg18[%c0_13, %c0_14], %27 {strides = array<i32>} : memref<392x32xf32, #tpu.memory_space<vmem>>, vector<392x32xf32>,
    %c0_15 = arith.constant 0 : index
    %c0_16 = arith.constant 0 : index
    %29 = vector.load %arg18[%c0_15, %c0_16] : memref<392x32xf32, #tpu.memory_space<vmem>>, vector<28x32xf32>
    %c0_17 = arith.constant 0 : index
    %c0_18 = arith.constant 0 : index
    %30 = vector.load %arg19[%c0_17, %c0_18] : memref<28x448xf32, #tpu.memory_space<vmem>>, vector<28x32xf32>
    tpu.vector_store %arg19[%c0_17, %c0_18], %29 {strides = array<i32>} : memref<28x448xf32, #tpu.memory_space<vmem>>, vector<28x32xf32>,
    %c28 = arith.constant 28 : index
    %c0_19 = arith.constant 0 : index
    %31 = vector.load %arg18[%c28, %c0_19] : memref<392x32xf32, #tpu.memory_space<vmem>>, vector<28x32xf32>
    %c0_20 = arith.constant 0 : index
    %c32 = arith.constant 32 : index
    %32 = vector.load %arg19[%c0_20, %c32] : memref<28x448xf32, #tpu.memory_space<vmem>>, vector<28x32xf32>
    tpu.vector_store %arg19[%c0_20, %c32], %31 {strides = array<i32>} : memref<28x448xf32, #tpu.memory_space<vmem>>, vector<28x32xf32>,
    %c56 = arith.constant 56 : index
    %c0_21 = arith.constant 0 : index
    %33 = vector.load %arg18[%c56, %c0_21] : memref<392x32xf32, #tpu.memory_space<vmem>>, vector<28x32xf32>
    %c0_22 = arith.constant 0 : index
    %c64 = arith.constant 64 : index
    %34 = vector.load %arg19[%c0_22, %c64] : memref<28x448xf32, #tpu.memory_space<vmem>>, vector<28x32xf32>
    tpu.vector_store %arg19[%c0_22, %c64], %33 {strides = array<i32>} : memref<28x448xf32, #tpu.memory_space<vmem>>, vector<28x32xf32>,
    %c84 = arith.constant 84 : index
    %c0_23 = arith.constant 0 : index
    %35 = vector.load %arg18[%c84, %c0_23] : memref<392x32xf32, #tpu.memory_space<vmem>>, vector<28x32xf32>
    %c0_24 = arith.constant 0 : index
    %c96 = arith.constant 96 : index
    %36 = vector.load %arg19[%c0_24, %c96] : memref<28x448xf32, #tpu.memory_space<vmem>>, vector<28x32xf32>
    tpu.vector_store %arg19[%c0_24, %c96], %35 {strides = array<i32>} : memref<28x448xf32, #tpu.memory_space<vmem>>, vector<28x32xf32>,
    %c112 = arith.constant 112 : index
    %c0_25 = arith.constant 0 : index
    %37 = vector.load %arg18[%c112, %c0_25] : memref<392x32xf32, #tpu.memory_space<vmem>>, vector<28x32xf32>
    %c0_26 = arith.constant 0 : index
    %c128 = arith.constant 128 : index
    %38 = vector.load %arg19[%c0_26, %c128] : memref<28x448xf32, #tpu.memory_space<vmem>>, vector<28x32xf32>
    tpu.vector_store %arg19[%c0_26, %c128], %37 {strides = array<i32>} : memref<28x448xf32, #tpu.memory_space<vmem>>, vector<28x32xf32>,
    %c140 = arith.constant 140 : index
    %c0_27 = arith.constant 0 : index
    %39 = vector.load %arg18[%c140, %c0_27] : memref<392x32xf32, #tpu.memory_space<vmem>>, vector<28x32xf32>
    %c0_28 = arith.constant 0 : index
    %c160 = arith.constant 160 : index
    %40 = vector.load %arg19[%c0_28, %c160] : memref<28x448xf32, #tpu.memory_space<vmem>>, vector<28x32xf32>
    tpu.vector_store %arg19[%c0_28, %c160], %39 {strides = array<i32>} : memref<28x448xf32, #tpu.memory_space<vmem>>, vector<28x32xf32>,
    %c168 = arith.constant 168 : index
    %c0_29 = arith.constant 0 : index
    %41 = vector.load %arg18[%c168, %c0_29] : memref<392x32xf32, #tpu.memory_space<vmem>>, vector<28x32xf32>
    %c0_30 = arith.constant 0 : index
    %c192 = arith.constant 192 : index
    %42 = vector.load %arg19[%c0_30, %c192] : memref<28x448xf32, #tpu.memory_space<vmem>>, vector<28x32xf32>
    tpu.vector_store %arg19[%c0_30, %c192], %41 {strides = array<i32>} : memref<28x448xf32, #tpu.memory_space<vmem>>, vector<28x32xf32>,
    %c196 = arith.constant 196 : index
    %c0_31 = arith.constant 0 : index
    %43 = vector.load %arg18[%c196, %c0_31] : memref<392x32xf32, #tpu.memory_space<vmem>>, vector<28x32xf32>
    %c0_32 = arith.constant 0 : index
    %c224 = arith.constant 224 : index
    %44 = vector.load %arg19[%c0_32, %c224] : memref<28x448xf32, #tpu.memory_space<vmem>>, vector<28x32xf32>
    tpu.vector_store %arg19[%c0_32, %c224], %43 {strides = array<i32>} : memref<28x448xf32, #tpu.memory_space<vmem>>, vector<28x32xf32>,
    %c224_33 = arith.constant 224 : index
    %c0_34 = arith.constant 0 : index
    %45 = vector.load %arg18[%c224_33, %c0_34] : memref<392x32xf32, #tpu.memory_space<vmem>>, vector<28x32xf32>
    %c0_35 = arith.constant 0 : index
    %c256 = arith.constant 256 : index
    %46 = vector.load %arg19[%c0_35, %c256] : memref<28x448xf32, #tpu.memory_space<vmem>>, vector<28x32xf32>
    tpu.vector_store %arg19[%c0_35, %c256], %45 {strides = array<i32>} : memref<28x448xf32, #tpu.memory_space<vmem>>, vector<28x32xf32>,
    %c252 = arith.constant 252 : index
    %c0_36 = arith.constant 0 : index
    %47 = vector.load %arg18[%c252, %c0_36] : memref<392x32xf32, #tpu.memory_space<vmem>>, vector<28x32xf32>
    %c0_37 = arith.constant 0 : index
    %c288 = arith.constant 288 : index
    %48 = vector.load %arg19[%c0_37, %c288] : memref<28x448xf32, #tpu.memory_space<vmem>>, vector<28x32xf32>
    tpu.vector_store %arg19[%c0_37, %c288], %47 {strides = array<i32>} : memref<28x448xf32, #tpu.memory_space<vmem>>, vector<28x32xf32>,
    %c280 = arith.constant 280 : index
    %c0_38 = arith.constant 0 : index
    %49 = vector.load %arg18[%c280, %c0_38] : memref<392x32xf32, #tpu.memory_space<vmem>>, vector<28x32xf32>
    %c0_39 = arith.constant 0 : index
    %c320 = arith.constant 320 : index
    %50 = vector.load %arg19[%c0_39, %c320] : memref<28x448xf32, #tpu.memory_space<vmem>>, vector<28x32xf32>
    tpu.vector_store %arg19[%c0_39, %c320], %49 {strides = array<i32>} : memref<28x448xf32, #tpu.memory_space<vmem>>, vector<28x32xf32>,
    %c308 = arith.constant 308 : index
    %c0_40 = arith.constant 0 : index
    %51 = vector.load %arg18[%c308, %c0_40] : memref<392x32xf32, #tpu.memory_space<vmem>>, vector<28x32xf32>
    %c0_41 = arith.constant 0 : index
    %c352 = arith.constant 352 : index
    %52 = vector.load %arg19[%c0_41, %c352] : memref<28x448xf32, #tpu.memory_space<vmem>>, vector<28x32xf32>
    tpu.vector_store %arg19[%c0_41, %c352], %51 {strides = array<i32>} : memref<28x448xf32, #tpu.memory_space<vmem>>, vector<28x32xf32>,
    %c336 = arith.constant 336 : index
    %c0_42 = arith.constant 0 : index
    %53 = vector.load %arg18[%c336, %c0_42] : memref<392x32xf32, #tpu.memory_space<vmem>>, vector<28x32xf32>
    %c0_43 = arith.constant 0 : index
    %c384 = arith.constant 384 : index
    %54 = vector.load %arg19[%c0_43, %c384] : memref<28x448xf32, #tpu.memory_space<vmem>>, vector<28x32xf32>
    tpu.vector_store %arg19[%c0_43, %c384], %53 {strides = array<i32>} : memref<28x448xf32, #tpu.memory_space<vmem>>, vector<28x32xf32>,
    %c364 = arith.constant 364 : index
    %c0_44 = arith.constant 0 : index
    %55 = vector.load %arg18[%c364, %c0_44] : memref<392x32xf32, #tpu.memory_space<vmem>>, vector<28x32xf32>
    %c0_45 = arith.constant 0 : index
    %c416 = arith.constant 416 : index
    %56 = vector.load %arg19[%c0_45, %c416] : memref<28x448xf32, #tpu.memory_space<vmem>>, vector<28x32xf32>
    tpu.vector_store %arg19[%c0_45, %c416], %55 {strides = array<i32>} : memref<28x448xf32, #tpu.memory_space<vmem>>, vector<28x32xf32>,
    %c0_46 = arith.constant 0 : index
    %c0_47 = arith.constant 0 : index
    %57 = vector.load %arg19[%c0_46, %c0_47] : memref<28x448xf32, #tpu.memory_space<vmem>>, vector<4x256xf32>
    %c0_48 = arith.constant 0 : index
    %c0_49 = arith.constant 0 : index
    %58 = vector.load %arg20[%c0_48, %c0_49] : memref<32x2048xf32, #tpu.memory_space<vmem>>, vector<4x256xf32>
    tpu.vector_store %arg20[%c0_48, %c0_49], %57 {strides = array<i32>} : memref<32x2048xf32, #tpu.memory_space<vmem>>, vector<4x256xf32>,
    %c0_50 = arith.constant 0 : index
    %c64_51 = arith.constant 64 : index
    %59 = vector.load %arg19[%c0_50, %c64_51] : memref<28x448xf32, #tpu.memory_space<vmem>>, vector<4x256xf32>
    %c4 = arith.constant 4 : index
    %c0_52 = arith.constant 0 : index
    %60 = vector.load %arg20[%c4, %c0_52] : memref<32x2048xf32, #tpu.memory_space<vmem>>, vector<4x256xf32>
    tpu.vector_store %arg20[%c4, %c0_52], %59 {strides = array<i32>} : memref<32x2048xf32, #tpu.memory_space<vmem>>, vector<4x256xf32>,
    %c0_53 = arith.constant 0 : index
    %c128_54 = arith.constant 128 : index
    %61 = vector.load %arg19[%c0_53, %c128_54] : memref<28x448xf32, #tpu.memory_space<vmem>>, vector<4x256xf32>
    %c8 = arith.constant 8 : index
    %c0_55 = arith.constant 0 : index
    %62 = vector.load %arg20[%c8, %c0_55] : memref<32x2048xf32, #tpu.memory_space<vmem>>, vector<4x256xf32>
    tpu.vector_store %arg20[%c8, %c0_55], %61 {strides = array<i32>} : memref<32x2048xf32, #tpu.memory_space<vmem>>, vector<4x256xf32>,
    %c0_56 = arith.constant 0 : index
    %c192_57 = arith.constant 192 : index
    %63 = vector.load %arg19[%c0_56, %c192_57] : memref<28x448xf32, #tpu.memory_space<vmem>>, vector<4x256xf32>
    %c12 = arith.constant 12 : index
    %c0_58 = arith.constant 0 : index
    %64 = vector.load %arg20[%c12, %c0_58] : memref<32x2048xf32, #tpu.memory_space<vmem>>, vector<4x256xf32>
    tpu.vector_store %arg20[%c12, %c0_58], %63 {strides = array<i32>} : memref<32x2048xf32, #tpu.memory_space<vmem>>, vector<4x256xf32>,
    %c14 = arith.constant 14 : index
    %c0_59 = arith.constant 0 : index
    %65 = vector.load %arg19[%c14, %c0_59] : memref<28x448xf32, #tpu.memory_space<vmem>>, vector<4x256xf32>
    %c16 = arith.constant 16 : index
    %c0_60 = arith.constant 0 : index
    %66 = vector.load %arg20[%c16, %c0_60] : memref<32x2048xf32, #tpu.memory_space<vmem>>, vector<4x256xf32>
    tpu.vector_store %arg20[%c16, %c0_60], %65 {strides = array<i32>} : memref<32x2048xf32, #tpu.memory_space<vmem>>, vector<4x256xf32>,
    %c14_61 = arith.constant 14 : index
    %c64_62 = arith.constant 64 : index
    %67 = vector.load %arg19[%c14_61, %c64_62] : memref<28x448xf32, #tpu.memory_space<vmem>>, vector<4x256xf32>
    %c20 = arith.constant 20 : index
    %c0_63 = arith.constant 0 : index
    %68 = vector.load %arg20[%c20, %c0_63] : memref<32x2048xf32, #tpu.memory_space<vmem>>, vector<4x256xf32>
    tpu.vector_store %arg20[%c20, %c0_63], %67 {strides = array<i32>} : memref<32x2048xf32, #tpu.memory_space<vmem>>, vector<4x256xf32>,
    %c14_64 = arith.constant 14 : index
    %c128_65 = arith.constant 128 : index
    %69 = vector.load %arg19[%c14_64, %c128_65] : memref<28x448xf32, #tpu.memory_space<vmem>>, vector<4x256xf32>
    %c24 = arith.constant 24 : index
    %c0_66 = arith.constant 0 : index
    %70 = vector.load %arg20[%c24, %c0_66] : memref<32x2048xf32, #tpu.memory_space<vmem>>, vector<4x256xf32>
    tpu.vector_store %arg20[%c24, %c0_66], %69 {strides = array<i32>} : memref<32x2048xf32, #tpu.memory_space<vmem>>, vector<4x256xf32>,
    %c14_67 = arith.constant 14 : index
    %c192_68 = arith.constant 192 : index
    %71 = vector.load %arg19[%c14_67, %c192_68] : memref<28x448xf32, #tpu.memory_space<vmem>>, vector<4x256xf32>
    %c28_69 = arith.constant 28 : index
    %c0_70 = arith.constant 0 : index
    %72 = vector.load %arg20[%c28_69, %c0_70] : memref<32x2048xf32, #tpu.memory_space<vmem>>, vector<4x256xf32>
    tpu.vector_store %arg20[%c28_69, %c0_70], %71 {strides = array<i32>} : memref<32x2048xf32, #tpu.memory_space<vmem>>, vector<4x256xf32>,
    %c7 = arith.constant 7 : index
    %c0_71 = arith.constant 0 : index
    %73 = vector.load %arg19[%c7, %c0_71] : memref<28x448xf32, #tpu.memory_space<vmem>>, vector<4x256xf32>
    %c0_72 = arith.constant 0 : index
    %c256_73 = arith.constant 256 : index
    %74 = vector.load %arg20[%c0_72, %c256_73] : memref<32x2048xf32, #tpu.memory_space<vmem>>, vector<4x256xf32>
    tpu.vector_store %arg20[%c0_72, %c256_73], %73 {strides = array<i32>} : memref<32x2048xf32, #tpu.memory_space<vmem>>, vector<4x256xf32>,
    %c7_74 = arith.constant 7 : index
    %c64_75 = arith.constant 64 : index
    %75 = vector.load %arg19[%c7_74, %c64_75] : memref<28x448xf32, #tpu.memory_space<vmem>>, vector<4x256xf32>
    %c4_76 = arith.constant 4 : index
    %c256_77 = arith.constant 256 : index
    %76 = vector.load %arg20[%c4_76, %c256_77] : memref<32x2048xf32, #tpu.memory_space<vmem>>, vector<4x256xf32>
    tpu.vector_store %arg20[%c4_76, %c256_77], %75 {strides = array<i32>} : memref<32x2048xf32, #tpu.memory_space<vmem>>, vector<4x256xf32>,
    %c7_78 = arith.constant 7 : index
    %c128_79 = arith.constant 128 : index
    %77 = vector.load %arg19[%c7_78, %c128_79] : memref<28x448xf32, #tpu.memory_space<vmem>>, vector<4x256xf32>
    %c8_80 = arith.constant 8 : index
    %c256_81 = arith.constant 256 : index
    %78 = vector.load %arg20[%c8_80, %c256_81] : memref<32x2048xf32, #tpu.memory_space<vmem>>, vector<4x256xf32>
    tpu.vector_store %arg20[%c8_80, %c256_81], %77 {strides = array<i32>} : memref<32x2048xf32, #tpu.memory_space<vmem>>, vector<4x256xf32>,
    %c7_82 = arith.constant 7 : index
    %c192_83 = arith.constant 192 : index
    %79 = vector.load %arg19[%c7_82, %c192_83] : memref<28x448xf32, #tpu.memory_space<vmem>>, vector<4x256xf32>
    %c12_84 = arith.constant 12 : index
    %c256_85 = arith.constant 256 : index
    %80 = vector.load %arg20[%c12_84, %c256_85] : memref<32x2048xf32, #tpu.memory_space<vmem>>, vector<4x256xf32>
    tpu.vector_store %arg20[%c12_84, %c256_85], %79 {strides = array<i32>} : memref<32x2048xf32, #tpu.memory_space<vmem>>, vector<4x256xf32>,
    %c21 = arith.constant 21 : index
    %c0_86 = arith.constant 0 : index
    %81 = vector.load %arg19[%c21, %c0_86] : memref<28x448xf32, #tpu.memory_space<vmem>>, vector<4x256xf32>
    %c16_87 = arith.constant 16 : index
    %c256_88 = arith.constant 256 : index
    %82 = vector.load %arg20[%c16_87, %c256_88] : memref<32x2048xf32, #tpu.memory_space<vmem>>, vector<4x256xf32>
    tpu.vector_store %arg20[%c16_87, %c256_88], %81 {strides = array<i32>} : memref<32x2048xf32, #tpu.memory_space<vmem>>, vector<4x256xf32>,
    %c21_89 = arith.constant 21 : index
    %c64_90 = arith.constant 64 : index
    %83 = vector.load %arg19[%c21_89, %c64_90] : memref<28x448xf32, #tpu.memory_space<vmem>>, vector<4x256xf32>
    %c20_91 = arith.constant 20 : index
    %c256_92 = arith.constant 256 : index
    %84 = vector.load %arg20[%c20_91, %c256_92] : memref<32x2048xf32, #tpu.memory_space<vmem>>, vector<4x256xf32>
    tpu.vector_store %arg20[%c20_91, %c256_92], %83 {strides = array<i32>} : memref<32x2048xf32, #tpu.memory_space<vmem>>, vector<4x256xf32>,
    %c21_93 = arith.constant 21 : index
    %c128_94 = arith.constant 128 : index
    %85 = vector.load %arg19[%c21_93, %c128_94] : memref<28x448xf32, #tpu.memory_space<vmem>>, vector<4x256xf32>
    %c24_95 = arith.constant 24 : index
    %c256_96 = arith.constant 256 : index
    %86 = vector.load %arg20[%c24_95, %c256_96] : memref<32x2048xf32, #tpu.memory_space<vmem>>, vector<4x256xf32>
    tpu.vector_store %arg20[%c24_95, %c256_96], %85 {strides = array<i32>} : memref<32x2048xf32, #tpu.memory_space<vmem>>, vector<4x256xf32>,
    %c21_97 = arith.constant 21 : index
    %c192_98 = arith.constant 192 : index
    %87 = vector.load %arg19[%c21_97, %c192_98] : memref<28x448xf32, #tpu.memory_space<vmem>>, vector<4x256xf32>
    %c28_99 = arith.constant 28 : index
    %c256_100 = arith.constant 256 : index
    %88 = vector.load %arg20[%c28_99, %c256_100] : memref<32x2048xf32, #tpu.memory_space<vmem>>, vector<4x256xf32>
    tpu.vector_store %arg20[%c28_99, %c256_100], %87 {strides = array<i32>} : memref<32x2048xf32, #tpu.memory_space<vmem>>, vector<4x256xf32>,
    %c1 = arith.constant 1 : index
    %c0_101 = arith.constant 0 : index
    %89 = vector.load %arg19[%c1, %c0_101] : memref<28x448xf32, #tpu.memory_space<vmem>>, vector<4x256xf32>
    %c0_102 = arith.constant 0 : index
    %c512 = arith.constant 512 : index
    %90 = vector.load %arg20[%c0_102, %c512] : memref<32x2048xf32, #tpu.memory_space<vmem>>, vector<4x256xf32>
    tpu.vector_store %arg20[%c0_102, %c512], %89 {strides = array<i32>} : memref<32x2048xf32, #tpu.memory_space<vmem>>, vector<4x256xf32>,
    %c1_103 = arith.constant 1 : index
    %c64_104 = arith.constant 64 : index
    %91 = vector.load %arg19[%c1_103, %c64_104] : memref<28x448xf32, #tpu.memory_space<vmem>>, vector<4x256xf32>
    %c4_105 = arith.constant 4 : index
    %c512_106 = arith.constant 512 : index
    %92 = vector.load %arg20[%c4_105, %c512_106] : memref<32x2048xf32, #tpu.memory_space<vmem>>, vector<4x256xf32>
    tpu.vector_store %arg20[%c4_105, %c512_106], %91 {strides = array<i32>} : memref<32x2048xf32, #tpu.memory_space<vmem>>, vector<4x256xf32>,
    %c1_107 = arith.constant 1 : index
    %c128_108 = arith.constant 128 : index
    %93 = vector.load %arg19[%c1_107, %c128_108] : memref<28x448xf32, #tpu.memory_space<vmem>>, vector<4x256xf32>
    %c8_109 = arith.constant 8 : index
    %c512_110 = arith.constant 512 : index
    %94 = vector.load %arg20[%c8_109, %c512_110] : memref<32x2048xf32, #tpu.memory_space<vmem>>, vector<4x256xf32>
    tpu.vector_store %arg20[%c8_109, %c512_110], %93 {strides = array<i32>} : memref<32x2048xf32, #tpu.memory_space<vmem>>, vector<4x256xf32>,
    %c1_111 = arith.constant 1 : index
    %c192_112 = arith.constant 192 : index
    %95 = vector.load %arg19[%c1_111, %c192_112] : memref<28x448xf32, #tpu.memory_space<vmem>>, vector<4x256xf32>
    %c12_113 = arith.constant 12 : index
    %c512_114 = arith.constant 512 : index
    %96 = vector.load %arg20[%c12_113, %c512_114] : memref<32x2048xf32, #tpu.memory_space<vmem>>, vector<4x256xf32>
    tpu.vector_store %arg20[%c12_113, %c512_114], %95 {strides = array<i32>} : memref<32x2048xf32, #tpu.memory_space<vmem>>, vector<4x256xf32>,
    %c15 = arith.constant 15 : index
    %c0_115 = arith.constant 0 : index
    %97 = vector.load %arg19[%c15, %c0_115] : memref<28x448xf32, #tpu.memory_space<vmem>>, vector<4x256xf32>
    %c16_116 = arith.constant 16 : index
    %c512_117 = arith.constant 512 : index
    %98 = vector.load %arg20[%c16_116, %c512_117] : memref<32x2048xf32, #tpu.memory_space<vmem>>, vector<4x256xf32>
    tpu.vector_store %arg20[%c16_116, %c512_117], %97 {strides = array<i32>} : memref<32x2048xf32, #tpu.memory_space<vmem>>, vector<4x256xf32>,
    %c15_118 = arith.constant 15 : index
    %c64_119 = arith.constant 64 : index
    %99 = vector.load %arg19[%c15_118, %c64_119] : memref<28x448xf32, #tpu.memory_space<vmem>>, vector<4x256xf32>
    %c20_120 = arith.constant 20 : index
    %c512_121 = arith.constant 512 : index
    %100 = vector.load %arg20[%c20_120, %c512_121] : memref<32x2048xf32, #tpu.memory_space<vmem>>, vector<4x256xf32>
    tpu.vector_store %arg20[%c20_120, %c512_121], %99 {strides = array<i32>} : memref<32x2048xf32, #tpu.memory_space<vmem>>, vector<4x256xf32>,
    %c15_122 = arith.constant 15 : index
    %c128_123 = arith.constant 128 : index
    %101 = vector.load %arg19[%c15_122, %c128_123] : memref<28x448xf32, #tpu.memory_space<vmem>>, vector<4x256xf32>
    %c24_124 = arith.constant 24 : index
    %c512_125 = arith.constant 512 : index
    %102 = vector.load %arg20[%c24_124, %c512_125] : memref<32x2048xf32, #tpu.memory_space<vmem>>, vector<4x256xf32>
    tpu.vector_store %arg20[%c24_124, %c512_125], %101 {strides = array<i32>} : memref<32x2048xf32, #tpu.memory_space<vmem>>, vector<4x256xf32>,
    %c15_126 = arith.constant 15 : index
    %c192_127 = arith.constant 192 : index
    %103 = vector.load %arg19[%c15_126, %c192_127] : memref<28x448xf32, #tpu.memory_space<vmem>>, vector<4x256xf32>
    %c28_128 = arith.constant 28 : index
    %c512_129 = arith.constant 512 : index
    %104 = vector.load %arg20[%c28_128, %c512_129] : memref<32x2048xf32, #tpu.memory_space<vmem>>, vector<4x256xf32>
    tpu.vector_store %arg20[%c28_128, %c512_129], %103 {strides = array<i32>} : memref<32x2048xf32, #tpu.memory_space<vmem>>, vector<4x256xf32>,
    %c8_130 = arith.constant 8 : index
    %c0_131 = arith.constant 0 : index
    %105 = vector.load %arg19[%c8_130, %c0_131] : memref<28x448xf32, #tpu.memory_space<vmem>>, vector<4x256xf32>
    %c0_132 = arith.constant 0 : index
    %c768 = arith.constant 768 : index
    %106 = vector.load %arg20[%c0_132, %c768] : memref<32x2048xf32, #tpu.memory_space<vmem>>, vector<4x256xf32>
    tpu.vector_store %arg20[%c0_132, %c768], %105 {strides = array<i32>} : memref<32x2048xf32, #tpu.memory_space<vmem>>, vector<4x256xf32>,
    %c8_133 = arith.constant 8 : index
    %c64_134 = arith.constant 64 : index
    %107 = vector.load %arg19[%c8_133, %c64_134] : memref<28x448xf32, #tpu.memory_space<vmem>>, vector<4x256xf32>
    %c4_135 = arith.constant 4 : index
    %c768_136 = arith.constant 768 : index
    %108 = vector.load %arg20[%c4_135, %c768_136] : memref<32x2048xf32, #tpu.memory_space<vmem>>, vector<4x256xf32>
    tpu.vector_store %arg20[%c4_135, %c768_136], %107 {strides = array<i32>} : memref<32x2048xf32, #tpu.memory_space<vmem>>, vector<4x256xf32>,
    %c8_137 = arith.constant 8 : index
    %c128_138 = arith.constant 128 : index
    %109 = vector.load %arg19[%c8_137, %c128_138] : memref<28x448xf32, #tpu.memory_space<vmem>>, vector<4x256xf32>
    %c8_139 = arith.constant 8 : index
    %c768_140 = arith.constant 768 : index
    %110 = vector.load %arg20[%c8_139, %c768_140] : memref<32x2048xf32, #tpu.memory_space<vmem>>, vector<4x256xf32>
    tpu.vector_store %arg20[%c8_139, %c768_140], %109 {strides = array<i32>} : memref<32x2048xf32, #tpu.memory_space<vmem>>, vector<4x256xf32>,
    %c8_141 = arith.constant 8 : index
    %c192_142 = arith.constant 192 : index
    %111 = vector.load %arg19[%c8_141, %c192_142] : memref<28x448xf32, #tpu.memory_space<vmem>>, vector<4x256xf32>
    %c12_143 = arith.constant 12 : index
    %c768_144 = arith.constant 768 : index
    %112 = vector.load %arg20[%c12_143, %c768_144] : memref<32x2048xf32, #tpu.memory_space<vmem>>, vector<4x256xf32>
    tpu.vector_store %arg20[%c12_143, %c768_144], %111 {strides = array<i32>} : memref<32x2048xf32, #tpu.memory_space<vmem>>, vector<4x256xf32>,
    %c22 = arith.constant 22 : index
    %c0_145 = arith.constant 0 : index
    %113 = vector.load %arg19[%c22, %c0_145] : memref<28x448xf32, #tpu.memory_space<vmem>>, vector<4x256xf32>
    %c16_146 = arith.constant 16 : index
    %c768_147 = arith.constant 768 : index
    %114 = vector.load %arg20[%c16_146, %c768_147] : memref<32x2048xf32, #tpu.memory_space<vmem>>, vector<4x256xf32>
    tpu.vector_store %arg20[%c16_146, %c768_147], %113 {strides = array<i32>} : memref<32x2048xf32, #tpu.memory_space<vmem>>, vector<4x256xf32>,
    %c22_148 = arith.constant 22 : index
    %c64_149 = arith.constant 64 : index
    %115 = vector.load %arg19[%c22_148, %c64_149] : memref<28x448xf32, #tpu.memory_space<vmem>>, vector<4x256xf32>
    %c20_150 = arith.constant 20 : index
    %c768_151 = arith.constant 768 : index
    %116 = vector.load %arg20[%c20_150, %c768_151] : memref<32x2048xf32, #tpu.memory_space<vmem>>, vector<4x256xf32>
    tpu.vector_store %arg20[%c20_150, %c768_151], %115 {strides = array<i32>} : memref<32x2048xf32, #tpu.memory_space<vmem>>, vector<4x256xf32>,
    %c22_152 = arith.constant 22 : index
    %c128_153 = arith.constant 128 : index
    %117 = vector.load %arg19[%c22_152, %c128_153] : memref<28x448xf32, #tpu.memory_space<vmem>>, vector<4x256xf32>
    %c24_154 = arith.constant 24 : index
    %c768_155 = arith.constant 768 : index
    %118 = vector.load %arg20[%c24_154, %c768_155] : memref<32x2048xf32, #tpu.memory_space<vmem>>, vector<4x256xf32>
    tpu.vector_store %arg20[%c24_154, %c768_155], %117 {strides = array<i32>} : memref<32x2048xf32, #tpu.memory_space<vmem>>, vector<4x256xf32>,
    %c22_156 = arith.constant 22 : index
    %c192_157 = arith.constant 192 : index
    %119 = vector.load %arg19[%c22_156, %c192_157] : memref<28x448xf32, #tpu.memory_space<vmem>>, vector<4x256xf32>
    %c28_158 = arith.constant 28 : index
    %c768_159 = arith.constant 768 : index
    %120 = vector.load %arg20[%c28_158, %c768_159] : memref<32x2048xf32, #tpu.memory_space<vmem>>, vector<4x256xf32>
    tpu.vector_store %arg20[%c28_158, %c768_159], %119 {strides = array<i32>} : memref<32x2048xf32, #tpu.memory_space<vmem>>, vector<4x256xf32>,
    %c2 = arith.constant 2 : index
    %c0_160 = arith.constant 0 : index
    %121 = vector.load %arg19[%c2, %c0_160] : memref<28x448xf32, #tpu.memory_space<vmem>>, vector<4x256xf32>
    %c0_161 = arith.constant 0 : index
    %c1024 = arith.constant 1024 : index
    %122 = vector.load %arg20[%c0_161, %c1024] : memref<32x2048xf32, #tpu.memory_space<vmem>>, vector<4x256xf32>
    tpu.vector_store %arg20[%c0_161, %c1024], %121 {strides = array<i32>} : memref<32x2048xf32, #tpu.memory_space<vmem>>, vector<4x256xf32>,
    %c2_162 = arith.constant 2 : index
    %c64_163 = arith.constant 64 : index
    %123 = vector.load %arg19[%c2_162, %c64_163] : memref<28x448xf32, #tpu.memory_space<vmem>>, vector<4x256xf32>
    %c4_164 = arith.constant 4 : index
    %c1024_165 = arith.constant 1024 : index
    %124 = vector.load %arg20[%c4_164, %c1024_165] : memref<32x2048xf32, #tpu.memory_space<vmem>>, vector<4x256xf32>
    tpu.vector_store %arg20[%c4_164, %c1024_165], %123 {strides = array<i32>} : memref<32x2048xf32, #tpu.memory_space<vmem>>, vector<4x256xf32>,
    %c2_166 = arith.constant 2 : index
    %c128_167 = arith.constant 128 : index
    %125 = vector.load %arg19[%c2_166, %c128_167] : memref<28x448xf32, #tpu.memory_space<vmem>>, vector<4x256xf32>
    %c8_168 = arith.constant 8 : index
    %c1024_169 = arith.constant 1024 : index
    %126 = vector.load %arg20[%c8_168, %c1024_169] : memref<32x2048xf32, #tpu.memory_space<vmem>>, vector<4x256xf32>
    tpu.vector_store %arg20[%c8_168, %c1024_169], %125 {strides = array<i32>} : memref<32x2048xf32, #tpu.memory_space<vmem>>, vector<4x256xf32>,
    %c2_170 = arith.constant 2 : index
    %c192_171 = arith.constant 192 : index
    %127 = vector.load %arg19[%c2_170, %c192_171] : memref<28x448xf32, #tpu.memory_space<vmem>>, vector<4x256xf32>
    %c12_172 = arith.constant 12 : index
    %c1024_173 = arith.constant 1024 : index
    %128 = vector.load %arg20[%c12_172, %c1024_173] : memref<32x2048xf32, #tpu.memory_space<vmem>>, vector<4x256xf32>
    tpu.vector_store %arg20[%c12_172, %c1024_173], %127 {strides = array<i32>} : memref<32x2048xf32, #tpu.memory_space<vmem>>, vector<4x256xf32>,
    %c16_174 = arith.constant 16 : index
    %c0_175 = arith.constant 0 : index
    %129 = vector.load %arg19[%c16_174, %c0_175] : memref<28x448xf32, #tpu.memory_space<vmem>>, vector<4x256xf32>
    %c16_176 = arith.constant 16 : index
    %c1024_177 = arith.constant 1024 : index
    %130 = vector.load %arg20[%c16_176, %c1024_177] : memref<32x2048xf32, #tpu.memory_space<vmem>>, vector<4x256xf32>
    tpu.vector_store %arg20[%c16_176, %c1024_177], %129 {strides = array<i32>} : memref<32x2048xf32, #tpu.memory_space<vmem>>, vector<4x256xf32>,
    %c16_178 = arith.constant 16 : index
    %c64_179 = arith.constant 64 : index
    %131 = vector.load %arg19[%c16_178, %c64_179] : memref<28x448xf32, #tpu.memory_space<vmem>>, vector<4x256xf32>
    %c20_180 = arith.constant 20 : index
    %c1024_181 = arith.constant 1024 : index
    %132 = vector.load %arg20[%c20_180, %c1024_181] : memref<32x2048xf32, #tpu.memory_space<vmem>>, vector<4x256xf32>
    tpu.vector_store %arg20[%c20_180, %c1024_181], %131 {strides = array<i32>} : memref<32x2048xf32, #tpu.memory_space<vmem>>, vector<4x256xf32>,
    %c16_182 = arith.constant 16 : index
    %c128_183 = arith.constant 128 : index
    %133 = vector.load %arg19[%c16_182, %c128_183] : memref<28x448xf32, #tpu.memory_space<vmem>>, vector<4x256xf32>
    %c24_184 = arith.constant 24 : index
    %c1024_185 = arith.constant 1024 : index
    %134 = vector.load %arg20[%c24_184, %c1024_185] : memref<32x2048xf32, #tpu.memory_space<vmem>>, vector<4x256xf32>
    tpu.vector_store %arg20[%c24_184, %c1024_185], %133 {strides = array<i32>} : memref<32x2048xf32, #tpu.memory_space<vmem>>, vector<4x256xf32>,
    %c16_186 = arith.constant 16 : index
    %c192_187 = arith.constant 192 : index
    %135 = vector.load %arg19[%c16_186, %c192_187] : memref<28x448xf32, #tpu.memory_space<vmem>>, vector<4x256xf32>
    %c28_188 = arith.constant 28 : index
    %c1024_189 = arith.constant 1024 : index
    %136 = vector.load %arg20[%c28_188, %c1024_189] : memref<32x2048xf32, #tpu.memory_space<vmem>>, vector<4x256xf32>
    tpu.vector_store %arg20[%c28_188, %c1024_189], %135 {strides = array<i32>} : memref<32x2048xf32, #tpu.memory_space<vmem>>, vector<4x256xf32>,
    %c9 = arith.constant 9 : index
    %c0_190 = arith.constant 0 : index
    %137 = vector.load %arg19[%c9, %c0_190] : memref<28x448xf32, #tpu.memory_space<vmem>>, vector<4x256xf32>
    %c0_191 = arith.constant 0 : index
    %c1280 = arith.constant 1280 : index
    %138 = vector.load %arg20[%c0_191, %c1280] : memref<32x2048xf32, #tpu.memory_space<vmem>>, vector<4x256xf32>
    tpu.vector_store %arg20[%c0_191, %c1280], %137 {strides = array<i32>} : memref<32x2048xf32, #tpu.memory_space<vmem>>, vector<4x256xf32>,
    %c9_192 = arith.constant 9 : index
    %c64_193 = arith.constant 64 : index
    %139 = vector.load %arg19[%c9_192, %c64_193] : memref<28x448xf32, #tpu.memory_space<vmem>>, vector<4x256xf32>
    %c4_194 = arith.constant 4 : index
    %c1280_195 = arith.constant 1280 : index
    %140 = vector.load %arg20[%c4_194, %c1280_195] : memref<32x2048xf32, #tpu.memory_space<vmem>>, vector<4x256xf32>
    tpu.vector_store %arg20[%c4_194, %c1280_195], %139 {strides = array<i32>} : memref<32x2048xf32, #tpu.memory_space<vmem>>, vector<4x256xf32>,
    %c9_196 = arith.constant 9 : index
    %c128_197 = arith.constant 128 : index
    %141 = vector.load %arg19[%c9_196, %c128_197] : memref<28x448xf32, #tpu.memory_space<vmem>>, vector<4x256xf32>
    %c8_198 = arith.constant 8 : index
    %c1280_199 = arith.constant 1280 : index
    %142 = vector.load %arg20[%c8_198, %c1280_199] : memref<32x2048xf32, #tpu.memory_space<vmem>>, vector<4x256xf32>
    tpu.vector_store %arg20[%c8_198, %c1280_199], %141 {strides = array<i32>} : memref<32x2048xf32, #tpu.memory_space<vmem>>, vector<4x256xf32>,
    %c9_200 = arith.constant 9 : index
    %c192_201 = arith.constant 192 : index
    %143 = vector.load %arg19[%c9_200, %c192_201] : memref<28x448xf32, #tpu.memory_space<vmem>>, vector<4x256xf32>
    %c12_202 = arith.constant 12 : index
    %c1280_203 = arith.constant 1280 : index
    %144 = vector.load %arg20[%c12_202, %c1280_203] : memref<32x2048xf32, #tpu.memory_space<vmem>>, vector<4x256xf32>
    tpu.vector_store %arg20[%c12_202, %c1280_203], %143 {strides = array<i32>} : memref<32x2048xf32, #tpu.memory_space<vmem>>, vector<4x256xf32>,
    %c23 = arith.constant 23 : index
    %c0_204 = arith.constant 0 : index
    %145 = vector.load %arg19[%c23, %c0_204] : memref<28x448xf32, #tpu.memory_space<vmem>>, vector<4x256xf32>
    %c16_205 = arith.constant 16 : index
    %c1280_206 = arith.constant 1280 : index
    %146 = vector.load %arg20[%c16_205, %c1280_206] : memref<32x2048xf32, #tpu.memory_space<vmem>>, vector<4x256xf32>
    tpu.vector_store %arg20[%c16_205, %c1280_206], %145 {strides = array<i32>} : memref<32x2048xf32, #tpu.memory_space<vmem>>, vector<4x256xf32>,
    %c23_207 = arith.constant 23 : index
    %c64_208 = arith.constant 64 : index
    %147 = vector.load %arg19[%c23_207, %c64_208] : memref<28x448xf32, #tpu.memory_space<vmem>>, vector<4x256xf32>
    %c20_209 = arith.constant 20 : index
    %c1280_210 = arith.constant 1280 : index
    %148 = vector.load %arg20[%c20_209, %c1280_210] : memref<32x2048xf32, #tpu.memory_space<vmem>>, vector<4x256xf32>
    tpu.vector_store %arg20[%c20_209, %c1280_210], %147 {strides = array<i32>} : memref<32x2048xf32, #tpu.memory_space<vmem>>, vector<4x256xf32>,
    %c23_211 = arith.constant 23 : index
    %c128_212 = arith.constant 128 : index
    %149 = vector.load %arg19[%c23_211, %c128_212] : memref<28x448xf32, #tpu.memory_space<vmem>>, vector<4x256xf32>
    %c24_213 = arith.constant 24 : index
    %c1280_214 = arith.constant 1280 : index
    %150 = vector.load %arg20[%c24_213, %c1280_214] : memref<32x2048xf32, #tpu.memory_space<vmem>>, vector<4x256xf32>
    tpu.vector_store %arg20[%c24_213, %c1280_214], %149 {strides = array<i32>} : memref<32x2048xf32, #tpu.memory_space<vmem>>, vector<4x256xf32>,
    %c23_215 = arith.constant 23 : index
    %c192_216 = arith.constant 192 : index
    %151 = vector.load %arg19[%c23_215, %c192_216] : memref<28x448xf32, #tpu.memory_space<vmem>>, vector<4x256xf32>
    %c28_217 = arith.constant 28 : index
    %c1280_218 = arith.constant 1280 : index
    %152 = vector.load %arg20[%c28_217, %c1280_218] : memref<32x2048xf32, #tpu.memory_space<vmem>>, vector<4x256xf32>
    tpu.vector_store %arg20[%c28_217, %c1280_218], %151 {strides = array<i32>} : memref<32x2048xf32, #tpu.memory_space<vmem>>, vector<4x256xf32>,
    %c3 = arith.constant 3 : index
    %c0_219 = arith.constant 0 : index
    %153 = vector.load %arg19[%c3, %c0_219] : memref<28x448xf32, #tpu.memory_space<vmem>>, vector<4x256xf32>
    %c0_220 = arith.constant 0 : index
    %c1536 = arith.constant 1536 : index
    %154 = vector.load %arg20[%c0_220, %c1536] : memref<32x2048xf32, #tpu.memory_space<vmem>>, vector<4x256xf32>
    tpu.vector_store %arg20[%c0_220, %c1536], %153 {strides = array<i32>} : memref<32x2048xf32, #tpu.memory_space<vmem>>, vector<4x256xf32>,
    %c3_221 = arith.constant 3 : index
    %c64_222 = arith.constant 64 : index
    %155 = vector.load %arg19[%c3_221, %c64_222] : memref<28x448xf32, #tpu.memory_space<vmem>>, vector<4x256xf32>
    %c4_223 = arith.constant 4 : index
    %c1536_224 = arith.constant 1536 : index
    %156 = vector.load %arg20[%c4_223, %c1536_224] : memref<32x2048xf32, #tpu.memory_space<vmem>>, vector<4x256xf32>
    tpu.vector_store %arg20[%c4_223, %c1536_224], %155 {strides = array<i32>} : memref<32x2048xf32, #tpu.memory_space<vmem>>, vector<4x256xf32>,
    %c3_225 = arith.constant 3 : index
    %c128_226 = arith.constant 128 : index
    %157 = vector.load %arg19[%c3_225, %c128_226] : memref<28x448xf32, #tpu.memory_space<vmem>>, vector<4x256xf32>
    %c8_227 = arith.constant 8 : index
    %c1536_228 = arith.constant 1536 : index
    %158 = vector.load %arg20[%c8_227, %c1536_228] : memref<32x2048xf32, #tpu.memory_space<vmem>>, vector<4x256xf32>
    tpu.vector_store %arg20[%c8_227, %c1536_228], %157 {strides = array<i32>} : memref<32x2048xf32, #tpu.memory_space<vmem>>, vector<4x256xf32>,
    %c3_229 = arith.constant 3 : index
    %c192_230 = arith.constant 192 : index
    %159 = vector.load %arg19[%c3_229, %c192_230] : memref<28x448xf32, #tpu.memory_space<vmem>>, vector<4x256xf32>
    %c12_231 = arith.constant 12 : index
    %c1536_232 = arith.constant 1536 : index
    %160 = vector.load %arg20[%c12_231, %c1536_232] : memref<32x2048xf32, #tpu.memory_space<vmem>>, vector<4x256xf32>
    tpu.vector_store %arg20[%c12_231, %c1536_232], %159 {strides = array<i32>} : memref<32x2048xf32, #tpu.memory_space<vmem>>, vector<4x256xf32>,
    %c17 = arith.constant 17 : index
    %c0_233 = arith.constant 0 : index
    %161 = vector.load %arg19[%c17, %c0_233] : memref<28x448xf32, #tpu.memory_space<vmem>>, vector<4x256xf32>
    %c16_234 = arith.constant 16 : index
    %c1536_235 = arith.constant 1536 : index
    %162 = vector.load %arg20[%c16_234, %c1536_235] : memref<32x2048xf32, #tpu.memory_space<vmem>>, vector<4x256xf32>
    tpu.vector_store %arg20[%c16_234, %c1536_235], %161 {strides = array<i32>} : memref<32x2048xf32, #tpu.memory_space<vmem>>, vector<4x256xf32>,
    %c17_236 = arith.constant 17 : index
    %c64_237 = arith.constant 64 : index
    %163 = vector.load %arg19[%c17_236, %c64_237] : memref<28x448xf32, #tpu.memory_space<vmem>>, vector<4x256xf32>
    %c20_238 = arith.constant 20 : index
    %c1536_239 = arith.constant 1536 : index
    %164 = vector.load %arg20[%c20_238, %c1536_239] : memref<32x2048xf32, #tpu.memory_space<vmem>>, vector<4x256xf32>
    tpu.vector_store %arg20[%c20_238, %c1536_239], %163 {strides = array<i32>} : memref<32x2048xf32, #tpu.memory_space<vmem>>, vector<4x256xf32>,
    %c17_240 = arith.constant 17 : index
    %c128_241 = arith.constant 128 : index
    %165 = vector.load %arg19[%c17_240, %c128_241] : memref<28x448xf32, #tpu.memory_space<vmem>>, vector<4x256xf32>
    %c24_242 = arith.constant 24 : index
    %c1536_243 = arith.constant 1536 : index
    %166 = vector.load %arg20[%c24_242, %c1536_243] : memref<32x2048xf32, #tpu.memory_space<vmem>>, vector<4x256xf32>
    tpu.vector_store %arg20[%c24_242, %c1536_243], %165 {strides = array<i32>} : memref<32x2048xf32, #tpu.memory_space<vmem>>, vector<4x256xf32>,
    %c17_244 = arith.constant 17 : index
    %c192_245 = arith.constant 192 : index
    %167 = vector.load %arg19[%c17_244, %c192_245] : memref<28x448xf32, #tpu.memory_space<vmem>>, vector<4x256xf32>
    %c28_246 = arith.constant 28 : index
    %c1536_247 = arith.constant 1536 : index
    %168 = vector.load %arg20[%c28_246, %c1536_247] : memref<32x2048xf32, #tpu.memory_space<vmem>>, vector<4x256xf32>
    tpu.vector_store %arg20[%c28_246, %c1536_247], %167 {strides = array<i32>} : memref<32x2048xf32, #tpu.memory_space<vmem>>, vector<4x256xf32>,
    %c10 = arith.constant 10 : index
    %c0_248 = arith.constant 0 : index
    %169 = vector.load %arg19[%c10, %c0_248] : memref<28x448xf32, #tpu.memory_space<vmem>>, vector<4x256xf32>
    %c0_249 = arith.constant 0 : index
    %c1792 = arith.constant 1792 : index
    %170 = vector.load %arg20[%c0_249, %c1792] : memref<32x2048xf32, #tpu.memory_space<vmem>>, vector<4x256xf32>
    tpu.vector_store %arg20[%c0_249, %c1792], %169 {strides = array<i32>} : memref<32x2048xf32, #tpu.memory_space<vmem>>, vector<4x256xf32>,
    %c10_250 = arith.constant 10 : index
    %c64_251 = arith.constant 64 : index
    %171 = vector.load %arg19[%c10_250, %c64_251] : memref<28x448xf32, #tpu.memory_space<vmem>>, vector<4x256xf32>
    %c4_252 = arith.constant 4 : index
    %c1792_253 = arith.constant 1792 : index
    %172 = vector.load %arg20[%c4_252, %c1792_253] : memref<32x2048xf32, #tpu.memory_space<vmem>>, vector<4x256xf32>
    tpu.vector_store %arg20[%c4_252, %c1792_253], %171 {strides = array<i32>} : memref<32x2048xf32, #tpu.memory_space<vmem>>, vector<4x256xf32>,
    %c10_254 = arith.constant 10 : index
    %c128_255 = arith.constant 128 : index
    %173 = vector.load %arg19[%c10_254, %c128_255] : memref<28x448xf32, #tpu.memory_space<vmem>>, vector<4x256xf32>
    %c8_256 = arith.constant 8 : index
    %c1792_257 = arith.constant 1792 : index
    %174 = vector.load %arg20[%c8_256, %c1792_257] : memref<32x2048xf32, #tpu.memory_space<vmem>>, vector<4x256xf32>
    tpu.vector_store %arg20[%c8_256, %c1792_257], %173 {strides = array<i32>} : memref<32x2048xf32, #tpu.memory_space<vmem>>, vector<4x256xf32>,
    %c10_258 = arith.constant 10 : index
    %c192_259 = arith.constant 192 : index
    %175 = vector.load %arg19[%c10_258, %c192_259] : memref<28x448xf32, #tpu.memory_space<vmem>>, vector<4x256xf32>
    %c12_260 = arith.constant 12 : index
    %c1792_261 = arith.constant 1792 : index
    %176 = vector.load %arg20[%c12_260, %c1792_261] : memref<32x2048xf32, #tpu.memory_space<vmem>>, vector<4x256xf32>
    tpu.vector_store %arg20[%c12_260, %c1792_261], %175 {strides = array<i32>} : memref<32x2048xf32, #tpu.memory_space<vmem>>, vector<4x256xf32>,
    %c24_262 = arith.constant 24 : index
    %c0_263 = arith.constant 0 : index
    %177 = vector.load %arg19[%c24_262, %c0_263] : memref<28x448xf32, #tpu.memory_space<vmem>>, vector<4x256xf32>
    %c16_264 = arith.constant 16 : index
    %c1792_265 = arith.constant 1792 : index
    %178 = vector.load %arg20[%c16_264, %c1792_265] : memref<32x2048xf32, #tpu.memory_space<vmem>>, vector<4x256xf32>
    tpu.vector_store %arg20[%c16_264, %c1792_265], %177 {strides = array<i32>} : memref<32x2048xf32, #tpu.memory_space<vmem>>, vector<4x256xf32>,
    %c24_266 = arith.constant 24 : index
    %c64_267 = arith.constant 64 : index
    %179 = vector.load %arg19[%c24_266, %c64_267] : memref<28x448xf32, #tpu.memory_space<vmem>>, vector<4x256xf32>
    %c20_268 = arith.constant 20 : index
    %c1792_269 = arith.constant 1792 : index
    %180 = vector.load %arg20[%c20_268, %c1792_269] : memref<32x2048xf32, #tpu.memory_space<vmem>>, vector<4x256xf32>
    tpu.vector_store %arg20[%c20_268, %c1792_269], %179 {strides = array<i32>} : memref<32x2048xf32, #tpu.memory_space<vmem>>, vector<4x256xf32>,
    %c24_270 = arith.constant 24 : index
    %c128_271 = arith.constant 128 : index
    %181 = vector.load %arg19[%c24_270, %c128_271] : memref<28x448xf32, #tpu.memory_space<vmem>>, vector<4x256xf32>
    %c24_272 = arith.constant 24 : index
    %c1792_273 = arith.constant 1792 : index
    %182 = vector.load %arg20[%c24_272, %c1792_273] : memref<32x2048xf32, #tpu.memory_space<vmem>>, vector<4x256xf32>
    tpu.vector_store %arg20[%c24_272, %c1792_273], %181 {strides = array<i32>} : memref<32x2048xf32, #tpu.memory_space<vmem>>, vector<4x256xf32>,
    %c24_274 = arith.constant 24 : index
    %c192_275 = arith.constant 192 : index
    %183 = vector.load %arg19[%c24_274, %c192_275] : memref<28x448xf32, #tpu.memory_space<vmem>>, vector<4x256xf32>
    %c28_276 = arith.constant 28 : index
    %c1792_277 = arith.constant 1792 : index
    %184 = vector.load %arg20[%c28_276, %c1792_277] : memref<32x2048xf32, #tpu.memory_space<vmem>>, vector<4x256xf32>
    tpu.vector_store %arg20[%c28_276, %c1792_277], %183 {strides = array<i32>} : memref<32x2048xf32, #tpu.memory_space<vmem>>, vector<4x256xf32>,
    %c0_278 = arith.constant 0 : index
    %c0_279 = arith.constant 0 : index
    %185 = vector.load %arg20[%c0_278, %c0_279] : memref<32x2048xf32, #tpu.memory_space<vmem>>, vector<32x2048xf32>
    %c0_280 = arith.constant 0 : index
    %c0_281 = arith.constant 0 : index
    %186 = vector.load %arg4[%c0_280, %c0_281] : memref<2048x64xf32, #tpu.memory_space<vmem>>, vector<2048x64xf32>
    %cst_282 = arith.constant dense<0.000000e+00> : vector<32x64xf32>
    %187 = tpu.matmul %185, %186, %cst_282 {dimension_numbers = #tpu.dot_dimension_numbers<[1], [0], [0], [1], [0, 0, 1, 1], [], []>} : vector<32x2048xf32>, vector<2048x64xf32>, vector<32x64xf32> -> vector<32x64xf32>
    %c0_283 = arith.constant 0 : index
    %c0_284 = arith.constant 0 : index
    %188 = vector.load %arg5[%c0_283, %c0_284] : memref<1x64xf32, #tpu.memory_space<vmem>>, vector<1x64xf32>
    %c0_285 = arith.constant 0 : index
    %c0_286 = arith.constant 0 : index
    %189 = vector.load %arg6[%c0_285, %c0_286] : memref<1x64xf32, #tpu.memory_space<vmem>>, vector<1x64xf32>
    %cst_287 = arith.constant dense<0.000000e+00> : vector<64xf32>
    %190 = vector.multi_reduction <add>, %187, %cst_287 [0] : vector<32x64xf32> to vector<64xf32>
    %191 = vector.shape_cast %190 : vector<64xf32> to vector<1x64xf32>
    %192 = arith.mulf %187, %187 : vector<32x64xf32>
    %cst_288 = arith.constant dense<0.000000e+00> : vector<64xf32>
    %193 = vector.multi_reduction <add>, %192, %cst_288 [0] : vector<32x64xf32> to vector<64xf32>
    %194 = vector.shape_cast %193 : vector<64xf32> to vector<1x64xf32>
    %cst_289 = arith.constant 3.125000e-02 : f32
    %195 = vector.broadcast %cst_289 : f32 to vector<1x64xf32>
    %196 = arith.mulf %191, %195 : vector<1x64xf32>
    %cst_290 = arith.constant 3.125000e-02 : f32
    %197 = vector.broadcast %cst_290 : f32 to vector<1x64xf32>
    %198 = arith.mulf %194, %197 : vector<1x64xf32>
    %199 = arith.mulf %196, %196 : vector<1x64xf32>
    %200 = arith.subf %198, %199 : vector<1x64xf32>
    %cst_291 = arith.constant 9.99999974E-6 : f32
    %201 = vector.broadcast %cst_291 : f32 to vector<1x64xf32>
    %202 = arith.addf %200, %201 : vector<1x64xf32>
    %203 = math.rsqrt %202 : vector<1x64xf32>
    %204 = arith.mulf %188, %203 : vector<1x64xf32>
    %205 = arith.mulf %196, %204 : vector<1x64xf32>
    %206 = arith.subf %189, %205 : vector<1x64xf32>
    %207 = vector.broadcast %204 : vector<1x64xf32> to vector<32x64xf32>
    %208 = arith.mulf %187, %207 : vector<32x64xf32>
    %209 = vector.broadcast %206 : vector<1x64xf32> to vector<32x64xf32>
    %210 = arith.addf %208, %209 : vector<32x64xf32>
    %cst_292 = arith.constant 0.000000e+00 : f32
    %211 = vector.broadcast %cst_292 : f32 to vector<32x64xf32>
    %212 = arith.maximumf %210, %211 : vector<32x64xf32>
    %c0_293 = arith.constant 0 : index
    %c0_294 = arith.constant 0 : index
    %213 = vector.load %arg21[%c0_293, %c0_294] : memref<32x64xf32, #tpu.memory_space<vmem>>, vector<32x64xf32>
    tpu.vector_store %arg21[%c0_293, %c0_294], %212 {strides = array<i32>} : memref<32x64xf32, #tpu.memory_space<vmem>>, vector<32x64xf32>,
    %c0_295 = arith.constant 0 : index
    %c0_296 = arith.constant 0 : index
    %214 = vector.load %arg21[%c0_295, %c0_296] : memref<32x64xf32, #tpu.memory_space<vmem>>, vector<1x64xf32>
    %c0_297 = arith.constant 0 : index
    %c0_298 = arith.constant 0 : index
    %215 = vector.load %arg22[%c0_297, %c0_298] : memref<2x1024xf32, #tpu.memory_space<vmem>>, vector<1x64xf32>
    tpu.vector_store %arg22[%c0_297, %c0_298], %214 {strides = array<i32>} : memref<2x1024xf32, #tpu.memory_space<vmem>>, vector<1x64xf32>,
    %c1_299 = arith.constant 1 : index
    %c0_300 = arith.constant 0 : index
    %216 = vector.load %arg21[%c1_299, %c0_300] : memref<32x64xf32, #tpu.memory_space<vmem>>, vector<1x64xf32>
    %c0_301 = arith.constant 0 : index
    %c64_302 = arith.constant 64 : index
    %217 = vector.load %arg22[%c0_301, %c64_302] : memref<2x1024xf32, #tpu.memory_space<vmem>>, vector<1x64xf32>
    tpu.vector_store %arg22[%c0_301, %c64_302], %216 {strides = array<i32>} : memref<2x1024xf32, #tpu.memory_space<vmem>>, vector<1x64xf32>,
    %c2_303 = arith.constant 2 : index
    %c0_304 = arith.constant 0 : index
    %218 = vector.load %arg21[%c2_303, %c0_304] : memref<32x64xf32, #tpu.memory_space<vmem>>, vector<1x64xf32>
    %c0_305 = arith.constant 0 : index
    %c128_306 = arith.constant 128 : index
    %219 = vector.load %arg22[%c0_305, %c128_306] : memref<2x1024xf32, #tpu.memory_space<vmem>>, vector<1x64xf32>
    tpu.vector_store %arg22[%c0_305, %c128_306], %218 {strides = array<i32>} : memref<2x1024xf32, #tpu.memory_space<vmem>>, vector<1x64xf32>,
    %c3_307 = arith.constant 3 : index
    %c0_308 = arith.constant 0 : index
    %220 = vector.load %arg21[%c3_307, %c0_308] : memref<32x64xf32, #tpu.memory_space<vmem>>, vector<1x64xf32>
    %c0_309 = arith.constant 0 : index
    %c192_310 = arith.constant 192 : index
    %221 = vector.load %arg22[%c0_309, %c192_310] : memref<2x1024xf32, #tpu.memory_space<vmem>>, vector<1x64xf32>
    tpu.vector_store %arg22[%c0_309, %c192_310], %220 {strides = array<i32>} : memref<2x1024xf32, #tpu.memory_space<vmem>>, vector<1x64xf32>,
    %c4_311 = arith.constant 4 : index
    %c0_312 = arith.constant 0 : index
    %222 = vector.load %arg21[%c4_311, %c0_312] : memref<32x64xf32, #tpu.memory_space<vmem>>, vector<1x64xf32>
    %c0_313 = arith.constant 0 : index
    %c256_314 = arith.constant 256 : index
    %223 = vector.load %arg22[%c0_313, %c256_314] : memref<2x1024xf32, #tpu.memory_space<vmem>>, vector<1x64xf32>
    tpu.vector_store %arg22[%c0_313, %c256_314], %222 {strides = array<i32>} : memref<2x1024xf32, #tpu.memory_space<vmem>>, vector<1x64xf32>,
    %c5 = arith.constant 5 : index
    %c0_315 = arith.constant 0 : index
    %224 = vector.load %arg21[%c5, %c0_315] : memref<32x64xf32, #tpu.memory_space<vmem>>, vector<1x64xf32>
    %c0_316 = arith.constant 0 : index
    %c320_317 = arith.constant 320 : index
    %225 = vector.load %arg22[%c0_316, %c320_317] : memref<2x1024xf32, #tpu.memory_space<vmem>>, vector<1x64xf32>
    tpu.vector_store %arg22[%c0_316, %c320_317], %224 {strides = array<i32>} : memref<2x1024xf32, #tpu.memory_space<vmem>>, vector<1x64xf32>,
    %c6 = arith.constant 6 : index
    %c0_318 = arith.constant 0 : index
    %226 = vector.load %arg21[%c6, %c0_318] : memref<32x64xf32, #tpu.memory_space<vmem>>, vector<1x64xf32>
    %c0_319 = arith.constant 0 : index
    %c384_320 = arith.constant 384 : index
    %227 = vector.load %arg22[%c0_319, %c384_320] : memref<2x1024xf32, #tpu.memory_space<vmem>>, vector<1x64xf32>
    tpu.vector_store %arg22[%c0_319, %c384_320], %226 {strides = array<i32>} : memref<2x1024xf32, #tpu.memory_space<vmem>>, vector<1x64xf32>,
    %c7_321 = arith.constant 7 : index
    %c0_322 = arith.constant 0 : index
    %228 = vector.load %arg21[%c7_321, %c0_322] : memref<32x64xf32, #tpu.memory_space<vmem>>, vector<1x64xf32>
    %c0_323 = arith.constant 0 : index
    %c448 = arith.constant 448 : index
    %229 = vector.load %arg22[%c0_323, %c448] : memref<2x1024xf32, #tpu.memory_space<vmem>>, vector<1x64xf32>
    tpu.vector_store %arg22[%c0_323, %c448], %228 {strides = array<i32>} : memref<2x1024xf32, #tpu.memory_space<vmem>>, vector<1x64xf32>,
    %c8_324 = arith.constant 8 : index
    %c0_325 = arith.constant 0 : index
    %230 = vector.load %arg21[%c8_324, %c0_325] : memref<32x64xf32, #tpu.memory_space<vmem>>, vector<1x64xf32>
    %c0_326 = arith.constant 0 : index
    %c512_327 = arith.constant 512 : index
    %231 = vector.load %arg22[%c0_326, %c512_327] : memref<2x1024xf32, #tpu.memory_space<vmem>>, vector<1x64xf32>
    tpu.vector_store %arg22[%c0_326, %c512_327], %230 {strides = array<i32>} : memref<2x1024xf32, #tpu.memory_space<vmem>>, vector<1x64xf32>,
    %c9_328 = arith.constant 9 : index
    %c0_329 = arith.constant 0 : index
    %232 = vector.load %arg21[%c9_328, %c0_329] : memref<32x64xf32, #tpu.memory_space<vmem>>, vector<1x64xf32>
    %c0_330 = arith.constant 0 : index
    %c576 = arith.constant 576 : index
    %233 = vector.load %arg22[%c0_330, %c576] : memref<2x1024xf32, #tpu.memory_space<vmem>>, vector<1x64xf32>
    tpu.vector_store %arg22[%c0_330, %c576], %232 {strides = array<i32>} : memref<2x1024xf32, #tpu.memory_space<vmem>>, vector<1x64xf32>,
    %c10_331 = arith.constant 10 : index
    %c0_332 = arith.constant 0 : index
    %234 = vector.load %arg21[%c10_331, %c0_332] : memref<32x64xf32, #tpu.memory_space<vmem>>, vector<1x64xf32>
    %c0_333 = arith.constant 0 : index
    %c640 = arith.constant 640 : index
    %235 = vector.load %arg22[%c0_333, %c640] : memref<2x1024xf32, #tpu.memory_space<vmem>>, vector<1x64xf32>
    tpu.vector_store %arg22[%c0_333, %c640], %234 {strides = array<i32>} : memref<2x1024xf32, #tpu.memory_space<vmem>>, vector<1x64xf32>,
    %c11 = arith.constant 11 : index
    %c0_334 = arith.constant 0 : index
    %236 = vector.load %arg21[%c11, %c0_334] : memref<32x64xf32, #tpu.memory_space<vmem>>, vector<1x64xf32>
    %c0_335 = arith.constant 0 : index
    %c704 = arith.constant 704 : index
    %237 = vector.load %arg22[%c0_335, %c704] : memref<2x1024xf32, #tpu.memory_space<vmem>>, vector<1x64xf32>
    tpu.vector_store %arg22[%c0_335, %c704], %236 {strides = array<i32>} : memref<2x1024xf32, #tpu.memory_space<vmem>>, vector<1x64xf32>,
    %c12_336 = arith.constant 12 : index
    %c0_337 = arith.constant 0 : index
    %238 = vector.load %arg21[%c12_336, %c0_337] : memref<32x64xf32, #tpu.memory_space<vmem>>, vector<1x64xf32>
    %c0_338 = arith.constant 0 : index
    %c768_339 = arith.constant 768 : index
    %239 = vector.load %arg22[%c0_338, %c768_339] : memref<2x1024xf32, #tpu.memory_space<vmem>>, vector<1x64xf32>
    tpu.vector_store %arg22[%c0_338, %c768_339], %238 {strides = array<i32>} : memref<2x1024xf32, #tpu.memory_space<vmem>>, vector<1x64xf32>,
    %c13 = arith.constant 13 : index
    %c0_340 = arith.constant 0 : index
    %240 = vector.load %arg21[%c13, %c0_340] : memref<32x64xf32, #tpu.memory_space<vmem>>, vector<1x64xf32>
    %c0_341 = arith.constant 0 : index
    %c832 = arith.constant 832 : index
    %241 = vector.load %arg22[%c0_341, %c832] : memref<2x1024xf32, #tpu.memory_space<vmem>>, vector<1x64xf32>
    tpu.vector_store %arg22[%c0_341, %c832], %240 {strides = array<i32>} : memref<2x1024xf32, #tpu.memory_space<vmem>>, vector<1x64xf32>,
    %c14_342 = arith.constant 14 : index
    %c0_343 = arith.constant 0 : index
    %242 = vector.load %arg21[%c14_342, %c0_343] : memref<32x64xf32, #tpu.memory_space<vmem>>, vector<1x64xf32>
    %c0_344 = arith.constant 0 : index
    %c896 = arith.constant 896 : index
    %243 = vector.load %arg22[%c0_344, %c896] : memref<2x1024xf32, #tpu.memory_space<vmem>>, vector<1x64xf32>
    tpu.vector_store %arg22[%c0_344, %c896], %242 {strides = array<i32>} : memref<2x1024xf32, #tpu.memory_space<vmem>>, vector<1x64xf32>,
    %c15_345 = arith.constant 15 : index
    %c0_346 = arith.constant 0 : index
    %244 = vector.load %arg21[%c15_345, %c0_346] : memref<32x64xf32, #tpu.memory_space<vmem>>, vector<1x64xf32>
    %c0_347 = arith.constant 0 : index
    %c960 = arith.constant 960 : index
    %245 = vector.load %arg22[%c0_347, %c960] : memref<2x1024xf32, #tpu.memory_space<vmem>>, vector<1x64xf32>
    tpu.vector_store %arg22[%c0_347, %c960], %244 {strides = array<i32>} : memref<2x1024xf32, #tpu.memory_space<vmem>>, vector<1x64xf32>,
    %c16_348 = arith.constant 16 : index
    %c0_349 = arith.constant 0 : index
    %246 = vector.load %arg21[%c16_348, %c0_349] : memref<32x64xf32, #tpu.memory_space<vmem>>, vector<1x64xf32>
    %c1_350 = arith.constant 1 : index
    %c0_351 = arith.constant 0 : index
    %247 = vector.load %arg22[%c1_350, %c0_351] : memref<2x1024xf32, #tpu.memory_space<vmem>>, vector<1x64xf32>
    tpu.vector_store %arg22[%c1_350, %c0_351], %246 {strides = array<i32>} : memref<2x1024xf32, #tpu.memory_space<vmem>>, vector<1x64xf32>,
    %c17_352 = arith.constant 17 : index
    %c0_353 = arith.constant 0 : index
    %248 = vector.load %arg21[%c17_352, %c0_353] : memref<32x64xf32, #tpu.memory_space<vmem>>, vector<1x64xf32>
    %c1_354 = arith.constant 1 : index
    %c64_355 = arith.constant 64 : index
    %249 = vector.load %arg22[%c1_354, %c64_355] : memref<2x1024xf32, #tpu.memory_space<vmem>>, vector<1x64xf32>
    tpu.vector_store %arg22[%c1_354, %c64_355], %248 {strides = array<i32>} : memref<2x1024xf32, #tpu.memory_space<vmem>>, vector<1x64xf32>,
    %c18 = arith.constant 18 : index
    %c0_356 = arith.constant 0 : index
    %250 = vector.load %arg21[%c18, %c0_356] : memref<32x64xf32, #tpu.memory_space<vmem>>, vector<1x64xf32>
    %c1_357 = arith.constant 1 : index
    %c128_358 = arith.constant 128 : index
    %251 = vector.load %arg22[%c1_357, %c128_358] : memref<2x1024xf32, #tpu.memory_space<vmem>>, vector<1x64xf32>
    tpu.vector_store %arg22[%c1_357, %c128_358], %250 {strides = array<i32>} : memref<2x1024xf32, #tpu.memory_space<vmem>>, vector<1x64xf32>,
    %c19 = arith.constant 19 : index
    %c0_359 = arith.constant 0 : index
    %252 = vector.load %arg21[%c19, %c0_359] : memref<32x64xf32, #tpu.memory_space<vmem>>, vector<1x64xf32>
    %c1_360 = arith.constant 1 : index
    %c192_361 = arith.constant 192 : index
    %253 = vector.load %arg22[%c1_360, %c192_361] : memref<2x1024xf32, #tpu.memory_space<vmem>>, vector<1x64xf32>
    tpu.vector_store %arg22[%c1_360, %c192_361], %252 {strides = array<i32>} : memref<2x1024xf32, #tpu.memory_space<vmem>>, vector<1x64xf32>,
    %c20_362 = arith.constant 20 : index
    %c0_363 = arith.constant 0 : index
    %254 = vector.load %arg21[%c20_362, %c0_363] : memref<32x64xf32, #tpu.memory_space<vmem>>, vector<1x64xf32>
    %c1_364 = arith.constant 1 : index
    %c256_365 = arith.constant 256 : index
    %255 = vector.load %arg22[%c1_364, %c256_365] : memref<2x1024xf32, #tpu.memory_space<vmem>>, vector<1x64xf32>
    tpu.vector_store %arg22[%c1_364, %c256_365], %254 {strides = array<i32>} : memref<2x1024xf32, #tpu.memory_space<vmem>>, vector<1x64xf32>,
    %c21_366 = arith.constant 21 : index
    %c0_367 = arith.constant 0 : index
    %256 = vector.load %arg21[%c21_366, %c0_367] : memref<32x64xf32, #tpu.memory_space<vmem>>, vector<1x64xf32>
    %c1_368 = arith.constant 1 : index
    %c320_369 = arith.constant 320 : index
    %257 = vector.load %arg22[%c1_368, %c320_369] : memref<2x1024xf32, #tpu.memory_space<vmem>>, vector<1x64xf32>
    tpu.vector_store %arg22[%c1_368, %c320_369], %256 {strides = array<i32>} : memref<2x1024xf32, #tpu.memory_space<vmem>>, vector<1x64xf32>,
    %c22_370 = arith.constant 22 : index
    %c0_371 = arith.constant 0 : index
    %258 = vector.load %arg21[%c22_370, %c0_371] : memref<32x64xf32, #tpu.memory_space<vmem>>, vector<1x64xf32>
    %c1_372 = arith.constant 1 : index
    %c384_373 = arith.constant 384 : index
    %259 = vector.load %arg22[%c1_372, %c384_373] : memref<2x1024xf32, #tpu.memory_space<vmem>>, vector<1x64xf32>
    tpu.vector_store %arg22[%c1_372, %c384_373], %258 {strides = array<i32>} : memref<2x1024xf32, #tpu.memory_space<vmem>>, vector<1x64xf32>,
    %c23_374 = arith.constant 23 : index
    %c0_375 = arith.constant 0 : index
    %260 = vector.load %arg21[%c23_374, %c0_375] : memref<32x64xf32, #tpu.memory_space<vmem>>, vector<1x64xf32>
    %c1_376 = arith.constant 1 : index
    %c448_377 = arith.constant 448 : index
    %261 = vector.load %arg22[%c1_376, %c448_377] : memref<2x1024xf32, #tpu.memory_space<vmem>>, vector<1x64xf32>
    tpu.vector_store %arg22[%c1_376, %c448_377], %260 {strides = array<i32>} : memref<2x1024xf32, #tpu.memory_space<vmem>>, vector<1x64xf32>,
    %c24_378 = arith.constant 24 : index
    %c0_379 = arith.constant 0 : index
    %262 = vector.load %arg21[%c24_378, %c0_379] : memref<32x64xf32, #tpu.memory_space<vmem>>, vector<1x64xf32>
    %c1_380 = arith.constant 1 : index
    %c512_381 = arith.constant 512 : index
    %263 = vector.load %arg22[%c1_380, %c512_381] : memref<2x1024xf32, #tpu.memory_space<vmem>>, vector<1x64xf32>
    tpu.vector_store %arg22[%c1_380, %c512_381], %262 {strides = array<i32>} : memref<2x1024xf32, #tpu.memory_space<vmem>>, vector<1x64xf32>,
    %c25 = arith.constant 25 : index
    %c0_382 = arith.constant 0 : index
    %264 = vector.load %arg21[%c25, %c0_382] : memref<32x64xf32, #tpu.memory_space<vmem>>, vector<1x64xf32>
    %c1_383 = arith.constant 1 : index
    %c576_384 = arith.constant 576 : index
    %265 = vector.load %arg22[%c1_383, %c576_384] : memref<2x1024xf32, #tpu.memory_space<vmem>>, vector<1x64xf32>
    tpu.vector_store %arg22[%c1_383, %c576_384], %264 {strides = array<i32>} : memref<2x1024xf32, #tpu.memory_space<vmem>>, vector<1x64xf32>,
    %c26 = arith.constant 26 : index
    %c0_385 = arith.constant 0 : index
    %266 = vector.load %arg21[%c26, %c0_385] : memref<32x64xf32, #tpu.memory_space<vmem>>, vector<1x64xf32>
    %c1_386 = arith.constant 1 : index
    %c640_387 = arith.constant 640 : index
    %267 = vector.load %arg22[%c1_386, %c640_387] : memref<2x1024xf32, #tpu.memory_space<vmem>>, vector<1x64xf32>
    tpu.vector_store %arg22[%c1_386, %c640_387], %266 {strides = array<i32>} : memref<2x1024xf32, #tpu.memory_space<vmem>>, vector<1x64xf32>,
    %c27 = arith.constant 27 : index
    %c0_388 = arith.constant 0 : index
    %268 = vector.load %arg21[%c27, %c0_388] : memref<32x64xf32, #tpu.memory_space<vmem>>, vector<1x64xf32>
    %c1_389 = arith.constant 1 : index
    %c704_390 = arith.constant 704 : index
    %269 = vector.load %arg22[%c1_389, %c704_390] : memref<2x1024xf32, #tpu.memory_space<vmem>>, vector<1x64xf32>
    tpu.vector_store %arg22[%c1_389, %c704_390], %268 {strides = array<i32>} : memref<2x1024xf32, #tpu.memory_space<vmem>>, vector<1x64xf32>,
    %c28_391 = arith.constant 28 : index
    %c0_392 = arith.constant 0 : index
    %270 = vector.load %arg21[%c28_391, %c0_392] : memref<32x64xf32, #tpu.memory_space<vmem>>, vector<1x64xf32>
    %c1_393 = arith.constant 1 : index
    %c768_394 = arith.constant 768 : index
    %271 = vector.load %arg22[%c1_393, %c768_394] : memref<2x1024xf32, #tpu.memory_space<vmem>>, vector<1x64xf32>
    tpu.vector_store %arg22[%c1_393, %c768_394], %270 {strides = array<i32>} : memref<2x1024xf32, #tpu.memory_space<vmem>>, vector<1x64xf32>,
    %c29 = arith.constant 29 : index
    %c0_395 = arith.constant 0 : index
    %272 = vector.load %arg21[%c29, %c0_395] : memref<32x64xf32, #tpu.memory_space<vmem>>, vector<1x64xf32>
    %c1_396 = arith.constant 1 : index
    %c832_397 = arith.constant 832 : index
    %273 = vector.load %arg22[%c1_396, %c832_397] : memref<2x1024xf32, #tpu.memory_space<vmem>>, vector<1x64xf32>
    tpu.vector_store %arg22[%c1_396, %c832_397], %272 {strides = array<i32>} : memref<2x1024xf32, #tpu.memory_space<vmem>>, vector<1x64xf32>,
    %c30 = arith.constant 30 : index
    %c0_398 = arith.constant 0 : index
    %274 = vector.load %arg21[%c30, %c0_398] : memref<32x64xf32, #tpu.memory_space<vmem>>, vector<1x64xf32>
    %c1_399 = arith.constant 1 : index
    %c896_400 = arith.constant 896 : index
    %275 = vector.load %arg22[%c1_399, %c896_400] : memref<2x1024xf32, #tpu.memory_space<vmem>>, vector<1x64xf32>
    tpu.vector_store %arg22[%c1_399, %c896_400], %274 {strides = array<i32>} : memref<2x1024xf32, #tpu.memory_space<vmem>>, vector<1x64xf32>,
    %c31 = arith.constant 31 : index
    %c0_401 = arith.constant 0 : index
    %276 = vector.load %arg21[%c31, %c0_401] : memref<32x64xf32, #tpu.memory_space<vmem>>, vector<1x64xf32>
    %c1_402 = arith.constant 1 : index
    %c960_403 = arith.constant 960 : index
    %277 = vector.load %arg22[%c1_402, %c960_403] : memref<2x1024xf32, #tpu.memory_space<vmem>>, vector<1x64xf32>
    tpu.vector_store %arg22[%c1_402, %c960_403], %276 {strides = array<i32>} : memref<2x1024xf32, #tpu.memory_space<vmem>>, vector<1x64xf32>,
    %c0_404 = arith.constant 0 : index
    %c0_405 = arith.constant 0 : index
    %278 = vector.load %arg22[%c0_404, %c0_405] : memref<2x1024xf32, #tpu.memory_space<vmem>>, vector<2x1024xf32>
    %c0_406 = arith.constant 0 : index
    %c0_407 = arith.constant 0 : index
    %279 = vector.load %arg7[%c0_406, %c0_407] : memref<1024x32xf32, #tpu.memory_space<vmem>>, vector<1024x32xf32>
    %cst_408 = arith.constant dense<0.000000e+00> : vector<2x32xf32>
    %280 = tpu.matmul %278, %279, %cst_408 {dimension_numbers = #tpu.dot_dimension_numbers<[1], [0], [0], [1], [0, 0, 1, 1], [], []>} : vector<2x1024xf32>, vector<1024x32xf32>, vector<2x32xf32> -> vector<2x32xf32>
    %c0_409 = arith.constant 0 : index
    %c0_410 = arith.constant 0 : index
    %281 = vector.load %arg8[%c0_409, %c0_410] : memref<1x32xf32, #tpu.memory_space<vmem>>, vector<1x32xf32>
    %282 = vector.broadcast %281 : vector<1x32xf32> to vector<2x32xf32>
    %283 = arith.addf %280, %282 : vector<2x32xf32>
    %c0_411 = arith.constant 0 : index
    %c0_412 = arith.constant 0 : index
    %284 = vector.load %arg9[%c0_411, %c0_412] : memref<32x256xf32, #tpu.memory_space<vmem>>, vector<32x256xf32>
    %cst_413 = arith.constant dense<0.000000e+00> : vector<2x256xf32>
    %285 = tpu.matmul %283, %284, %cst_413 {dimension_numbers = #tpu.dot_dimension_numbers<[1], [0], [0], [1], [0, 0, 1, 1], [], []>} : vector<2x32xf32>, vector<32x256xf32>, vector<2x256xf32> -> vector<2x256xf32>
    %c0_414 = arith.constant 0 : index
    %c0_415 = arith.constant 0 : index
    %286 = vector.load %arg10[%c0_414, %c0_415] : memref<1x256xf32, #tpu.memory_space<vmem>>, vector<1x256xf32>
    %287 = vector.broadcast %286 : vector<1x256xf32> to vector<2x256xf32>
    %288 = arith.addf %285, %287 : vector<2x256xf32>
    %cst_416 = arith.constant 0.000000e+00 : f32
    %289 = vector.broadcast %cst_416 : f32 to vector<2x256xf32>
    %290 = arith.maximumf %288, %289 : vector<2x256xf32>
    %c0_417 = arith.constant 0 : index
    %c0_418 = arith.constant 0 : index
    %291 = vector.load %arg11[%c0_417, %c0_418] : memref<256x128xf32, #tpu.memory_space<vmem>>, vector<256x128xf32>
    %cst_419 = arith.constant dense<0.000000e+00> : vector<2x128xf32>
    %292 = tpu.matmul %290, %291, %cst_419 {dimension_numbers = #tpu.dot_dimension_numbers<[1], [0], [0], [1], [0, 0, 1, 1], [], []>} : vector<2x256xf32>, vector<256x128xf32>, vector<2x128xf32> -> vector<2x128xf32>
    %c0_420 = arith.constant 0 : index
    %c0_421 = arith.constant 0 : index
    %293 = vector.load %arg12[%c0_420, %c0_421] : memref<1x128xf32, #tpu.memory_space<vmem>>, vector<1x128xf32>
    %294 = vector.broadcast %293 : vector<1x128xf32> to vector<2x128xf32>
    %295 = arith.addf %292, %294 : vector<2x128xf32>
    %cst_422 = arith.constant 0.000000e+00 : f32
    %296 = vector.broadcast %cst_422 : f32 to vector<2x128xf32>
    %297 = arith.maximumf %295, %296 : vector<2x128xf32>
    %c0_423 = arith.constant 0 : index
    %c0_424 = arith.constant 0 : index
    %298 = vector.load %arg13[%c0_423, %c0_424] : memref<128x64xf32, #tpu.memory_space<vmem>>, vector<128x64xf32>
    %cst_425 = arith.constant dense<0.000000e+00> : vector<2x64xf32>
    %299 = tpu.matmul %297, %298, %cst_425 {dimension_numbers = #tpu.dot_dimension_numbers<[1], [0], [0], [1], [0, 0, 1, 1], [], []>} : vector<2x128xf32>, vector<128x64xf32>, vector<2x64xf32> -> vector<2x64xf32>
    %c0_426 = arith.constant 0 : index
    %c0_427 = arith.constant 0 : index
    %300 = vector.load %arg14[%c0_426, %c0_427] : memref<1x64xf32, #tpu.memory_space<vmem>>, vector<1x64xf32>
    %301 = vector.broadcast %300 : vector<1x64xf32> to vector<2x64xf32>
    %302 = arith.addf %299, %301 : vector<2x64xf32>
    %cst_428 = arith.constant 0.000000e+00 : f32
    %303 = vector.broadcast %cst_428 : f32 to vector<2x64xf32>
    %304 = arith.maximumf %302, %303 : vector<2x64xf32>
    %c0_429 = arith.constant 0 : index
    %c0_430 = arith.constant 0 : index
    %305 = vector.load %arg15[%c0_429, %c0_430] : memref<64x4xf32, #tpu.memory_space<vmem>>, vector<64x4xf32>
    %cst_431 = arith.constant dense<0.000000e+00> : vector<2x4xf32>
    %306 = tpu.matmul %304, %305, %cst_431 {dimension_numbers = #tpu.dot_dimension_numbers<[1], [0], [0], [1], [0, 0, 1, 1], [], []>} : vector<2x64xf32>, vector<64x4xf32>, vector<2x4xf32> -> vector<2x4xf32>
    %c0_432 = arith.constant 0 : index
    %c0_433 = arith.constant 0 : index
    %307 = vector.load %arg16[%c0_432, %c0_433] : memref<1x4xf32, #tpu.memory_space<vmem>>, vector<1x4xf32>
    %308 = vector.broadcast %307 : vector<1x4xf32> to vector<2x4xf32>
    %309 = arith.addf %306, %308 : vector<2x4xf32>
    %310 = math.tanh %309 : vector<2x4xf32>
    %cst_434 = arith.constant 2.000000e+00 : f32
    %311 = vector.broadcast %cst_434 : f32 to vector<2x4xf32>
    %312 = arith.mulf %310, %311 : vector<2x4xf32>
    %c0_435 = arith.constant 0 : index
    %c0_436 = arith.constant 0 : index
    %313 = vector.load %arg17[%c0_435, %c0_436] : memref<2x4xf32, #tpu.memory_space<vmem>>, vector<2x4xf32>
    tpu.vector_store %arg17[%c0_435, %c0_436], %312 {strides = array<i32>} : memref<2x4xf32, #tpu.memory_space<vmem>>, vector<2x4xf32>,
    return
  }
}

</mosaic_0001>

<bundles_post_ra>
// kernel: small_image_actor_forward.1
= control target key start
LH: loop header
LB: loop body
LE: loop exit
PB: predicated region body
PF: predicated region fallthrough
CT: control target
= control target key end

     0   :  { %s9996_s0 = inlined_call_operand.vmem [shape: f32[392,432], index: 0, kind: input, shape index: {}]   ;;  %s9997_s1 = inlined_call_operand.vmem [shape: f32[432,32], index: 1, kind: input, shape index: {}]   ;;  %s9998_s2 = inlined_call_operand.vmem [shape: f32[1,32], index: 2, kind: input, shape index: {}]   ;;  %s9999_s3 = inlined_call_operand.vmem [shape: f32[1,32], index: 3, kind: input, shape index: {}]   ;;  %s10000_s4 = inlined_call_operand.vmem [shape: f32[2048,64], index: 4, kind: input, shape index: {}]   ;;  %s10001_s5 = inlined_call_operand.vmem [shape: f32[1,64], index: 5, kind: input, shape index: {}]   ;;  %s10002_s6 = inlined_call_operand.vmem [shape: f32[1,64], index: 6, kind: input, shape index: {}]   ;;  %s10003_s7 = inlined_call_operand.vmem [shape: f32[1024,32], index: 7, kind: input, shape index: {}]   ;;  %s10004_s8 = inlined_call_operand.vmem [shape: f32[1,32], index: 8, kind: input, shape index: {}]   ;;  %s10005_s9 = inlined_call_operand.vmem [shape: f32[32,256], index: 9, kind: input, shape index: {}]   ;;  %s10006_s10 = inlined_call_operand.vmem [shape: f32[1,256], index: 10, kind: input, shape index: {}]   ;;  %s10007_s11 = inlined_call_operand.vmem [shape: f32[256,128], index: 11, kind: input, shape index: {}]   ;;  %s10008_s12 = inlined_call_operand.vmem [shape: f32[1,128], index: 12, kind: input, shape index: {}]   ;;  %s10009_s13 = inlined_call_operand.vmem [shape: f32[128,64], index: 13, kind: input, shape index: {}]   ;;  %s10010_s14 = inlined_call_operand.vmem [shape: f32[1,64], index: 14, kind: input, shape index: {}]   ;;  %s10011_s15 = inlined_call_operand.vmem [shape: f32[64,4], index: 15, kind: input, shape index: {}]   ;;  %s10012_s16 = inlined_call_operand.vmem [shape: f32[1,4], index: 16, kind: input, shape index: {}]   ;;  %s10013_s17 = inlined_call_operand.hbm [shape: f32[2,4], index: 17, kind: output, shape index: {}]  }
   0x1   :  { %10026 = sst [smem:[#allocation18_spill]] %s9996_s0 }
   0x2   :  { %10027 = sst [smem:[#allocation19_spill]] %s9997_s1 }
   0x3   :  { %s10028_s26 = sld [smem:[#allocation19_spill]]  ;;  %v10016_v3 = vmov 0.0|0.0   ;;  %s10029_s29 = sld [smem:[#allocation18_spill]] }
   0x4   :  { %5876 = vmatprep.subr.bf16.mxu0 %v10016_v3 }
   0x9   :  { %v253_v0 = vld [vmem:[%s10028_s26] sm:$0xff]  ;;  %v254_v1 = vld [vmem:[%s10028_s26 + $0x8] sm:$0xff]  ;;  %v255_v2 = vld [vmem:[%s10028_s26 + $0x10] sm:$0xff] }
   0xa   :  { %v5877_v4 = vpack.c.bf16 %v254_v1, %v253_v0  ;;  %v256_v5 = vld [vmem:[%s10028_s26 + $0x18] sm:$0xff]  ;;  %v257_v7 = vld [vmem:[%s10028_s26 + $0x20] sm:$0xff]  ;;  %v258_v8 = vld [vmem:[%s10028_s26 + $0x28] sm:$0xff] }
   0xb   :  { %v5880_v6 = vpack.c.bf16 %v256_v5, %v255_v2  ;;  %v5883_v9 = vpack.c.bf16 %v258_v8, %v257_v7  ;;  %v259_v10 = vld [vmem:[%s10028_s26 + $0x30] sm:$0xff]  ;;  %v260_v11 = vld [vmem:[%s10028_s26 + $0x38] sm:$0xff]  ;;  %v58_v12 = vld [vmem:[%s10029_s29 + $0x8] sm:$0xff] }
   0xc   :  { %5878 = vmatpush1.bf16.msra.mxu0 %v5877_v4  ;;  %v5886_v13 = vpack.c.bf16 %v260_v11, %v259_v10  ;;  %519 = vmatprep.mubr.f32.mxu0 %v58_v12  ;;  %v261_v14 = vld [vmem:[%s10028_s26 + $0x40] sm:$0xff]  ;;  %v262_v15 = vld [vmem:[%s10028_s26 + $0x48] sm:$0xff]  ;;  %v263_v17 = vld [vmem:[%s10028_s26 + $0x50] sm:$0xff] }
   0xd   :  { %5879 = vmatprep.subr.bf16.mxu0 %v10016_v3  ;;  %v5889_v16 = vpack.c.bf16 %v262_v15, %v261_v14  ;;  %v264_v18 = vld [vmem:[%s10028_s26 + $0x58] sm:$0xff]  ;;  %v265_v20 = vld [vmem:[%s10028_s26 + $0x60] sm:$0xff]  ;;  %v266_v21 = vld [vmem:[%s10028_s26 + $0x68] sm:$0xff] }
   0xe   :  { %v5892_v19 = vpack.c.bf16 %v264_v18, %v263_v17  ;;  %v5895_v22 = vpack.c.bf16 %v266_v21, %v265_v20  ;;  %v267_v23 = vld [vmem:[%s10028_s26 + $0x70] sm:$0xff]  ;;  %v268_v24 = vld [vmem:[%s10028_s26 + $0x78] sm:$0xff]  ;;  %v269_v26 = vld [vmem:[%s10028_s26 + $0x80] sm:$0xff] }
   0xf   :  { %v5898_v25 = vpack.c.bf16 %v268_v24, %v267_v23  ;;  %v270_v27 = vld [vmem:[%s10028_s26 + $0x88] sm:$0xff] }
  0x10   :  { %5881 = vmatpush1.bf16.msra.mxu0 %v5880_v6  ;;  %v5901_v28 = vpack.c.bf16 %v270_v27, %v269_v26 }
  0x11   :  { %5882 = vmatprep.subr.bf16.mxu0 %v10016_v3 }
  0x14   :  { %5884 = vmatpush1.bf16.msra.mxu0 %v5883_v9 }
  0x15   :  { %5885 = vmatprep.subr.bf16.mxu0 %v10016_v3 }
  0x18   :  { %5887 = vmatpush1.bf16.msra.mxu0 %v5886_v13 }
  0x19   :  { %5888 = vmatprep.subr.bf16.mxu0 %v10016_v3 }
  0x1c   :  { %5890 = vmatpush1.bf16.msra.mxu0 %v5889_v16 }
  0x1d   :  { %5891 = vmatprep.subr.bf16.mxu0 %v10016_v3 }
  0x20   :  { %5893 = vmatpush1.bf16.msra.mxu0 %v5892_v19 }
  0x21   :  { %5894 = vmatprep.subr.bf16.mxu0 %v10016_v3 }
  0x24   :  { %5896 = vmatpush1.bf16.msra.mxu0 %v5895_v22 }
  0x25   :  { %5897 = vmatprep.subr.bf16.mxu0 %v10016_v3 }
  0x28   :  { %5899 = vmatpush1.bf16.msra.mxu0 %v5898_v25 }
  0x29   :  { %22 = vsyncpa [#allocation8], 0  ;;  %5900 = vmatprep.subr.bf16.mxu0 %v10016_v3  ;;  %v271_v29 = vld [vmem:[%s10028_s26 + $0x90] sm:$0xff]  ;;  %v272_v30 = vld [vmem:[%s10028_s26 + $0x98] sm:$0xff]  ;;  %vm307_vm0 = vcmask 392192   ;;  %vm1077_vm1 = vcmask 261120  }
  0x2a   :  { %v5904_v31 = vpack.c.bf16 %v272_v30, %v271_v29  ;;  %v273_v32 = vld [vmem:[%s10028_s26 + $0xa0] sm:$0xff]  ;;  %v274_v33 = vld [vmem:[%s10028_s26 + $0xa8] sm:$0xff]  ;;  %v275_v35 = vld [vmem:[%s10028_s26 + $0xb0] sm:$0xff]  ;;  %s6558_s21 = smov 96   ;;  %vm1557_vm2 = vcmask 257024   ;;  %vm1579_vm3 = vcmask 523520  }
  0x2b   :  { %v5907_v34 = vpack.c.bf16 %v274_v33, %v273_v32  ;;  %v276_v36 = vld [vmem:[%s10028_s26 + $0xb8] sm:$0xff]  ;;  %v277_v38 = vld [vmem:[%s10028_s26 + $0xc0] sm:$0xff]  ;;  %v278_v39 = vld [vmem:[%s10028_s26 + $0xc8] sm:$0xff]  ;;  %vm1605_vm4 = vcmask 785920   ;;  %vm1631_vm5 = vcmask 1048320   ;;  %vm1583_vm6 = vcmask 519424  }
  0x2c   :  { %5902 = vmatpush1.bf16.msra.mxu0 %v5901_v28  ;;  %v5910_v37 = vpack.c.bf16 %v276_v36, %v275_v35  ;;  %v5913_v40 = vpack.c.bf16 %v278_v39, %v277_v38  ;;  %v279_v41 = vld [vmem:[%s10028_s26 + $0xd0] sm:$0xff]  ;;  %v280_v42 = vld [vmem:[%s10028_s26 + $0xd8] sm:$0xff]  ;;  %v281_v44 = vld [vmem:[%s10028_s26 + $0xe0] sm:$0xff]  ;;  %vm1888_vm7 = vcmask 1041408   ;;  %vm1992_vm8 = vcmask 1040384  }
  0x2d   :  { %5903 = vmatprep.subr.bf16.mxu0 %v10016_v3  ;;  %v5916_v43 = vpack.c.bf16 %v280_v42, %v279_v41  ;;  %v282_v45 = vld [vmem:[%s10028_s26 + $0xe8] sm:$0xff]  ;;  %v283_v47 = vld [vmem:[%s10028_s26 + $0xf0] sm:$0xff]  ;;  %v284_v48 = vld [vmem:[%s10028_s26 + $0xf8] sm:$0xff]  ;;  %vm1609_vm9 = vcmask 781824   ;;  %vm1635_vm10 = vcmask 1044224   ;;  %vm1911_vm11 = vcmask 1045504  }
  0x2e   :  { %v5919_v46 = vpack.c.bf16 %v282_v45, %v281_v44  ;;  %v5922_v49 = vpack.c.bf16 %v284_v48, %v283_v47  ;;  %v285_v50 = vld [vmem:[%s10028_s26 + $0x100] sm:$0xff]  ;;  %v286_v51 = vld [vmem:[%s10028_s26 + $0x108] sm:$0xff]  ;;  %v287_v55 = vld [vmem:[%s10028_s26 + $0x110] sm:$0xff]  ;;  %vm2096_vm12 = vcmask 1042432   ;;  %vm2015_vm13 = vcmask 1044480  }
  0x2f   :  { %v57_v52 = vld [vmem:[%s10029_s29] sm:$0xff]  ;;  %v5925_v53 = vpack.c.bf16 %v286_v51, %v285_v50  ;;  %v62_v54 = vld [vmem:[%s10029_s29 + $0x28] sm:$0xff]  ;;  %v288_v56 = vld [vmem:[%s10028_s26 + $0x118] sm:$0xff]  ;;  %vm2119_vm14 = vcmask 1046528   ;;  %vm1848_vm15 = vcmask 523264  }
  0x30   :  { %5905 = vmatpush1.bf16.msra.mxu0 %v5904_v31  ;;  %v61_v57 = vld [vmem:[%s10029_s29 + $0x20] sm:$0xff]  ;;  %v5928_v58 = vpack.c.bf16 %v288_v56, %v287_v55  ;;  %v66_v59 = vld [vmem:[%s10029_s29 + $0x48] sm:$0xff]  ;;  %v291_v1 = vld [vmem:[%s10028_s26 + $0x130] sm:$0xff] }
  0x31   :  { %5906 = vmatprep.subr.bf16.mxu0 %v10016_v3  ;;  %v289_v60 = vld [vmem:[%s10028_s26 + $0x120] sm:$0xff]  ;;  %v290_v61 = vld [vmem:[%s10028_s26 + $0x128] sm:$0xff]  ;;  %v292_v2 = vld [vmem:[%s10028_s26 + $0x138] sm:$0xff] }
  0x32   :  { %v65_v62 = vld [vmem:[%s10029_s29 + $0x40] sm:$0xff]  ;;  %v5931_v63 = vpack.c.bf16 %v290_v61, %v289_v60  ;;  %v70_v0 = vld [vmem:[%s10029_s29 + $0x68] sm:$0xff]  ;;  %v5934_v5 = vpack.c.bf16 %v292_v2, %v291_v1  ;;  %v295_v12 = vld [vmem:[%s10028_s26 + $0x150] sm:$0xff] }
  0x33   :  { %v69_v4 = vld [vmem:[%s10029_s29 + $0x60] sm:$0xff]  ;;  %v74_v6 = vld [vmem:[%s10029_s29 + $0x88] sm:$0xff]  ;;  %v296_v13 = vld [vmem:[%s10028_s26 + $0x158] sm:$0xff] }
  0x34   :  { %5908 = vmatpush1.bf16.msra.mxu0 %v5907_v34  ;;  %v293_v7 = vld [vmem:[%s10028_s26 + $0x140] sm:$0xff]  ;;  %v294_v8 = vld [vmem:[%s10028_s26 + $0x148] sm:$0xff]  ;;  %v5940_v15 = vpack.c.bf16 %v296_v13, %v295_v12  ;;  %v299_v22 = vld [vmem:[%s10028_s26 + $0x170] sm:$0xff] }
  0x35   :  { %5909 = vmatprep.subr.bf16.mxu0 %v10016_v3  ;;  %v73_v9 = vld [vmem:[%s10029_s29 + $0x80] sm:$0xff]  ;;  %v5937_v10 = vpack.c.bf16 %v294_v8, %v293_v7  ;;  %v78_v11 = vld [vmem:[%s10029_s29 + $0xa8] sm:$0xff]  ;;  %v300_v23 = vld [vmem:[%s10028_s26 + $0x178] sm:$0xff] }
  0x36   :  { %v77_v14 = vld [vmem:[%s10029_s29 + $0xa0] sm:$0xff]  ;;  %v82_v16 = vld [vmem:[%s10029_s29 + $0xc8] sm:$0xff]  ;;  %v5946_v25 = vpack.c.bf16 %v300_v23, %v299_v22  ;;  %v303_v32 = vld [vmem:[%s10028_s26 + $0x190] sm:$0xff] }
  0x37   :  { %v297_v17 = vld [vmem:[%s10028_s26 + $0x160] sm:$0xff]  ;;  %v298_v18 = vld [vmem:[%s10028_s26 + $0x168] sm:$0xff]  ;;  %v304_v33 = vld [vmem:[%s10028_s26 + $0x198] sm:$0xff] }
  0x38   :  { %5911 = vmatpush1.bf16.msra.mxu0 %v5910_v37  ;;  %v81_v19 = vld [vmem:[%s10029_s29 + $0xc0] sm:$0xff]  ;;  %v5943_v20 = vpack.c.bf16 %v298_v18, %v297_v17  ;;  %v86_v21 = vld [vmem:[%s10029_s29 + $0xe8] sm:$0xff]  ;;  %v5952_v35 = vpack.c.bf16 %v304_v33, %v303_v32 }
  0x39   :  { %5912 = vmatprep.subr.bf16.mxu0 %v10016_v3  ;;  %v85_v24 = vld [vmem:[%s10029_s29 + $0xe0] sm:$0xff]  ;;  %v90_v26 = vld [vmem:[%s10029_s29 + $0x108] sm:$0xff] }
  0x3a   :  { %v301_v27 = vld [vmem:[%s10028_s26 + $0x180] sm:$0xff]  ;;  %v302_v28 = vld [vmem:[%s10028_s26 + $0x188] sm:$0xff] }
  0x3b   :  { %v89_v29 = vld [vmem:[%s10029_s29 + $0x100] sm:$0xff]  ;;  %v5949_v30 = vpack.c.bf16 %v302_v28, %v301_v27  ;;  %v94_v31 = vld [vmem:[%s10029_s29 + $0x128] sm:$0xff] }
  0x3c   :  { %5914 = vmatpush1.bf16.msra.mxu0 %v5913_v40  ;;  %v93_v34 = vld [vmem:[%s10029_s29 + $0x120] sm:$0xff]  ;;  %v98_v36 = vld [vmem:[%s10029_s29 + $0x148] sm:$0xff] }
  0x3d   :  { %5915 = vmatprep.subr.bf16.mxu0 %v10016_v3  ;;  %v97_v37 = vld [vmem:[%s10029_s29 + $0x140] sm:$0xff]  ;;  %v102_v38 = vld [vmem:[%s10029_s29 + $0x168] sm:$0xff] }
  0x3e   :  { %v101_v39 = vld [vmem:[%s10029_s29 + $0x160] sm:$0xff]  ;;  %v106_v40 = vld [vmem:[%s10029_s29 + $0x188] sm:$0xff] }
  0x3f   :  { %v105_v41 = vld [vmem:[%s10029_s29 + $0x180] sm:$0xff]  ;;  %v110_v42 = vld [vmem:[%s10029_s29 + $0x1a8] sm:$0xff] }
  0x40   :  { %5917 = vmatpush1.bf16.msra.mxu0 %v5916_v43  ;;  %v109_v43 = vld [vmem:[%s10029_s29 + $0x1a0] sm:$0xff]  ;;  %v114_v44 = vld [vmem:[%s10029_s29 + $0x1c8] sm:$0xff] }
  0x41   :  { %5918 = vmatprep.subr.bf16.mxu0 %v10016_v3  ;;  %v305_v45 = vld [vmem:[%s10028_s26 + $0x1a0] sm:$0xff]  ;;  %v122_v51 = vld [vmem:[%s10029_s29 + $0x208] sm:$0xff] }
  0x42   :  { %v113_v47 = vld [vmem:[%s10029_s29 + $0x1c0] sm:$0xff]  ;;  %v130_v55 = vld [vmem:[%s10029_s29 + $0x248] sm:$0xff] }
  0x43   :  { %v117_v50 = vld [vmem:[%s10029_s29 + $0x1e0] sm:$0xff]  ;;  %v142_v61 = vld [vmem:[%s10029_s29 + $0x2a8] sm:$0xff] }
  0x44   :  { %5920 = vmatpush1.bf16.msra.mxu0 %v5919_v46  ;;  %v306_v46 = vld [vmem:[%s10028_s26 + $0x1a8] sm:$0xff]  ;;  %v129_v56 = vld [vmem:[%s10029_s29 + $0x240] sm:$0xff] }
  0x45   :  { %5921 = vmatprep.subr.bf16.mxu0 %v10016_v3  ;;  %v5955_v48 = vpack.c.bf16 %v306_v46, %v305_v45  ;;  %v137_v60 = vld [vmem:[%s10029_s29 + $0x280] sm:$0xff]  ;;  %v150_v1 = vld [vmem:[%s10029_s29 + $0x2e8] sm:$0xff] }
  0x46   :  { %v149_v2 = vld [vmem:[%s10029_s29 + $0x2e0] sm:$0xff]  ;;  %v162_v8 = vld [vmem:[%s10029_s29 + $0x348] sm:$0xff] }
  0x47   :  { %v157_v7 = vld [vmem:[%s10029_s29 + $0x320] sm:$0xff]  ;;  %v170_v12 = vld [vmem:[%s10029_s29 + $0x388] sm:$0xff] }
  0x48   :  { %5923 = vmatpush1.bf16.msra.mxu0 %v5922_v49  ;;  %v118_v49 = vld [vmem:[%s10029_s29 + $0x1e8] sm:$0xff]  ;;  %v169_v13 = vld [vmem:[%s10029_s29 + $0x380] sm:$0xff] }
  0x49   :  { %5924 = vmatprep.subr.bf16.mxu0 %v10016_v3  ;;  %v177_v17 = vld [vmem:[%s10029_s29 + $0x3c0] sm:$0xff]  ;;  %v182_v18 = vld [vmem:[%s10029_s29 + $0x3e8] sm:$0xff] }
  0x4a   :  { %v190_v22 = vld [vmem:[%s10029_s29 + $0x428] sm:$0xff]  ;;  %v189_v23 = vld [vmem:[%s10029_s29 + $0x420] sm:$0xff] }
  0x4b   :  { %520 = vmatmul.mubr.f32.vlgmr.msra.gmra.mrb[0].mxu0 %v57_v52  ;;  %v121_v52 = vld [vmem:[%s10029_s29 + $0x200] sm:$0xff]  ;;  %v202_v28 = vld [vmem:[%s10029_s29 + $0x488] sm:$0xff] }
  0x4c   :  { %5926 = vmatpush1.bf16.msra.mxu0 %v5925_v53  ;;  %524 = vmatprep.mubr.f32.mxu0 %v62_v54  ;;  %v126_v53 = vld [vmem:[%s10029_s29 + $0x228] sm:$0xff]  ;;  %v125_v54 = vld [vmem:[%s10029_s29 + $0x220] sm:$0xff] }
  0x4d   :  { %5927 = vmatprep.subr.bf16.mxu0 %v10016_v3  ;;  %v197_v27 = vld [vmem:[%s10029_s29 + $0x460] sm:$0xff]  ;;  %v210_v32 = vld [vmem:[%s10029_s29 + $0x4c8] sm:$0xff] }
  0x4e   :  { %v209_v33 = vld [vmem:[%s10029_s29 + $0x4c0] sm:$0xff]  ;;  %v238_v46 = vld [vmem:[%s10029_s29 + $0x5a8] sm:$0xff] }
  0x4f   :  { %525 = vmatmul.mubr.f32.gmra.mrb[2].mxu0 %v61_v57  ;;  %v134_v57 = vld [vmem:[%s10029_s29 + $0x268] sm:$0xff]  ;;  %v233_v45 = vld [vmem:[%s10029_s29 + $0x580] sm:$0xff] }
  0x50   :  { %529 = vmatprep.mubr.f32.mxu0 %v66_v59  ;;  %5929 = vmatpush1.bf16.msra.mxu0 %v5928_v58  ;;  %v133_v58 = vld [vmem:[%s10029_s29 + $0x260] sm:$0xff]  ;;  %v138_v59 = vld [vmem:[%s10029_s29 + $0x288] sm:$0xff] }
  0x51   :  { %5930 = vmatprep.subr.bf16.mxu0 %v10016_v3 }
  0x53   :  { %530 = vmatmul.mubr.f32.gmra.mrb[4].mxu0 %v65_v62  ;;  %v141_v62 = vld [vmem:[%s10029_s29 + $0x2a0] sm:$0xff] }
  0x54   :  { %534 = vmatprep.mubr.f32.mxu0 %v70_v0  ;;  %5932 = vmatpush1.bf16.msra.mxu0 %v5931_v63  ;;  %v146_v63 = vld [vmem:[%s10029_s29 + $0x2c8] sm:$0xff]  ;;  %v145_v0 = vld [vmem:[%s10029_s29 + $0x2c0] sm:$0xff] }
  0x55   :  { %5933 = vmatprep.subr.bf16.mxu0 %v10016_v3 }
  0x57   :  { %535 = vmatmul.mubr.f32.gmra.mrb[6].mxu0 %v69_v4  ;;  %v154_v4 = vld [vmem:[%s10029_s29 + $0x308] sm:$0xff] }
  0x58   :  { %539 = vmatprep.mubr.f32.mxu0 %v74_v6  ;;  %5935 = vmatpush1.bf16.msra.mxu0 %v5934_v5  ;;  %v153_v5 = vld [vmem:[%s10029_s29 + $0x300] sm:$0xff]  ;;  %v158_v6 = vld [vmem:[%s10029_s29 + $0x328] sm:$0xff] }
  0x59   :  { %5936 = vmatprep.subr.bf16.mxu0 %v10016_v3 }
  0x5b   :  { %540 = vmatmul.mubr.f32.gmra.mrb[8].mxu0 %v73_v9  ;;  %v161_v9 = vld [vmem:[%s10029_s29 + $0x340] sm:$0xff] }
  0x5c   :  { %544 = vmatprep.mubr.f32.mxu0 %v78_v11  ;;  %5938 = vmatpush1.bf16.msra.mxu0 %v5937_v10  ;;  %v166_v10 = vld [vmem:[%s10029_s29 + $0x368] sm:$0xff]  ;;  %v165_v11 = vld [vmem:[%s10029_s29 + $0x360] sm:$0xff] }
  0x5d   :  { %5939 = vmatprep.subr.bf16.mxu0 %v10016_v3 }
  0x5f   :  { %545 = vmatmul.mubr.f32.gmra.mrb[10].mxu0 %v77_v14  ;;  %v174_v14 = vld [vmem:[%s10029_s29 + $0x3a8] sm:$0xff] }
  0x60   :  { %549 = vmatprep.mubr.f32.mxu0 %v82_v16  ;;  %5941 = vmatpush1.bf16.msra.mxu0 %v5940_v15  ;;  %v173_v15 = vld [vmem:[%s10029_s29 + $0x3a0] sm:$0xff]  ;;  %v178_v16 = vld [vmem:[%s10029_s29 + $0x3c8] sm:$0xff] }
  0x61   :  { %5942 = vmatprep.subr.bf16.mxu0 %v10016_v3 }
  0x63   :  { %550 = vmatmul.mubr.f32.gmra.mrb[12].mxu0 %v81_v19  ;;  %v181_v19 = vld [vmem:[%s10029_s29 + $0x3e0] sm:$0xff] }
  0x64   :  { %554 = vmatprep.mubr.f32.mxu0 %v86_v21  ;;  %5944 = vmatpush1.bf16.msra.mxu0 %v5943_v20  ;;  %v186_v20 = vld [vmem:[%s10029_s29 + $0x408] sm:$0xff]  ;;  %v185_v21 = vld [vmem:[%s10029_s29 + $0x400] sm:$0xff] }
  0x65   :  { %5945 = vmatprep.subr.bf16.mxu0 %v10016_v3 }
  0x67   :  { %555 = vmatmul.mubr.f32.gmra.mrb[14].mxu0 %v85_v24  ;;  %v194_v24 = vld [vmem:[%s10029_s29 + $0x448] sm:$0xff] }
  0x68   :  { %559 = vmatprep.mubr.f32.mxu0 %v90_v26  ;;  %5947 = vmatpush1.bf16.msra.mxu0 %v5946_v25  ;;  %v193_v25 = vld [vmem:[%s10029_s29 + $0x440] sm:$0xff]  ;;  %v198_v26 = vld [vmem:[%s10029_s29 + $0x468] sm:$0xff] }
  0x69   :  { %5948 = vmatprep.subr.bf16.mxu0 %v10016_v3 }
  0x6b   :  { %560 = vmatmul.mubr.f32.gmra.mrb[16].mxu0 %v89_v29  ;;  %v201_v29 = vld [vmem:[%s10029_s29 + $0x480] sm:$0xff] }
  0x6c   :  { %564 = vmatprep.mubr.f32.mxu0 %v94_v31  ;;  %5950 = vmatpush1.bf16.msra.mxu0 %v5949_v30  ;;  %v206_v30 = vld [vmem:[%s10029_s29 + $0x4a8] sm:$0xff]  ;;  %v205_v31 = vld [vmem:[%s10029_s29 + $0x4a0] sm:$0xff] }
  0x6d   :  { %5951 = vmatprep.subr.bf16.mxu0 %v10016_v3 }
  0x6f   :  { %565 = vmatmul.mubr.f32.gmra.mrb[18].mxu0 %v93_v34  ;;  %v214_v34 = vld [vmem:[%s10029_s29 + $0x4e8] sm:$0xff] }
  0x70   :  { %569 = vmatprep.mubr.f32.mxu0 %v98_v36  ;;  %5953 = vmatpush1.bf16.msra.mxu0 %v5952_v35  ;;  %v213_v35 = vld [vmem:[%s10029_s29 + $0x4e0] sm:$0xff]  ;;  %v218_v36 = vld [vmem:[%s10029_s29 + $0x508] sm:$0xff] }
  0x71   :  { %5954 = vmatprep.subr.bf16.mxu0 %v10016_v3 }
  0x73   :  { %570 = vmatmul.mubr.f32.gmra.mrb[20].mxu0 %v97_v37  ;;  %v217_v37 = vld [vmem:[%s10029_s29 + $0x500] sm:$0xff] }
  0x74   :  { %574 = vmatprep.mubr.f32.mxu0 %v102_v38  ;;  %5956 = vmatpush1.bf16.msra.mxu0 %v5955_v48  ;;  %v222_v38 = vld [vmem:[%s10029_s29 + $0x528] sm:$0xff] }
  0x75   :  { %6381 = vmatprep.subr.bf16.mxu0 %v10016_v3  ;;  %v242_v48 = vld [vmem:[%s10029_s29 + $0x5c8] sm:$0xff] }
  0x77   :  { %575 = vmatmul.mubr.f32.gmra.mrb[22].mxu0 %v101_v39  ;;  %v221_v39 = vld [vmem:[%s10029_s29 + $0x520] sm:$0xff] }
  0x78   :  { %579 = vmatprep.mubr.f32.mxu0 %v106_v40  ;;  %v226_v40 = vld [vmem:[%s10029_s29 + $0x548] sm:$0xff] }
  0x7b   :  { %580 = vmatmul.mubr.f32.gmra.mrb[24].mxu0 %v105_v41  ;;  %v225_v41 = vld [vmem:[%s10029_s29 + $0x540] sm:$0xff] }
  0x7c   :  { %584 = vmatprep.mubr.f32.mxu0 %v110_v42  ;;  %v230_v42 = vld [vmem:[%s10029_s29 + $0x568] sm:$0xff] }
  0x7f   :  { %585 = vmatmul.mubr.f32.gmra.mrb[26].mxu0 %v109_v43  ;;  %v229_v43 = vld [vmem:[%s10029_s29 + $0x560] sm:$0xff] }
  0x80   :  { %589 = vmatprep.mubr.f32.mxu0 %v114_v44  ;;  %v234_v44 = vld [vmem:[%s10029_s29 + $0x588] sm:$0xff] }
  0x83   :  { %590 = vmatmul.mubr.f32.gmra.mrb[28].mxu0 %v113_v47  ;;  %v237_v47 = vld [vmem:[%s10029_s29 + $0x5a0] sm:$0xff] }
  0x84   :  { %594 = vmatprep.mubr.f32.mxu0 %v118_v49  ;;  %v241_v49 = vld [vmem:[%s10029_s29 + $0x5c0] sm:$0xff] }
  0x87   :  { %595 = vmatmul.mubr.f32.gmra.mrb[30].mxu0 %v117_v50  ;;  %v246_v50 = vld [vmem:[%s10029_s29 + $0x5e8] sm:$0xff] }
  0x88   :  { %599 = vmatprep.mubr.f32.mxu0 %v122_v51  ;;  %v245_v51 = vld [vmem:[%s10029_s29 + $0x5e0] sm:$0xff] }
  0x8b   :  { %600 = vmatmul.mubr.f32.gmra.mrb[32].mxu0 %v121_v52  ;;  %v250_v52 = vld [vmem:[%s10029_s29 + $0x608] sm:$0xff] }
  0x8c   :  { %604 = vmatprep.mubr.f32.mxu0 %v126_v53  ;;  %v249_v53 = vld [vmem:[%s10029_s29 + $0x600] sm:$0xff] }
  0x8f   :  { %605 = vmatmul.mubr.f32.gmra.mrb[34].mxu0 %v125_v54  ;;  %v60_v54 = vld [vmem:[%s10029_s29 + $0x18] sm:$0xff] }
  0x90   :  { %609 = vmatprep.mubr.f32.mxu0 %v130_v55  ;;  %v59_v55 = vld [vmem:[%s10029_s29 + $0x10] sm:$0xff] }
  0x93   :  { %610 = vmatmul.mubr.f32.gmra.mrb[36].mxu0 %v129_v56  ;;  %v64_v56 = vld [vmem:[%s10029_s29 + $0x38] sm:$0xff] }
  0x94   :  { %614 = vmatprep.mubr.f32.mxu0 %v134_v57  ;;  %v63_v57 = vld [vmem:[%s10029_s29 + $0x30] sm:$0xff] }
  0x97   :  { %615 = vmatmul.mubr.f32.gmra.mrb[38].mxu0 %v133_v58  ;;  %v68_v58 = vld [vmem:[%s10029_s29 + $0x58] sm:$0xff] }
  0x98   :  { %619 = vmatprep.mubr.f32.mxu0 %v138_v59  ;;  %v67_v59 = vld [vmem:[%s10029_s29 + $0x50] sm:$0xff] }
  0x9b   :  { %620 = vmatmul.mubr.f32.gmra.mrb[40].mxu0 %v137_v60  ;;  %v72_v60 = vld [vmem:[%s10029_s29 + $0x78] sm:$0xff] }
  0x9c   :  { %624 = vmatprep.mubr.f32.mxu0 %v142_v61  ;;  %v71_v61 = vld [vmem:[%s10029_s29 + $0x70] sm:$0xff] }
  0x9f   :  { %625 = vmatmul.mubr.f32.gmra.mrb[42].mxu0 %v141_v62  ;;  %v76_v62 = vld [vmem:[%s10029_s29 + $0x98] sm:$0xff] }
  0xa0   :  { %629 = vmatprep.mubr.f32.mxu0 %v146_v63  ;;  %v75_v63 = vld [vmem:[%s10029_s29 + $0x90] sm:$0xff] }
  0xa3   :  { %630 = vmatmul.mubr.f32.gmra.mrb[44].mxu0 %v145_v0  ;;  %v80_v0 = vld [vmem:[%s10029_s29 + $0xb8] sm:$0xff] }
  0xa4   :  { %634 = vmatprep.mubr.f32.mxu0 %v150_v1  ;;  %v79_v1 = vld [vmem:[%s10029_s29 + $0xb0] sm:$0xff] }
  0xa7   :  { %635 = vmatmul.mubr.f32.gmra.mrb[46].mxu0 %v149_v2  ;;  %v84_v2 = vld [vmem:[%s10029_s29 + $0xd8] sm:$0xff] }
  0xa8   :  { %639 = vmatprep.mubr.f32.mxu0 %v154_v4  ;;  %v83_v4 = vld [vmem:[%s10029_s29 + $0xd0] sm:$0xff] }
  0xab   :  { %640 = vmatmul.mubr.f32.gmra.mrb[48].mxu0 %v153_v5  ;;  %v88_v5 = vld [vmem:[%s10029_s29 + $0xf8] sm:$0xff] }
  0xac   :  { %644 = vmatprep.mubr.f32.mxu0 %v158_v6  ;;  %v87_v6 = vld [vmem:[%s10029_s29 + $0xf0] sm:$0xff] }
  0xaf   :  { %645 = vmatmul.mubr.f32.gmra.mrb[50].mxu0 %v157_v7  ;;  %v92_v7 = vld [vmem:[%s10029_s29 + $0x118] sm:$0xff] }
  0xb0   :  { %649 = vmatprep.mubr.f32.mxu0 %v162_v8  ;;  %v91_v8 = vld [vmem:[%s10029_s29 + $0x110] sm:$0xff] }
  0xb3   :  { %650 = vmatmul.mubr.f32.gmra.mrb[52].mxu0 %v161_v9  ;;  %v96_v9 = vld [vmem:[%s10029_s29 + $0x138] sm:$0xff] }
  0xb4   :  { %654 = vmatprep.mubr.f32.mxu0 %v166_v10  ;;  %v95_v10 = vld [vmem:[%s10029_s29 + $0x130] sm:$0xff] }
  0xb7   :  { %655 = vmatmul.mubr.f32.gmra.mrb[54].mxu0 %v165_v11  ;;  %v100_v11 = vld [vmem:[%s10029_s29 + $0x158] sm:$0xff] }
  0xb8   :  { %659 = vmatprep.mubr.f32.mxu0 %v170_v12  ;;  %v99_v12 = vld [vmem:[%s10029_s29 + $0x150] sm:$0xff] }
  0xbb   :  { %660 = vmatmul.mubr.f32.gmra.mrb[56].mxu0 %v169_v13  ;;  %v104_v13 = vld [vmem:[%s10029_s29 + $0x178] sm:$0xff] }
  0xbc   :  { %664 = vmatprep.mubr.f32.mxu0 %v174_v14  ;;  %v103_v14 = vld [vmem:[%s10029_s29 + $0x170] sm:$0xff] }
  0xbf   :  { %665 = vmatmul.mubr.f32.gmra.mrb[58].mxu0 %v173_v15  ;;  %v108_v15 = vld [vmem:[%s10029_s29 + $0x198] sm:$0xff] }
  0xc0   :  { %669 = vmatprep.mubr.f32.mxu0 %v178_v16  ;;  %v107_v16 = vld [vmem:[%s10029_s29 + $0x190] sm:$0xff] }
  0xc3   :  { %670 = vmatmul.mubr.f32.gmra.mrb[60].mxu0 %v177_v17  ;;  %v112_v17 = vld [vmem:[%s10029_s29 + $0x1b8] sm:$0xff] }
  0xc4   :  { %674 = vmatprep.mubr.f32.mxu0 %v182_v18  ;;  %v111_v18 = vld [vmem:[%s10029_s29 + $0x1b0] sm:$0xff] }
  0xc7   :  { %675 = vmatmul.mubr.f32.gmra.mrb[62].mxu0 %v181_v19  ;;  %v116_v19 = vld [vmem:[%s10029_s29 + $0x1d8] sm:$0xff] }
  0xc8   :  { %679 = vmatprep.mubr.f32.mxu0 %v186_v20  ;;  %v115_v20 = vld [vmem:[%s10029_s29 + $0x1d0] sm:$0xff] }
  0xcb   :  { %680 = vmatmul.mubr.f32.gmra.mrb[64].mxu0 %v185_v21  ;;  %v120_v21 = vld [vmem:[%s10029_s29 + $0x1f8] sm:$0xff] }
  0xcc   :  { %684 = vmatprep.mubr.f32.mxu0 %v190_v22  ;;  %v119_v22 = vld [vmem:[%s10029_s29 + $0x1f0] sm:$0xff] }
  0xcf   :  { %685 = vmatmul.mubr.f32.gmra.mrb[66].mxu0 %v189_v23  ;;  %v124_v23 = vld [vmem:[%s10029_s29 + $0x218] sm:$0xff] }
  0xd0   :  { %689 = vmatprep.mubr.f32.mxu0 %v194_v24  ;;  %v123_v24 = vld [vmem:[%s10029_s29 + $0x210] sm:$0xff] }
  0xd3   :  { %690 = vmatmul.mubr.f32.gmra.mrb[68].mxu0 %v193_v25  ;;  %v128_v25 = vld [vmem:[%s10029_s29 + $0x238] sm:$0xff] }
  0xd4   :  { %694 = vmatprep.mubr.f32.mxu0 %v198_v26  ;;  %v127_v26 = vld [vmem:[%s10029_s29 + $0x230] sm:$0xff] }
  0xd7   :  { %695 = vmatmul.mubr.f32.gmra.mrb[70].mxu0 %v197_v27  ;;  %v132_v27 = vld [vmem:[%s10029_s29 + $0x258] sm:$0xff] }
  0xd8   :  { %699 = vmatprep.mubr.f32.mxu0 %v202_v28  ;;  %v131_v28 = vld [vmem:[%s10029_s29 + $0x250] sm:$0xff] }
  0xdb   :  { %700 = vmatmul.mubr.f32.gmra.mrb[72].mxu0 %v201_v29  ;;  %v136_v29 = vld [vmem:[%s10029_s29 + $0x278] sm:$0xff] }
  0xdc   :  { %704 = vmatprep.mubr.f32.mxu0 %v206_v30  ;;  %v135_v30 = vld [vmem:[%s10029_s29 + $0x270] sm:$0xff] }
  0xdf   :  { %705 = vmatmul.mubr.f32.gmra.mrb[74].mxu0 %v205_v31  ;;  %v140_v31 = vld [vmem:[%s10029_s29 + $0x298] sm:$0xff] }
  0xe0   :  { %709 = vmatprep.mubr.f32.mxu0 %v210_v32  ;;  %v139_v32 = vld [vmem:[%s10029_s29 + $0x290] sm:$0xff] }
  0xe3   :  { %710 = vmatmul.mubr.f32.gmra.mrb[76].mxu0 %v209_v33  ;;  %v144_v33 = vld [vmem:[%s10029_s29 + $0x2b8] sm:$0xff] }
  0xe4   :  { %714 = vmatprep.mubr.f32.mxu0 %v214_v34  ;;  %v143_v34 = vld [vmem:[%s10029_s29 + $0x2b0] sm:$0xff] }
  0xe7   :  { %715 = vmatmul.mubr.f32.gmra.mrb[78].mxu0 %v213_v35  ;;  %v148_v35 = vld [vmem:[%s10029_s29 + $0x2d8] sm:$0xff] }
  0xe8   :  { %719 = vmatprep.mubr.f32.mxu0 %v218_v36  ;;  %v147_v36 = vld [vmem:[%s10029_s29 + $0x2d0] sm:$0xff] }
  0xeb   :  { %720 = vmatmul.mubr.f32.gmra.mrb[80].mxu0 %v217_v37  ;;  %v152_v37 = vld [vmem:[%s10029_s29 + $0x2f8] sm:$0xff] }
  0xec   :  { %724 = vmatprep.mubr.f32.mxu0 %v222_v38  ;;  %v151_v38 = vld [vmem:[%s10029_s29 + $0x2f0] sm:$0xff] }
  0xef   :  { %725 = vmatmul.mubr.f32.gmra.mrb[82].mxu0 %v221_v39  ;;  %v156_v39 = vld [vmem:[%s10029_s29 + $0x318] sm:$0xff] }
  0xf0   :  { %729 = vmatprep.mubr.f32.mxu0 %v226_v40  ;;  %v155_v40 = vld [vmem:[%s10029_s29 + $0x310] sm:$0xff] }
  0xf3   :  { %730 = vmatmul.mubr.f32.gmra.mrb[84].mxu0 %v225_v41  ;;  %v160_v41 = vld [vmem:[%s10029_s29 + $0x338] sm:$0xff] }
  0xf4   :  { %734 = vmatprep.mubr.f32.mxu0 %v230_v42  ;;  %v159_v42 = vld [vmem:[%s10029_s29 + $0x330] sm:$0xff] }
  0xf7   :  { %735 = vmatmul.mubr.f32.gmra.mrb[86].mxu0 %v229_v43  ;;  %v164_v43 = vld [vmem:[%s10029_s29 + $0x358] sm:$0xff] }
  0xf8   :  { %739 = vmatprep.mubr.f32.mxu0 %v234_v44  ;;  %v163_v44 = vld [vmem:[%s10029_s29 + $0x350] sm:$0xff] }
  0xfb   :  { %740 = vmatmul.mubr.f32.gmra.mrb[88].mxu0 %v233_v45  ;;  %v168_v45 = vld [vmem:[%s10029_s29 + $0x378] sm:$0xff] }
  0xfc   :  { %744 = vmatprep.mubr.f32.mxu0 %v238_v46  ;;  %v167_v46 = vld [vmem:[%s10029_s29 + $0x370] sm:$0xff] }
  0xff   :  { %745 = vmatmul.mubr.f32.gmra.mrb[90].mxu0 %v237_v47  ;;  %v172_v47 = vld [vmem:[%s10029_s29 + $0x398] sm:$0xff] }
 0x100   :  { %749 = vmatprep.mubr.f32.mxu0 %v242_v48  ;;  %v171_v48 = vld [vmem:[%s10029_s29 + $0x390] sm:$0xff] }
 0x103   :  { %750 = vmatmul.mubr.f32.gmra.mrb[92].mxu0 %v241_v49  ;;  %v176_v49 = vld [vmem:[%s10029_s29 + $0x3b8] sm:$0xff] }
 0x104   :  { %754 = vmatprep.mubr.f32.mxu0 %v246_v50  ;;  %v175_v50 = vld [vmem:[%s10029_s29 + $0x3b0] sm:$0xff] }
 0x107   :  { %755 = vmatmul.mubr.f32.gmra.mrb[94].mxu0 %v245_v51  ;;  %v180_v51 = vld [vmem:[%s10029_s29 + $0x3d8] sm:$0xff] }
 0x108   :  { %759 = vmatprep.mubr.f32.mxu0 %v250_v52  ;;  %v179_v52 = vld [vmem:[%s10029_s29 + $0x3d0] sm:$0xff] }
 0x10b   :  { %760 = vmatmul.mubr.f32.gmra.mrb[96].mxu0 %v249_v53  ;;  %v184_v53 = vld [vmem:[%s10029_s29 + $0x3f8] sm:$0xff] }
 0x10c   :  { %5198 = vmatprep.mubr.msk.f32.mxu0 %vm307_vm0, %v60_v54  ;;  %v183_v54 = vld [vmem:[%s10029_s29 + $0x3f0] sm:$0xff] }
 0x10f   :  { %830 = vmatmul.mubr.f32.vlgmr.msra.gmra.mrb[0].mxu0 %v59_v55  ;;  %v188_v55 = vld [vmem:[%s10029_s29 + $0x418] sm:$0xff] }
 0x110   :  { %5199 = vmatprep.mubr.msk.f32.mxu0 %vm307_vm0, %v64_v56  ;;  %v187_v56 = vld [vmem:[%s10029_s29 + $0x410] sm:$0xff] }
 0x113   :  { %835 = vmatmul.mubr.f32.gmra.mrb[2].mxu0 %v63_v57  ;;  %v192_v57 = vld [vmem:[%s10029_s29 + $0x438] sm:$0xff] }
 0x114   :  { %5200 = vmatprep.mubr.msk.f32.mxu0 %vm307_vm0, %v68_v58  ;;  %v191_v58 = vld [vmem:[%s10029_s29 + $0x430] sm:$0xff] }
 0x117   :  { %840 = vmatmul.mubr.f32.gmra.mrb[4].mxu0 %v67_v59  ;;  %v196_v59 = vld [vmem:[%s10029_s29 + $0x458] sm:$0xff] }
 0x118   :  { %5201 = vmatprep.mubr.msk.f32.mxu0 %vm307_vm0, %v72_v60  ;;  %v195_v60 = vld [vmem:[%s10029_s29 + $0x450] sm:$0xff] }
 0x11b   :  { %845 = vmatmul.mubr.f32.gmra.mrb[6].mxu0 %v71_v61  ;;  %v200_v61 = vld [vmem:[%s10029_s29 + $0x478] sm:$0xff] }
 0x11c   :  { %5202 = vmatprep.mubr.msk.f32.mxu0 %vm307_vm0, %v76_v62  ;;  %v199_v62 = vld [vmem:[%s10029_s29 + $0x470] sm:$0xff] }
 0x11f   :  { %850 = vmatmul.mubr.f32.gmra.mrb[8].mxu0 %v75_v63  ;;  %v204_v63 = vld [vmem:[%s10029_s29 + $0x498] sm:$0xff] }
 0x120   :  { %5203 = vmatprep.mubr.msk.f32.mxu0 %vm307_vm0, %v80_v0  ;;  %v203_v0 = vld [vmem:[%s10029_s29 + $0x490] sm:$0xff] }
 0x123   :  { %855 = vmatmul.mubr.f32.gmra.mrb[10].mxu0 %v79_v1  ;;  %v208_v1 = vld [vmem:[%s10029_s29 + $0x4b8] sm:$0xff] }
 0x124   :  { %5204 = vmatprep.mubr.msk.f32.mxu0 %vm307_vm0, %v84_v2  ;;  %v207_v2 = vld [vmem:[%s10029_s29 + $0x4b0] sm:$0xff] }
 0x127   :  { %860 = vmatmul.mubr.f32.gmra.mrb[12].mxu0 %v83_v4  ;;  %v212_v4 = vld [vmem:[%s10029_s29 + $0x4d8] sm:$0xff] }
 0x128   :  { %5205 = vmatprep.mubr.msk.f32.mxu0 %vm307_vm0, %v88_v5  ;;  %v211_v5 = vld [vmem:[%s10029_s29 + $0x4d0] sm:$0xff] }
 0x12b   :  { %865 = vmatmul.mubr.f32.gmra.mrb[14].mxu0 %v87_v6  ;;  %v216_v6 = vld [vmem:[%s10029_s29 + $0x4f8] sm:$0xff] }
 0x12c   :  { %5206 = vmatprep.mubr.msk.f32.mxu0 %vm307_vm0, %v92_v7  ;;  %v215_v7 = vld [vmem:[%s10029_s29 + $0x4f0] sm:$0xff] }
 0x12f   :  { %870 = vmatmul.mubr.f32.gmra.mrb[16].mxu0 %v91_v8  ;;  %v220_v8 = vld [vmem:[%s10029_s29 + $0x518] sm:$0xff] }
 0x130   :  { %5207 = vmatprep.mubr.msk.f32.mxu0 %vm307_vm0, %v96_v9  ;;  %v219_v9 = vld [vmem:[%s10029_s29 + $0x510] sm:$0xff] }
 0x133   :  { %875 = vmatmul.mubr.f32.gmra.mrb[18].mxu0 %v95_v10  ;;  %v224_v10 = vld [vmem:[%s10029_s29 + $0x538] sm:$0xff] }
 0x134   :  { %5208 = vmatprep.mubr.msk.f32.mxu0 %vm307_vm0, %v100_v11  ;;  %v223_v11 = vld [vmem:[%s10029_s29 + $0x530] sm:$0xff] }
 0x137   :  { %880 = vmatmul.mubr.f32.gmra.mrb[20].mxu0 %v99_v12  ;;  %v228_v12 = vld [vmem:[%s10029_s29 + $0x558] sm:$0xff] }
 0x138   :  { %5209 = vmatprep.mubr.msk.f32.mxu0 %vm307_vm0, %v104_v13  ;;  %v227_v13 = vld [vmem:[%s10029_s29 + $0x550] sm:$0xff] }
 0x13b   :  { %885 = vmatmul.mubr.f32.gmra.mrb[22].mxu0 %v103_v14  ;;  %v232_v14 = vld [vmem:[%s10029_s29 + $0x578] sm:$0xff] }
 0x13c   :  { %5210 = vmatprep.mubr.msk.f32.mxu0 %vm307_vm0, %v108_v15  ;;  %v231_v15 = vld [vmem:[%s10029_s29 + $0x570] sm:$0xff] }
 0x13f   :  { %890 = vmatmul.mubr.f32.gmra.mrb[24].mxu0 %v107_v16  ;;  %v236_v16 = vld [vmem:[%s10029_s29 + $0x598] sm:$0xff] }
 0x140   :  { %5211 = vmatprep.mubr.msk.f32.mxu0 %vm307_vm0, %v112_v17  ;;  %v235_v17 = vld [vmem:[%s10029_s29 + $0x590] sm:$0xff] }
 0x143   :  { %895 = vmatmul.mubr.f32.gmra.mrb[26].mxu0 %v111_v18  ;;  %v240_v18 = vld [vmem:[%s10029_s29 + $0x5b8] sm:$0xff] }
 0x144   :  { %5212 = vmatprep.mubr.msk.f32.mxu0 %vm307_vm0, %v116_v19  ;;  %v239_v19 = vld [vmem:[%s10029_s29 + $0x5b0] sm:$0xff] }
 0x147   :  { %900 = vmatmul.mubr.f32.gmra.mrb[28].mxu0 %v115_v20  ;;  %v244_v20 = vld [vmem:[%s10029_s29 + $0x5d8] sm:$0xff] }
 0x148   :  { %5213 = vmatprep.mubr.msk.f32.mxu0 %vm307_vm0, %v120_v21  ;;  %v243_v21 = vld [vmem:[%s10029_s29 + $0x5d0] sm:$0xff] }
 0x14b   :  { %905 = vmatmul.mubr.f32.gmra.mrb[30].mxu0 %v119_v22  ;;  %v248_v22 = vld [vmem:[%s10029_s29 + $0x5f8] sm:$0xff] }
 0x14c   :  { %5214 = vmatprep.mubr.msk.f32.mxu0 %vm307_vm0, %v124_v23  ;;  %v247_v23 = vld [vmem:[%s10029_s29 + $0x5f0] sm:$0xff] }
 0x14f   :  { %910 = vmatmul.mubr.f32.gmra.mrb[32].mxu0 %v123_v24  ;;  %v252_v24 = vld [vmem:[%s10029_s29 + $0x618] sm:$0xff] }
 0x150   :  { %5215 = vmatprep.mubr.msk.f32.mxu0 %vm307_vm0, %v128_v25  ;;  %v251_v25 = vld [vmem:[%s10029_s29 + $0x610] sm:$0xff] }
 0x153   :  { %915 = vmatmul.mubr.f32.gmra.mrb[34].mxu0 %v127_v26 }
 0x154   :  { %5216 = vmatprep.mubr.msk.f32.mxu0 %vm307_vm0, %v132_v27 }
 0x157   :  { %920 = vmatmul.mubr.f32.gmra.mrb[36].mxu0 %v131_v28 }
 0x158   :  { %5217 = vmatprep.mubr.msk.f32.mxu0 %vm307_vm0, %v136_v29 }
 0x15b   :  { %925 = vmatmul.mubr.f32.gmra.mrb[38].mxu0 %v135_v30 }
 0x15c   :  { %5218 = vmatprep.mubr.msk.f32.mxu0 %vm307_vm0, %v140_v31 }
 0x15f   :  { %930 = vmatmul.mubr.f32.gmra.mrb[40].mxu0 %v139_v32 }
 0x160   :  { %5219 = vmatprep.mubr.msk.f32.mxu0 %vm307_vm0, %v144_v33 }
 0x163   :  { %935 = vmatmul.mubr.f32.gmra.mrb[42].mxu0 %v143_v34 }
 0x164   :  { %5220 = vmatprep.mubr.msk.f32.mxu0 %vm307_vm0, %v148_v35 }
 0x167   :  { %940 = vmatmul.mubr.f32.gmra.mrb[44].mxu0 %v147_v36 }
 0x168   :  { %5221 = vmatprep.mubr.msk.f32.mxu0 %vm307_vm0, %v152_v37 }
 0x16b   :  { %945 = vmatmul.mubr.f32.gmra.mrb[46].mxu0 %v151_v38 }
 0x16c   :  { %5222 = vmatprep.mubr.msk.f32.mxu0 %vm307_vm0, %v156_v39 }
 0x16f   :  { %950 = vmatmul.mubr.f32.gmra.mrb[48].mxu0 %v155_v40 }
 0x170   :  { %5223 = vmatprep.mubr.msk.f32.mxu0 %vm307_vm0, %v160_v41 }
 0x173   :  { %955 = vmatmul.mubr.f32.gmra.mrb[50].mxu0 %v159_v42 }
 0x174   :  { %5224 = vmatprep.mubr.msk.f32.mxu0 %vm307_vm0, %v164_v43 }
 0x177   :  { %960 = vmatmul.mubr.f32.gmra.mrb[52].mxu0 %v163_v44 }
 0x178   :  { %5225 = vmatprep.mubr.msk.f32.mxu0 %vm307_vm0, %v168_v45 }
 0x17b   :  { %965 = vmatmul.mubr.f32.gmra.mrb[54].mxu0 %v167_v46 }
 0x17c   :  { %5226 = vmatprep.mubr.msk.f32.mxu0 %vm307_vm0, %v172_v47 }
 0x17f   :  { %970 = vmatmul.mubr.f32.gmra.mrb[56].mxu0 %v171_v48 }
 0x180   :  { %5227 = vmatprep.mubr.msk.f32.mxu0 %vm307_vm0, %v176_v49 }
 0x183   :  { %975 = vmatmul.mubr.f32.gmra.mrb[58].mxu0 %v175_v50 }
 0x184   :  { %5228 = vmatprep.mubr.msk.f32.mxu0 %vm307_vm0, %v180_v51 }
 0x187   :  { %980 = vmatmul.mubr.f32.gmra.mrb[60].mxu0 %v179_v52 }
 0x188   :  { %5229 = vmatprep.mubr.msk.f32.mxu0 %vm307_vm0, %v184_v53 }
 0x18b   :  { %985 = vmatmul.mubr.f32.gmra.mrb[62].mxu0 %v183_v54 }
 0x18c   :  { %5230 = vmatprep.mubr.msk.f32.mxu0 %vm307_vm0, %v188_v55 }
 0x18f   :  { %990 = vmatmul.mubr.f32.gmra.mrb[64].mxu0 %v187_v56 }
 0x190   :  { %5231 = vmatprep.mubr.msk.f32.mxu0 %vm307_vm0, %v192_v57 }
 0x193   :  { %995 = vmatmul.mubr.f32.gmra.mrb[66].mxu0 %v191_v58 }
 0x194   :  { %5232 = vmatprep.mubr.msk.f32.mxu0 %vm307_vm0, %v196_v59 }
 0x197   :  { %1000 = vmatmul.mubr.f32.gmra.mrb[68].mxu0 %v195_v60 }
 0x198   :  { %5233 = vmatprep.mubr.msk.f32.mxu0 %vm307_vm0, %v200_v61 }
 0x19b   :  { %1005 = vmatmul.mubr.f32.gmra.mrb[70].mxu0 %v199_v62 }
 0x19c   :  { %5234 = vmatprep.mubr.msk.f32.mxu0 %vm307_vm0, %v204_v63 }
 0x19f   :  { %1010 = vmatmul.mubr.f32.gmra.mrb[72].mxu0 %v203_v0 }
 0x1a0   :  { %5235 = vmatprep.mubr.msk.f32.mxu0 %vm307_vm0, %v208_v1 }
 0x1a3   :  { %1015 = vmatmul.mubr.f32.gmra.mrb[74].mxu0 %v207_v2 }
 0x1a4   :  { %5236 = vmatprep.mubr.msk.f32.mxu0 %vm307_vm0, %v212_v4 }
 0x1a7   :  { %1020 = vmatmul.mubr.f32.gmra.mrb[76].mxu0 %v211_v5 }
 0x1a8   :  { %5237 = vmatprep.mubr.msk.f32.mxu0 %vm307_vm0, %v216_v6 }
 0x1ab   :  { %1025 = vmatmul.mubr.f32.gmra.mrb[78].mxu0 %v215_v7 }
 0x1ac   :  { %5238 = vmatprep.mubr.msk.f32.mxu0 %vm307_vm0, %v220_v8 }
 0x1af   :  { %1030 = vmatmul.mubr.f32.gmra.mrb[80].mxu0 %v219_v9 }
 0x1b0   :  { %5239 = vmatprep.mubr.msk.f32.mxu0 %vm307_vm0, %v224_v10 }
 0x1b3   :  { %1035 = vmatmul.mubr.f32.gmra.mrb[82].mxu0 %v223_v11 }
 0x1b4   :  { %5240 = vmatprep.mubr.msk.f32.mxu0 %vm307_vm0, %v228_v12 }
 0x1b7   :  { %1040 = vmatmul.mubr.f32.gmra.mrb[84].mxu0 %v227_v13 }
 0x1b8   :  { %5241 = vmatprep.mubr.msk.f32.mxu0 %vm307_vm0, %v232_v14 }
 0x1bb   :  { %1045 = vmatmul.mubr.f32.gmra.mrb[86].mxu0 %v231_v15 }
 0x1bc   :  { %5242 = vmatprep.mubr.msk.f32.mxu0 %vm307_vm0, %v236_v16 }
 0x1bf   :  { %1050 = vmatmul.mubr.f32.gmra.mrb[88].mxu0 %v235_v17 }
 0x1c0   :  { %5243 = vmatprep.mubr.msk.f32.mxu0 %vm307_vm0, %v240_v18 }
 0x1c3   :  { %1055 = vmatmul.mubr.f32.gmra.mrb[90].mxu0 %v239_v19 }
 0x1c4   :  { %5244 = vmatprep.mubr.msk.f32.mxu0 %vm307_vm0, %v244_v20 }
 0x1c7   :  { %1060 = vmatmul.mubr.f32.gmra.mrb[92].mxu0 %v243_v21 }
 0x1c8   :  { %5245 = vmatprep.mubr.msk.f32.mxu0 %vm307_vm0, %v248_v22 }
 0x1cb   :  { %1065 = vmatmul.mubr.f32.gmra.mrb[94].mxu0 %v247_v23 }
 0x1cc   :  { %5246 = vmatprep.mubr.msk.f32.mxu0 %vm307_vm0, %v252_v24  ;;  %vm4090_vm0 = vcmask 516096  }
 0x1cf   :  { %1070 = vmatmul.mubr.f32.gmra.mrb[96].mxu0 %v251_v25 }
 0x1e2   :  { %v7480_v26 = vpop.f32.mrb[0].mxu0 }
 0x1e3   :  { %v833_v27 = vpop.f32.mrb[1].mxu0  ;;  %v1181_v28 = vmul.f32 %v7480_v26, %v7480_v26  ;;  %v1078_v30 = vsel %vm1077_vm1, %v7480_v26, 0.0 }
 0x1e5   :  { %v1230_v35 = vsel %vm1077_vm1, %v1181_v28, 0.0 }
 0x1e6   :  { %v7484_v29 = vpop.f32.mrb[2].mxu0 }
 0x1e7   :  { %v1079_v31 = vsel %vm1077_vm1, %v7484_v29, 0.0  ;;  %v1182_v32 = vmul.f32 %v7484_v29, %v7484_v29  ;;  %v838_v33 = vpop.f32.mrb[3].mxu0 }
 0x1e8   :  { %v1080_v34 = vadd.f32 %v1079_v31, %v1078_v30 }
 0x1e9   :  { %v1231_v36 = vsel %vm1077_vm1, %v1182_v32, 0.0 }
 0x1ea   :  { %v1232_v37 = vadd.f32 %v1231_v36, %v1230_v35  ;;  %v7494_v38 = vpop.f32.mrb[4].mxu0 }
 0x1eb   :  { %v1081_v39 = vsel %vm1077_vm1, %v7494_v38, 0.0  ;;  %v1183_v40 = vmul.f32 %v7494_v38, %v7494_v38  ;;  %v843_v41 = vpop.f32.mrb[5].mxu0 }
 0x1ec   :  { %v1082_v42 = vadd.f32 %v1081_v39, %v1080_v34 }
 0x1ed   :  { %v1233_v43 = vsel %vm1077_vm1, %v1183_v40, 0.0 }
 0x1ee   :  { %v1234_v44 = vadd.f32 %v1233_v43, %v1232_v37  ;;  %v7501_v45 = vpop.f32.mrb[6].mxu0 }
 0x1ef   :  { %v1083_v46 = vsel %vm1077_vm1, %v7501_v45, 0.0  ;;  %v1184_v47 = vmul.f32 %v7501_v45, %v7501_v45  ;;  %v848_v48 = vpop.f32.mrb[7].mxu0 }
 0x1f0   :  { %v1084_v49 = vadd.f32 %v1083_v46, %v1082_v42 }
 0x1f1   :  { %v1235_v50 = vsel %vm1077_vm1, %v1184_v47, 0.0 }
 0x1f2   :  { %v1236_v51 = vadd.f32 %v1235_v50, %v1234_v44  ;;  %v7508_v52 = vpop.f32.mrb[8].mxu0 }
 0x1f3   :  { %v1085_v53 = vsel %vm1077_vm1, %v7508_v52, 0.0  ;;  %v1185_v54 = vmul.f32 %v7508_v52, %v7508_v52  ;;  %v853_v55 = vpop.f32.mrb[9].mxu0 }
 0x1f4   :  { %v1086_v56 = vadd.f32 %v1085_v53, %v1084_v49 }
 0x1f5   :  { %v1237_v57 = vsel %vm1077_vm1, %v1185_v54, 0.0 }
 0x1f6   :  { %v1238_v58 = vadd.f32 %v1237_v57, %v1236_v51  ;;  %v7515_v59 = vpop.f32.mrb[10].mxu0 }
 0x1f7   :  { %v1087_v60 = vsel %vm1077_vm1, %v7515_v59, 0.0  ;;  %v1186_v61 = vmul.f32 %v7515_v59, %v7515_v59  ;;  %v858_v62 = vpop.f32.mrb[11].mxu0 }
 0x1f8   :  { %v1088_v63 = vadd.f32 %v1087_v60, %v1086_v56 }
 0x1f9   :  { %v1239_v0 = vsel %vm1077_vm1, %v1186_v61, 0.0 }
 0x1fa   :  { %v1240_v1 = vadd.f32 %v1239_v0, %v1238_v58  ;;  %v7522_v2 = vpop.f32.mrb[12].mxu0 }
 0x1fb   :  { %v1089_v4 = vsel %vm1077_vm1, %v7522_v2, 0.0  ;;  %v1187_v5 = vmul.f32 %v7522_v2, %v7522_v2  ;;  %v863_v6 = vpop.f32.mrb[13].mxu0 }
 0x1fc   :  { %v1090_v7 = vadd.f32 %v1089_v4, %v1088_v63 }
 0x1fd   :  { %v1241_v8 = vsel %vm1077_vm1, %v1187_v5, 0.0 }
 0x1fe   :  { %v1242_v9 = vadd.f32 %v1241_v8, %v1240_v1  ;;  %v7529_v10 = vpop.f32.mrb[14].mxu0 }
 0x1ff   :  { %v1091_v11 = vsel %vm1077_vm1, %v7529_v10, 0.0  ;;  %v1188_v12 = vmul.f32 %v7529_v10, %v7529_v10  ;;  %v868_v13 = vpop.f32.mrb[15].mxu0 }
 0x200   :  { %v1092_v14 = vadd.f32 %v1091_v11, %v1090_v7 }
 0x201   :  { %v1243_v15 = vsel %vm1077_vm1, %v1188_v12, 0.0 }
 0x202   :  { %v1244_v16 = vadd.f32 %v1243_v15, %v1242_v9  ;;  %v7536_v17 = vpop.f32.mrb[16].mxu0 }
 0x203   :  { %v1093_v18 = vsel %vm1077_vm1, %v7536_v17, 0.0  ;;  %v1189_v19 = vmul.f32 %v7536_v17, %v7536_v17  ;;  %v873_v20 = vpop.f32.mrb[17].mxu0 }
 0x204   :  { %v1094_v21 = vadd.f32 %v1093_v18, %v1092_v14 }
 0x205   :  { %v1245_v22 = vsel %vm1077_vm1, %v1189_v19, 0.0 }
 0x206   :  { %v1246_v23 = vadd.f32 %v1245_v22, %v1244_v16  ;;  %v7543_v24 = vpop.f32.mrb[18].mxu0 }
 0x207   :  { %v1095_v25 = vsel %vm1077_vm1, %v7543_v24, 0.0  ;;  %v1190_v27 = vmul.f32 %v7543_v24, %v7543_v24  ;;  %v878_v28 = vpop.f32.mrb[19].mxu0 }
 0x208   :  { %v1096_v30 = vadd.f32 %v1095_v25, %v1094_v21 }
 0x209   :  { %v1247_v31 = vsel %vm1077_vm1, %v1190_v27, 0.0 }
 0x20a   :  { %v1248_v32 = vadd.f32 %v1247_v31, %v1246_v23  ;;  %v7550_v33 = vpop.f32.mrb[20].mxu0 }
 0x20b   :  { %v1097_v34 = vsel %vm1077_vm1, %v7550_v33, 0.0  ;;  %v1191_v35 = vmul.f32 %v7550_v33, %v7550_v33  ;;  %v883_v36 = vpop.f32.mrb[21].mxu0 }
 0x20c   :  { %v1098_v37 = vadd.f32 %v1097_v34, %v1096_v30 }
 0x20d   :  { %v1249_v39 = vsel %vm1077_vm1, %v1191_v35, 0.0 }
 0x20e   :  { %v1250_v40 = vadd.f32 %v1249_v39, %v1248_v32  ;;  %v7557_v41 = vpop.f32.mrb[22].mxu0 }
 0x20f   :  { %v1099_v42 = vsel %vm1077_vm1, %v7557_v41, 0.0  ;;  %v1192_v43 = vmul.f32 %v7557_v41, %v7557_v41  ;;  %v888_v44 = vpop.f32.mrb[23].mxu0 }
 0x210   :  { %v1100_v46 = vadd.f32 %v1099_v42, %v1098_v37 }
 0x211   :  { %v1251_v47 = vsel %vm1077_vm1, %v1192_v43, 0.0 }
 0x212   :  { %v1252_v48 = vadd.f32 %v1251_v47, %v1250_v40  ;;  %v7564_v49 = vpop.f32.mrb[24].mxu0 }
 0x213   :  { %v1101_v50 = vsel %vm1077_vm1, %v7564_v49, 0.0  ;;  %v1193_v51 = vmul.f32 %v7564_v49, %v7564_v49  ;;  %v893_v53 = vpop.f32.mrb[25].mxu0 }
 0x214   :  { %v1102_v54 = vadd.f32 %v1101_v50, %v1100_v46 }
 0x215   :  { %v1253_v55 = vsel %vm1077_vm1, %v1193_v51, 0.0 }
 0x216   :  { %v1254_v56 = vadd.f32 %v1253_v55, %v1252_v48  ;;  %v7571_v57 = vpop.f32.mrb[26].mxu0 }
 0x217   :  { %v1103_v58 = vsel %vm1077_vm1, %v7571_v57, 0.0  ;;  %v1194_v60 = vmul.f32 %v7571_v57, %v7571_v57  ;;  %v898_v61 = vpop.f32.mrb[27].mxu0 }
 0x218   :  { %v1104_v62 = vadd.f32 %v1103_v58, %v1102_v54 }
 0x219   :  { %v1255_v63 = vsel %vm1077_vm1, %v1194_v60, 0.0 }
 0x21a   :  { %v1256_v0 = vadd.f32 %v1255_v63, %v1254_v56  ;;  %v7578_v1 = vpop.f32.mrb[28].mxu0 }
 0x21b   :  { %v1105_v4 = vsel %vm1077_vm1, %v7578_v1, 0.0  ;;  %v1195_v5 = vmul.f32 %v7578_v1, %v7578_v1  ;;  %v903_v6 = vpop.f32.mrb[29].mxu0 }
 0x21c   :  { %v1106_v7 = vadd.f32 %v1105_v4, %v1104_v62 }
 0x21d   :  { %v1257_v8 = vsel %vm1077_vm1, %v1195_v5, 0.0 }
 0x21e   :  { %v1258_v9 = vadd.f32 %v1257_v8, %v1256_v0  ;;  %v7585_v11 = vpop.f32.mrb[30].mxu0 }
 0x21f   :  { %v1107_v12 = vsel %vm1077_vm1, %v7585_v11, 0.0  ;;  %v1196_v13 = vmul.f32 %v7585_v11, %v7585_v11  ;;  %v908_v14 = vpop.f32.mrb[31].mxu0 }
 0x220   :  { %v1108_v15 = vadd.f32 %v1107_v12, %v1106_v7 }
 0x221   :  { %v1259_v16 = vsel %vm1077_vm1, %v1196_v13, 0.0 }
 0x222   :  { %v1260_v18 = vadd.f32 %v1259_v16, %v1258_v9  ;;  %v7592_v19 = vpop.f32.mrb[32].mxu0 }
 0x223   :  { %v1109_v20 = vsel %vm1077_vm1, %v7592_v19, 0.0  ;;  %v1197_v21 = vmul.f32 %v7592_v19, %v7592_v19  ;;  %v913_v22 = vpop.f32.mrb[33].mxu0 }
 0x224   :  { %v1110_v23 = vadd.f32 %v1109_v20, %v1108_v15 }
 0x225   :  { %v1261_v25 = vsel %vm1077_vm1, %v1197_v21, 0.0 }
 0x226   :  { %v1262_v27 = vadd.f32 %v1261_v25, %v1260_v18  ;;  %v7599_v28 = vpop.f32.mrb[34].mxu0 }
 0x227   :  { %v1111_v30 = vsel %vm1077_vm1, %v7599_v28, 0.0  ;;  %v1198_v31 = vmul.f32 %v7599_v28, %v7599_v28  ;;  %v918_v32 = vpop.f32.mrb[35].mxu0 }
 0x228   :  { %v1112_v34 = vadd.f32 %v1111_v30, %v1110_v23 }
 0x229   :  { %v1263_v35 = vsel %vm1077_vm1, %v1198_v31, 0.0 }
 0x22a   :  { %v1264_v36 = vadd.f32 %v1263_v35, %v1262_v27  ;;  %v7606_v37 = vpop.f32.mrb[36].mxu0 }
 0x22b   :  { %v1113_v39 = vsel %vm1077_vm1, %v7606_v37, 0.0  ;;  %v1199_v40 = vmul.f32 %v7606_v37, %v7606_v37  ;;  %v923_v42 = vpop.f32.mrb[37].mxu0 }
 0x22c   :  { %v1114_v43 = vadd.f32 %v1113_v39, %v1112_v34 }
 0x22d   :  { %v1265_v44 = vsel %vm1077_vm1, %v1199_v40, 0.0 }
 0x22e   :  { %v1266_v46 = vadd.f32 %v1265_v44, %v1264_v36  ;;  %v7613_v47 = vpop.f32.mrb[38].mxu0 }
 0x22f   :  { %v1115_v48 = vsel %vm1077_vm1, %v7613_v47, 0.0  ;;  %v1200_v50 = vmul.f32 %v7613_v47, %v7613_v47  ;;  %v928_v51 = vpop.f32.mrb[39].mxu0 }
 0x230   :  { %v1116_v53 = vadd.f32 %v1115_v48, %v1114_v43 }
 0x231   :  { %v1267_v54 = vsel %vm1077_vm1, %v1200_v50, 0.0 }
 0x232   :  { %v1268_v55 = vadd.f32 %v1267_v54, %v1266_v46  ;;  %v7620_v56 = vpop.f32.mrb[40].mxu0 }
 0x233   :  { %v1117_v58 = vsel %vm1077_vm1, %v7620_v56, 0.0  ;;  %v1201_v60 = vmul.f32 %v7620_v56, %v7620_v56  ;;  %v933_v61 = vpop.f32.mrb[41].mxu0 }
 0x234   :  { %v1118_v62 = vadd.f32 %v1117_v58, %v1116_v53 }
 0x235   :  { %v1269_v63 = vsel %vm1077_vm1, %v1201_v60, 0.0 }
 0x236   :  { %v1270_v0 = vadd.f32 %v1269_v63, %v1268_v55  ;;  %v7627_v4 = vpop.f32.mrb[42].mxu0 }
 0x237   :  { %v1119_v5 = vsel %vm1077_vm1, %v7627_v4, 0.0  ;;  %v1202_v6 = vmul.f32 %v7627_v4, %v7627_v4  ;;  %v938_v7 = vpop.f32.mrb[43].mxu0 }
 0x238   :  { %v1120_v8 = vadd.f32 %v1119_v5, %v1118_v62 }
 0x239   :  { %v1271_v9 = vsel %vm1077_vm1, %v1202_v6, 0.0 }
 0x23a   :  { %v1272_v12 = vadd.f32 %v1271_v9, %v1270_v0  ;;  %v7634_v13 = vpop.f32.mrb[44].mxu0 }
 0x23b   :  { %v1121_v14 = vsel %vm1077_vm1, %v7634_v13, 0.0  ;;  %v1203_v15 = vmul.f32 %v7634_v13, %v7634_v13  ;;  %v943_v16 = vpop.f32.mrb[45].mxu0 }
 0x23c   :  { %v1122_v18 = vadd.f32 %v1121_v14, %v1120_v8 }
 0x23d   :  { %v1273_v20 = vsel %vm1077_vm1, %v1203_v15, 0.0 }
 0x23e   :  { %v1274_v21 = vadd.f32 %v1273_v20, %v1272_v12  ;;  %v7641_v22 = vpop.f32.mrb[46].mxu0 }
 0x23f   :  { %v1123_v23 = vsel %vm1077_vm1, %v7641_v22, 0.0  ;;  %v1204_v25 = vmul.f32 %v7641_v22, %v7641_v22  ;;  %v948_v27 = vpop.f32.mrb[47].mxu0 }
 0x240   :  { %v1124_v30 = vadd.f32 %v1123_v23, %v1122_v18 }
 0x241   :  { %v1275_v31 = vsel %vm1077_vm1, %v1204_v25, 0.0 }
 0x242   :  { %v1276_v32 = vadd.f32 %v1275_v31, %v1274_v21  ;;  %v7648_v34 = vpop.f32.mrb[48].mxu0 }
 0x243   :  { %v1125_v35 = vsel %vm1077_vm1, %v7648_v34, 0.0  ;;  %v1205_v36 = vmul.f32 %v7648_v34, %v7648_v34  ;;  %v953_v39 = vpop.f32.mrb[49].mxu0 }
 0x244   :  { %v1126_v40 = vadd.f32 %v1125_v35, %v1124_v30 }
 0x245   :  { %v1277_v42 = vsel %vm1077_vm1, %v1205_v36, 0.0 }
 0x246   :  { %v1278_v43 = vadd.f32 %v1277_v42, %v1276_v32  ;;  %v7655_v44 = vpop.f32.mrb[50].mxu0 }
 0x247   :  { %v1127_v46 = vsel %vm1077_vm1, %v7655_v44, 0.0  ;;  %v1206_v48 = vmul.f32 %v7655_v44, %v7655_v44  ;;  %v958_v50 = vpop.f32.mrb[51].mxu0 }
 0x248   :  { %v1128_v51 = vadd.f32 %v1127_v46, %v1126_v40 }
 0x249   :  { %v1279_v53 = vsel %vm1077_vm1, %v1206_v48, 0.0 }
 0x24a   :  { %v1280_v54 = vadd.f32 %v1279_v53, %v1278_v43  ;;  %v7662_v55 = vpop.f32.mrb[52].mxu0 }
 0x24b   :  { %v1129_v58 = vsel %vm1077_vm1, %v7662_v55, 0.0  ;;  %v1207_v60 = vmul.f32 %v7662_v55, %v7662_v55  ;;  %v963_v61 = vpop.f32.mrb[53].mxu0 }
 0x24c   :  { %v1130_v62 = vadd.f32 %v1129_v58, %v1128_v51 }
 0x24d   :  { %v1281_v63 = vsel %vm1077_vm1, %v1207_v60, 0.0 }
 0x24e   :  { %v1282_v0 = vadd.f32 %v1281_v63, %v1280_v54  ;;  %v7669_v5 = vpop.f32.mrb[54].mxu0 }
 0x24f   :  { %v1131_v6 = vsel %vm1077_vm1, %v7669_v5, 0.0  ;;  %v1208_v7 = vmul.f32 %v7669_v5, %v7669_v5  ;;  %v968_v8 = vpop.f32.mrb[55].mxu0 }
 0x250   :  { %v1132_v9 = vadd.f32 %v1131_v6, %v1130_v62 }
 0x251   :  { %v1283_v12 = vsel %vm1077_vm1, %v1208_v7, 0.0 }
 0x252   :  { %v1284_v14 = vadd.f32 %v1283_v12, %v1282_v0  ;;  %v7676_v15 = vpop.f32.mrb[56].mxu0 }
 0x253   :  { %v1133_v16 = vsel %vm1077_vm1, %v7676_v15, 0.0  ;;  %v1209_v18 = vmul.f32 %v7676_v15, %v7676_v15  ;;  %v973_v20 = vpop.f32.mrb[57].mxu0 }
 0x254   :  { %v1134_v21 = vadd.f32 %v1133_v16, %v1132_v9 }
 0x255   :  { %v1285_v23 = vsel %vm1077_vm1, %v1209_v18, 0.0 }
 0x256   :  { %v1286_v25 = vadd.f32 %v1285_v23, %v1284_v14  ;;  %v7683_v27 = vpop.f32.mrb[58].mxu0 }
 0x257   :  { %v1135_v30 = vsel %vm1077_vm1, %v7683_v27, 0.0  ;;  %v1210_v31 = vmul.f32 %v7683_v27, %v7683_v27  ;;  %v978_v32 = vpop.f32.mrb[59].mxu0 }
 0x258   :  { %v1136_v35 = vadd.f32 %v1135_v30, %v1134_v21 }
 0x259   :  { %v1287_v36 = vsel %vm1077_vm1, %v1210_v31, 0.0 }
 0x25a   :  { %v1288_v39 = vadd.f32 %v1287_v36, %v1286_v25  ;;  %v7690_v40 = vpop.f32.mrb[60].mxu0 }
 0x25b   :  { %v1137_v42 = vsel %vm1077_vm1, %v7690_v40, 0.0  ;;  %v1211_v43 = vmul.f32 %v7690_v40, %v7690_v40  ;;  %v983_v46 = vpop.f32.mrb[61].mxu0 }
 0x25c   :  { %v1138_v48 = vadd.f32 %v1137_v42, %v1136_v35 }
 0x25d   :  { %v1289_v50 = vsel %vm1077_vm1, %v1211_v43, 0.0 }
 0x25e   :  { %v1290_v51 = vadd.f32 %v1289_v50, %v1288_v39  ;;  %v7697_v53 = vpop.f32.mrb[62].mxu0 }
 0x25f   :  { %v1139_v54 = vsel %vm1077_vm1, %v7697_v53, 0.0  ;;  %v1212_v58 = vmul.f32 %v7697_v53, %v7697_v53  ;;  %v988_v60 = vpop.f32.mrb[63].mxu0 }
 0x260   :  { %v1140_v61 = vadd.f32 %v1139_v54, %v1138_v48 }
 0x261   :  { %v1291_v62 = vsel %vm1077_vm1, %v1212_v58, 0.0 }
 0x262   :  { %v1292_v63 = vadd.f32 %v1291_v62, %v1290_v51  ;;  %v7704_v0 = vpop.f32.mrb[64].mxu0 }
 0x263   :  { %v1141_v6 = vsel %vm1077_vm1, %v7704_v0, 0.0  ;;  %v1213_v7 = vmul.f32 %v7704_v0, %v7704_v0  ;;  %v993_v8 = vpop.f32.mrb[65].mxu0 }
 0x264   :  { %v1142_v9 = vadd.f32 %v1141_v6, %v1140_v61 }
 0x265   :  { %v1293_v12 = vsel %vm1077_vm1, %v1213_v7, 0.0 }
 0x266   :  { %v1294_v14 = vadd.f32 %v1293_v12, %v1292_v63  ;;  %v7711_v16 = vpop.f32.mrb[66].mxu0 }
 0x267   :  { %v1143_v18 = vsel %vm1077_vm1, %v7711_v16, 0.0  ;;  %v1214_v20 = vmul.f32 %v7711_v16, %v7711_v16  ;;  %v998_v21 = vpop.f32.mrb[67].mxu0 }
 0x268   :  { %v1144_v23 = vadd.f32 %v1143_v18, %v1142_v9 }
 0x269   :  { %v1295_v25 = vsel %vm1077_vm1, %v1214_v20, 0.0 }
 0x26a   :  { %v1296_v30 = vadd.f32 %v1295_v25, %v1294_v14  ;;  %v7718_v31 = vpop.f32.mrb[68].mxu0 }
 0x26b   :  { %v1145_v32 = vsel %vm1077_vm1, %v7718_v31, 0.0  ;;  %v1215_v35 = vmul.f32 %v7718_v31, %v7718_v31  ;;  %v1003_v36 = vpop.f32.mrb[69].mxu0 }
 0x26c   :  { %v1146_v39 = vadd.f32 %v1145_v32, %v1144_v23 }
 0x26d   :  { %v1297_v42 = vsel %vm1077_vm1, %v1215_v35, 0.0 }
 0x26e   :  { %v1298_v43 = vadd.f32 %v1297_v42, %v1296_v30  ;;  %v7725_v46 = vpop.f32.mrb[70].mxu0 }
 0x26f   :  { %v1147_v48 = vsel %vm1077_vm1, %v7725_v46, 0.0  ;;  %v1216_v50 = vmul.f32 %v7725_v46, %v7725_v46  ;;  %v1008_v51 = vpop.f32.mrb[71].mxu0 }
 0x270   :  { %v1148_v54 = vadd.f32 %v1147_v48, %v1146_v39 }
 0x271   :  { %v1299_v58 = vsel %vm1077_vm1, %v1216_v50, 0.0 }
 0x272   :  { %v1300_v60 = vadd.f32 %v1299_v58, %v1298_v43  ;;  %v7732_v61 = vpop.f32.mrb[72].mxu0 }
 0x273   :  { %v1149_v62 = vsel %vm1077_vm1, %v7732_v61, 0.0  ;;  %v1217_v63 = vmul.f32 %v7732_v61, %v7732_v61  ;;  %v1013_v6 = vpop.f32.mrb[73].mxu0 }
 0x274   :  { %v1150_v7 = vadd.f32 %v1149_v62, %v1148_v54 }
 0x275   :  { %v1301_v8 = vsel %vm1077_vm1, %v1217_v63, 0.0 }
 0x276   :  { %v1302_v9 = vadd.f32 %v1301_v8, %v1300_v60  ;;  %v7739_v12 = vpop.f32.mrb[74].mxu0 }
 0x277   :  { %v1151_v14 = vsel %vm1077_vm1, %v7739_v12, 0.0  ;;  %v1218_v18 = vmul.f32 %v7739_v12, %v7739_v12  ;;  %v1018_v20 = vpop.f32.mrb[75].mxu0 }
 0x278   :  { %v1152_v21 = vadd.f32 %v1151_v14, %v1150_v7 }
 0x279   :  { %v1303_v23 = vsel %vm1077_vm1, %v1218_v18, 0.0 }
 0x27a   :  { %v1304_v25 = vadd.f32 %v1303_v23, %v1302_v9  ;;  %v7746_v30 = vpop.f32.mrb[76].mxu0 }
 0x27b   :  { %v1153_v32 = vsel %vm1077_vm1, %v7746_v30, 0.0  ;;  %v1219_v35 = vmul.f32 %v7746_v30, %v7746_v30  ;;  %v1023_v36 = vpop.f32.mrb[77].mxu0 }
 0x27c   :  { %v1154_v39 = vadd.f32 %v1153_v32, %v1152_v21 }
 0x27d   :  { %v1305_v42 = vsel %vm1077_vm1, %v1219_v35, 0.0 }
 0x27e   :  { %v1306_v43 = vadd.f32 %v1305_v42, %v1304_v25  ;;  %v7753_v48 = vpop.f32.mrb[78].mxu0 }
 0x27f   :  { %v1155_v50 = vsel %vm1077_vm1, %v7753_v48, 0.0  ;;  %v1220_v51 = vmul.f32 %v7753_v48, %v7753_v48  ;;  %v1028_v54 = vpop.f32.mrb[79].mxu0 }
 0x280   :  { %v1156_v58 = vadd.f32 %v1155_v50, %v1154_v39 }
 0x281   :  { %v1307_v60 = vsel %vm1077_vm1, %v1220_v51, 0.0 }
 0x282   :  { %v1308_v62 = vadd.f32 %v1307_v60, %v1306_v43  ;;  %v7760_v63 = vpop.f32.mrb[80].mxu0 }
 0x283   :  { %10030 = vst [vmem:[#allocation10_spill] sm:$0xff] %v7760_v63  ;;  %v1157_v6 = vsel %vm1077_vm1, %v7760_v63, 0.0  ;;  %v1221_v7 = vmul.f32 %v7760_v63, %v7760_v63  ;;  %v1033_v8 = vpop.f32.mrb[81].mxu0 }
 0x284   :  { %v1158_v9 = vadd.f32 %v1157_v6, %v1156_v58 }
 0x285   :  { %v1309_v14 = vsel %vm1077_vm1, %v1221_v7, 0.0 }
 0x286   :  { %v1310_v18 = vadd.f32 %v1309_v14, %v1308_v62  ;;  %v7767_v20 = vpop.f32.mrb[82].mxu0 }
 0x287   :  { %10031 = vst [vmem:[#allocation11_spill] sm:$0xff] %v7767_v20  ;;  %v1159_v21 = vsel %vm1077_vm1, %v7767_v20, 0.0  ;;  %v1222_v23 = vmul.f32 %v7767_v20, %v7767_v20  ;;  %v1038_v25 = vpop.f32.mrb[83].mxu0 }
 0x288   :  { %v1160_v32 = vadd.f32 %v1159_v21, %v1158_v9 }
 0x289   :  { %v1311_v35 = vsel %vm1077_vm1, %v1222_v23, 0.0 }
 0x28a   :  { %v1312_v36 = vadd.f32 %v1311_v35, %v1310_v18  ;;  %v7774_v39 = vpop.f32.mrb[84].mxu0 }
 0x28b   :  { %10032 = vst [vmem:[#allocation12_spill] sm:$0xff] %v7774_v39  ;;  %v1161_v42 = vsel %vm1077_vm1, %v7774_v39, 0.0  ;;  %v1223_v43 = vmul.f32 %v7774_v39, %v7774_v39  ;;  %v1043_v50 = vpop.f32.mrb[85].mxu0 }
 0x28c   :  { %v1162_v51 = vadd.f32 %v1161_v42, %v1160_v32 }
 0x28d   :  { %v1313_v54 = vsel %vm1077_vm1, %v1223_v43, 0.0 }
 0x28e   :  { %v1314_v58 = vadd.f32 %v1313_v54, %v1312_v36  ;;  %v7781_v60 = vpop.f32.mrb[86].mxu0 }
 0x28f   :  { %10033 = vst [vmem:[#allocation13_spill] sm:$0xff] %v7781_v60  ;;  %v1163_v62 = vsel %vm1077_vm1, %v7781_v60, 0.0  ;;  %v1224_v6 = vmul.f32 %v7781_v60, %v7781_v60  ;;  %v1048_v7 = vpop.f32.mrb[87].mxu0 }
 0x290   :  { %v1164_v8 = vadd.f32 %v1163_v62, %v1162_v51 }
 0x291   :  { %v1315_v9 = vsel %vm1077_vm1, %v1224_v6, 0.0 }
 0x292   :  { %v1316_v14 = vadd.f32 %v1315_v9, %v1314_v58  ;;  %v7788_v18 = vpop.f32.mrb[88].mxu0 }
 0x293   :  { %10034 = vst [vmem:[#allocation14_spill] sm:$0xff] %v7788_v18  ;;  %v1165_v21 = vsel %vm1077_vm1, %v7788_v18, 0.0  ;;  %v1225_v23 = vmul.f32 %v7788_v18, %v7788_v18  ;;  %v1053_v25 = vpop.f32.mrb[89].mxu0 }
 0x294   :  { %v1166_v32 = vadd.f32 %v1165_v21, %v1164_v8 }
 0x295   :  { %v1317_v35 = vsel %vm1077_vm1, %v1225_v23, 0.0 }
 0x296   :  { %v1318_v36 = vadd.f32 %v1317_v35, %v1316_v14  ;;  %v7795_v42 = vpop.f32.mrb[90].mxu0 }
 0x297   :  { %10035 = vst [vmem:[#allocation15_spill] sm:$0xff] %v7795_v42  ;;  %v1167_v43 = vsel %vm1077_vm1, %v7795_v42, 0.0  ;;  %v1226_v50 = vmul.f32 %v7795_v42, %v7795_v42  ;;  %v1058_v51 = vpop.f32.mrb[91].mxu0 }
 0x298   :  { %v1168_v54 = vadd.f32 %v1167_v43, %v1166_v32 }
 0x299   :  { %v1319_v58 = vsel %vm1077_vm1, %v1226_v50, 0.0 }
 0x29a   :  { %v1320_v62 = vadd.f32 %v1319_v58, %v1318_v36  ;;  %v7802_v6 = vpop.f32.mrb[92].mxu0 }
 0x29b   :  { %10036 = vst [vmem:[#allocation16_spill] sm:$0xff] %v7802_v6  ;;  %v1169_v7 = vsel %vm1077_vm1, %v7802_v6, 0.0  ;;  %v1227_v8 = vmul.f32 %v7802_v6, %v7802_v6  ;;  %v1063_v9 = vpop.f32.mrb[93].mxu0 }
 0x29c   :  { %v1170_v14 = vadd.f32 %v1169_v7, %v1168_v54 }
 0x29d   :  { %v1321_v21 = vsel %vm1077_vm1, %v1227_v8, 0.0 }
 0x29e   :  { %v1322_v23 = vadd.f32 %v1321_v21, %v1320_v62  ;;  %v7809_v25 = vpop.f32.mrb[94].mxu0 }
 0x29f   :  { %10037 = vst [vmem:[#allocation17_spill] sm:$0xff] %v7809_v25  ;;  %v1171_v32 = vsel %vm1077_vm1, %v7809_v25, 0.0  ;;  %v1228_v35 = vmul.f32 %v7809_v25, %v7809_v25  ;;  %v1068_v36 = vpop.f32.mrb[95].mxu0 }
 0x2a0   :  { %v1172_v43 = vadd.f32 %v1171_v32, %v1170_v14 }
 0x2a1   :  { %v1323_v50 = vsel %vm1077_vm1, %v1228_v35, 0.0 }
 0x2a2   :  { %v1324_v51 = vadd.f32 %v1323_v50, %v1322_v23  ;;  %v1071_v58 = vpop.f32.mrb[96].mxu0 }
 0x2a3   :  { %v1173_v9 = vsel %vm1077_vm1, %v1071_v58, 0.0  ;;  %v1229_v54 = vmul.f32 %v1071_v58, %v1071_v58  ;;  %v1073_v7 = vpop.f32.mrb[97].mxu0 }
 0x2a4   :  { %v1174_v8 = vadd.f32 %v1173_v9, %v1172_v43  ;;  %v1343_v9 = vlaneseq }
 0x2a5   :  { %v1325_v62 = vsel %vm1077_vm1, %v1229_v54, 0.0 }
 0x2a6   :  { %v1175_v21 = vrot.slane %v1174_v8, 4  ;;  %v1326_v3 = vadd.f32 %v1325_v62, %v1324_v51  ;;  %v7818_v54 = vshrl.u32 %v1343_v9, 7  ;;  %v10038_v9 = vld [vmem:[#allocation10_spill] sm:$0xff] }
 0x2a8   :  { %v1176_v6 = vadd.f32 %v1175_v21, %v1174_v8  ;;  %v1327_v42 = vrot.slane %v1326_v3, 4 }
 0x2aa   :  { %v1177_v18 = vrot.slane %v1176_v6, 2  ;;  %v1328_v60 = vadd.f32 %v1327_v42, %v1326_v3  ;;  %v1075_v3 = vld [vmem:[%s9998_s2] sm:$0x1]  ;;  %s6556_s2 = smov 32  }
 0x2ac   :  { %v1178_v25 = vadd.f32 %v1177_v18, %v1176_v6  ;;  %v1329_v36 = vrot.slane %v1328_v60, 2  ;;  %v7824_v18 = vsub.s32 0, %v7818_v54  ;;  %v1076_v6 = vld [vmem:[%s9999_s3] sm:$0x1]  ;;  %s6557_s3 = smov 64  }
 0x2ae   :  { %v1179_v14 = vrot.slane %v1178_v25, 1  ;;  %v1330_v32 = vadd.f32 %v1329_v36, %v1328_v60 }
 0x2b0   :  { %v1180_v35 = vadd.f32 %v1179_v14, %v1178_v25  ;;  %v1331_v23 = vrot.slane %v1330_v32, 1 }
 0x2b2   :  { %v1332_v50 = vadd.f32 %v1331_v23, %v1330_v32  ;;  %v1333_v39 = vmul.f32 0.0025510204, %v1180_v35 }
 0x2b4   :  { %v1334_v20 = vmul.f32 0.0025510204, %v1332_v50  ;;  %v1335_v63 = vmul.f32 %v1333_v39, %v1333_v39 }
 0x2b6   :  { %v1336_v7 = vsub.f32 %v1334_v20, %v1335_v63 }
 0x2b8   :  { %v1337_v43 = vadd.f32 1e-05, %v1336_v7 }
 0x2ba   :  { %6525 = vrsqrt.f32 %v1337_v43 }
 0x2c4   :  { %v6526_v60 = vpop.eup %6525 }
 0x2c5   :  { %v1339_v42 = vmul.f32 %v6526_v60, %v1075_v3  ;;  %v10039_v3 = vld [vmem:[#allocation11_spill] sm:$0xff]  ;;  %v10040_v60 = vld [vmem:[#allocation12_spill] sm:$0xff] }
 0x2c7   :  { %v1340_v25 = vmul.f32 %v1339_v42, %v1333_v39  ;;  %v1346_v63 = vrot.slane %v1339_v42, %v7824_v18  ;;  %v10041_v42 = vld [vmem:[#allocation13_spill] sm:$0xff] }
 0x2c9   :  { %v1341_v20 = vsub.f32 %v1076_v6, %v1340_v25  ;;  %v1396_v51 = vmul.f32 %v1346_v63, %v1071_v58  ;;  %v1348_v8 = vmul.f32 %v1346_v63, %v7480_v26  ;;  %v1349_v62 = vmul.f32 %v1346_v63, %v7484_v29  ;;  %v10042_v6 = vld [vmem:[#allocation14_spill] sm:$0xff]  ;;  %v10043_v25 = vld [vmem:[#allocation15_spill] sm:$0xff] }
 0x2ca   :  { %v1350_v21 = vmul.f32 %v1346_v63, %v7494_v38  ;;  %v1351_v36 = vmul.f32 %v1346_v63, %v7501_v45  ;;  %v1352_v14 = vmul.f32 %v1346_v63, %v7508_v52  ;;  %v1353_v32 = vmul.f32 %v1346_v63, %v7515_v59 }
 0x2cb   :  { %v7837_v35 = vrot.slane %v1341_v20, %v7824_v18  ;;  %v1354_v39 = vmul.f32 %v1346_v63, %v7522_v2  ;;  %v1355_v23 = vmul.f32 %v1346_v63, %v7529_v10  ;;  %v1356_v58 = vmul.f32 %v1346_v63, %v7536_v17  ;;  %v10044_v20 = vld [vmem:[#allocation16_spill] sm:$0xff] }
 0x2cc   :  { %v1357_v26 = vmul.f32 %v1346_v63, %v7543_v24  ;;  %v1358_v29 = vmul.f32 %v1346_v63, %v7550_v33  ;;  %v1359_v38 = vmul.f32 %v1346_v63, %v7557_v41  ;;  %v1360_v45 = vmul.f32 %v1346_v63, %v7564_v49 }
 0x2cd   :  { %v1451_v52 = vadd.f32 %v7837_v35, %v1396_v51  ;;  %v1361_v59 = vmul.f32 %v1346_v63, %v7571_v57  ;;  %v1362_v50 = vmul.f32 %v1346_v63, %v7578_v1  ;;  %v1363_v2 = vmul.f32 %v1346_v63, %v7585_v11  ;;  %v10045_v51 = vld [vmem:[#allocation17_spill] sm:$0xff] }
 0x2ce   :  { %v1364_v10 = vmul.f32 %v1346_v63, %v7592_v19  ;;  %v1365_v17 = vmul.f32 %v1346_v63, %v7599_v28  ;;  %v1366_v24 = vmul.f32 %v1346_v63, %v7606_v37  ;;  %v1367_v33 = vmul.f32 %v1346_v63, %v7613_v47 }
 0x2cf   :  { %v1500_v7 = vmax.f32 %v1451_v52, 0.0  ;;  %v1368_v41 = vmul.f32 %v1346_v63, %v7620_v56  ;;  %v1369_v49 = vmul.f32 %v1346_v63, %v7627_v4  ;;  %v1370_v43 = vmul.f32 %v1346_v63, %v7634_v13 }
 0x2d0   :  { %v1371_v57 = vmul.f32 %v1346_v63, %v7641_v22  ;;  %v1372_v1 = vmul.f32 %v1346_v63, %v7648_v34  ;;  %v1373_v11 = vmul.f32 %v1346_v63, %v7655_v44  ;;  %v1374_v19 = vmul.f32 %v1346_v63, %v7662_v55 }
 0x2d1   :  { %1549 = vst.msk [vmem:[#allocation2 + $0x180] sm:$0xff] %vm1077_vm1, %v1500_v7  ;;  %v1375_v28 = vmul.f32 %v1346_v63, %v7669_v5  ;;  %v1376_v37 = vmul.f32 %v1346_v63, %v7676_v15  ;;  %v1377_v47 = vmul.f32 %v1346_v63, %v7683_v27  ;;  %v1378_v56 = vmul.f32 %v1346_v63, %v7690_v40 }
 0x2d2   :  { %v1379_v4 = vmul.f32 %v1346_v63, %v7697_v53  ;;  %v1380_v13 = vmul.f32 %v1346_v63, %v7704_v0  ;;  %v1381_v22 = vmul.f32 %v1346_v63, %v7711_v16  ;;  %v1382_v34 = vmul.f32 %v1346_v63, %v7718_v31 }
 0x2d3   :  { %v1383_v44 = vmul.f32 %v1346_v63, %v7725_v46  ;;  %v1384_v55 = vmul.f32 %v1346_v63, %v7732_v61  ;;  %v1385_v5 = vmul.f32 %v1346_v63, %v7739_v12  ;;  %v1386_v15 = vmul.f32 %v1346_v63, %v7746_v30 }
 0x2d4   :  { %v1387_v27 = vmul.f32 %v1346_v63, %v7753_v48  ;;  %v1388_v40 = vmul.f32 %v1346_v63, %v10038_v9  ;;  %v1389_v53 = vmul.f32 %v1346_v63, %v10039_v3  ;;  %v1390_v0 = vmul.f32 %v1346_v63, %v10040_v60 }
 0x2d5   :  { %v1391_v16 = vmul.f32 %v1346_v63, %v10041_v42  ;;  %v1392_v31 = vmul.f32 %v1346_v63, %v10042_v6  ;;  %v1393_v46 = vmul.f32 %v1346_v63, %v10043_v25  ;;  %v1394_v61 = vmul.f32 %v1346_v63, %v10044_v20 }
 0x2d6   :  { %v1395_v12 = vmul.f32 %v1346_v63, %v10045_v51  ;;  %v1403_v30 = vadd.f32 %v7837_v35, %v1348_v8  ;;  %v7885_v48 = vadd.f32 %v7837_v35, %v1349_v62  ;;  %v7888_v52 = vadd.f32 %v7837_v35, %v1350_v21 }
 0x2d7   :  { %v7891_v7 = vadd.f32 %v7837_v35, %v1351_v36  ;;  %v7894_v9 = vadd.f32 %v7837_v35, %v1352_v14  ;;  %v7897_v3 = vadd.f32 %v7837_v35, %v1353_v32  ;;  %v7900_v60 = vadd.f32 %v7837_v35, %v1354_v39 }
 0x2d8   :  { %v7903_v63 = vadd.f32 %v7837_v35, %v1355_v23  ;;  %v7906_v8 = vadd.f32 %v7837_v35, %v1356_v58  ;;  %v7909_v62 = vadd.f32 %v7837_v35, %v1357_v26  ;;  %v7912_v21 = vadd.f32 %v7837_v35, %v1358_v29 }
 0x2d9   :  { %v7915_v36 = vadd.f32 %v7837_v35, %v1359_v38  ;;  %v7918_v14 = vadd.f32 %v7837_v35, %v1360_v45  ;;  %v7921_v32 = vadd.f32 %v7837_v35, %v1361_v59  ;;  %v7924_v39 = vadd.f32 %v7837_v35, %v1362_v50 }
 0x2da   :  { %v7927_v23 = vadd.f32 %v7837_v35, %v1363_v2  ;;  %v7930_v58 = vadd.f32 %v7837_v35, %v1364_v10  ;;  %v1420_v26 = vadd.f32 %v7837_v35, %v1365_v17  ;;  %v1421_v29 = vadd.f32 %v7837_v35, %v1366_v24 }
 0x2db   :  { %v7935_v38 = vadd.f32 %v7837_v35, %v1367_v33  ;;  %v7938_v45 = vadd.f32 %v7837_v35, %v1368_v41  ;;  %v7941_v59 = vadd.f32 %v7837_v35, %v1369_v49  ;;  %v7944_v50 = vadd.f32 %v7837_v35, %v1370_v43 }
 0x2dc   :  { %v7947_v2 = vadd.f32 %v7837_v35, %v1371_v57  ;;  %v7950_v10 = vadd.f32 %v7837_v35, %v1372_v1  ;;  %v7953_v17 = vadd.f32 %v7837_v35, %v1373_v11  ;;  %v7956_v24 = vadd.f32 %v7837_v35, %v1374_v19 }
 0x2dd   :  { %v7959_v33 = vadd.f32 %v7837_v35, %v1375_v28  ;;  %v7962_v41 = vadd.f32 %v7837_v35, %v1376_v37  ;;  %v7965_v49 = vadd.f32 %v7837_v35, %v1377_v47  ;;  %v7968_v43 = vadd.f32 %v7837_v35, %v1378_v56 }
 0x2de   :  { %v7971_v57 = vadd.f32 %v7837_v35, %v1379_v4  ;;  %v7974_v1 = vadd.f32 %v7837_v35, %v1380_v13  ;;  %v7977_v11 = vadd.f32 %v7837_v35, %v1381_v22  ;;  %v7980_v19 = vadd.f32 %v7837_v35, %v1382_v34 }
 0x2df   :  { %v7983_v28 = vadd.f32 %v7837_v35, %v1383_v44  ;;  %v7986_v37 = vadd.f32 %v7837_v35, %v1384_v55  ;;  %v7989_v47 = vadd.f32 %v7837_v35, %v1385_v5  ;;  %v7992_v56 = vadd.f32 %v7837_v35, %v1386_v15 }
 0x2e0   :  { %v7995_v4 = vadd.f32 %v7837_v35, %v1387_v27  ;;  %v7998_v13 = vadd.f32 %v7837_v35, %v1388_v40  ;;  %v8001_v22 = vadd.f32 %v7837_v35, %v1389_v53  ;;  %v8004_v34 = vadd.f32 %v7837_v35, %v1390_v0 }
 0x2e1   :  { %v8007_v44 = vadd.f32 %v7837_v35, %v1391_v16  ;;  %v8010_v55 = vadd.f32 %v7837_v35, %v1392_v31  ;;  %v8013_v5 = vadd.f32 %v7837_v35, %v1393_v46  ;;  %v8016_v15 = vadd.f32 %v7837_v35, %v1394_v61 }
 0x2e2   :  { %v8019_v27 = vadd.f32 %v7837_v35, %v1395_v12  ;;  %v1469_v40 = vmax.f32 %v1420_v26, 0.0  ;;  %v1470_v53 = vmax.f32 %v1421_v29, 0.0  ;;  %v1452_v42 = vmax.f32 %v1403_v30, 0.0 }
 0x2e3   :  { %v1453_v0 = vmax.f32 %v7885_v48, 0.0  ;;  %v1454_v16 = vmax.f32 %v7888_v52, 0.0  ;;  %v1455_v6 = vmax.f32 %v7891_v7, 0.0  ;;  %v1456_v31 = vmax.f32 %v7894_v9, 0.0 }
 0x2e4   :  { %1518 = vst.msk [vmem:[#allocation2 + $0x88] sm:$0xff] %vm1077_vm1, %v1469_v40  ;;  %1519 = vst.msk [vmem:[#allocation2 + $0x90] sm:$0xff] %vm1077_vm1, %v1470_v53  ;;  %v1457_v25 = vmax.f32 %v7897_v3, 0.0  ;;  %v1458_v35 = vmax.f32 %v7900_v60, 0.0  ;;  %v1459_v46 = vmax.f32 %v7903_v63, 0.0  ;;  %v1460_v20 = vmax.f32 %v7906_v8, 0.0 }
 0x2e5   :  { %1501 = vst.msk [vmem:[#allocation2] sm:$0xff] %vm1077_vm1, %v1452_v42  ;;  %v1461_v61 = vmax.f32 %v7909_v62, 0.0  ;;  %v1462_v51 = vmax.f32 %v7912_v21, 0.0  ;;  %v1463_v12 = vmax.f32 %v7915_v36, 0.0  ;;  %v1464_v30 = vmax.f32 %v7918_v14, 0.0  ;;  %1504 = vst.msk [vmem:[#allocation2 + $0x18] sm:$0xff] %vm1077_vm1, %v1455_v6 }
 0x2e6   :  { %1505 = vst.msk [vmem:[#allocation2 + $0x20] sm:$0xff] %vm1077_vm1, %v1456_v31  ;;  %1502 = vst.msk [vmem:[#allocation2 + $0x8] sm:$0xff] %vm1077_vm1, %v1453_v0  ;;  %v1465_v48 = vmax.f32 %v7921_v32, 0.0  ;;  %v1466_v52 = vmax.f32 %v7924_v39, 0.0  ;;  %v1467_v7 = vmax.f32 %v7927_v23, 0.0  ;;  %v1468_v9 = vmax.f32 %v7930_v58, 0.0 }
 0x2e7   :  { %1503 = vst.msk [vmem:[#allocation2 + $0x10] sm:$0xff] %vm1077_vm1, %v1454_v16  ;;  %1506 = vst.msk [vmem:[#allocation2 + $0x28] sm:$0xff] %vm1077_vm1, %v1457_v25  ;;  %v1471_v3 = vmax.f32 %v7935_v38, 0.0  ;;  %v1472_v60 = vmax.f32 %v7938_v45, 0.0  ;;  %v1473_v63 = vmax.f32 %v7941_v59, 0.0  ;;  %v1474_v8 = vmax.f32 %v7944_v50, 0.0 }
 0x2e8   :  { %1507 = vst.msk [vmem:[#allocation2 + $0x30] sm:$0xff] %vm1077_vm1, %v1458_v35  ;;  %1508 = vst.msk [vmem:[#allocation2 + $0x38] sm:$0xff] %vm1077_vm1, %v1459_v46  ;;  %v1475_v62 = vmax.f32 %v7947_v2, 0.0  ;;  %v1476_v21 = vmax.f32 %v7950_v10, 0.0  ;;  %v1477_v36 = vmax.f32 %v7953_v17, 0.0  ;;  %v1478_v14 = vmax.f32 %v7956_v24, 0.0 }
 0x2e9   :  { %1509 = vst.msk [vmem:[#allocation2 + $0x40] sm:$0xff] %vm1077_vm1, %v1460_v20  ;;  %1510 = vst.msk [vmem:[#allocation2 + $0x48] sm:$0xff] %vm1077_vm1, %v1461_v61  ;;  %v1479_v32 = vmax.f32 %v7959_v33, 0.0  ;;  %v1480_v39 = vmax.f32 %v7962_v41, 0.0  ;;  %v1481_v23 = vmax.f32 %v7965_v49, 0.0  ;;  %v1482_v58 = vmax.f32 %v7968_v43, 0.0 }
 0x2ea   :  { %1511 = vst.msk [vmem:[#allocation2 + $0x50] sm:$0xff] %vm1077_vm1, %v1462_v51  ;;  %1512 = vst.msk [vmem:[#allocation2 + $0x58] sm:$0xff] %vm1077_vm1, %v1463_v12  ;;  %v1483_v26 = vmax.f32 %v7971_v57, 0.0  ;;  %v1484_v29 = vmax.f32 %v7974_v1, 0.0  ;;  %v1485_v38 = vmax.f32 %v7977_v11, 0.0  ;;  %v1486_v45 = vmax.f32 %v7980_v19, 0.0 }
 0x2eb   :  { %1513 = vst.msk [vmem:[#allocation2 + $0x60] sm:$0xff] %vm1077_vm1, %v1464_v30  ;;  %1514 = vst.msk [vmem:[#allocation2 + $0x68] sm:$0xff] %vm1077_vm1, %v1465_v48  ;;  %v1645_v59 = vld [vmem:[#allocation2 + $0x8c] sm:$0xff]  ;;  %v1487_v50 = vmax.f32 %v7983_v28, 0.0  ;;  %v1488_v2 = vmax.f32 %v7986_v37, 0.0  ;;  %v1489_v10 = vmax.f32 %v7989_v47, 0.0 }
 0x2ec   :  { %1515 = vst.msk [vmem:[#allocation2 + $0x70] sm:$0xff] %vm1077_vm1, %v1466_v52  ;;  %1516 = vst.msk [vmem:[#allocation2 + $0x78] sm:$0xff] %vm1077_vm1, %v1467_v7  ;;  %v1490_v17 = vmax.f32 %v7992_v56, 0.0  ;;  %v1550_v24 = vld [vmem:[#allocation2] sm:$0xff]  ;;  %1653 = vrot.lane.b32.xlu0 %v1645_v59, %s6556_s2  ;;  %v1491_v33 = vmax.f32 %v7995_v4, 0.0  ;;  %v1492_v41 = vmax.f32 %v7998_v13, 0.0 }
 0x2ed   :  { %1517 = vst.msk [vmem:[#allocation2 + $0x80] sm:$0xff] %vm1077_vm1, %v1468_v9  ;;  %1520 = vst.msk [vmem:[#allocation2 + $0x98] sm:$0xff] %vm1077_vm1, %v1471_v3  ;;  %v1493_v49 = vmax.f32 %v8001_v22, 0.0  ;;  %v1494_v43 = vmax.f32 %v8004_v34, 0.0  ;;  %v1559_v57 = vld [vmem:[#allocation2 + $0x1c] sm:$0xff]  ;;  %v1551_v1 = vld [vmem:[#allocation2 + $0x8] sm:$0xff] }
 0x2ee   :  { %1521 = vst.msk [vmem:[#allocation2 + $0xa0] sm:$0xff] %vm1077_vm1, %v1472_v60  ;;  %1522 = vst.msk [vmem:[#allocation2 + $0xa8] sm:$0xff] %vm1077_vm1, %v1473_v63  ;;  %v1495_v11 = vmax.f32 %v8007_v44, 0.0  ;;  %v1496_v19 = vmax.f32 %v8010_v55, 0.0  ;;  %v1497_v28 = vmax.f32 %v8013_v5, 0.0  ;;  %v1498_v37 = vmax.f32 %v8016_v15, 0.0  ;;  %1567 = vrot.lane.b32.xlu1 %v1559_v57, %s6556_s2 }
 0x2ef   :  { %1523 = vst.msk [vmem:[#allocation2 + $0xb0] sm:$0xff] %vm1077_vm1, %v1474_v8  ;;  %1524 = vst.msk [vmem:[#allocation2 + $0xb8] sm:$0xff] %vm1077_vm1, %v1475_v62  ;;  %v1499_v47 = vmax.f32 %v8019_v27, 0.0  ;;  %v1585_v13 = vld [vmem:[#allocation2 + $0x38] sm:$0xff]  ;;  %v1552_v16 = vld [vmem:[#allocation2 + $0x10] sm:$0xff] }
 0x2f0   :  { %1525 = vst.msk [vmem:[#allocation2 + $0xc0] sm:$0xff] %vm1077_vm1, %v1476_v21  ;;  %1526 = vst.msk [vmem:[#allocation2 + $0xc8] sm:$0xff] %vm1077_vm1, %v1477_v36  ;;  %v1640_v25 = vld [vmem:[#allocation2 + $0x88] sm:$0xf]  ;;  %v1553_v46 = vld [vmem:[#allocation2 + $0x18] sm:$0xf] }
 0x2f1   :  { %1527 = vst.msk [vmem:[#allocation2 + $0xd0] sm:$0xff] %vm1077_vm1, %v1478_v14  ;;  %1528 = vst.msk [vmem:[#allocation2 + $0xd8] sm:$0xff] %vm1077_vm1, %v1479_v32  ;;  %v1611_v61 = vld [vmem:[#allocation2 + $0x54] sm:$0xff]  ;;  %v1561_v52 = vld [vmem:[#allocation2 + $0x2c] sm:$0xff] }
 0x2f2   :  { %1529 = vst.msk [vmem:[#allocation2 + $0xe0] sm:$0xff] %vm1077_vm1, %v1480_v39  ;;  %1530 = vst.msk [vmem:[#allocation2 + $0xe8] sm:$0xff] %vm1077_vm1, %v1481_v23  ;;  %v1560_v7 = vld [vmem:[#allocation2 + $0x24] sm:$0xff]  ;;  %v1612_v23 = vld [vmem:[#allocation2 + $0x5c] sm:$0xff] }
 0x2f3   :  { %1531 = vst.msk [vmem:[#allocation2 + $0xf0] sm:$0xff] %vm1077_vm1, %v1482_v58  ;;  %1532 = vst.msk [vmem:[#allocation2 + $0xf8] sm:$0xff] %vm1077_vm1, %v1483_v26  ;;  %v1637_v55 = vld [vmem:[#allocation2 + $0x70] sm:$0xff]  ;;  %v1638_v40 = vld [vmem:[#allocation2 + $0x78] sm:$0xff] }
 0x2f4   :  { %1533 = vst.msk [vmem:[#allocation2 + $0x100] sm:$0xff] %vm1077_vm1, %v1484_v29  ;;  %1534 = vst.msk [vmem:[#allocation2 + $0x108] sm:$0xff] %vm1077_vm1, %v1485_v38  ;;  %v1639_v53 = vld [vmem:[#allocation2 + $0x80] sm:$0xff]  ;;  %v1646_v12 = vld [vmem:[#allocation2 + $0x94] sm:$0xff] }
 0x2f5   :  { %1535 = vst.msk [vmem:[#allocation2 + $0x110] sm:$0xff] %vm1077_vm1, %v1486_v45  ;;  %1554 = vst.msk [vmem:[#allocation3] sm:$0xff] %vm1077_vm1, %v1550_v24  ;;  %v1669_v56 = vld [vmem:[#allocation2 + $0xa8] sm:$0xff]  ;;  %v1647_v51 = vld [vmem:[#allocation2 + $0x9c] sm:$0xff] }
 0x2f6   :  { %1536 = vst.msk [vmem:[#allocation2 + $0x118] sm:$0xff] %vm1077_vm1, %v1487_v50  ;;  %1537 = vst.msk [vmem:[#allocation2 + $0x120] sm:$0xff] %vm1077_vm1, %v1488_v2  ;;  %1677 = vrot.lane.b32.xlu1 %v1669_v56, %s6557_s3  ;;  %v1671_v9 = vld [vmem:[#allocation2 + $0xb8] sm:$0xff]  ;;  %v1670_v3 = vld [vmem:[#allocation2 + $0xb0] sm:$0xff] }
 0x2f7   :  { %1538 = vst.msk [vmem:[#allocation2 + $0x128] sm:$0xff] %vm1077_vm1, %v1489_v10  ;;  %1539 = vst.msk [vmem:[#allocation2 + $0x130] sm:$0xff] %vm1077_vm1, %v1490_v17  ;;  %v1693_v44 = vld [vmem:[#allocation2 + $0xc4] sm:$0xff]  ;;  %v1672_v45 = vld [vmem:[#allocation2 + $0xc0] sm:$0xf] }
 0x2f8   :  { %1555 = vst.msk [vmem:[#allocation3 + $0x20] sm:$0xff] %vm1077_vm1, %v1551_v1  ;;  %1540 = vst.msk [vmem:[#allocation2 + $0x138] sm:$0xff] %vm1077_vm1, %v1491_v33  ;;  %v1587_v8 = vld [vmem:[#allocation2 + $0x48] sm:$0xff]  ;;  %v1586_v62 = vld [vmem:[#allocation2 + $0x40] sm:$0xff] }
 0x2f9   :  { %1541 = vst.msk [vmem:[#allocation2 + $0x140] sm:$0xff] %vm1077_vm1, %v1492_v41  ;;  %1542 = vst.msk [vmem:[#allocation2 + $0x148] sm:$0xff] %vm1077_vm1, %v1493_v49  ;;  %v1717_v15 = vld [vmem:[#allocation2 + $0xe0] sm:$0xff]  ;;  %v1718_v42 = vld [vmem:[#allocation2 + $0xe8] sm:$0xff] }
 0x2fa   :  { %1543 = vst.msk [vmem:[#allocation2 + $0x150] sm:$0xff] %vm1077_vm1, %v1494_v43  ;;  %1544 = vst.msk [vmem:[#allocation2 + $0x158] sm:$0xff] %vm1077_vm1, %v1495_v11  ;;  %1593 = vrot.lane.b32.xlu1 %v1585_v13, %s6557_s3  ;;  %v1719_v0 = vld [vmem:[#allocation2 + $0xf0] sm:$0xff]  ;;  %v1720_v35 = vld [vmem:[#allocation2 + $0xf8] sm:$0xf] }
 0x2fb   :  { %1545 = vst.msk [vmem:[#allocation2 + $0x160] sm:$0xff] %vm1077_vm1, %v1496_v19  ;;  %1546 = vst.msk [vmem:[#allocation2 + $0x168] sm:$0xff] %vm1077_vm1, %v1497_v28  ;;  %v1725_v4 = vld [vmem:[#allocation2 + $0xfc] sm:$0xff]  ;;  %v1726_v48 = vld [vmem:[#allocation2 + $0x104] sm:$0xff] }
 0x2fc   :  { %1547 = vst.msk [vmem:[#allocation2 + $0x170] sm:$0xff] %vm1077_vm1, %v1498_v37  ;;  %1548 = vst.msk [vmem:[#allocation2 + $0x178] sm:$0xff] %vm1077_vm1, %v1499_v47  ;;  %1733 = vrot.lane.b32.xlu0 %v1725_v4, %s6556_s2  ;;  %v1727_v30 = vld [vmem:[#allocation2 + $0x10c] sm:$0xff]  ;;  %v1695_v21 = vld [vmem:[#allocation2 + $0xd4] sm:$0xff] }
 0x2fd   :  { %v1749_v22 = vld [vmem:[#allocation2 + $0x118] sm:$0xff]  ;;  %1641 = vst.msk [vmem:[#allocation3 + $0x8] sm:$0xff] %vm1077_vm1, %v1637_v55  ;;  %1721 = vst.msk [vmem:[#allocation3 + $0x10] sm:$0xff] %vm1077_vm1, %v1717_v15  ;;  %v1750_v63 = vld [vmem:[#allocation2 + $0x120] sm:$0xff] }
 0x2fe   :  { %1642 = vst.msk [vmem:[#allocation3 + $0x28] sm:$0xff] %vm1077_vm1, %v1638_v40  ;;  %1643 = vst.msk [vmem:[#allocation3 + $0x48] sm:$0xff] %vm1077_vm1, %v1639_v53  ;;  %v1751_v60 = vld [vmem:[#allocation2 + $0x128] sm:$0xff]  ;;  %v1728_v29 = vld [vmem:[#allocation2 + $0x114] sm:$0xf] }
 0x2ff   :  { %v1773_v34 = vld [vmem:[#allocation2 + $0x134] sm:$0xff]  ;;  %1722 = vst.msk [vmem:[#allocation3 + $0x30] sm:$0xff] %vm1077_vm1, %v1718_v42  ;;  %1723 = vst.msk [vmem:[#allocation3 + $0x50] sm:$0xff] %vm1077_vm1, %v1719_v0  ;;  %v1694_v36 = vld [vmem:[#allocation2 + $0xcc] sm:$0xff] }
 0x300   :  { %1757 = vrot.lane.b32.xlu0 %v1749_v22, %s6557_s3  ;;  %1781 = vrot.lane.b32.xlu1 %v1773_v34, %s6558_s21  ;;  %1556 = vst.msk [vmem:[#allocation3 + $0x40] sm:$0xff] %vm1077_vm1, %v1552_v16  ;;  %v1775_v14 = vld [vmem:[#allocation2 + $0x144] sm:$0xff]  ;;  %v1774_v32 = vld [vmem:[#allocation2 + $0x13c] sm:$0xff]  ;;  %v1562_v59 = vld [vmem:[#allocation2 + $0x34] sm:$0xf] }
 0x301   :  { %v1797_v27 = vld [vmem:[#allocation2 + $0x150] sm:$0xff]  ;;  %v1798_v6 = vld [vmem:[#allocation2 + $0x158] sm:$0xff]  ;;  %1644 = vst.msk [vmem:[#allocation3 + $0x68] sm:$0xf] %vm1557_vm2, %v1640_v25  ;;  %1724 = vst.msk [vmem:[#allocation3 + $0x70] sm:$0xf] %vm1557_vm2, %v1720_v35 }
 0x302   :  { %1801 = vst.msk [vmem:[#allocation3 + $0x18] sm:$0xff] %vm1077_vm1, %v1797_v27  ;;  %v1799_v31 = vld [vmem:[#allocation2 + $0x160] sm:$0xff]  ;;  %1802 = vst.msk [vmem:[#allocation3 + $0x38] sm:$0xff] %vm1077_vm1, %v1798_v6  ;;  %v1800_v20 = vld [vmem:[#allocation2 + $0x168] sm:$0xf] }
 0x303   :  { %v1805_v5 = vld [vmem:[#allocation2 + $0x16c] sm:$0xff]  ;;  %1803 = vst.msk [vmem:[#allocation3 + $0x58] sm:$0xff] %vm1077_vm1, %v1799_v31  ;;  %v1613_v39 = vld [vmem:[#allocation2 + $0x64] sm:$0xff]  ;;  %v1807_v58 = vld [vmem:[#allocation2 + $0x17c] sm:$0xff] }
 0x304   :  { %1701 = vrot.lane.b32.xlu0 %v1693_v44, %s6558_s21  ;;  %1813 = vrot.lane.b32.xlu1 %v1805_v5, %s6556_s2  ;;  %1558 = vst.msk [vmem:[#allocation3 + $0x60] sm:$0xf] %vm1557_vm2, %v1553_v46  ;;  %1804 = vst.msk [vmem:[#allocation3 + $0x78] sm:$0xf] %vm1557_vm2, %v1800_v20  ;;  %v1806_v26 = vld [vmem:[#allocation2 + $0x174] sm:$0xff]  ;;  %v3100_v11 = vld [vmem:[%s10000_s4 + $0x80] sm:$0xff] }
 0x305   :  { %v1648_v38 = vld [vmem:[#allocation2 + $0xa4] sm:$0xf]  ;;  %v1588_v50 = vld [vmem:[#allocation2 + $0x50] sm:$0xf]  ;;  %v1776_v10 = vld [vmem:[#allocation2 + $0x14c] sm:$0xf] }
 0x306   :  { %v1752_v2 = vld [vmem:[#allocation2 + $0x130] sm:$0xf]  ;;  %v1696_v17 = vld [vmem:[#allocation2 + $0xdc] sm:$0xf]  ;;  %v1808_v24 = vld [vmem:[#allocation2 + $0x184] sm:$0xf] }
 0x307   :  { %v1614_v33 = vld [vmem:[#allocation2 + $0x6c] sm:$0xf]  ;;  %v3084_v28 = vld [vmem:[%s10000_s4] sm:$0xff]  ;;  %v3102_v22 = vld [vmem:[%s10000_s4 + $0x90] sm:$0xff]  ;;  %vm4104_vm2 = vcmask 1040896  }
 0x308   :  { %1619 = vrot.lane.b32.xlu0 %v1611_v61, %s6558_s21  ;;  %1657 = vrot.lane.b32.xlu1 %v1647_v51, %s6556_s2  ;;  %v3101_v19 = vld [vmem:[%s10000_s4 + $0x88] sm:$0xff]  ;;  %v3103_v34 = vld [vmem:[%s10000_s4 + $0x98] sm:$0xff] }
 0x309   :  { %v5957_v47 = vpack.c.bf16 %v3101_v19, %v3100_v11  ;;  %v3085_v56 = vld [vmem:[%s10000_s4 + $0x8] sm:$0xff]  ;;  %v3086_v44 = vld [vmem:[%s10000_s4 + $0x10] sm:$0xff]  ;;  %v5961_v5 = vpack.c.bf16 %v3103_v34, %v3102_v22  ;;  %v3087_v15 = vld [vmem:[%s10000_s4 + $0x18] sm:$0xff] }
 0x30a   :  { %v5959_v13 = vpack.c.bf16 %v3085_v56, %v3084_v28  ;;  %v5963_v40 = vpack.c.bf16 %v3087_v15, %v3086_v44  ;;  %v3104_v53 = vld [vmem:[%s10000_s4 + $0xa0] sm:$0xff]  ;;  %v3105_v42 = vld [vmem:[%s10000_s4 + $0xa8] sm:$0xff]  ;;  %v3107_v19 = vld [vmem:[%s10000_s4 + $0xb8] sm:$0xff] }
 0x30b   :  { %5958 = vmatprep.subr.bf16.mxu1 %v5957_v47  ;;  %v3088_v0 = vld [vmem:[%s10000_s4 + $0x20] sm:$0xff]  ;;  %v5965_v6 = vpack.c.bf16 %v3105_v42, %v3104_v53  ;;  %v3089_v31 = vld [vmem:[%s10000_s4 + $0x28] sm:$0xff]  ;;  %v3091_v15 = vld [vmem:[%s10000_s4 + $0x38] sm:$0xff] }
 0x30c   :  { %1655 = vrot.lane.b32.xlu0 %v1646_v12, %s6556_s2  ;;  %1737 = vrot.lane.b32.xlu1 %v1727_v30, %s6556_s2  ;;  %v5967_v20 = vpack.c.bf16 %v3089_v31, %v3088_v0  ;;  %v3109_v42 = vld [vmem:[%s10000_s4 + $0xc8] sm:$0xff]  ;;  %v3092_v0 = vld [vmem:[%s10000_s4 + $0x40] sm:$0xff] }
 0x30d   :  { %5960 = vmatpush3.bf16.msra.mxu1 %v5959_v13 }
 0x30e   :  { %5962 = vmatprep.subr.bf16.mxu1 %v5961_v5  ;;  %v3090_v5 = vld [vmem:[%s10000_s4 + $0x30] sm:$0xff] }
 0x30f   :  { %v5971_v53 = vpack.c.bf16 %v3091_v15, %v3090_v5 }
 0x310   :  { %1735 = vrot.lane.b32.xlu0 %v1726_v48, %s6556_s2  ;;  %1571 = vrot.lane.b32.xlu1 %v1561_v52, %s6556_s2 }
 0x311   :  { %5964 = vmatpush3.bf16.msra.mxu1 %v5963_v40 }
 0x312   :  { %5966 = vmatprep.subr.bf16.mxu1 %v5965_v6 }
 0x314   :  { %1569 = vrot.lane.b32.xlu0 %v1560_v7, %s6556_s2  ;;  %1681 = vrot.lane.b32.xlu1 %v1671_v9, %s6557_s3 }
 0x315   :  { %5968 = vmatpush3.bf16.msra.mxu1 %v5967_v20 }
 0x318   :  { %1679 = vrot.lane.b32.xlu0 %v1670_v3, %s6557_s3  ;;  %1761 = vrot.lane.b32.xlu1 %v1751_v60, %s6557_s3 }
 0x31c   :  { %1759 = vrot.lane.b32.xlu0 %v1750_v63, %s6557_s3  ;;  %1597 = vrot.lane.b32.xlu1 %v1587_v8, %s6557_s3 }
 0x320   :  { %1595 = vrot.lane.b32.xlu0 %v1586_v62, %s6557_s3  ;;  %1705 = vrot.lane.b32.xlu1 %v1695_v21, %s6558_s21 }
 0x324   :  { %1703 = vrot.lane.b32.xlu0 %v1694_v36, %s6558_s21  ;;  %1785 = vrot.lane.b32.xlu1 %v1775_v14, %s6558_s21 }
 0x328   :  { %1783 = vrot.lane.b32.xlu0 %v1774_v32, %s6558_s21  ;;  %1623 = vrot.lane.b32.xlu1 %v1613_v39, %s6558_s21 }
 0x32c   :  { %1621 = vrot.lane.b32.xlu0 %v1612_v23, %s6558_s21  ;;  %1817 = vrot.lane.b32.xlu1 %v1807_v58, %s6556_s2 }
 0x330   :  { %1815 = vrot.lane.b32.xlu0 %v1806_v26, %s6556_s2  ;;  %1739 = vrot.lane.b32.xlu1 %v1728_v29, %s6556_s2 }
 0x334   :  { %1659 = vrot.lane.b32.xlu0 %v1648_v38, %s6556_s2  ;;  %1683 = vrot.lane.b32.xlu1 %v1672_v45, %s6557_s3 }
 0x338   :  { %1573 = vrot.lane.b32.xlu0 %v1562_v59, %s6556_s2  ;;  %1599 = vrot.lane.b32.xlu1 %v1588_v50, %s6557_s3 }
 0x33c   :  { %1763 = vrot.lane.b32.xlu0 %v1752_v2, %s6557_s3  ;;  %1787 = vrot.lane.b32.xlu1 %v1776_v10, %s6558_s21 }
 0x340   :  { %1707 = vrot.lane.b32.xlu0 %v1696_v17, %s6558_s21  ;;  %1819 = vrot.lane.b32.xlu1 %v1808_v24, %s6556_s2 }
 0x344   :  { %1625 = vrot.lane.b32.xlu0 %v1614_v33, %s6558_s21 }
 0x35e   :  { %v1654_v41 = vpop.permute.xlu0 %1653 }
 0x35f   :  { %1665 = vst.msk [vmem:[#allocation3 + $0x8] sm:$0xff] %vm1579_vm3, %v1654_v41 }
 0x360   :  { %v1568_v49 = vpop.permute.xlu1 %1567 }
 0x361   :  { %1580 = vst.msk [vmem:[#allocation3] sm:$0xff] %vm1579_vm3, %v1568_v49 }
 0x368   :  { %v1678_v43 = vpop.permute.xlu1 %1677 }
 0x369   :  { %1689 = vst.msk [vmem:[#allocation3 + $0x8] sm:$0xff] %vm1605_vm4, %v1678_v43 }
 0x36c   :  { %v1594_v1 = vpop.permute.xlu1 %1593 }
 0x36d   :  { %1606 = vst.msk [vmem:[#allocation3] sm:$0xff] %vm1605_vm4, %v1594_v1  ;;  %v3106_v1 = vld [vmem:[%s10000_s4 + $0xb0] sm:$0xff] }
 0x36e   :  { %v1734_v57 = vpop.permute.xlu0 %1733  ;;  %v5969_v56 = vpack.c.bf16 %v3107_v19, %v3106_v1 }
 0x36f   :  { %1745 = vst.msk [vmem:[#allocation3 + $0x10] sm:$0xff] %vm1579_vm3, %v1734_v57 }
 0x370   :  { %5970 = vmatprep.subr.bf16.mxu1 %v5969_v56 }
 0x371   :  { %5972 = vmatpush3.bf16.msra.mxu1 %v5971_v53 }
 0x372   :  { %v1758_v37 = vpop.permute.xlu0 %1757  ;;  %v1782_v4 = vpop.permute.xlu1 %1781 }
 0x373   :  { %1769 = vst.msk [vmem:[#allocation3 + $0x10] sm:$0xff] %vm1605_vm4, %v1758_v37 }
 0x374   :  { %1793 = vst.msk [vmem:[#allocation3 + $0x10] sm:$0xff] %vm1631_vm5, %v1782_v4 }
 0x376   :  { %v1702_v55 = vpop.permute.xlu0 %1701  ;;  %v1814_v27 = vpop.permute.xlu1 %1813 }
 0x377   :  { %1713 = vst.msk [vmem:[#allocation3 + $0x8] sm:$0xff] %vm1631_vm5, %v1702_v55 }
 0x378   :  { %1825 = vst.msk [vmem:[#allocation3 + $0x18] sm:$0xff] %vm1579_vm3, %v1814_v27  ;;  %v3108_v27 = vld [vmem:[%s10000_s4 + $0xc0] sm:$0xff] }
 0x379   :  { %v5973_v31 = vpack.c.bf16 %v3109_v42, %v3108_v27 }
 0x37a   :  { %v1620_v16 = vpop.permute.xlu0 %1619  ;;  %v1658_v46 = vpop.permute.xlu1 %1657 }
 0x37b   :  { %v1856_v25 = vld [vmem:[#allocation3 + $0x10] sm:$0xf]  ;;  %1632 = vst.msk [vmem:[#allocation3] sm:$0xff] %vm1631_vm5, %v1620_v16  ;;  %v3093_v16 = vld [vmem:[%s10000_s4 + $0x48] sm:$0xff]  ;;  %5974 = vmatprep.subr.bf16.mxu1 %v5973_v31 }
 0x37c   :  { %v2224_v35 = vld [vmem:[#allocation3 + $0x10] sm:$0x1e]  ;;  %1858 = vst [vmem:[#allocation4 + $0x88] sm:$0xf] %v1856_v25  ;;  %1667 = vst.msk [vmem:[#allocation3 + $0x48] sm:$0xff] %vm1579_vm3, %v1658_v46  ;;  %v3110_v25 = vld [vmem:[%s10000_s4 + $0xd0] sm:$0xff]  ;;  %v5975_v46 = vpack.c.bf16 %v3093_v16, %v3092_v0 }
 0x37d   :  { %v2228_v61 = vrot.slane %v2224_v35, 1  ;;  %v2540_v51 = vld [vmem:[#allocation3 + $0x10] sm:$0x3c] }
 0x37e   :  { %v2816_v12 = vld [vmem:[#allocation3 + $0x10] sm:$0x78]  ;;  %v2544_v30 = vrot.slane %v2540_v51, 2  ;;  %v1855_v52 = vld [vmem:[#allocation3 + $0x8] sm:$0xf]  ;;  %v1656_v7 = vpop.permute.xlu0 %1655  ;;  %v1738_v63 = vpop.permute.xlu1 %1737  ;;  %5976 = vmatpush3.bf16.msra.mxu1 %v5975_v46 }
 0x37f   :  { %v2820_v48 = vrot.slane %v2816_v12, 3  ;;  %2232 = vst [vmem:[#allocation4 + $0xa8] sm:$0xf] %v2228_v61  ;;  %v2193_v9 = vld [vmem:[#allocation3 + $0x8] sm:$0x1e]  ;;  %1666 = vst.msk [vmem:[#allocation3 + $0x28] sm:$0xff] %vm1579_vm3, %v1656_v7 }
 0x380   :  { %v2223_v3 = vld [vmem:[#allocation3 + $0x8] sm:$0x1e]  ;;  %1857 = vst [vmem:[#allocation4 + $0x80] sm:$0xf] %v1855_v52  ;;  %2548 = vst [vmem:[#allocation4 + $0xc8] sm:$0xf] %v2544_v30 }
 0x381   :  { %2824 = vst [vmem:[#allocation4 + $0xe8] sm:$0xf] %v2820_v48  ;;  %v1835_v60 = vld [vmem:[#allocation3 + $0x10] sm:$0xf]  ;;  %v2197_v8 = vrot.slane %v2193_v9, 1  ;;  %v2227_v62 = vrot.slane %v2223_v3, 1 }
 0x382   :  { %v2509_v21 = vld [vmem:[#allocation3 + $0x8] sm:$0x3c]  ;;  %1747 = vst.msk [vmem:[#allocation3 + $0x50] sm:$0xff] %vm1579_vm3, %v1738_v63  ;;  %v1829_v29 = vld [vmem:[#allocation3] sm:$0xf]  ;;  %v1736_v38 = vpop.permute.xlu0 %1735  ;;  %v1841_v2 = vrot.slane %v1835_v60, 4  ;;  %v1572_v10 = vpop.permute.xlu1 %1571 }
 0x383   :  { %v2539_v36 = vld [vmem:[#allocation3 + $0x8] sm:$0x3c]  ;;  %v2513_v14 = vrot.slane %v2509_v21, 2  ;;  %2201 = vst [vmem:[#allocation4 + $0x28] sm:$0xf] %v2197_v8  ;;  %1746 = vst.msk [vmem:[#allocation3 + $0x30] sm:$0xff] %vm1579_vm3, %v1736_v38 }
 0x384   :  { %v2543_v32 = vrot.slane %v2539_v36, 2  ;;  %v2785_v39 = vld [vmem:[#allocation3 + $0x8] sm:$0x78]  ;;  %2231 = vst [vmem:[#allocation4 + $0xa0] sm:$0xf] %v2227_v62  ;;  %1582 = vst.msk [vmem:[#allocation3 + $0x40] sm:$0xff] %vm1579_vm3, %v1572_v10  ;;  %1846 = vrot.lane.b32.xlu1 %v1841_v2, %s6557_s3 }
 0x385   :  { %v2815_v23 = vld [vmem:[#allocation3 + $0x8] sm:$0x78]  ;;  %v2789_v58 = vrot.slane %v2785_v39, 3  ;;  %v1860_v45 = vld [vmem:[#allocation3 + $0x10] sm:$0xf]  ;;  %v3112_v30 = vld [vmem:[%s10000_s4 + $0xe0] sm:$0xff] }
 0x386   :  { %v2819_v26 = vrot.slane %v2815_v23, 3  ;;  %2517 = vst [vmem:[#allocation4 + $0x48] sm:$0xf] %v2513_v14  ;;  %2547 = vst [vmem:[#allocation4 + $0xc0] sm:$0xf] %v2543_v32  ;;  %v1570_v11 = vpop.permute.xlu0 %1569  ;;  %v1866_v28 = vrot.slane %v1860_v45, 4  ;;  %v1682_v47 = vpop.permute.xlu1 %1681 }
 0x387   :  { %v2192_v59 = vld [vmem:[#allocation3] sm:$0x1e]  ;;  %1831 = vst [vmem:[#allocation4] sm:$0xf] %v1829_v29  ;;  %2793 = vst [vmem:[#allocation4 + $0x68] sm:$0xf] %v2789_v58 }
 0x388   :  { %v2508_v50 = vld [vmem:[#allocation3] sm:$0x3c]  ;;  %2823 = vst [vmem:[#allocation4 + $0xe0] sm:$0xf] %v2819_v26  ;;  %v2196_v17 = vrot.slane %v2192_v59, 1  ;;  %1581 = vst.msk [vmem:[#allocation3 + $0x20] sm:$0xff] %vm1579_vm3, %v1570_v11  ;;  %1870 = vrot.lane.b32.xlu1 %v1866_v28, %s6557_s3 }
 0x389   :  { %v2512_v24 = vrot.slane %v2508_v50, 2  ;;  %v2784_v33 = vld [vmem:[#allocation3] sm:$0x78]  ;;  %v1834_v41 = vld [vmem:[#allocation3 + $0x8] sm:$0xf]  ;;  %1691 = vst.msk [vmem:[#allocation3 + $0x48] sm:$0xff] %vm1605_vm4, %v1682_v47 }
 0x38a   :  { %v2788_v49 = vrot.slane %v2784_v33, 3  ;;  %v1840_v43 = vrot.slane %v1834_v41, 4  ;;  %v1833_v57 = vld [vmem:[#allocation3] sm:$0xf]  ;;  %2200 = vst [vmem:[#allocation4 + $0x20] sm:$0xf] %v2196_v17  ;;  %v1680_v22 = vpop.permute.xlu0 %1679  ;;  %v1762_v44 = vpop.permute.xlu1 %1761 }
 0x38b   :  { %2516 = vst [vmem:[#allocation4 + $0x40] sm:$0xf] %v2512_v24  ;;  %v1839_v37 = vrot.slane %v1833_v57, 4  ;;  %v1859_v4 = vld [vmem:[#allocation3 + $0x8] sm:$0xf]  ;;  %1690 = vst.msk [vmem:[#allocation3 + $0x28] sm:$0xff] %vm1605_vm4, %v1680_v22 }
 0x38c   :  { %2792 = vst [vmem:[#allocation4 + $0x60] sm:$0xf] %v2788_v49  ;;  %1844 = vrot.lane.b32.xlu0 %v1840_v43, %s6557_s3  ;;  %v1861_v13 = vld [vmem:[#allocation3 + $0x18] sm:$0xf]  ;;  %v1865_v34 = vrot.slane %v1859_v4, 4  ;;  %1771 = vst.msk [vmem:[#allocation3 + $0x50] sm:$0xff] %vm1605_vm4, %v1762_v44 }
 0x38d   :  { %v1867_v55 = vrot.slane %v1861_v13, 4  ;;  %v3111_v35 = vld [vmem:[%s10000_s4 + $0xd8] sm:$0xff]  ;;  %v3094_v61 = vld [vmem:[%s10000_s4 + $0x50] sm:$0xff]  ;;  %v3113_v48 = vld [vmem:[%s10000_s4 + $0xe8] sm:$0xff] }
 0x38e   :  { %1868 = vrot.lane.b32.xlu1 %v1865_v34, %s6557_s3  ;;  %v1760_v40 = vpop.permute.xlu0 %1759  ;;  %v1598_v6 = vpop.permute.xlu1 %1597  ;;  %v5977_v20 = vpack.c.bf16 %v3111_v35, %v3110_v25  ;;  %v3095_v51 = vld [vmem:[%s10000_s4 + $0x58] sm:$0xff]  ;;  %v1830_v52 = vld [vmem:[#allocation3 + $0x8] sm:$0xf]  ;;  %v5981_v3 = vpack.c.bf16 %v3113_v48, %v3112_v30  ;;  %v3096_v60 = vld [vmem:[%s10000_s4 + $0x60] sm:$0xff] }
 0x38f   :  { %1770 = vst.msk [vmem:[#allocation3 + $0x30] sm:$0xff] %vm1605_vm4, %v1760_v40  ;;  %1608 = vst.msk [vmem:[#allocation3 + $0x40] sm:$0xff] %vm1605_vm4, %v1598_v6  ;;  %v5979_v9 = vpack.c.bf16 %v3095_v51, %v3094_v61  ;;  %v3097_v63 = vld [vmem:[%s10000_s4 + $0x68] sm:$0xff]  ;;  %v3114_v62 = vld [vmem:[%s10000_s4 + $0xf0] sm:$0xff] }
 0x390   :  { %1842 = vrot.lane.b32.xlu0 %v1839_v37, %s6557_s3  ;;  %1832 = vst [vmem:[#allocation4 + $0x8] sm:$0xf] %v1830_v52  ;;  %5978 = vmatprep.subr.bf16.mxu1 %v5977_v20  ;;  %v3115_v21 = vld [vmem:[%s10000_s4 + $0xf8] sm:$0xff]  ;;  %v1985_v14 = vld [vmem:[#allocation3 + $0x8] sm:$0x80]  ;;  %v5983_v32 = vpack.c.bf16 %v3097_v63, %v3096_v60 }
 0x391   :  { %5980 = vmatpush3.bf16.msra.mxu1 %v5979_v9  ;;  %v2037_v39 = vld [vmem:[#allocation3 + $0x8] sm:$0x80]  ;;  %v5985_v23 = vpack.c.bf16 %v3115_v21, %v3114_v62  ;;  %v3099_v26 = vld [vmem:[%s10000_s4 + $0x78] sm:$0xff]  ;;  %v1996_v50 = vrot.slane %v1985_v14, 7  ;;  %v8309_v60 = vld [vmem:[#allocation3] sm:$0x80] }
 0x392   :  { %v1596_v12 = vpop.permute.xlu0 %1595  ;;  %v1706_v7 = vpop.permute.xlu1 %1705  ;;  %5982 = vmatprep.subr.bf16.mxu1 %v5981_v3  ;;  %v3098_v58 = vld [vmem:[%s10000_s4 + $0x70] sm:$0xff]  ;;  %v2045_v2 = vrot.slane %v2037_v39, 7  ;;  %v8312_v21 = vld [vmem:[#allocation3 + $0x10] sm:$0x80] }
 0x393   :  { %1607 = vst.msk [vmem:[#allocation3 + $0x20] sm:$0xff] %vm1605_vm4, %v1596_v12  ;;  %v5987_v10 = vpack.c.bf16 %v3099_v26, %v3098_v58 }
 0x394   :  { %1872 = vrot.lane.b32.xlu0 %v1867_v55, %s6557_s3  ;;  %1715 = vst.msk [vmem:[#allocation3 + $0x48] sm:$0xff] %vm1631_vm5, %v1706_v7  ;;  %v2038_v7 = vld [vmem:[#allocation3 + $0x10] sm:$0x80] }
 0x395   :  { %5984 = vmatpush3.bf16.msra.mxu1 %v5983_v32  ;;  %v2048_v26 = vrot.slane %v2038_v7, 7  ;;  %v3133_v7 = vld [vmem:[%s10000_s4 + $0x188] sm:$0xff] }
 0x396   :  { %v1704_v8 = vpop.permute.xlu0 %1703  ;;  %v1786_v36 = vpop.permute.xlu1 %1785  ;;  %5986 = vmatprep.subr.bf16.mxu1 %v5985_v23 }
 0x397   :  { %1714 = vst.msk [vmem:[#allocation3 + $0x28] sm:$0xff] %vm1631_vm5, %v1704_v8  ;;  %1795 = vst.msk [vmem:[#allocation3 + $0x50] sm:$0xff] %vm1631_vm5, %v1786_v36 }
 0x399   :  { %5988 = vmatpush3.bf16.msra.mxu1 %v5987_v10 }
 0x39a   :  { %v1784_v29 = vpop.permute.xlu0 %1783  ;;  %v1624_v59 = vpop.permute.xlu1 %1623 }
 0x39b   :  { %v1883_v38 = vld [vmem:[#allocation3 + $0x48] sm:$0x3]  ;;  %1794 = vst.msk [vmem:[#allocation3 + $0x30] sm:$0xff] %vm1631_vm5, %v1784_v29  ;;  %1634 = vst.msk [vmem:[#allocation3 + $0x40] sm:$0xff] %vm1631_vm5, %v1624_v59  ;;  %v8314_v36 = vld [vmem:[#allocation3 + $0x48] sm:$0xe0] }
 0x39c   :  { %v1935_v45 = vld [vmem:[#allocation3 + $0x48] sm:$0x3]  ;;  %v1893_v17 = vrot.slane %v1883_v38, 6  ;;  %v8316_v14 = vld [vmem:[#allocation3 + $0x48] sm:$0xe0] }
 0x39d   :  { %v1942_v24 = vrot.slane %v1935_v45, 6  ;;  %v2257_v33 = vld [vmem:[#allocation3 + $0x48] sm:$0x7]  ;;  %v8318_v32 = vld [vmem:[#allocation3 + $0x48] sm:$0xc0] }
 0x39e   :  { %v2307_v41 = vld [vmem:[#allocation3 + $0x48] sm:$0x7]  ;;  %v1881_v49 = vld [vmem:[#allocation3 + $0x28] sm:$0xc0]  ;;  %v1622_v1 = vpop.permute.xlu0 %1621  ;;  %v2266_v47 = vrot.slane %v2257_v33, 7  ;;  %v1818_v56 = vpop.permute.xlu1 %1817 }
 0x39f   :  { %v1933_v43 = vld [vmem:[#allocation3 + $0x28] sm:$0xc0]  ;;  %v1987_v57 = vld [vmem:[#allocation3 + $0x28] sm:$0x7]  ;;  %v1892_v11 = vrot.slane %v1881_v49, 6  ;;  %1633 = vst.msk [vmem:[#allocation3 + $0x20] sm:$0xff] %vm1631_vm5, %v1622_v1 }
 0x3a0   :  { %v1941_v19 = vrot.slane %v1933_v43, 6  ;;  %v1997_v28 = vrot.slane %v1987_v57, 7  ;;  %v2039_v37 = vld [vmem:[#allocation3 + $0x28] sm:$0x7]  ;;  %v2255_v13 = vld [vmem:[#allocation3 + $0x28] sm:$0x80] }
 0x3a1   :  { %v2046_v4 = vrot.slane %v2039_v37, 7  ;;  %v2305_v22 = vld [vmem:[#allocation3 + $0x28] sm:$0x80]  ;;  %v2314_v34 = vrot.slane %v2307_v41, 7  ;;  %1827 = vst.msk [vmem:[#allocation3 + $0x58] sm:$0xff] %vm1579_vm3, %v1818_v56  ;;  %v2265_v44 = vrot.slane %v2255_v13, 7  ;;  %v1894_v27 = vsel %vm1888_vm7, %v1892_v11, %v1893_v17 }
 0x3a2   :  { %v2313_v55 = vrot.slane %v2305_v22, 7  ;;  %v2357_v5 = vld [vmem:[#allocation3 + $0x28] sm:$0xf]  ;;  %v1943_v40 = vsel %vm1888_vm7, %v1941_v19, %v1942_v24  ;;  %v1816_v16 = vpop.permute.xlu0 %1815  ;;  %1898 = vst [vmem:[#allocation4 + $0x108] sm:$0xf] %v1894_v27  ;;  %v1998_v6 = vsel %vm1992_vm8, %v1996_v50, %v1997_v28  ;;  %v1740_v61 = vpop.permute.xlu1 %1739  ;;  %v1993_v1 = vrot.slane %v8309_v60, 7 }
 0x3a3   :  { %v2381_v15 = vld [vmem:[#allocation3 + $0x28] sm:$0xf]  ;;  %2359 = vst [vmem:[#allocation4 + $0x38] sm:$0xf] %v2357_v5  ;;  %1949 = vst [vmem:[#allocation4 + $0x180] sm:$0xf] %v1943_v40  ;;  %v2047_v31 = vsel %vm1992_vm8, %v2045_v2, %v2046_v4  ;;  %v2267_v51 = vsel %vm1992_vm8, %v2265_v44, %v2266_v47 }
 0x3a4   :  { %v2621_v53 = vld [vmem:[#allocation3 + $0x28] sm:$0x1e]  ;;  %2383 = vst [vmem:[#allocation4 + $0xb0] sm:$0xf] %v2381_v15  ;;  %1826 = vst.msk [vmem:[#allocation3 + $0x38] sm:$0xff] %vm1579_vm3, %v1816_v16  ;;  %v2315_v30 = vsel %vm1992_vm8, %v2313_v55, %v2314_v34  ;;  %v2022_v28 = vrot.slane %v8312_v21, 3 }
 0x3a5   :  { %v2651_v42 = vld [vmem:[#allocation3 + $0x28] sm:$0x1e]  ;;  %v2625_v25 = vrot.slane %v2621_v53, 1  ;;  %2002 = vst [vmem:[#allocation4 + $0x18] sm:$0xf] %v1998_v6  ;;  %v2100_v37 = vrot.slane %v8314_v36, 5 }
 0x3a6   :  { %v2909_v0 = vld [vmem:[#allocation3 + $0x28] sm:$0x3c]  ;;  %v2655_v35 = vrot.slane %v2651_v42, 1  ;;  %2053 = vst [vmem:[#allocation4 + $0x90] sm:$0xf] %v2047_v31  ;;  %v1660_v3 = vpop.permute.xlu0 %1659  ;;  %v1684_v62 = vpop.permute.xlu1 %1683  ;;  %v2149_v47 = vrot.slane %v8316_v14, 5 }
 0x3a7   :  { %v2913_v46 = vrot.slane %v2909_v0, 2  ;;  %v2939_v20 = vld [vmem:[#allocation3 + $0x28] sm:$0x3c]  ;;  %1748 = vst.msk [vmem:[#allocation3 + $0x70] sm:$0xf] %vm1583_vm6, %v1740_v61  ;;  %v2417_v56 = vrot.slane %v8318_v32, 6 }
 0x3a8   :  { %v2943_v12 = vrot.slane %v2939_v20, 2  ;;  %2271 = vst [vmem:[#allocation4 + $0x128] sm:$0xf] %v2267_v51  ;;  %2629 = vst [vmem:[#allocation4 + $0x58] sm:$0xf] %v2625_v25  ;;  %v3132_v40 = vld [vmem:[%s10000_s4 + $0x180] sm:$0xff] }
 0x3a9   :  { %2659 = vst [vmem:[#allocation4 + $0xd0] sm:$0xf] %v2655_v35  ;;  %2917 = vst [vmem:[#allocation4 + $0x78] sm:$0xf] %v2913_v46  ;;  %v2571_v48 = vld [vmem:[#allocation3 + $0x48] sm:$0xf] }
 0x3aa   :  { %v2595_v52 = vld [vmem:[#allocation3 + $0x48] sm:$0xf]  ;;  %2321 = vst [vmem:[#allocation4 + $0x1a0] sm:$0xf] %v2315_v30  ;;  %2947 = vst [vmem:[#allocation4 + $0xf0] sm:$0xf] %v2943_v12  ;;  %v1574_v17 = vpop.permute.xlu0 %1573  ;;  %v1600_v43 = vpop.permute.xlu1 %1599 }
 0x3ab   :  { %v2847_v9 = vld [vmem:[#allocation3 + $0x48] sm:$0x1e]  ;;  %2573 = vst [vmem:[#allocation4 + $0x148] sm:$0xf] %v2571_v48  ;;  %2597 = vst [vmem:[#allocation4 + $0x1c0] sm:$0xf] %v2595_v52 }
 0x3ac   :  { %v2851_v63 = vrot.slane %v2847_v9, 1  ;;  %v2877_v8 = vld [vmem:[#allocation3 + $0x48] sm:$0x1e]  ;;  %1668 = vst.msk [vmem:[#allocation3 + $0x68] sm:$0xf] %vm1583_vm6, %v1660_v3  ;;  %vm5182_vm3 = vcmask 25600  }
 0x3ad   :  { %v2881_v39 = vrot.slane %v2877_v8, 1  ;;  %v1934_v23 = vld [vmem:[#allocation3 + $0x30] sm:$0xc0]  ;;  %v2040_v58 = vld [vmem:[#allocation3 + $0x30] sm:$0x7] }
 0x3ae   :  { %1692 = vst.msk [vmem:[#allocation3 + $0x68] sm:$0xf] %vm1609_vm9, %v1684_v62  ;;  %v8321_v29 = vld [vmem:[#allocation3 + $0x48] sm:$0xc0]  ;;  %2855 = vst [vmem:[#allocation4 + $0x168] sm:$0xf] %v2851_v63  ;;  %v1764_v27 = vpop.permute.xlu0 %1763  ;;  %v1788_v35 = vpop.permute.xlu1 %1787  ;;  %v5989_v62 = vpack.c.bf16 %v3133_v7, %v3132_v40 }
 0x3af   :  { %v2049_v38 = vrot.slane %v2040_v58, 7  ;;  %v2306_v45 = vld [vmem:[#allocation3 + $0x30] sm:$0x80]  ;;  %v2382_v59 = vld [vmem:[#allocation3 + $0x30] sm:$0xf]  ;;  %v1944_v50 = vrot.slane %v1934_v23, 6 }
 0x3b0   :  { %2885 = vst [vmem:[#allocation4 + $0x1e0] sm:$0xf] %v2881_v39  ;;  %v2652_v2 = vld [vmem:[#allocation3 + $0x30] sm:$0x1e]  ;;  %2384 = vst [vmem:[#allocation4 + $0xb8] sm:$0xf] %v2382_v59  ;;  %5990 = vmatprep.subr.bf16.mxu1 %v5989_v62 }
 0x3b1   :  { %v2940_v10 = vld [vmem:[#allocation3 + $0x30] sm:$0x3c]  ;;  %v2316_v24 = vrot.slane %v2306_v45, 7  ;;  %v2656_v33 = vrot.slane %v2652_v2, 1  ;;  %v1936_v49 = vld [vmem:[#allocation3 + $0x50] sm:$0x3]  ;;  %v2050_v57 = vsel %vm1992_vm8, %v2048_v26, %v2049_v38 }
 0x3b2   :  { %v2944_v41 = vrot.slane %v2940_v10, 2  ;;  %1584 = vst.msk [vmem:[#allocation3 + $0x60] sm:$0xf] %vm1583_vm6, %v1574_v17  ;;  %v1945_v11 = vrot.slane %v1936_v49, 6  ;;  %v2308_v19 = vld [vmem:[#allocation3 + $0x50] sm:$0x7]  ;;  %v1708_v8 = vpop.permute.xlu0 %1707  ;;  %v1820_v59 = vpop.permute.xlu1 %1819 }
 0x3b3   :  { %1610 = vst.msk [vmem:[#allocation3 + $0x60] sm:$0xf] %vm1609_vm9, %v1600_v43  ;;  %2054 = vst [vmem:[#allocation4 + $0x98] sm:$0xf] %v2050_v57  ;;  %v2317_v4 = vrot.slane %v2308_v19, 7  ;;  %v2465_v22 = vrot.slane %v8321_v29, 6 }
 0x3b4   :  { %2660 = vst [vmem:[#allocation4 + $0xd8] sm:$0xf] %v2656_v33  ;;  %2948 = vst [vmem:[#allocation4 + $0xf8] sm:$0xf] %v2944_v41  ;;  %v2596_v13 = vld [vmem:[#allocation3 + $0x50] sm:$0xf]  ;;  %v1946_v53 = vsel %vm1888_vm7, %v1944_v50, %v1945_v11 }
 0x3b5   :  { %v8332_v34 = vld [vmem:[#allocation3 + $0x48] sm:$0x80]  ;;  %v8336_v55 = vld [vmem:[#allocation3 + $0x50] sm:$0xe0]  ;;  %v2878_v5 = vld [vmem:[#allocation3 + $0x50] sm:$0x1e]  ;;  %v2318_v46 = vsel %vm1992_vm8, %v2316_v24, %v2317_v4 }
 0x3b6   :  { %v8334_v44 = vld [vmem:[#allocation3 + $0x48] sm:$0x80]  ;;  %2598 = vst [vmem:[#allocation4 + $0x1c8] sm:$0xf] %v2596_v13  ;;  %v1880_v15 = vld [vmem:[#allocation3 + $0x20] sm:$0xc0]  ;;  %v1626_v13 = vpop.permute.xlu0 %1625 }
 0x3b7   :  { %v8342_v42 = vld [vmem:[#allocation3 + $0x50] sm:$0xc0]  ;;  %v2882_v16 = vrot.slane %v2878_v5, 1  ;;  %v1889_v6 = vrot.slane %v1880_v15, 6  ;;  %v1986_v31 = vld [vmem:[#allocation3 + $0x20] sm:$0x7] }
 0x3b8   :  { %v8344_v0 = vld [vmem:[#allocation3 + $0x50] sm:$0x80]  ;;  %v2254_v25 = vld [vmem:[#allocation3 + $0x20] sm:$0x80]  ;;  %1772 = vst.msk [vmem:[#allocation3 + $0x70] sm:$0xf] %vm1609_vm9, %v1764_v27 }
 0x3b9   :  { %1950 = vst [vmem:[#allocation4 + $0x188] sm:$0xf] %v1946_v53  ;;  %v1994_v20 = vrot.slane %v1986_v31, 7  ;;  %v2262_v61 = vrot.slane %v2254_v25, 7  ;;  %v2356_v51 = vld [vmem:[#allocation3 + $0x20] sm:$0xf] }
 0x3ba   :  { %v2620_v12 = vld [vmem:[#allocation3 + $0x20] sm:$0x1e]  ;;  %1796 = vst.msk [vmem:[#allocation3 + $0x70] sm:$0xf] %vm1635_vm10, %v1788_v35  ;;  %2322 = vst [vmem:[#allocation4 + $0x1a8] sm:$0xf] %v2318_v46 }
 0x3bb   :  { %2886 = vst [vmem:[#allocation4 + $0x1e8] sm:$0xf] %v2882_v16  ;;  %2358 = vst [vmem:[#allocation4 + $0x30] sm:$0xf] %v2356_v51  ;;  %v2624_v30 = vrot.slane %v2620_v12, 1  ;;  %v1995_v39 = vsel %vm1992_vm8, %v1993_v1, %v1994_v20  ;;  %v2693_v23 = vrot.slane %v8332_v34, 7 }
 0x3bc   :  { %v2908_v48 = vld [vmem:[#allocation3 + $0x20] sm:$0x3c]  ;;  %v1882_v52 = vld [vmem:[#allocation3 + $0x40] sm:$0x3]  ;;  %v2741_v58 = vrot.slane %v8334_v44, 7  ;;  %v2152_v26 = vrot.slane %v8336_v55, 5 }
 0x3bd   :  { %v2912_v9 = vrot.slane %v2908_v48, 2  ;;  %v1890_v3 = vrot.slane %v1882_v52, 6  ;;  %v8352_v60 = vld [vmem:[#allocation3 + $0x40] sm:$0xe0]  ;;  %v2256_v63 = vld [vmem:[#allocation3 + $0x40] sm:$0x7] }
 0x3be   :  { %2628 = vst [vmem:[#allocation4 + $0x50] sm:$0xf] %v2624_v30  ;;  %v2263_v38 = vrot.slane %v2256_v63, 7  ;;  %v2570_v45 = vld [vmem:[#allocation3 + $0x40] sm:$0xf]  ;;  %v2468_v50 = vrot.slane %v8342_v42, 6 }
 0x3bf   :  { %1716 = vst.msk [vmem:[#allocation3 + $0x68] sm:$0xf] %vm1635_vm10, %v1708_v8  ;;  %2001 = vst [vmem:[#allocation4 + $0x10] sm:$0xf] %v1995_v39  ;;  %v2744_v2 = vrot.slane %v8344_v0, 7  ;;  %v1891_v24 = vsel %vm1888_vm7, %v1889_v6, %v1890_v3  ;;  %v2097_v33 = vrot.slane %v8352_v60, 5 }
 0x3c0   :  { %2916 = vst [vmem:[#allocation4 + $0x70] sm:$0xf] %v2912_v9  ;;  %v8361_v10 = vld [vmem:[#allocation3 + $0x40] sm:$0xc0]  ;;  %v2846_v17 = vld [vmem:[#allocation3 + $0x40] sm:$0x1e]  ;;  %v2264_v57 = vsel %vm1992_vm8, %v2262_v61, %v2263_v38 }
 0x3c1   :  { %2572 = vst [vmem:[#allocation4 + $0x140] sm:$0xf] %v2570_v45  ;;  %1828 = vst.msk [vmem:[#allocation3 + $0x78] sm:$0xf] %vm1583_vm6, %v1820_v59  ;;  %v2850_v41 = vrot.slane %v2846_v17, 1  ;;  %v2414_v5 = vrot.slane %v8361_v10, 6 }
 0x3c2   :  { %v1901_v49 = vld [vmem:[#allocation3 + $0x30] sm:$0xc0]  ;;  %v1904_v43 = vld [vmem:[#allocation3 + $0x50] sm:$0x3]  ;;  %1897 = vst [vmem:[#allocation4 + $0x100] sm:$0xf] %v1891_v24 }
 0x3c3   :  { %v1918_v1 = vrot.slane %v1901_v49, 2  ;;  %v1919_v11 = vrot.slane %v1904_v43, 2  ;;  %v1952_v19 = vld [vmem:[#allocation3 + $0x30] sm:$0xc0]  ;;  %v1955_v4 = vld [vmem:[#allocation3 + $0x50] sm:$0x3] }
 0x3c4   :  { %2270 = vst [vmem:[#allocation4 + $0x120] sm:$0xf] %v2264_v57  ;;  %2854 = vst [vmem:[#allocation4 + $0x160] sm:$0xf] %v2850_v41  ;;  %v1966_v15 = vrot.slane %v1952_v19, 2  ;;  %v1967_v16 = vrot.slane %v1955_v4, 2 }
 0x3c5   :  { %v1951_v27 = vld [vmem:[#allocation3 + $0x28] sm:$0xc0]  ;;  %v1954_v40 = vld [vmem:[#allocation3 + $0x48] sm:$0x3]  ;;  %1636 = vst.msk [vmem:[#allocation3 + $0x60] sm:$0xf] %vm1635_vm10, %v1626_v13  ;;  %v1920_v53 = vsel %vm1911_vm11, %v1918_v1, %v1919_v11 }
 0x3c6   :  { %v1963_v6 = vrot.slane %v1951_v27, 2  ;;  %v1953_v31 = vld [vmem:[#allocation3 + $0x38] sm:$0xc0]  ;;  %v1956_v25 = vld [vmem:[#allocation3 + $0x58] sm:$0x3]  ;;  %1925 = vrot.lane.b32.xlu1 %v1920_v53, %s6557_s3  ;;  %v1968_v8 = vsel %vm1911_vm11, %v1966_v15, %v1967_v16  ;;  %v1964_v62 = vrot.slane %v1954_v40, 2 }
 0x3c7   :  { %v1969_v35 = vrot.slane %v1953_v31, 2  ;;  %v1970_v46 = vrot.slane %v1956_v25, 2  ;;  %v8371_v20 = vld [vmem:[#allocation3 + $0x30] sm:$0x7]  ;;  %v2091_v51 = vld [vmem:[#allocation3 + $0x68] sm:$0x1] }
 0x3c8   :  { %v2144_v61 = vld [vmem:[#allocation3 + $0x70] sm:$0x1]  ;;  %v2143_v12 = vld [vmem:[#allocation3 + $0x68] sm:$0x1]  ;;  %v8373_v48 = vld [vmem:[#allocation3 + $0x40] sm:$0x80]  ;;  %v1965_v29 = vsel %vm1911_vm11, %v1963_v6, %v1964_v62 }
 0x3c9   :  { %v2409_v30 = vld [vmem:[#allocation3 + $0x68] sm:$0x3]  ;;  %v1971_v52 = vsel %vm1911_vm11, %v1969_v35, %v1970_v46  ;;  %v2101_v7 = vrot.slane %v2091_v51, 5  ;;  %v2150_v9 = vrot.slane %v2143_v12, 5  ;;  %v2023_v57 = vrot.slane %v8371_v20, 3 }
 0x3ca   :  { %v2418_v3 = vrot.slane %v2409_v30, 6  ;;  %v2459_v63 = vld [vmem:[#allocation3 + $0x68] sm:$0x3]  ;;  %1976 = vrot.lane.b32.xlu0 %v1971_v52, %s6557_s3  ;;  %1974 = vrot.lane.b32.xlu1 %v1968_v8, %s6557_s3  ;;  %v2153_v1 = vrot.slane %v2144_v61, 5  ;;  %v2460_v11 = vld [vmem:[#allocation3 + $0x70] sm:$0x3] }
 0x3cb   :  { %v2466_v39 = vrot.slane %v2459_v63, 6  ;;  %v2685_v38 = vld [vmem:[#allocation3 + $0x68] sm:$0x7]  ;;  %v2102_v49 = vsel %vm2096_vm12, %v2100_v37, %v2101_v7  ;;  %v2151_v43 = vsel %vm2096_vm12, %v2149_v47, %v2150_v9  ;;  %v2736_v19 = vld [vmem:[#allocation3 + $0x70] sm:$0x7]  ;;  %v2469_v14 = vrot.slane %v2460_v11, 6 }
 0x3cc   :  { %v2735_v45 = vld [vmem:[#allocation3 + $0x68] sm:$0x7]  ;;  %v2694_v59 = vrot.slane %v2685_v38, 7  ;;  %2106 = vst [vmem:[#allocation4 + $0x118] sm:$0xf] %v2102_v49  ;;  %v2419_v4 = vsel %vm1888_vm7, %v2417_v56, %v2418_v3  ;;  %v2745_v37 = vrot.slane %v2736_v19, 7  ;;  %v2154_v53 = vsel %vm2096_vm12, %v2152_v26, %v2153_v1 }
 0x3cd   :  { %v2742_v17 = vrot.slane %v2735_v45, 7  ;;  %v2971_v24 = vld [vmem:[#allocation3 + $0x68] sm:$0xf]  ;;  %2157 = vst [vmem:[#allocation4 + $0x190] sm:$0xf] %v2151_v43  ;;  %v2467_v36 = vsel %vm1888_vm7, %v2465_v22, %v2466_v39  ;;  %v2690_v56 = vrot.slane %v8373_v48, 7  ;;  %v2470_v6 = vsel %vm1888_vm7, %v2468_v50, %v2469_v14 }
 0x3ce   :  { %v2995_v41 = vld [vmem:[#allocation3 + $0x68] sm:$0xf]  ;;  %2973 = vst [vmem:[#allocation4 + $0x178] sm:$0xf] %v2971_v24  ;;  %v2996_v47 = vld [vmem:[#allocation3 + $0x70] sm:$0xf]  ;;  %v2695_v15 = vsel %vm1992_vm8, %v2693_v23, %v2694_v59  ;;  %1972 = vrot.lane.b32.xlu1 %v1965_v29, %s6557_s3  ;;  %v2746_v26 = vsel %vm1992_vm8, %v2744_v2, %v2745_v37  ;;  %v2024_v46 = vsel %vm2015_vm13, %v2022_v28, %v2023_v57 }
 0x3cf   :  { %2997 = vst [vmem:[#allocation4 + $0x1f0] sm:$0xf] %v2995_v41  ;;  %v1900_v13 = vld [vmem:[#allocation3 + $0x28] sm:$0xc0]  ;;  %2423 = vst [vmem:[#allocation4 + $0x138] sm:$0xf] %v2419_v4  ;;  %v2743_v32 = vsel %vm1992_vm8, %v2741_v58, %v2742_v17 }
 0x3d0   :  { %2473 = vst [vmem:[#allocation4 + $0x1b0] sm:$0xf] %v2467_v36  ;;  %2998 = vst [vmem:[#allocation4 + $0x1f8] sm:$0xf] %v2996_v47  ;;  %v1903_v22 = vld [vmem:[#allocation3 + $0x48] sm:$0x3] }
 0x3d1   :  { %v1915_v27 = vrot.slane %v1900_v13, 2  ;;  %v2090_v40 = vld [vmem:[#allocation3 + $0x60] sm:$0x1]  ;;  %2699 = vst [vmem:[#allocation4 + $0x158] sm:$0xf] %v2695_v15  ;;  %v1916_v34 = vrot.slane %v1903_v22, 2 }
 0x3d2   :  { %2749 = vst [vmem:[#allocation4 + $0x1d0] sm:$0xf] %v2743_v32  ;;  %v2098_v44 = vrot.slane %v2090_v40, 5  ;;  %v2408_v23 = vld [vmem:[#allocation3 + $0x60] sm:$0x3]  ;;  %2029 = vrot.lane.b32.xlu1 %v2024_v46, %s6557_s3 }
 0x3d3   :  { %v2684_v58 = vld [vmem:[#allocation3 + $0x60] sm:$0x7]  ;;  %v2056_v16 = vld [vmem:[#allocation3 + $0x10] sm:$0x80]  ;;  %2158 = vst [vmem:[#allocation4 + $0x198] sm:$0xf] %v2154_v53  ;;  %v1917_v20 = vsel %vm1911_vm11, %v1915_v27, %v1916_v34 }
 0x3d4   :  { %v2415_v31 = vrot.slane %v2408_v23, 6  ;;  %v2691_v25 = vrot.slane %v2684_v58, 7  ;;  %v2970_v35 = vld [vmem:[#allocation3 + $0x60] sm:$0xf]  ;;  %v2059_v55 = vld [vmem:[#allocation3 + $0x30] sm:$0x7]  ;;  %v2099_v50 = vsel %vm2096_vm12, %v2097_v33, %v2098_v44  ;;  %1923 = vrot.lane.b32.xlu0 %v1917_v20, %s6557_s3 }
 0x3d5   :  { %2474 = vst [vmem:[#allocation4 + $0x1b8] sm:$0xf] %v2470_v6  ;;  %2972 = vst [vmem:[#allocation4 + $0x170] sm:$0xf] %v2970_v35  ;;  %v2071_v61 = vrot.slane %v2059_v55, 3  ;;  %v2070_v60 = vrot.slane %v2056_v16, 3 }
 0x3d6   :  { %v1899_v42 = vld [vmem:[#allocation3 + $0x20] sm:$0xc0]  ;;  %v1902_v51 = vld [vmem:[#allocation3 + $0x40] sm:$0x3]  ;;  %2750 = vst [vmem:[#allocation4 + $0x1d8] sm:$0xf] %v2746_v26  ;;  %v2416_v21 = vsel %vm1888_vm7, %v2414_v5, %v2415_v31  ;;  %v2692_v28 = vsel %vm1992_vm8, %v2690_v56, %v2691_v25 }
 0x3d7   :  { %v1912_v0 = vrot.slane %v1899_v42, 2  ;;  %v1913_v12 = vrot.slane %v1902_v51, 2  ;;  %v2007_v2 = vld [vmem:[#allocation3 + $0x28] sm:$0x7]  ;;  %2105 = vst [vmem:[#allocation4 + $0x110] sm:$0xf] %v2099_v50  ;;  %v2072_v3 = vsel %vm2015_vm13, %v2070_v60, %v2071_v61 }
 0x3d8   :  { %v2058_v30 = vld [vmem:[#allocation3 + $0x28] sm:$0x7]  ;;  %2422 = vst [vmem:[#allocation4 + $0x130] sm:$0xf] %v2416_v21  ;;  %2698 = vst [vmem:[#allocation4 + $0x150] sm:$0xf] %v2692_v28  ;;  %2078 = vrot.lane.b32.xlu1 %v2072_v3, %s6557_s3 }
 0x3d9   :  { %v2004_v33 = vld [vmem:[#allocation3 + $0x8] sm:$0x80]  ;;  %v1914_v48 = vsel %vm1911_vm11, %v1912_v0, %v1913_v12  ;;  %v2020_v7 = vrot.slane %v2007_v2, 3  ;;  %v2112_v9 = vld [vmem:[#allocation3 + $0x70] sm:$0x1]  ;;  %v2068_v10 = vrot.slane %v2058_v30, 3 }
 0x3da   :  { %v2055_v52 = vld [vmem:[#allocation3 + $0x8] sm:$0x80]  ;;  %1921 = vrot.lane.b32.xlu0 %v1914_v48, %s6557_s3  ;;  %v2006_v5 = vld [vmem:[#allocation3 + $0x20] sm:$0x7]  ;;  %v2019_v63 = vrot.slane %v2004_v33, 3  ;;  %v2127_v39 = vrot.slane %v2112_v9, 1 }
 0x3db   :  { %v2109_v8 = vld [vmem:[#allocation3 + $0x50] sm:$0xe0]  ;;  %v2067_v62 = vrot.slane %v2055_v52, 3  ;;  %v2003_v38 = vld [vmem:[#allocation3] sm:$0x80]  ;;  %v2017_v59 = vrot.slane %v2006_v5, 3 }
 0x3dc   :  { %v2021_v45 = vsel %vm2015_vm13, %v2019_v63, %v2020_v7  ;;  %v2126_v24 = vrot.slane %v2109_v8, 1  ;;  %v2060_v41 = vld [vmem:[#allocation3 + $0x38] sm:$0x7]  ;;  %v2016_v49 = vrot.slane %v2003_v38, 3  ;;  %v2163_v43 = vld [vmem:[#allocation3 + $0x70] sm:$0x1] }
 0x3dd   :  { %v2069_v17 = vsel %vm2015_vm13, %v2067_v62, %v2068_v10  ;;  %v2057_v1 = vld [vmem:[#allocation3 + $0x18] sm:$0x80]  ;;  %v2160_v19 = vld [vmem:[#allocation3 + $0x50] sm:$0xe0]  ;;  %v2074_v4 = vrot.slane %v2060_v41, 3  ;;  %v2175_v36 = vrot.slane %v2163_v43, 1 }
 0x3de   :  { %2027 = vrot.lane.b32.xlu0 %v2021_v45, %s6557_s3  ;;  %2076 = vrot.lane.b32.xlu1 %v2069_v17, %s6557_s3  ;;  %v2128_v57 = vsel %vm2119_vm14, %v2126_v24, %v2127_v39  ;;  %v2018_v11 = vsel %vm2015_vm13, %v2016_v49, %v2017_v59  ;;  %v2164_v14 = vld [vmem:[#allocation3 + $0x78] sm:$0x1]  ;;  %v2073_v37 = vrot.slane %v2057_v1, 3  ;;  %v2162_v47 = vld [vmem:[#allocation3 + $0x68] sm:$0x1]  ;;  %v2174_v13 = vrot.slane %v2160_v19, 1 }
 0x3df   :  { %v2161_v15 = vld [vmem:[#allocation3 + $0x58] sm:$0xe0]  ;;  %v2159_v56 = vld [vmem:[#allocation3 + $0x48] sm:$0xe0]  ;;  %v2178_v29 = vrot.slane %v2164_v14, 1  ;;  %v2172_v27 = vrot.slane %v2162_v47, 1 }
 0x3e0   :  { %v2075_v32 = vsel %vm2015_vm13, %v2073_v37, %v2074_v4  ;;  %v2176_v22 = vsel %vm2119_vm14, %v2174_v13, %v2175_v36  ;;  %v2111_v40 = vld [vmem:[#allocation3 + $0x68] sm:$0x1]  ;;  %v2177_v53 = vrot.slane %v2161_v15, 1  ;;  %v2171_v34 = vrot.slane %v2159_v56, 1  ;;  %v2108_v44 = vld [vmem:[#allocation3 + $0x48] sm:$0xe0] }
 0x3e1   :  { %v2124_v58 = vrot.slane %v2111_v40, 1  ;;  %v2204_v6 = vld [vmem:[#allocation3 + $0x10] sm:$0x1e]  ;;  %v2110_v31 = vld [vmem:[#allocation3 + $0x60] sm:$0x1]  ;;  %v2123_v25 = vrot.slane %v2108_v44, 1 }
 0x3e2   :  { %2025 = vrot.lane.b32.xlu0 %v2018_v11, %s6557_s3  ;;  %2133 = vrot.lane.b32.xlu1 %v2128_v57, %s6557_s3  ;;  %v2179_v23 = vsel %vm2119_vm14, %v2177_v53, %v2178_v29  ;;  %v2173_v16 = vsel %vm2119_vm14, %v2171_v34, %v2172_v27  ;;  %v2107_v35 = vld [vmem:[#allocation3 + $0x40] sm:$0xe0]  ;;  %v2210_v55 = vrot.slane %v2204_v6, 5  ;;  %v2121_v46 = vrot.slane %v2110_v31, 1  ;;  %v2234_v20 = vld [vmem:[#allocation3 + $0x10] sm:$0x1e] }
 0x3e3   :  { %v2125_v26 = vsel %vm2119_vm14, %v2123_v25, %v2124_v58  ;;  %v2120_v61 = vrot.slane %v2107_v35, 1  ;;  %v2240_v42 = vrot.slane %v2234_v20, 5  ;;  %v2203_v50 = vld [vmem:[#allocation3 + $0x8] sm:$0x1e]  ;;  %v2274_v12 = vld [vmem:[#allocation3 + $0x30] sm:$0x80] }
 0x3e4   :  { %v2233_v0 = vld [vmem:[#allocation3 + $0x8] sm:$0x1e]  ;;  %v2277_v2 = vld [vmem:[#allocation3 + $0x50] sm:$0x7]  ;;  %v2209_v21 = vrot.slane %v2203_v50, 5  ;;  %v2290_v60 = vrot.slane %v2274_v12, 3 }
 0x3e5   :  { %v2122_v51 = vsel %vm2119_vm14, %v2120_v61, %v2121_v46  ;;  %v2239_v28 = vrot.slane %v2233_v0, 5  ;;  %v2202_v30 = vld [vmem:[#allocation3] sm:$0x1e]  ;;  %v2291_v33 = vrot.slane %v2277_v2, 3  ;;  %v2324_v48 = vld [vmem:[#allocation3 + $0x30] sm:$0x80] }
 0x3e6   :  { %2080 = vrot.lane.b32.xlu0 %v2075_v32, %s6557_s3  ;;  %2182 = vrot.lane.b32.xlu1 %v2176_v22, %s6557_s3  ;;  %v2327_v52 = vld [vmem:[#allocation3 + $0x50] sm:$0x7]  ;;  %v2208_v7 = vrot.slane %v2202_v30, 5  ;;  %v2235_v9 = vld [vmem:[#allocation3 + $0x18] sm:$0x1e]  ;;  %v2338_v10 = vrot.slane %v2324_v48, 3 }
 0x3e7   :  { %v2292_v3 = vsel %vm2015_vm13, %v2290_v60, %v2291_v33  ;;  %v2339_v5 = vrot.slane %v2327_v52, 3  ;;  %v2325_v63 = vld [vmem:[#allocation3 + $0x38] sm:$0x80]  ;;  %v2328_v8 = vld [vmem:[#allocation3 + $0x58] sm:$0x7]  ;;  %v2241_v38 = vrot.slane %v2235_v9, 5 }
 0x3e8   :  { %v2323_v62 = vld [vmem:[#allocation3 + $0x28] sm:$0x80]  ;;  %v2326_v39 = vld [vmem:[#allocation3 + $0x48] sm:$0x7]  ;;  %v2341_v45 = vrot.slane %v2325_v63, 3  ;;  %v2342_v59 = vrot.slane %v2328_v8, 3 }
 0x3e9   :  { %v2340_v17 = vsel %vm2015_vm13, %v2338_v10, %v2339_v5  ;;  %v2335_v24 = vrot.slane %v2323_v62, 3  ;;  %v2336_v41 = vrot.slane %v2326_v39, 3  ;;  %v2273_v49 = vld [vmem:[#allocation3 + $0x28] sm:$0x80]  ;;  %v2276_v43 = vld [vmem:[#allocation3 + $0x48] sm:$0x7] }
 0x3ea   :  { %2184 = vrot.lane.b32.xlu0 %v2179_v23, %s6557_s3  ;;  %2180 = vrot.lane.b32.xlu1 %v2173_v16, %s6557_s3  ;;  %v2343_v57 = vsel %vm2015_vm13, %v2341_v45, %v2342_v59  ;;  %v2287_v1 = vrot.slane %v2273_v49, 3  ;;  %v2288_v11 = vrot.slane %v2276_v43, 3  ;;  %v2362_v4 = vld [vmem:[#allocation3 + $0x30] sm:$0xf]  ;;  %v2272_v36 = vld [vmem:[#allocation3 + $0x20] sm:$0x80] }
 0x3eb   :  { %v2337_v19 = vsel %vm2015_vm13, %v2335_v24, %v2336_v41  ;;  %v2275_v14 = vld [vmem:[#allocation3 + $0x40] sm:$0x7]  ;;  %v2368_v37 = vrot.slane %v2362_v4, 4  ;;  %v2284_v13 = vrot.slane %v2272_v36, 3  ;;  %v2386_v32 = vld [vmem:[#allocation3 + $0x30] sm:$0xf] }
 0x3ec   :  { %v2289_v47 = vsel %vm2015_vm13, %v2287_v1, %v2288_v11  ;;  %v2285_v15 = vrot.slane %v2275_v14, 3  ;;  %v2392_v56 = vrot.slane %v2386_v32, 4  ;;  %v2361_v22 = vld [vmem:[#allocation3 + $0x28] sm:$0xf]  ;;  %v2429_v53 = vld [vmem:[#allocation3 + $0x70] sm:$0x3] }
 0x3ed   :  { %v2385_v40 = vld [vmem:[#allocation3 + $0x28] sm:$0xf]  ;;  %v2367_v44 = vrot.slane %v2361_v22, 4  ;;  %v2426_v16 = vld [vmem:[#allocation3 + $0x50] sm:$0xc0]  ;;  %v2443_v25 = vrot.slane %v2429_v53, 2 }
 0x3ee   :  { %2131 = vrot.lane.b32.xlu0 %v2125_v26, %s6557_s3  ;;  %2215 = vrot.lane.b32.xlu1 %v2210_v55, %s6557_s3  ;;  %v2286_v29 = vsel %vm2015_vm13, %v2284_v13, %v2285_v15  ;;  %v2391_v58 = vrot.slane %v2385_v40, 4  ;;  %v2360_v6 = vld [vmem:[#allocation3 + $0x20] sm:$0xf]  ;;  %v2479_v35 = vld [vmem:[#allocation3 + $0x70] sm:$0x3]  ;;  %v2442_v26 = vrot.slane %v2426_v16, 2 }
 0x3ef   :  { %v2366_v46 = vrot.slane %v2360_v6, 4  ;;  %v2476_v61 = vld [vmem:[#allocation3 + $0x50] sm:$0xc0]  ;;  %v2491_v0 = vrot.slane %v2479_v35, 2  ;;  %v2480_v12 = vld [vmem:[#allocation3 + $0x78] sm:$0x3] }
 0x3f0   :  { %v2444_v50 = vsel %vm1911_vm11, %v2442_v26, %v2443_v25  ;;  %v3117_v60 = vld [vmem:[%s10000_s4 + $0x108] sm:$0xff]  ;;  %v3134_v33 = vld [vmem:[%s10000_s4 + $0x190] sm:$0xff]  ;;  %v2490_v48 = vrot.slane %v2476_v61, 2  ;;  %v3135_v10 = vld [vmem:[%s10000_s4 + $0x198] sm:$0xff]  ;;  %v2494_v63 = vrot.slane %v2480_v12, 2 }
 0x3f1   :  { %v2475_v5 = vld [vmem:[#allocation3 + $0x48] sm:$0xc0]  ;;  %v2428_v39 = vld [vmem:[#allocation3 + $0x68] sm:$0x3]  ;;  %v5993_v59 = vpack.c.bf16 %v3135_v10, %v3134_v33  ;;  %v3119_v43 = vld [vmem:[%s10000_s4 + $0x118] sm:$0xff] }
 0x3f2   :  { %2129 = vrot.lane.b32.xlu0 %v2122_v51, %s6557_s3  ;;  %2244 = vrot.lane.b32.xlu1 %v2240_v42, %s6557_s3  ;;  %v2387_v42 = vld [vmem:[#allocation3 + $0x38] sm:$0xf]  ;;  %v2492_v8 = vsel %vm1911_vm11, %v2490_v48, %v2491_v0  ;;  %v2487_v24 = vrot.slane %v2475_v5, 2  ;;  %v2425_v41 = vld [vmem:[#allocation3 + $0x48] sm:$0xc0]  ;;  %v2440_v1 = vrot.slane %v2428_v39, 2 }
 0x3f3   :  { %v2393_v52 = vrot.slane %v2387_v42, 4  ;;  %v3136_v11 = vld [vmem:[%s10000_s4 + $0x1a0] sm:$0xff]  ;;  %v2520_v36 = vld [vmem:[#allocation3 + $0x10] sm:$0x3c]  ;;  %v2427_v14 = vld [vmem:[#allocation3 + $0x60] sm:$0x3] }
 0x3f4   :  { %v3121_v22 = vld [vmem:[%s10000_s4 + $0x128] sm:$0xff]  ;;  %v2437_v53 = vrot.slane %v2427_v14, 2  ;;  %v3123_v25 = vld [vmem:[%s10000_s4 + $0x138] sm:$0xff]  ;;  %v2519_v26 = vld [vmem:[#allocation3 + $0x8] sm:$0x3c] }
 0x3f5   :  { %v2549_v61 = vld [vmem:[#allocation3 + $0x8] sm:$0x3c]  ;;  %v3124_v0 = vld [vmem:[%s10000_s4 + $0x140] sm:$0xff]  ;;  %v3125_v12 = vld [vmem:[%s10000_s4 + $0x148] sm:$0xff] }
 0x3f6   :  { %2213 = vrot.lane.b32.xlu0 %v2209_v21, %s6557_s3  ;;  %2242 = vrot.lane.b32.xlu1 %v2239_v28, %s6557_s3  ;;  %v1847_v27 = vpop.permute.xlu1 %1846  ;;  %v3116_v21 = vld [vmem:[%s10000_s4 + $0x100] sm:$0xff]  ;;  %v2478_v28 = vld [vmem:[#allocation3 + $0x68] sm:$0x3]  ;;  %v6007_v33 = vpack.c.bf16 %v3125_v12, %v3124_v0  ;;  %v2574_v14 = vld [vmem:[#allocation3 + $0x40] sm:$0xf] }
 0x3f7   :  { %v2488_v62 = vrot.slane %v2478_v28, 2  ;;  %v3142_v28 = vld [vmem:[%s10000_s4 + $0x1d0] sm:$0xff]  ;;  %v2551_v10 = vld [vmem:[#allocation3 + $0x18] sm:$0x3c] }
 0x3f8   :  { %v3144_v5 = vld [vmem:[%s10000_s4 + $0x1e0] sm:$0xff]  ;;  %v2557_v39 = vrot.slane %v2551_v10, 6  ;;  %v2704_v10 = vld [vmem:[#allocation3 + $0x68] sm:$0x7] }
 0x3f9   :  { %v2489_v4 = vsel %vm1911_vm11, %v2487_v24, %v2488_v62  ;;  %v2575_v24 = vld [vmem:[#allocation3 + $0x48] sm:$0xf] }
 0x3fa   :  { %2211 = vrot.lane.b32.xlu0 %v2208_v7, %s6557_s3  ;;  %2297 = vrot.lane.b32.xlu1 %v2292_v3, %s6557_s3  ;;  %v1871_v31 = vpop.permute.xlu1 %1870  ;;  %v2477_v7 = vld [vmem:[#allocation3 + $0x58] sm:$0xc0] }
 0x3fb   :  { %v2493_v45 = vrot.slane %v2477_v7, 2  ;;  %v3126_v7 = vld [vmem:[%s10000_s4 + $0x150] sm:$0xff] }
 0x3fe   :  { %2246 = vrot.lane.b32.xlu0 %v2241_v38, %s6557_s3  ;;  %2346 = vrot.lane.b32.xlu1 %v2340_v17, %s6557_s3  ;;  %v1845_v34 = vpop.permute.xlu0 %1844  ;;  %v5991_v38 = vpack.c.bf16 %v3117_v60, %v3116_v21  ;;  %v3118_v17 = vld [vmem:[%s10000_s4 + $0x110] sm:$0xff]  ;;  %v2518_v21 = vld [vmem:[#allocation3] sm:$0x3c]  ;;  %v2576_v60 = vld [vmem:[#allocation3 + $0x50] sm:$0xf] }
 0x3ff   :  { %v1850_v23 = vsel %vm1848_vm15, %v1845_v34, %v1847_v27  ;;  %v5995_v15 = vpack.c.bf16 %v3119_v43, %v3118_v17  ;;  %v2526_v27 = vrot.slane %v2520_v36, 6  ;;  %v2524_v48 = vrot.slane %v2518_v21, 6  ;;  %v2599_v43 = vld [vmem:[#allocation3 + $0x48] sm:$0xf] }
 0x400   :  { %1854 = vst [vmem:[#allocation4 + $0x8] sm:$0xf0] %v1850_v23  ;;  %v1869_v51 = vpop.permute.xlu1 %1868  ;;  %v2550_v23 = vld [vmem:[#allocation3 + $0x10] sm:$0x3c]  ;;  %v2605_v36 = vrot.slane %v2599_v43, 4 }
 0x401   :  { %v1874_v2 = vsel %vm1848_vm15, %v1869_v51, %v1871_v31  ;;  %v2556_v35 = vrot.slane %v2550_v23, 6  ;;  %v2525_v51 = vrot.slane %v2519_v26, 6  ;;  %v2705_v23 = vld [vmem:[#allocation3 + $0x70] sm:$0x7]  ;;  %v2754_v21 = vld [vmem:[#allocation3 + $0x68] sm:$0x7] }
 0x402   :  { %2348 = vrot.lane.b32.xlu0 %v2343_v57, %s6557_s3  ;;  %2344 = vrot.lane.b32.xlu1 %v2337_v19, %s6557_s3  ;;  %v1843_v55 = vpop.permute.xlu0 %1842  ;;  %1878 = vst [vmem:[#allocation4 + $0x80] sm:$0xf0] %v1874_v2  ;;  %v2495_v57 = vsel %vm1911_vm11, %v2493_v45, %v2494_v63  ;;  %v3137_v19 = vld [vmem:[%s10000_s4 + $0x1a8] sm:$0xff]  ;;  %v2555_v2 = vrot.slane %v2549_v61, 6  ;;  %v3128_v45 = vld [vmem:[%s10000_s4 + $0x160] sm:$0xff] }
 0x403   :  { %v1849_v20 = vsel %vm1848_vm15, %v1843_v55, %v1845_v34  ;;  %v3138_v34 = vld [vmem:[%s10000_s4 + $0x1b0] sm:$0xff]  ;;  %v3145_v63 = vld [vmem:[%s10000_s4 + $0x1e8] sm:$0xff] }
 0x404   :  { %1853 = vst [vmem:[#allocation4] sm:$0xf0] %v1849_v20  ;;  %v3141_v20 = vld [vmem:[%s10000_s4 + $0x1c8] sm:$0xff] }
 0x406   :  { %2295 = vrot.lane.b32.xlu0 %v2289_v47, %s6557_s3  ;;  %2373 = vrot.lane.b32.xlu1 %v2368_v37, %s6557_s3  ;;  %v1873_v30 = vpop.permute.xlu0 %1872  ;;  %v2439_v37 = vrot.slane %v2425_v41, 2  ;;  %v2424_v47 = vld [vmem:[#allocation3 + $0x40] sm:$0xc0]  ;;  %v3146_v41 = vld [vmem:[%s10000_s4 + $0x1f0] sm:$0xff] }
 0x407   :  { %v1875_v9 = vsel %vm1848_vm15, %v1871_v31, %v1873_v30  ;;  %v3021_v3 = vld [vmem:[#allocation4 + $0x8] sm:$0xff]  ;;  %v3143_v30 = vld [vmem:[%s10000_s4 + $0x1d8] sm:$0xff] }
 0x408   :  { %1879 = vst [vmem:[#allocation4 + $0x88] sm:$0xf0] %v1875_v9  ;;  %3404 = vmatprep.mubr.f32.mxu1 %v3021_v3  ;;  %v2441_v40 = vsel %vm1911_vm11, %v2439_v37, %v2440_v1  ;;  %v3122_v31 = vld [vmem:[%s10000_s4 + $0x130] sm:$0xff]  ;;  %v3127_v9 = vld [vmem:[%s10000_s4 + $0x158] sm:$0xff]  ;;  %v2582_v3 = vrot.slane %v2576_v60, 4  ;;  %v2581_v1 = vrot.slane %v2575_v24, 4 }
 0x409   :  { %v3036_v13 = vld [vmem:[#allocation4 + $0x80] sm:$0xff]  ;;  %v6003_v42 = vpack.c.bf16 %v3123_v25, %v3122_v31  ;;  %v6011_v62 = vpack.c.bf16 %v3127_v9, %v3126_v7  ;;  %v3164_v37 = vld [vmem:[%s10000_s4 + $0x280] sm:$0xff]  ;;  %v2702_v31 = vld [vmem:[#allocation3 + $0x50] sm:$0x80] }
 0x40a   :  { %2293 = vrot.lane.b32.xlu0 %v2286_v29, %s6557_s3  ;;  %2396 = vrot.lane.b32.xlu1 %v2392_v56, %s6557_s3  ;;  %v5997_v56 = vpack.c.bf16 %v3137_v19, %v3136_v11  ;;  %v3120_v29 = vld [vmem:[%s10000_s4 + $0x120] sm:$0xff]  ;;  %v3130_v19 = vld [vmem:[%s10000_s4 + $0x170] sm:$0xff]  ;;  %v2630_v25 = vld [vmem:[#allocation3 + $0x20] sm:$0x1e]  ;;  %v2718_v26 = vrot.slane %v2702_v31, 3 }
 0x40b   :  { %v3020_v49 = vld [vmem:[#allocation4] sm:$0xff]  ;;  %v5999_v16 = vpack.c.bf16 %v3121_v22, %v3120_v29  ;;  %v2601_v22 = vld [vmem:[#allocation3 + $0x58] sm:$0xf]  ;;  %v2753_v60 = vld [vmem:[#allocation3 + $0x58] sm:$0x80] }
 0x40c   :  { %3405 = vmatmul.mubr.f32.vlgmr.msra.gmra.mrb[0].mxu1 %v3020_v49  ;;  %v3147_v49 = vld [vmem:[%s10000_s4 + $0x1f8] sm:$0xff] }
 0x40d   :  { %5992 = vmatpush3.bf16.msra.mxu1 %v5991_v38  ;;  %v6013_v38 = vpack.c.bf16 %v3145_v63, %v3144_v5  ;;  %v6017_v11 = vpack.c.bf16 %v3147_v49, %v3146_v41  ;;  %v2769_v5 = vrot.slane %v2753_v60, 3  ;;  %v2796_v24 = vld [vmem:[#allocation3 + $0x10] sm:$0x78]  ;;  %v2703_v41 = vld [vmem:[#allocation3 + $0x60] sm:$0x7] }
 0x40e   :  { %2371 = vrot.lane.b32.xlu0 %v2367_v44, %s6557_s3  ;;  %2394 = vrot.lane.b32.xlu1 %v2391_v58, %s6557_s3  ;;  %v3139_v44 = vld [vmem:[%s10000_s4 + $0x1b8] sm:$0xff]  ;;  %v2436_v58 = vrot.slane %v2424_v47, 2  ;;  %v3165_v47 = vld [vmem:[%s10000_s4 + $0x288] sm:$0xff] }
 0x40f   :  { %5994 = vmatprep.subr.bf16.mxu1 %v5993_v59  ;;  %v3037_v32 = vld [vmem:[#allocation4 + $0x88] sm:$0xff]  ;;  %v6001_v6 = vpack.c.bf16 %v3139_v44, %v3138_v34  ;;  %v3129_v59 = vld [vmem:[%s10000_s4 + $0x168] sm:$0xff] }
 0x410   :  { %3409 = vmatprep.mubr.f32.mxu1 %v3037_v32  ;;  %v2438_v55 = vsel %vm1911_vm11, %v2436_v58, %v2437_v53  ;;  %v2580_v32 = vrot.slane %v2574_v14, 4  ;;  %v2631_v34 = vld [vmem:[#allocation3 + $0x28] sm:$0x1e]  ;;  %v2826_v14 = vld [vmem:[#allocation3 + $0x10] sm:$0x78] }
 0x411   :  { %3410 = vmatmul.mubr.f32.gmra.mrb[2].mxu1 %v3036_v13  ;;  %v2632_v13 = vld [vmem:[#allocation3 + $0x30] sm:$0x1e]  ;;  %v2661_v44 = vld [vmem:[#allocation3 + $0x28] sm:$0x1e]  ;;  %v2637_v58 = vrot.slane %v2631_v34, 5 }
 0x412   :  { %2369 = vrot.lane.b32.xlu0 %v2366_v46, %s6557_s3  ;;  %2449 = vrot.lane.b32.xlu1 %v2444_v50, %s6557_s3  ;;  %v3140_v46 = vld [vmem:[%s10000_s4 + $0x1c0] sm:$0xff]  ;;  %v2638_v29 = vrot.slane %v2632_v13, 5 }
 0x413   :  { %5996 = vmatpush3.bf16.msra.mxu1 %v5995_v15  ;;  %v6005_v50 = vpack.c.bf16 %v3141_v20, %v3140_v46  ;;  %v2636_v46 = vrot.slane %v2630_v25, 5  ;;  %v2858_v25 = vld [vmem:[#allocation3 + $0x50] sm:$0x1e] }
 0x414   :  { %5998 = vmatprep.subr.bf16.mxu1 %v5997_v56  ;;  %v6021_v56 = vpack.c.bf16 %v3165_v47, %v3164_v37 }
 0x416   :  { %2398 = vrot.lane.b32.xlu0 %v2393_v52, %s6557_s3  ;;  %2498 = vrot.lane.b32.xlu1 %v2492_v8, %s6557_s3  ;;  %v6009_v52 = vpack.c.bf16 %v3143_v30, %v3142_v28  ;;  %v2600_v8 = vld [vmem:[#allocation3 + $0x50] sm:$0xf] }
 0x417   :  { %6000 = vmatpush3.bf16.msra.mxu1 %v5999_v16  ;;  %v2606_v17 = vrot.slane %v2600_v8, 4 }
 0x418   :  { %6002 = vmatprep.subr.bf16.mxu1 %v6001_v6  ;;  %v2667_v6 = vrot.slane %v2661_v44, 5 }
 0x41a   :  { %2500 = vrot.lane.b32.xlu0 %v2495_v57, %s6557_s3  ;;  %2496 = vrot.lane.b32.xlu1 %v2489_v4, %s6557_s3  ;;  %v6015_v57 = vpack.c.bf16 %v3129_v59, %v3128_v45  ;;  %v3131_v4 = vld [vmem:[%s10000_s4 + $0x178] sm:$0xff]  ;;  %v2716_v59 = vrot.slane %v2704_v10, 3 }
 0x41b   :  { %6004 = vmatpush3.bf16.msra.mxu1 %v6003_v42  ;;  %v6019_v15 = vpack.c.bf16 %v3131_v4, %v3130_v19  ;;  %v2752_v42 = vld [vmem:[#allocation3 + $0x50] sm:$0x80]  ;;  %v2802_v19 = vrot.slane %v2796_v24, 7  ;;  %v2856_v24 = vld [vmem:[#allocation3 + $0x40] sm:$0x1e] }
 0x41c   :  { %6006 = vmatprep.subr.bf16.mxu1 %v6005_v50  ;;  %v2766_v28 = vrot.slane %v2752_v42, 3 }
 0x41e   :  { %2447 = vrot.lane.b32.xlu0 %v2441_v40, %s6557_s3  ;;  %2531 = vrot.lane.b32.xlu1 %v2526_v27, %s6557_s3  ;;  %v2662_v27 = vld [vmem:[#allocation3 + $0x30] sm:$0x1e]  ;;  %v2607_v40 = vrot.slane %v2601_v22, 4  ;;  %v2795_v22 = vld [vmem:[#allocation3 + $0x8] sm:$0x78] }
 0x41f   :  { %6008 = vmatpush3.bf16.msra.mxu1 %v6007_v33  ;;  %v2668_v53 = vrot.slane %v2662_v27, 5  ;;  %v2801_v34 = vrot.slane %v2795_v22, 7 }
 0x420   :  { %6010 = vmatprep.subr.bf16.mxu1 %v6009_v52 }
 0x422   :  { %2445 = vrot.lane.b32.xlu0 %v2438_v55, %s6557_s3  ;;  %2560 = vrot.lane.b32.xlu1 %v2556_v35, %s6557_s3  ;;  %v2719_v35 = vrot.slane %v2705_v23, 3  ;;  %v2755_v55 = vld [vmem:[#allocation3 + $0x70] sm:$0x7] }
 0x423   :  { %6012 = vmatpush3.bf16.msra.mxu1 %v6011_v62  ;;  %v2767_v12 = vrot.slane %v2755_v55, 3  ;;  %v2701_v62 = vld [vmem:[#allocation3 + $0x48] sm:$0x80] }
 0x424   :  { %6014 = vmatprep.subr.bf16.mxu1 %v6013_v38  ;;  %v2720_v50 = vsel %vm2015_vm13, %v2718_v26, %v2719_v35  ;;  %v2715_v49 = vrot.slane %v2701_v62, 3  ;;  %v2827_v35 = vld [vmem:[#allocation3 + $0x18] sm:$0x78] }
 0x425   :  { %v2768_v9 = vsel %vm2015_vm13, %v2766_v28, %v2767_v12  ;;  %v2833_v60 = vrot.slane %v2827_v35, 7  ;;  %v3157_v35 = vld [vmem:[%s10000_s4 + $0x248] sm:$0xff] }
 0x426   :  { %2529 = vrot.lane.b32.xlu0 %v2525_v51, %s6557_s3  ;;  %2558 = vrot.lane.b32.xlu1 %v2555_v2, %s6557_s3  ;;  %v2663_v51 = vld [vmem:[#allocation3 + $0x38] sm:$0x1e]  ;;  %v2717_v4 = vsel %vm2015_vm13, %v2715_v49, %v2716_v59  ;;  %v3153_v49 = vld [vmem:[%s10000_s4 + $0x228] sm:$0xff] }
 0x427   :  { %6016 = vmatpush3.bf16.msra.mxu1 %v6015_v57  ;;  %v2756_v2 = vld [vmem:[#allocation3 + $0x78] sm:$0x7]  ;;  %v2669_v30 = vrot.slane %v2663_v51, 5  ;;  %v2700_v57 = vld [vmem:[#allocation3 + $0x40] sm:$0x80] }
 0x428   :  { %6018 = vmatprep.subr.bf16.mxu1 %v6017_v11  ;;  %v2770_v52 = vrot.slane %v2756_v2, 3  ;;  %v2712_v37 = vrot.slane %v2700_v57, 3  ;;  %v3167_v2 = vld [vmem:[%s10000_s4 + $0x298] sm:$0xff] }
 0x42a   :  { %2527 = vrot.lane.b32.xlu0 %v2524_v48, %s6557_s3  ;;  %2587 = vrot.lane.b32.xlu1 %v2582_v3, %s6557_s3  ;;  %v2751_v48 = vld [vmem:[#allocation3 + $0x48] sm:$0x80]  ;;  %v2764_v3 = vrot.slane %v2754_v21, 3  ;;  %v2771_v45 = vsel %vm2015_vm13, %v2769_v5, %v2770_v52  ;;  %v2888_v21 = vld [vmem:[#allocation3 + $0x50] sm:$0x1e] }
 0x42b   :  { %6020 = vmatpush3.bf16.msra.mxu1 %v6019_v15  ;;  %v2763_v8 = vrot.slane %v2751_v48, 3  ;;  %v2857_v48 = vld [vmem:[#allocation3 + $0x48] sm:$0x1e]  ;;  %v2894_v10 = vrot.slane %v2888_v21, 5 }
 0x42c   :  { %6022 = vmatprep.subr.bf16.mxu1 %v6021_v56  ;;  %v3150_v52 = vld [vmem:[%s10000_s4 + $0x210] sm:$0xff]  ;;  %v2863_v59 = vrot.slane %v2857_v48, 5 }
 0x42e   :  { %2562 = vrot.lane.b32.xlu0 %v2557_v39, %s6557_s3  ;;  %2610 = vrot.lane.b32.xlu1 %v2606_v17, %s6557_s3  ;;  %v2765_v17 = vsel %vm2015_vm13, %v2763_v8, %v2764_v3  ;;  %v3169_v8 = vld [vmem:[%s10000_s4 + $0x2a8] sm:$0xff] }
 0x432   :  { %2585 = vrot.lane.b32.xlu0 %v2581_v1, %s6557_s3  ;;  %2608 = vrot.lane.b32.xlu1 %v2605_v36, %s6557_s3  ;;  %v2713_v36 = vrot.slane %v2703_v41, 3  ;;  %v3152_v41 = vld [vmem:[%s10000_s4 + $0x220] sm:$0xff] }
 0x434   :  { %v2714_v56 = vsel %vm2015_vm13, %v2712_v37, %v2713_v36  ;;  %v2920_v36 = vld [vmem:[#allocation3 + $0x30] sm:$0x3c]  ;;  %v6031_v37 = vpack.c.bf16 %v3153_v49, %v3152_v41 }
 0x436   :  { %2583 = vrot.lane.b32.xlu0 %v2580_v32, %s6557_s3  ;;  %2643 = vrot.lane.b32.xlu1 %v2638_v29, %s6557_s3  ;;  %v2832_v32 = vrot.slane %v2826_v14, 7 }
 0x438   :  { %v1926_v16 = vpop.permute.xlu1 %1925 }
 0x43a   :  { %2612 = vrot.lane.b32.xlu0 %v2607_v40, %s6557_s3  ;;  %2672 = vrot.lane.b32.xlu1 %v2668_v53, %s6557_s3  ;;  %v2825_v40 = vld [vmem:[#allocation3 + $0x8] sm:$0x78] }
 0x43c   :  { %v1977_v20 = vpop.permute.xlu0 %1976  ;;  %v1975_v61 = vpop.permute.xlu1 %1974 }
 0x43d   :  { %v1979_v0 = vsel %vm1848_vm15, %v1975_v61, %v1977_v20  ;;  %v3149_v20 = vld [vmem:[%s10000_s4 + $0x208] sm:$0xff] }
 0x43e   :  { %2641 = vrot.lane.b32.xlu0 %v2637_v58, %s6557_s3  ;;  %2670 = vrot.lane.b32.xlu1 %v2667_v6, %s6557_s3  ;;  %1983 = vst [vmem:[#allocation4 + $0x188] sm:$0xf0] %v1979_v0  ;;  %v2831_v58 = vrot.slane %v2825_v40, 7  ;;  %v2794_v6 = vld [vmem:[#allocation3] sm:$0x78] }
 0x43f   :  { %v2800_v26 = vrot.slane %v2794_v6, 7  ;;  %v2889_v40 = vld [vmem:[#allocation3 + $0x58] sm:$0x1e] }
 0x440   :  { %v1973_v33 = vpop.permute.xlu1 %1972 }
 0x441   :  { %v1978_v7 = vsel %vm1848_vm15, %v1973_v33, %v1975_v61  ;;  %v3166_v61 = vld [vmem:[%s10000_s4 + $0x290] sm:$0xff] }
 0x442   :  { %2639 = vrot.lane.b32.xlu0 %v2636_v46, %s6557_s3  ;;  %2725 = vrot.lane.b32.xlu1 %v2720_v50, %s6557_s3  ;;  %1982 = vst [vmem:[#allocation4 + $0x180] sm:$0xf0] %v1978_v7  ;;  %v3148_v46 = vld [vmem:[%s10000_s4 + $0x200] sm:$0xff]  ;;  %v2864_v50 = vrot.slane %v2858_v25, 5  ;;  %v6025_v33 = vpack.c.bf16 %v3167_v2, %v3166_v61  ;;  %v3151_v7 = vld [vmem:[%s10000_s4 + $0x218] sm:$0xff] }
 0x443   :  { %v6023_v28 = vpack.c.bf16 %v3149_v20, %v3148_v46  ;;  %v3156_v25 = vld [vmem:[%s10000_s4 + $0x240] sm:$0xff]  ;;  %v3174_v61 = vld [vmem:[%s10000_s4 + $0x2d0] sm:$0xff] }
 0x444   :  { %v2030_v39 = vpop.permute.xlu1 %2029 }
 0x445   :  { %v3069_v31 = vld [vmem:[#allocation4 + $0x188] sm:$0xff] }
 0x446   :  { %2674 = vrot.lane.b32.xlu0 %v2669_v30, %s6557_s3  ;;  %2774 = vrot.lane.b32.xlu1 %v2768_v9, %s6557_s3  ;;  %v1924_v63 = vpop.permute.xlu0 %1923 }
 0x447   :  { %v1928_v38 = vsel %vm1848_vm15, %v1924_v63, %v1926_v16 }
 0x448   :  { %1932 = vst [vmem:[#allocation4 + $0x108] sm:$0xf0] %v1928_v38  ;;  %v6027_v38 = vpack.c.bf16 %v3151_v7, %v3150_v52 }
 0x449   :  { %v3068_v0 = vld [vmem:[#allocation4 + $0x180] sm:$0xff] }
 0x44a   :  { %2776 = vrot.lane.b32.xlu0 %v2771_v45, %s6557_s3  ;;  %2772 = vrot.lane.b32.xlu1 %v2765_v17, %s6557_s3  ;;  %v2079_v1 = vpop.permute.xlu1 %2078 }
 0x44c   :  { %v1922_v43 = vpop.permute.xlu0 %1921 }
 0x44d   :  { %v1927_v11 = vsel %vm1848_vm15, %v1922_v43, %v1924_v63  ;;  %v3168_v63 = vld [vmem:[%s10000_s4 + $0x2a0] sm:$0xff] }
 0x44e   :  { %1931 = vst [vmem:[#allocation4 + $0x100] sm:$0xf0] %v1927_v11  ;;  %2723 = vrot.lane.b32.xlu0 %v2717_v4, %s6557_s3  ;;  %2807 = vrot.lane.b32.xlu1 %v2802_v19, %s6557_s3  ;;  %v6029_v17 = vpack.c.bf16 %v3169_v8, %v3168_v63  ;;  %v3170_v19 = vld [vmem:[%s10000_s4 + $0x2b0] sm:$0xff]  ;;  %v3171_v4 = vld [vmem:[%s10000_s4 + $0x2b8] sm:$0xff]  ;;  %v2951_v8 = vld [vmem:[#allocation3 + $0x38] sm:$0x3c] }
 0x44f   :  { %v3053_v29 = vld [vmem:[#allocation4 + $0x108] sm:$0xff] }
 0x450   :  { %v2028_v47 = vpop.permute.xlu0 %2027  ;;  %v2077_v13 = vpop.permute.xlu1 %2076  ;;  %3414 = vmatprep.mubr.f32.mxu1 %v3053_v29 }
 0x451   :  { %v2032_v15 = vsel %vm1848_vm15, %v2028_v47, %v2030_v39  ;;  %v2082_v27 = vsel %vm1848_vm15, %v2077_v13, %v2079_v1  ;;  %v2887_v39 = vld [vmem:[#allocation3 + $0x48] sm:$0x1e]  ;;  %v2862_v13 = vrot.slane %v2856_v24, 5 }
 0x452   :  { %2036 = vst [vmem:[#allocation4 + $0x18] sm:$0xf0] %v2032_v15  ;;  %2721 = vrot.lane.b32.xlu0 %v2714_v56, %s6557_s3  ;;  %2086 = vst [vmem:[#allocation4 + $0x90] sm:$0xf0] %v2082_v27  ;;  %2836 = vrot.lane.b32.xlu1 %v2832_v32, %s6557_s3  ;;  %v6033_v15 = vpack.c.bf16 %v3171_v4, %v3170_v19  ;;  %v3154_v32 = vld [vmem:[%s10000_s4 + $0x230] sm:$0xff]  ;;  %v3155_v56 = vld [vmem:[%s10000_s4 + $0x238] sm:$0xff] }
 0x453   :  { %v2926_v27 = vrot.slane %v2920_v36, 6  ;;  %v2957_v36 = vrot.slane %v2951_v8, 6 }
 0x454   :  { %v2026_v53 = vpop.permute.xlu0 %2025  ;;  %v2134_v44 = vpop.permute.xlu1 %2133 }
 0x455   :  { %v2031_v23 = vsel %vm1848_vm15, %v2026_v53, %v2028_v47  ;;  %v3052_v16 = vld [vmem:[#allocation4 + $0x100] sm:$0xff]  ;;  %v3172_v53 = vld [vmem:[%s10000_s4 + $0x2c0] sm:$0xff] }
 0x456   :  { %2035 = vst [vmem:[#allocation4 + $0x10] sm:$0xf0] %v2031_v23  ;;  %2805 = vrot.lane.b32.xlu0 %v2801_v34, %s6557_s3  ;;  %3415 = vmatmul.mubr.f32.gmra.mrb[4].mxu1 %v3052_v16  ;;  %v3173_v34 = vld [vmem:[%s10000_s4 + $0x2c8] sm:$0xff]  ;;  %v6035_v23 = vpack.c.bf16 %v3155_v56, %v3154_v32  ;;  %v2895_v16 = vrot.slane %v2889_v40, 5  ;;  %v2975_v56 = vld [vmem:[#allocation3 + $0x68] sm:$0xf] }
 0x457   :  { %2834 = vrot.lane.b32.xlu1 %v2831_v58, %s6557_s3  ;;  %3419 = vmatprep.mubr.f32.mxu1 %v3069_v31  ;;  %v6037_v6 = vpack.c.bf16 %v3173_v34, %v3172_v53  ;;  %v2919_v31 = vld [vmem:[#allocation3 + $0x28] sm:$0x3c] }
 0x458   :  { %v2081_v55 = vpop.permute.xlu0 %2080  ;;  %v2183_v42 = vpop.permute.xlu1 %2182  ;;  %v2925_v2 = vrot.slane %v2919_v31, 6  ;;  %v2999_v40 = vld [vmem:[#allocation3 + $0x68] sm:$0xf] }
 0x459   :  { %v2083_v51 = vsel %vm1848_vm15, %v2079_v1, %v2081_v55  ;;  %v3023_v12 = vld [vmem:[#allocation4 + $0x18] sm:$0xff]  ;;  %v2893_v1 = vrot.slane %v2887_v39, 5  ;;  %v3038_v14 = vld [vmem:[#allocation4 + $0x90] sm:$0xff] }
 0x45a   :  { %2087 = vst [vmem:[#allocation4 + $0x98] sm:$0xf0] %v2083_v51  ;;  %2803 = vrot.lane.b32.xlu0 %v2800_v26, %s6557_s3  ;;  %3420 = vmatmul.mubr.f32.gmra.mrb[6].mxu1 %v3068_v0  ;;  %v6039_v0 = vpack.c.bf16 %v3157_v35, %v3156_v25  ;;  %v3005_v25 = vrot.slane %v2999_v40, 4  ;;  %v2974_v35 = vld [vmem:[#allocation3 + $0x60] sm:$0xf] }
 0x45b   :  { %2869 = vrot.lane.b32.xlu1 %v2864_v50, %s6557_s3  ;;  %3489 = vmatprep.mubr.f32.mxu1 %v3023_v12  ;;  %v2949_v50 = vld [vmem:[#allocation3 + $0x28] sm:$0x3c] }
 0x45c   :  { %v2185_v30 = vpop.permute.xlu0 %2184  ;;  %v2181_v9 = vpop.permute.xlu1 %2180  ;;  %v2955_v52 = vrot.slane %v2949_v50, 6  ;;  %v3182_v50 = vld [vmem:[%s10000_s4 + $0x310] sm:$0xff] }
 0x45d   :  { %v2187_v3 = vsel %vm1848_vm15, %v2183_v42, %v2185_v30  ;;  %v3022_v5 = vld [vmem:[#allocation4 + $0x10] sm:$0xff]  ;;  %v2186_v62 = vsel %vm1848_vm15, %v2181_v9, %v2183_v42  ;;  %v3158_v30 = vld [vmem:[%s10000_s4 + $0x250] sm:$0xff]  ;;  %v3176_v9 = vld [vmem:[%s10000_s4 + $0x2e0] sm:$0xff] }
 0x45e   :  { %2191 = vst [vmem:[#allocation4 + $0x198] sm:$0xf0] %v2187_v3  ;;  %2838 = vrot.lane.b32.xlu0 %v2833_v60, %s6557_s3  ;;  %3490 = vmatmul.mubr.f32.vlgmr.msra.gmra.mrb[8].mxu1 %v3022_v5  ;;  %2190 = vst [vmem:[#allocation4 + $0x190] sm:$0xf0] %v2186_v62  ;;  %v3175_v42 = vld [vmem:[%s10000_s4 + $0x2d8] sm:$0xff]  ;;  %v3177_v3 = vld [vmem:[%s10000_s4 + $0x2e8] sm:$0xff] }
 0x45f   :  { %2898 = vrot.lane.b32.xlu1 %v2894_v10, %s6557_s3  ;;  %6024 = vmatpush3.bf16.msra.mxu1 %v6023_v28  ;;  %v6041_v21 = vpack.c.bf16 %v3175_v42, %v3174_v61  ;;  %v2918_v28 = vld [vmem:[#allocation3 + $0x20] sm:$0x3c]  ;;  %v3159_v60 = vld [vmem:[%s10000_s4 + $0x258] sm:$0xff]  ;;  %v2980_v61 = vrot.slane %v2974_v35, 4 }
 0x460   :  { %v2132_v45 = vpop.permute.xlu0 %2131  ;;  %6026 = vmatprep.subr.bf16.mxu1 %v6025_v33  ;;  %v2216_v43 = vpop.permute.xlu1 %2215  ;;  %v2976_v10 = vld [vmem:[#allocation3 + $0x70] sm:$0xf]  ;;  %v6043_v63 = vpack.c.bf16 %v3159_v60, %v3158_v30  ;;  %v2924_v39 = vrot.slane %v2918_v28, 6  ;;  %v3200_v28 = vld [vmem:[%s10000_s4 + $0x3a0] sm:$0xff]  ;;  %v3201_v30 = vld [vmem:[%s10000_s4 + $0x3a8] sm:$0xff] }
 0x461   :  { %v2136_v57 = vsel %vm1848_vm15, %v2132_v45, %v2134_v44  ;;  %v3039_v11 = vld [vmem:[#allocation4 + $0x98] sm:$0xff]  ;;  %v2950_v44 = vld [vmem:[#allocation3 + $0x30] sm:$0x3c]  ;;  %v2982_v49 = vrot.slane %v2976_v10, 4  ;;  %v3202_v10 = vld [vmem:[%s10000_s4 + $0x3b0] sm:$0xff] }
 0x462   :  { %2140 = vst [vmem:[#allocation4 + $0x118] sm:$0xf0] %v2136_v57  ;;  %2867 = vrot.lane.b32.xlu0 %v2863_v59, %s6557_s3  ;;  %3494 = vmatprep.mubr.f32.mxu1 %v3039_v11  ;;  %v2956_v46 = vrot.slane %v2950_v44, 6  ;;  %v3161_v59 = vld [vmem:[%s10000_s4 + $0x268] sm:$0xff]  ;;  %v3000_v11 = vld [vmem:[#allocation3 + $0x70] sm:$0xf] }
 0x463   :  { %2896 = vrot.lane.b32.xlu1 %v2893_v1, %s6557_s3  ;;  %6028 = vmatpush3.bf16.msra.mxu1 %v6027_v38  ;;  %v6045_v38 = vpack.c.bf16 %v3177_v3, %v3176_v9  ;;  %v3179_v1 = vld [vmem:[%s10000_s4 + $0x2f8] sm:$0xff]  ;;  %v3006_v32 = vrot.slane %v3000_v11, 4  ;;  %v2981_v44 = vrot.slane %v2975_v56, 4  ;;  %v3184_v9 = vld [vmem:[%s10000_s4 + $0x320] sm:$0xff]  ;;  %v3185_v3 = vld [vmem:[%s10000_s4 + $0x328] sm:$0xff] }
 0x464   :  { %3495 = vmatmul.mubr.f32.gmra.mrb[10].mxu1 %v3038_v14  ;;  %v2130_v47 = vpop.permute.xlu0 %2129  ;;  %6030 = vmatprep.subr.bf16.mxu1 %v6029_v17  ;;  %v8676_v29 = vpop.permute.xlu1 %2244  ;;  %v3178_v17 = vld [vmem:[%s10000_s4 + $0x2f0] sm:$0xff]  ;;  %v3205_v11 = vld [vmem:[%s10000_s4 + $0x3c8] sm:$0xff] }
 0x465   :  { %v2135_v22 = vsel %vm1848_vm15, %v2130_v47, %v2132_v45  ;;  %v3071_v5 = vld [vmem:[#allocation4 + $0x198] sm:$0xff]  ;;  %v6049_v14 = vpack.c.bf16 %v3179_v1, %v3178_v17  ;;  %v3163_v47 = vld [vmem:[%s10000_s4 + $0x278] sm:$0xff] }
 0x466   :  { %2139 = vst [vmem:[#allocation4 + $0x110] sm:$0xf0] %v2135_v22  ;;  %2865 = vrot.lane.b32.xlu0 %v2862_v13, %s6557_s3  ;;  %v3160_v45 = vld [vmem:[%s10000_s4 + $0x260] sm:$0xff]  ;;  %v3197_v22 = vld [vmem:[%s10000_s4 + $0x388] sm:$0xff] }
 0x467   :  { %2931 = vrot.lane.b32.xlu1 %v2926_v27, %s6557_s3  ;;  %6032 = vmatpush3.bf16.msra.mxu1 %v6031_v37  ;;  %v6047_v19 = vpack.c.bf16 %v3161_v59, %v3160_v45  ;;  %v3162_v37 = vld [vmem:[%s10000_s4 + $0x270] sm:$0xff]  ;;  %v6063_v45 = vpack.c.bf16 %v3185_v3, %v3184_v9  ;;  %v3204_v1 = vld [vmem:[%s10000_s4 + $0x3c0] sm:$0xff]  ;;  %v3213_v3 = vld [vmem:[%s10000_s4 + $0x408] sm:$0xff] }
 0x468   :  { %v2214_v58 = vpop.permute.xlu0 %2213  ;;  %6034 = vmatprep.subr.bf16.mxu1 %v6033_v15  ;;  %v2243_v55 = vpop.permute.xlu1 %2242  ;;  %v6051_v53 = vpack.c.bf16 %v3163_v47, %v3162_v37  ;;  %v3188_v37 = vld [vmem:[%s10000_s4 + $0x340] sm:$0xff]  ;;  %v3189_v47 = vld [vmem:[%s10000_s4 + $0x348] sm:$0xff] }
 0x469   :  { %v2218_v26 = vsel %vm1848_vm15, %v2214_v58, %v2216_v43  ;;  %v3055_v20 = vld [vmem:[#allocation4 + $0x118] sm:$0xff]  ;;  %v2248_v51 = vsel %vm1848_vm15, %v2243_v55, %v8676_v29  ;;  %v3070_v43 = vld [vmem:[#allocation4 + $0x190] sm:$0xff]  ;;  %v3198_v55 = vld [vmem:[%s10000_s4 + $0x390] sm:$0xff] }
 0x46a   :  { %2222 = vst [vmem:[#allocation4 + $0x28] sm:$0xf0] %v2218_v26  ;;  %2900 = vrot.lane.b32.xlu0 %v2895_v16, %s6557_s3  ;;  %3499 = vmatprep.mubr.f32.mxu1 %v3055_v20  ;;  %2252 = vst [vmem:[#allocation4 + $0xa0] sm:$0xf0] %v2248_v51  ;;  %v3181_v16 = vld [vmem:[%s10000_s4 + $0x308] sm:$0xff]  ;;  %v3199_v26 = vld [vmem:[%s10000_s4 + $0x398] sm:$0xff] }
 0x46b   :  { %2960 = vrot.lane.b32.xlu1 %v2956_v46, %s6557_s3  ;;  %6036 = vmatpush3.bf16.msra.mxu1 %v6035_v23  ;;  %v6057_v42 = vpack.c.bf16 %v3199_v26, %v3198_v55  ;;  %v3001_v51 = vld [vmem:[#allocation3 + $0x78] sm:$0xf] }
 0x46c   :  { %v2212_v12 = vpop.permute.xlu0 %2211  ;;  %6038 = vmatprep.subr.bf16.mxu1 %v6037_v6  ;;  %v8710_v33 = vpop.permute.xlu1 %2297  ;;  %v3192_v26 = vld [vmem:[%s10000_s4 + $0x360] sm:$0xff] }
 0x46d   :  { %v2217_v48 = vsel %vm1848_vm15, %v2212_v12, %v2214_v58  ;;  %v3054_v7 = vld [vmem:[#allocation4 + $0x110] sm:$0xff]  ;;  %v3180_v58 = vld [vmem:[%s10000_s4 + $0x300] sm:$0xff] }
 0x46e   :  { %2221 = vst [vmem:[#allocation4 + $0x20] sm:$0xf0] %v2217_v48  ;;  %2929 = vrot.lane.b32.xlu0 %v2925_v2, %s6557_s3  ;;  %3500 = vmatmul.mubr.f32.gmra.mrb[12].mxu1 %v3054_v7  ;;  %v6055_v46 = vpack.c.bf16 %v3181_v16, %v3180_v58  ;;  %v6061_v7 = vpack.c.bf16 %v3201_v30, %v3200_v28  ;;  %v3208_v16 = vld [vmem:[%s10000_s4 + $0x3e0] sm:$0xff] }
 0x46f   :  { %2958 = vrot.lane.b32.xlu1 %v2955_v52, %s6557_s3  ;;  %6040 = vmatpush3.bf16.msra.mxu1 %v6039_v0  ;;  %v3183_v0 = vld [vmem:[%s10000_s4 + $0x318] sm:$0xff]  ;;  %v3007_v52 = vrot.slane %v3001_v51, 4  ;;  %v3212_v9 = vld [vmem:[%s10000_s4 + $0x400] sm:$0xff] }
 0x470   :  { %3504 = vmatprep.mubr.f32.mxu1 %v3071_v5  ;;  %v2247_v62 = vpop.permute.xlu0 %2246  ;;  %6042 = vmatprep.subr.bf16.mxu1 %v6041_v21  ;;  %v2347_v24 = vpop.permute.xlu1 %2346  ;;  %v3211_v51 = vld [vmem:[%s10000_s4 + $0x3f8] sm:$0xff] }
 0x471   :  { %v2249_v41 = vsel %vm1848_vm15, %v8676_v29, %v2247_v62  ;;  %v3025_v57 = vld [vmem:[#allocation4 + $0x28] sm:$0xff]  ;;  %v3196_v29 = vld [vmem:[%s10000_s4 + $0x380] sm:$0xff]  ;;  %v3040_v8 = vld [vmem:[#allocation4 + $0xa0] sm:$0xff] }
 0x472   :  { %2253 = vst [vmem:[#allocation4 + $0xa8] sm:$0xf0] %v2249_v41  ;;  %2927 = vrot.lane.b32.xlu0 %v2924_v39, %s6557_s3  ;;  %3505 = vmatmul.mubr.f32.gmra.mrb[14].mxu1 %v3070_v43  ;;  %v6053_v23 = vpack.c.bf16 %v3197_v22, %v3196_v29  ;;  %v3203_v39 = vld [vmem:[%s10000_s4 + $0x3b8] sm:$0xff] }
 0x473   :  { %2987 = vrot.lane.b32.xlu1 %v2982_v49, %s6557_s3  ;;  %6044 = vmatpush3.bf16.msra.mxu1 %v6043_v63  ;;  %v6065_v17 = vpack.c.bf16 %v3203_v39, %v3202_v10  ;;  %v3187_v41 = vld [vmem:[%s10000_s4 + $0x338] sm:$0xff]  ;;  %v6087_v39 = vpack.c.bf16 %v3213_v3, %v3212_v9 }
 0x474   :  { %3574 = vmatprep.mubr.f32.mxu1 %v3025_v57  ;;  %v2349_v4 = vpop.permute.xlu0 %2348  ;;  %6046 = vmatprep.subr.bf16.mxu1 %v6045_v38  ;;  %v2345_v13 = vpop.permute.xlu1 %2344  ;;  %v3207_v22 = vld [vmem:[%s10000_s4 + $0x3d8] sm:$0xff] }
 0x475   :  { %v2351_v15 = vsel %vm1848_vm15, %v2347_v24, %v2349_v4  ;;  %v2350_v27 = vsel %vm1848_vm15, %v2345_v13, %v2347_v24  ;;  %v3024_v21 = vld [vmem:[#allocation4 + $0x20] sm:$0xff]  ;;  %v3186_v24 = vld [vmem:[%s10000_s4 + $0x330] sm:$0xff] }
 0x476   :  { %2355 = vst [vmem:[#allocation4 + $0x1a8] sm:$0xf0] %v2351_v15  ;;  %2962 = vrot.lane.b32.xlu0 %v2957_v36, %s6557_s3  ;;  %2354 = vst [vmem:[#allocation4 + $0x1a0] sm:$0xf0] %v2350_v27  ;;  %v6067_v4 = vpack.c.bf16 %v3187_v41, %v3186_v24  ;;  %v3206_v13 = vld [vmem:[%s10000_s4 + $0x3d0] sm:$0xff]  ;;  %v6071_v27 = vpack.c.bf16 %v3189_v47, %v3188_v37 }
 0x477   :  { %3010 = vrot.lane.b32.xlu1 %v3006_v32, %s6557_s3  ;;  %6048 = vmatpush3.bf16.msra.mxu1 %v6047_v19 }
 0x478   :  { %v2296_v34 = vpop.permute.xlu0 %2295  ;;  %6050 = vmatprep.subr.bf16.mxu1 %v6049_v14  ;;  %v2374_v6 = vpop.permute.xlu1 %2373  ;;  %v6069_v14 = vpack.c.bf16 %v3205_v11, %v3204_v1 }
 0x479   :  { %v2300_v31 = vsel %vm1848_vm15, %v2296_v34, %v8710_v33  ;;  %v3041_v60 = vld [vmem:[#allocation4 + $0xa8] sm:$0xff]  ;;  %v6059_v33 = vpack.c.bf16 %v3183_v0, %v3182_v50 }
 0x47a   :  { %2304 = vst [vmem:[#allocation4 + $0x128] sm:$0xf0] %v2300_v31  ;;  %2985 = vrot.lane.b32.xlu0 %v2981_v44, %s6557_s3  ;;  %v3191_v44 = vld [vmem:[%s10000_s4 + $0x358] sm:$0xff] }
 0x47b   :  { %3008 = vrot.lane.b32.xlu1 %v3005_v25, %s6557_s3  ;;  %6052 = vmatpush3.bf16.msra.mxu1 %v6051_v53  ;;  %v6073_v53 = vpack.c.bf16 %v3207_v22, %v3206_v13 }
 0x47c   :  { %v2294_v20 = vpop.permute.xlu0 %2293  ;;  %6054 = vmatprep.subr.bf16.mxu1 %v6053_v23  ;;  %v2397_v12 = vpop.permute.xlu1 %2396 }
 0x47d   :  { %v2299_v2 = vsel %vm1848_vm15, %v2294_v20, %v2296_v34  ;;  %v3073_v19 = vld [vmem:[#allocation4 + $0x1a8] sm:$0xff]  ;;  %v3072_v56 = vld [vmem:[#allocation4 + $0x1a0] sm:$0xff] }
 0x47e   :  { %2303 = vst [vmem:[#allocation4 + $0x120] sm:$0xf0] %v2299_v2  ;;  %3575 = vmatmul.mubr.f32.vlgmr.msra.gmra.mrb[16].mxu1 %v3024_v21  ;;  %2983 = vrot.lane.b32.xlu0 %v2980_v61, %s6557_s3  ;;  %v3190_v34 = vld [vmem:[%s10000_s4 + $0x350] sm:$0xff]  ;;  %v3195_v21 = vld [vmem:[%s10000_s4 + $0x378] sm:$0xff] }
 0x47f   :  { %3579 = vmatprep.mubr.f32.mxu1 %v3041_v60  ;;  %6056 = vmatpush3.bf16.msra.mxu1 %v6055_v46  ;;  %v6075_v25 = vpack.c.bf16 %v3191_v44, %v3190_v34  ;;  %v3193_v46 = vld [vmem:[%s10000_s4 + $0x368] sm:$0xff]  ;;  %v3194_v2 = vld [vmem:[%s10000_s4 + $0x370] sm:$0xff]  ;;  %v3228_v60 = vld [vmem:[%s10000_s4 + $0x480] sm:$0xff] }
 0x480   :  { %v2372_v48 = vpop.permute.xlu0 %2371  ;;  %6058 = vmatprep.subr.bf16.mxu1 %v6057_v42  ;;  %v2395_v5 = vpop.permute.xlu1 %2394  ;;  %v3210_v42 = vld [vmem:[%s10000_s4 + $0x3f0] sm:$0xff]  ;;  %v6079_v50 = vpack.c.bf16 %v3193_v46, %v3192_v26  ;;  %v3220_v26 = vld [vmem:[%s10000_s4 + $0x440] sm:$0xff]  ;;  %v3221_v46 = vld [vmem:[%s10000_s4 + $0x448] sm:$0xff] }
 0x481   :  { %v2376_v63 = vsel %vm1848_vm15, %v2372_v48, %v2374_v6  ;;  %v3057_v62 = vld [vmem:[#allocation4 + $0x128] sm:$0xff]  ;;  %v2400_v38 = vsel %vm1848_vm15, %v2395_v5, %v2397_v12  ;;  %v3209_v6 = vld [vmem:[%s10000_s4 + $0x3e8] sm:$0xff] }
 0x482   :  { %2380 = vst [vmem:[#allocation4 + $0x38] sm:$0xf0] %v2376_v63  ;;  %3580 = vmatmul.mubr.f32.gmra.mrb[18].mxu1 %v3040_v8  ;;  %3012 = vrot.lane.b32.xlu0 %v3007_v52, %s6557_s3  ;;  %2404 = vst [vmem:[#allocation4 + $0xb0] sm:$0xf0] %v2400_v38  ;;  %v6077_v55 = vpack.c.bf16 %v3209_v6, %v3208_v16  ;;  %v3230_v63 = vld [vmem:[%s10000_s4 + $0x490] sm:$0xff]  ;;  %v3231_v8 = vld [vmem:[%s10000_s4 + $0x498] sm:$0xff] }
 0x483   :  { %3584 = vmatprep.mubr.f32.mxu1 %v3057_v62  ;;  %6060 = vmatpush3.bf16.msra.mxu1 %v6059_v33  ;;  %v3229_v33 = vld [vmem:[%s10000_s4 + $0x488] sm:$0xff] }
 0x484   :  { %v2370_v59 = vpop.permute.xlu0 %2369  ;;  %6062 = vmatprep.subr.bf16.mxu1 %v6061_v7  ;;  %v2450_v49 = vpop.permute.xlu1 %2449  ;;  %v6085_v7 = vpack.c.bf16 %v3229_v33, %v3228_v60  ;;  %v3237_v16 = vld [vmem:[%s10000_s4 + $0x4c8] sm:$0xff] }
 0x485   :  { %v2375_v43 = vsel %vm1848_vm15, %v2370_v59, %v2372_v48  ;;  %v3056_v57 = vld [vmem:[#allocation4 + $0x120] sm:$0xff]  ;;  %v6083_v48 = vpack.c.bf16 %v3195_v21, %v3194_v2  ;;  %v3214_v59 = vld [vmem:[%s10000_s4 + $0x410] sm:$0xff] }
 0x486   :  { %2379 = vst [vmem:[#allocation4 + $0x30] sm:$0xf0] %v2375_v43  ;;  %3585 = vmatmul.mubr.f32.gmra.mrb[20].mxu1 %v3056_v57  ;;  %v3232_v43 = vld [vmem:[%s10000_s4 + $0x4a0] sm:$0xff]  ;;  %v3233_v57 = vld [vmem:[%s10000_s4 + $0x4a8] sm:$0xff] }
 0x487   :  { %6064 = vmatpush3.bf16.msra.mxu1 %v6063_v45  ;;  %3589 = vmatprep.mubr.f32.mxu1 %v3073_v19  ;;  %v6089_v45 = vpack.c.bf16 %v3231_v8, %v3230_v63 }
 0x488   :  { %v2399_v36 = vpop.permute.xlu0 %2398  ;;  %6066 = vmatprep.subr.bf16.mxu1 %v6065_v17  ;;  %v2499_v15 = vpop.permute.xlu1 %2498  ;;  %v3215_v17 = vld [vmem:[%s10000_s4 + $0x418] sm:$0xff] }
 0x489   :  { %v2401_v32 = vsel %vm1848_vm15, %v2397_v12, %v2399_v36  ;;  %v3027_v29 = vld [vmem:[#allocation4 + $0x38] sm:$0xff]  ;;  %v6081_v12 = vpack.c.bf16 %v3211_v51, %v3210_v42  ;;  %v6091_v11 = vpack.c.bf16 %v3215_v17, %v3214_v59  ;;  %v3042_v13 = vld [vmem:[#allocation4 + $0xb0] sm:$0xff]  ;;  %v3238_v51 = vld [vmem:[%s10000_s4 + $0x4d0] sm:$0xff] }
 0x48a   :  { %2405 = vst [vmem:[#allocation4 + $0xb8] sm:$0xf0] %v2401_v32  ;;  %3590 = vmatmul.mubr.f32.gmra.mrb[22].mxu1 %v3072_v56  ;;  %v3216_v36 = vld [vmem:[%s10000_s4 + $0x420] sm:$0xff]  ;;  %v3235_v32 = vld [vmem:[%s10000_s4 + $0x4b8] sm:$0xff] }
 0x48b   :  { %6068 = vmatpush3.bf16.msra.mxu1 %v6067_v4  ;;  %3659 = vmatprep.mubr.f32.mxu1 %v3027_v29  ;;  %v6093_v4 = vpack.c.bf16 %v3233_v57, %v3232_v43  ;;  %v3260_v57 = vld [vmem:[%s10000_s4 + $0x580] sm:$0xff] }
 0x48c   :  { %v2501_v40 = vpop.permute.xlu0 %2500  ;;  %6070 = vmatprep.subr.bf16.mxu1 %v6069_v14  ;;  %v2497_v23 = vpop.permute.xlu1 %2496  ;;  %v3217_v14 = vld [vmem:[%s10000_s4 + $0x428] sm:$0xff] }
 0x48d   :  { %v2503_v58 = vsel %vm1848_vm15, %v2499_v15, %v2501_v40  ;;  %v2502_v31 = vsel %vm1848_vm15, %v2497_v23, %v2499_v15  ;;  %v3234_v15 = vld [vmem:[%s10000_s4 + $0x4b0] sm:$0xff]  ;;  %v6095_v29 = vpack.c.bf16 %v3217_v14, %v3216_v36  ;;  %v3244_v36 = vld [vmem:[%s10000_s4 + $0x500] sm:$0xff]  ;;  %v3245_v14 = vld [vmem:[%s10000_s4 + $0x508] sm:$0xff] }
 0x48e   :  { %2507 = vst [vmem:[#allocation4 + $0x1b8] sm:$0xf0] %v2503_v58  ;;  %2506 = vst [vmem:[#allocation4 + $0x1b0] sm:$0xf0] %v2502_v31  ;;  %v3218_v40 = vld [vmem:[%s10000_s4 + $0x430] sm:$0xff]  ;;  %v3236_v58 = vld [vmem:[%s10000_s4 + $0x4c0] sm:$0xff] }
 0x48f   :  { %6072 = vmatpush3.bf16.msra.mxu1 %v6071_v27  ;;  %v6097_v27 = vpack.c.bf16 %v3235_v32, %v3234_v15  ;;  %v3263_v15 = vld [vmem:[%s10000_s4 + $0x598] sm:$0xff]  ;;  %v6119_v32 = vpack.c.bf16 %v3245_v14, %v3244_v36 }
 0x490   :  { %v2448_v35 = vpop.permute.xlu0 %2447  ;;  %6074 = vmatprep.subr.bf16.mxu1 %v6073_v53  ;;  %v2532_v20 = vpop.permute.xlu1 %2531  ;;  %v3219_v53 = vld [vmem:[%s10000_s4 + $0x438] sm:$0xff] }
 0x491   :  { %v2452_v61 = vsel %vm1848_vm15, %v2448_v35, %v2450_v49  ;;  %v3026_v49 = vld [vmem:[#allocation4 + $0x30] sm:$0xff]  ;;  %v3043_v1 = vld [vmem:[#allocation4 + $0xb8] sm:$0xff] }
 0x492   :  { %2456 = vst [vmem:[#allocation4 + $0x138] sm:$0xf0] %v2452_v61 }
 0x493   :  { %6076 = vmatpush3.bf16.msra.mxu1 %v6075_v25  ;;  %v6099_v25 = vpack.c.bf16 %v3219_v53, %v3218_v40 }
 0x494   :  { %v2446_v0 = vpop.permute.xlu0 %2445  ;;  %6078 = vmatprep.subr.bf16.mxu1 %v6077_v55  ;;  %v2561_v28 = vpop.permute.xlu1 %2560  ;;  %v6101_v55 = vpack.c.bf16 %v3237_v16, %v3236_v58 }
 0x495   :  { %v2451_v30 = vsel %vm1848_vm15, %v2446_v0, %v2448_v35  ;;  %v3075_v31 = vld [vmem:[#allocation4 + $0x1b8] sm:$0xff]  ;;  %v3074_v42 = vld [vmem:[#allocation4 + $0x1b0] sm:$0xff] }
 0x496   :  { %2455 = vst [vmem:[#allocation4 + $0x130] sm:$0xf0] %v2451_v30  ;;  %v3223_v30 = vld [vmem:[%s10000_s4 + $0x458] sm:$0xff] }
 0x497   :  { %6080 = vmatpush3.bf16.msra.mxu1 %v6079_v50  ;;  %v3239_v50 = vld [vmem:[%s10000_s4 + $0x4d8] sm:$0xff] }
 0x498   :  { %v2530_v52 = vpop.permute.xlu0 %2529  ;;  %6082 = vmatprep.subr.bf16.mxu1 %v6081_v12  ;;  %v2559_v10 = vpop.permute.xlu1 %2558  ;;  %v6103_v12 = vpack.c.bf16 %v3221_v46, %v3220_v26  ;;  %v6105_v21 = vpack.c.bf16 %v3239_v50, %v3238_v51 }
 0x499   :  { %v2534_v5 = vsel %vm1848_vm15, %v2530_v52, %v2532_v20  ;;  %v2564_v62 = vsel %vm1848_vm15, %v2559_v10, %v2561_v28  ;;  %v3059_v56 = vld [vmem:[#allocation4 + $0x138] sm:$0xff] }
 0x49a   :  { %2538 = vst [vmem:[#allocation4 + $0x48] sm:$0xf0] %v2534_v5  ;;  %2568 = vst [vmem:[#allocation4 + $0xc0] sm:$0xf0] %v2564_v62  ;;  %v3224_v10 = vld [vmem:[%s10000_s4 + $0x460] sm:$0xff]  ;;  %v3225_v5 = vld [vmem:[%s10000_s4 + $0x468] sm:$0xff] }
 0x49b   :  { %6084 = vmatpush3.bf16.msra.mxu1 %v6083_v48  ;;  %v3240_v48 = vld [vmem:[%s10000_s4 + $0x4e0] sm:$0xff]  ;;  %v3242_v62 = vld [vmem:[%s10000_s4 + $0x4f0] sm:$0xff] }
 0x49c   :  { %v2528_v38 = vpop.permute.xlu0 %2527  ;;  %6086 = vmatprep.subr.bf16.mxu1 %v6085_v7  ;;  %v2588_v24 = vpop.permute.xlu1 %2587 }
 0x49d   :  { %v2533_v41 = vsel %vm1848_vm15, %v2528_v38, %v2530_v52  ;;  %v3058_v23 = vld [vmem:[#allocation4 + $0x130] sm:$0xff]  ;;  %v3241_v52 = vld [vmem:[%s10000_s4 + $0x4e8] sm:$0xff] }
 0x49e   :  { %2537 = vst [vmem:[#allocation4 + $0x40] sm:$0xf0] %v2533_v41  ;;  %3660 = vmatmul.mubr.f32.vlgmr.msra.gmra.mrb[24].mxu1 %v3026_v49  ;;  %v6109_v3 = vpack.c.bf16 %v3241_v52, %v3240_v48  ;;  %v3227_v41 = vld [vmem:[%s10000_s4 + $0x478] sm:$0xff]  ;;  %v3269_v48 = vld [vmem:[%s10000_s4 + $0x5c8] sm:$0xff] }
 0x49f   :  { %3664 = vmatprep.mubr.f32.mxu1 %v3043_v1  ;;  %6088 = vmatpush3.bf16.msra.mxu1 %v6087_v39  ;;  %v3243_v39 = vld [vmem:[%s10000_s4 + $0x4f8] sm:$0xff]  ;;  %v3261_v1 = vld [vmem:[%s10000_s4 + $0x588] sm:$0xff] }
 0x4a0   :  { %v2563_v19 = vpop.permute.xlu0 %2562  ;;  %6090 = vmatprep.subr.bf16.mxu1 %v6089_v45  ;;  %v2611_v37 = vpop.permute.xlu1 %2610  ;;  %v6111_v45 = vpack.c.bf16 %v3225_v5, %v3224_v10  ;;  %v6113_v17 = vpack.c.bf16 %v3243_v39, %v3242_v62  ;;  %v3252_v10 = vld [vmem:[%s10000_s4 + $0x540] sm:$0xff]  ;;  %v3253_v5 = vld [vmem:[%s10000_s4 + $0x548] sm:$0xff]  ;;  %v3270_v39 = vld [vmem:[%s10000_s4 + $0x5d0] sm:$0xff] }
 0x4a1   :  { %v2565_v47 = vsel %vm1848_vm15, %v2561_v28, %v2563_v19  ;;  %v3029_v0 = vld [vmem:[#allocation4 + $0x48] sm:$0xff] }
 0x4a2   :  { %2569 = vst [vmem:[#allocation4 + $0xc8] sm:$0xf0] %v2565_v47  ;;  %3665 = vmatmul.mubr.f32.gmra.mrb[26].mxu1 %v3042_v13  ;;  %v3222_v28 = vld [vmem:[%s10000_s4 + $0x450] sm:$0xff] }
 0x4a3   :  { %3669 = vmatprep.mubr.f32.mxu1 %v3059_v56  ;;  %6092 = vmatpush3.bf16.msra.mxu1 %v6091_v11  ;;  %v6107_v7 = vpack.c.bf16 %v3223_v30, %v3222_v28  ;;  %v3262_v13 = vld [vmem:[%s10000_s4 + $0x590] sm:$0xff] }
 0x4a4   :  { %v2586_v22 = vpop.permute.xlu0 %2585  ;;  %6094 = vmatprep.subr.bf16.mxu1 %v6093_v4  ;;  %v2609_v34 = vpop.permute.xlu1 %2608  ;;  %v6117_v4 = vpack.c.bf16 %v3261_v1, %v3260_v57 }
 0x4a5   :  { %v2590_v44 = vsel %vm1848_vm15, %v2586_v22, %v2588_v24  ;;  %v2614_v6 = vsel %vm1848_vm15, %v2609_v34, %v2611_v37  ;;  %v3226_v24 = vld [vmem:[%s10000_s4 + $0x470] sm:$0xff]  ;;  %v3028_v34 = vld [vmem:[#allocation4 + $0x40] sm:$0xff] }
 0x4a6   :  { %2594 = vst [vmem:[#allocation4 + $0x148] sm:$0xf0] %v2590_v44  ;;  %3670 = vmatmul.mubr.f32.gmra.mrb[28].mxu1 %v3058_v23  ;;  %2618 = vst [vmem:[#allocation4 + $0x1c0] sm:$0xf0] %v2614_v6  ;;  %v6115_v11 = vpack.c.bf16 %v3227_v41, %v3226_v24  ;;  %v3264_v44 = vld [vmem:[%s10000_s4 + $0x5a0] sm:$0xff]  ;;  %v3265_v23 = vld [vmem:[%s10000_s4 + $0x5a8] sm:$0xff] }
 0x4a7   :  { %3674 = vmatprep.mubr.f32.mxu1 %v3075_v31  ;;  %6096 = vmatpush3.bf16.msra.mxu1 %v6095_v29  ;;  %v6121_v29 = vpack.c.bf16 %v3263_v15, %v3262_v13 }
 0x4a8   :  { %v2584_v35 = vpop.permute.xlu0 %2583  ;;  %6098 = vmatprep.subr.bf16.mxu1 %v6097_v27  ;;  %v2644_v20 = vpop.permute.xlu1 %2643  ;;  %v3247_v27 = vld [vmem:[%s10000_s4 + $0x518] sm:$0xff] }
 0x4a9   :  { %v2589_v61 = vsel %vm1848_vm15, %v2584_v35, %v2586_v22  ;;  %v3246_v22 = vld [vmem:[%s10000_s4 + $0x510] sm:$0xff]  ;;  %v3248_v35 = vld [vmem:[%s10000_s4 + $0x520] sm:$0xff] }
 0x4aa   :  { %2593 = vst [vmem:[#allocation4 + $0x140] sm:$0xf0] %v2589_v61  ;;  %3675 = vmatmul.mubr.f32.gmra.mrb[30].mxu1 %v3074_v42  ;;  %v3045_v16 = vld [vmem:[#allocation4 + $0xc8] sm:$0xff]  ;;  %v6123_v6 = vpack.c.bf16 %v3247_v27, %v3246_v22  ;;  %v3267_v42 = vld [vmem:[%s10000_s4 + $0x5b8] sm:$0xff] }
 0x4ab   :  { %6100 = vmatpush3.bf16.msra.mxu1 %v6099_v25  ;;  %3744 = vmatprep.mubr.f32.mxu1 %v3029_v0  ;;  %v6125_v25 = vpack.c.bf16 %v3265_v23, %v3264_v44  ;;  %v3266_v61 = vld [vmem:[%s10000_s4 + $0x5b0] sm:$0xff]  ;;  %v3292_v23 = vld [vmem:[%s10000_s4 + $0x680] sm:$0xff] }
 0x4ac   :  { %v2613_v2 = vpop.permute.xlu0 %2612  ;;  %6102 = vmatprep.subr.bf16.mxu1 %v6101_v55  ;;  %v2673_v60 = vpop.permute.xlu1 %2672  ;;  %v3249_v55 = vld [vmem:[%s10000_s4 + $0x528] sm:$0xff] }
 0x4ad   :  { %v2615_v33 = vsel %vm1848_vm15, %v2611_v37, %v2613_v2  ;;  %v3061_v51 = vld [vmem:[#allocation4 + $0x148] sm:$0xff]  ;;  %v6127_v50 = vpack.c.bf16 %v3249_v55, %v3248_v35  ;;  %v3076_v62 = vld [vmem:[#allocation4 + $0x1c0] sm:$0xff]  ;;  %v3276_v35 = vld [vmem:[%s10000_s4 + $0x600] sm:$0xff] }
 0x4ae   :  { %2619 = vst [vmem:[#allocation4 + $0x1c8] sm:$0xf0] %v2615_v33  ;;  %v3250_v2 = vld [vmem:[%s10000_s4 + $0x530] sm:$0xff]  ;;  %v3268_v33 = vld [vmem:[%s10000_s4 + $0x5c0] sm:$0xff]  ;;  %v3277_v55 = vld [vmem:[%s10000_s4 + $0x608] sm:$0xff] }
 0x4af   :  { %6104 = vmatpush3.bf16.msra.mxu1 %v6103_v12  ;;  %v6129_v12 = vpack.c.bf16 %v3267_v42, %v3266_v61  ;;  %v3295_v61 = vld [vmem:[%s10000_s4 + $0x698] sm:$0xff]  ;;  %v6151_v42 = vpack.c.bf16 %v3277_v55, %v3276_v35 }
 0x4b0   :  { %v2642_v9 = vpop.permute.xlu0 %2641  ;;  %6106 = vmatprep.subr.bf16.mxu1 %v6105_v21  ;;  %v2671_v63 = vpop.permute.xlu1 %2670  ;;  %v3251_v21 = vld [vmem:[%s10000_s4 + $0x538] sm:$0xff] }
 0x4b1   :  { %v2646_v8 = vsel %vm1848_vm15, %v2642_v9, %v2644_v20  ;;  %v2676_v38 = vsel %vm1848_vm15, %v2671_v63, %v2673_v60  ;;  %v3044_v20 = vld [vmem:[#allocation4 + $0xc0] sm:$0xff] }
 0x4b2   :  { %2650 = vst [vmem:[#allocation4 + $0x58] sm:$0xf0] %v2646_v8  ;;  %2680 = vst [vmem:[#allocation4 + $0xd0] sm:$0xf0] %v2676_v38  ;;  %v3271_v38 = vld [vmem:[%s10000_s4 + $0x5d8] sm:$0xff] }
 0x4b3   :  { %6108 = vmatpush3.bf16.msra.mxu1 %v6107_v7  ;;  %v6131_v7 = vpack.c.bf16 %v3251_v21, %v3250_v2  ;;  %v6137_v41 = vpack.c.bf16 %v3271_v38, %v3270_v39 }
 0x4b4   :  { %v2640_v59 = vpop.permute.xlu0 %2639  ;;  %6110 = vmatprep.subr.bf16.mxu1 %v6109_v3  ;;  %v2726_v49 = vpop.permute.xlu1 %2725  ;;  %v6133_v3 = vpack.c.bf16 %v3269_v48, %v3268_v33 }
 0x4b5   :  { %v2645_v43 = vsel %vm1848_vm15, %v2640_v59, %v2642_v9  ;;  %v3077_v52 = vld [vmem:[#allocation4 + $0x1c8] sm:$0xff] }
 0x4b6   :  { %2649 = vst [vmem:[#allocation4 + $0x50] sm:$0xf0] %v2645_v43  ;;  %v3255_v43 = vld [vmem:[%s10000_s4 + $0x558] sm:$0xff] }
 0x4b7   :  { %6112 = vmatpush3.bf16.msra.mxu1 %v6111_v45 }
 0x4b8   :  { %v2675_v19 = vpop.permute.xlu0 %2674  ;;  %6114 = vmatprep.subr.bf16.mxu1 %v6113_v17  ;;  %v2775_v37 = vpop.permute.xlu1 %2774  ;;  %v6135_v17 = vpack.c.bf16 %v3253_v5, %v3252_v10 }
 0x4b9   :  { %v2677_v47 = vsel %vm1848_vm15, %v2673_v60, %v2675_v19  ;;  %v3060_v60 = vld [vmem:[#allocation4 + $0x140] sm:$0xff]  ;;  %v3031_v59 = vld [vmem:[#allocation4 + $0x58] sm:$0xff] }
 0x4ba   :  { %2681 = vst [vmem:[#allocation4 + $0xd8] sm:$0xf0] %v2677_v47  ;;  %v3273_v19 = vld [vmem:[%s10000_s4 + $0x5e8] sm:$0xff] }
 0x4bb   :  { %6116 = vmatpush3.bf16.msra.mxu1 %v6115_v11  ;;  %v3272_v11 = vld [vmem:[%s10000_s4 + $0x5e0] sm:$0xff]  ;;  %v3257_v47 = vld [vmem:[%s10000_s4 + $0x568] sm:$0xff] }
 0x4bc   :  { %v2777_v56 = vpop.permute.xlu0 %2776  ;;  %6118 = vmatprep.subr.bf16.mxu1 %v6117_v4  ;;  %v2773_v40 = vpop.permute.xlu1 %2772  ;;  %v6141_v14 = vpack.c.bf16 %v3273_v19, %v3272_v11  ;;  %v3301_v11 = vld [vmem:[%s10000_s4 + $0x6c8] sm:$0xff] }
 0x4bd   :  { %v2779_v53 = vsel %vm1848_vm15, %v2775_v37, %v2777_v56  ;;  %v2778_v58 = vsel %vm1848_vm15, %v2773_v40, %v2775_v37  ;;  %v3256_v37 = vld [vmem:[%s10000_s4 + $0x560] sm:$0xff]  ;;  %v3275_v56 = vld [vmem:[%s10000_s4 + $0x5f8] sm:$0xff]  ;;  %v3258_v40 = vld [vmem:[%s10000_s4 + $0x570] sm:$0xff] }
 0x4be   :  { %2783 = vst [vmem:[#allocation4 + $0x1d8] sm:$0xf0] %v2779_v53  ;;  %3745 = vmatmul.mubr.f32.vlgmr.msra.gmra.mrb[32].mxu1 %v3028_v34  ;;  %2782 = vst [vmem:[#allocation4 + $0x1d0] sm:$0xf0] %v2778_v58  ;;  %v3259_v53 = vld [vmem:[%s10000_s4 + $0x578] sm:$0xff]  ;;  %v3293_v58 = vld [vmem:[%s10000_s4 + $0x688] sm:$0xff] }
 0x4bf   :  { %3749 = vmatprep.mubr.f32.mxu1 %v3045_v16  ;;  %6120 = vmatpush3.bf16.msra.mxu1 %v6119_v32  ;;  %v3274_v32 = vld [vmem:[%s10000_s4 + $0x5f0] sm:$0xff] }
 0x4c0   :  { %v2724_v31 = vpop.permute.xlu0 %2723  ;;  %6122 = vmatprep.subr.bf16.mxu1 %v6121_v29  ;;  %v2808_v26 = vpop.permute.xlu1 %2807  ;;  %v6143_v29 = vpack.c.bf16 %v3257_v47, %v3256_v37  ;;  %v6145_v27 = vpack.c.bf16 %v3275_v56, %v3274_v32  ;;  %v3284_v37 = vld [vmem:[%s10000_s4 + $0x640] sm:$0xff]  ;;  %v3285_v47 = vld [vmem:[%s10000_s4 + $0x648] sm:$0xff]  ;;  %v3302_v56 = vld [vmem:[%s10000_s4 + $0x6d0] sm:$0xff] }
 0x4c1   :  { %v2728_v46 = vsel %vm1848_vm15, %v2724_v31, %v2726_v49  ;;  %v3254_v49 = vld [vmem:[%s10000_s4 + $0x550] sm:$0xff]  ;;  %v3047_v33 = vld [vmem:[#allocation4 + $0xd8] sm:$0xff] }
 0x4c2   :  { %2732 = vst [vmem:[#allocation4 + $0x158] sm:$0xf0] %v2728_v46  ;;  %3750 = vmatmul.mubr.f32.gmra.mrb[34].mxu1 %v3044_v20  ;;  %v6139_v4 = vpack.c.bf16 %v3255_v43, %v3254_v49  ;;  %v3294_v20 = vld [vmem:[%s10000_s4 + $0x690] sm:$0xff] }
 0x4c3   :  { %3754 = vmatprep.mubr.f32.mxu1 %v3061_v51  ;;  %6124 = vmatpush3.bf16.msra.mxu1 %v6123_v6  ;;  %v6147_v6 = vpack.c.bf16 %v3259_v53, %v3258_v40 }
 0x4c4   :  { %v2722_v0 = vpop.permute.xlu0 %2721  ;;  %6126 = vmatprep.subr.bf16.mxu1 %v6125_v25  ;;  %v2837_v28 = vpop.permute.xlu1 %2836  ;;  %v6149_v25 = vpack.c.bf16 %v3293_v58, %v3292_v23 }
 0x4c5   :  { %v2727_v30 = vsel %vm1848_vm15, %v2722_v0, %v2724_v31  ;;  %v3278_v0 = vld [vmem:[%s10000_s4 + $0x610] sm:$0xff]  ;;  %v3079_v19 = vld [vmem:[#allocation4 + $0x1d8] sm:$0xff]  ;;  %v3078_v32 = vld [vmem:[#allocation4 + $0x1d0] sm:$0xff] }
 0x4c6   :  { %2731 = vst [vmem:[#allocation4 + $0x150] sm:$0xf0] %v2727_v30  ;;  %3755 = vmatmul.mubr.f32.gmra.mrb[36].mxu1 %v3060_v60  ;;  %v3296_v30 = vld [vmem:[%s10000_s4 + $0x6a0] sm:$0xff]  ;;  %v3297_v60 = vld [vmem:[%s10000_s4 + $0x6a8] sm:$0xff] }
 0x4c7   :  { %3759 = vmatprep.mubr.f32.mxu1 %v3077_v52  ;;  %6128 = vmatpush3.bf16.msra.mxu1 %v6127_v50  ;;  %v6153_v50 = vpack.c.bf16 %v3295_v61, %v3294_v20  ;;  %v3288_v61 = vld [vmem:[%s10000_s4 + $0x660] sm:$0xff] }
 0x4c8   :  { %v2806_v9 = vpop.permute.xlu0 %2805  ;;  %6130 = vmatprep.subr.bf16.mxu1 %v6129_v12  ;;  %v3279_v12 = vld [vmem:[%s10000_s4 + $0x618] sm:$0xff] }
 0x4c9   :  { %v2835_v63 = vpop.permute.xlu1 %2834  ;;  %v2810_v8 = vsel %vm1848_vm15, %v2806_v9, %v2808_v26  ;;  %v6155_v48 = vpack.c.bf16 %v3279_v12, %v3278_v0  ;;  %v3063_v38 = vld [vmem:[#allocation4 + $0x158] sm:$0xff]  ;;  %v3307_v0 = vld [vmem:[%s10000_s4 + $0x6f8] sm:$0xff] }
 0x4ca   :  { %v2840_v45 = vsel %vm1848_vm15, %v2835_v63, %v2837_v28  ;;  %2814 = vst [vmem:[#allocation4 + $0x68] sm:$0xf0] %v2810_v8  ;;  %3760 = vmatmul.mubr.f32.gmra.mrb[38].mxu1 %v3076_v62  ;;  %v3046_v63 = vld [vmem:[#allocation4 + $0xd0] sm:$0xff]  ;;  %v3298_v8 = vld [vmem:[%s10000_s4 + $0x6b0] sm:$0xff] }
 0x4cb   :  { %2844 = vst [vmem:[#allocation4 + $0xe0] sm:$0xf0] %v2840_v45  ;;  %6132 = vmatpush3.bf16.msra.mxu1 %v6131_v7  ;;  %3829 = vmatprep.mubr.f32.mxu1 %v3031_v59  ;;  %v6157_v7 = vpack.c.bf16 %v3297_v60, %v3296_v30  ;;  %v3299_v62 = vld [vmem:[%s10000_s4 + $0x6b8] sm:$0xff] }
 0x4cc   :  { %v2804_v24 = vpop.permute.xlu0 %2803  ;;  %6134 = vmatprep.subr.bf16.mxu1 %v6133_v3  ;;  %v3281_v3 = vld [vmem:[%s10000_s4 + $0x628] sm:$0xff] }
 0x4cd   :  { %v2870_v57 = vpop.permute.xlu1 %2869  ;;  %v2809_v1 = vsel %vm1848_vm15, %v2804_v24, %v2806_v9  ;;  %v3280_v9 = vld [vmem:[%s10000_s4 + $0x620] sm:$0xff]  ;;  %v3282_v24 = vld [vmem:[%s10000_s4 + $0x630] sm:$0xff] }
 0x4ce   :  { %2813 = vst [vmem:[#allocation4 + $0x60] sm:$0xf0] %v2809_v1  ;;  %v6159_v45 = vpack.c.bf16 %v3281_v3, %v3280_v9  ;;  %v3300_v1 = vld [vmem:[%s10000_s4 + $0x6c0] sm:$0xff]  ;;  %v3325_v9 = vld [vmem:[%s10000_s4 + $0x788] sm:$0xff] }
 0x4cf   :  { %6136 = vmatpush3.bf16.msra.mxu1 %v6135_v17  ;;  %v6161_v17 = vpack.c.bf16 %v3299_v62, %v3298_v8  ;;  %v3326_v8 = vld [vmem:[%s10000_s4 + $0x790] sm:$0xff]  ;;  %v3327_v62 = vld [vmem:[%s10000_s4 + $0x798] sm:$0xff] }
 0x4d0   :  { %v2839_v36 = vpop.permute.xlu0 %2838  ;;  %6138 = vmatprep.subr.bf16.mxu1 %v6137_v41  ;;  %v3283_v41 = vld [vmem:[%s10000_s4 + $0x638] sm:$0xff] }
 0x4d1   :  { %v2899_v13 = vpop.permute.xlu1 %2898  ;;  %v2841_v15 = vsel %vm1848_vm15, %v2837_v28, %v2839_v36  ;;  %v3030_v28 = vld [vmem:[#allocation4 + $0x50] sm:$0xff] }
 0x4d2   :  { %2845 = vst [vmem:[#allocation4 + $0xe8] sm:$0xf0] %v2841_v15 }
 0x4d3   :  { %6140 = vmatpush3.bf16.msra.mxu1 %v6139_v4  ;;  %v6163_v4 = vpack.c.bf16 %v3283_v41, %v3282_v24  ;;  %v3328_v24 = vld [vmem:[%s10000_s4 + $0x7a0] sm:$0xff]  ;;  %v3329_v41 = vld [vmem:[%s10000_s4 + $0x7a8] sm:$0xff] }
 0x4d4   :  { %v2868_v22 = vpop.permute.xlu0 %2867  ;;  %6142 = vmatprep.subr.bf16.mxu1 %v6141_v14  ;;  %v6165_v14 = vpack.c.bf16 %v3301_v11, %v3300_v1  ;;  %v3312_v1 = vld [vmem:[%s10000_s4 + $0x720] sm:$0xff]  ;;  %v3313_v11 = vld [vmem:[%s10000_s4 + $0x728] sm:$0xff] }
 0x4d5   :  { %v2897_v34 = vpop.permute.xlu1 %2896  ;;  %v2872_v44 = vsel %vm1848_vm15, %v2868_v22, %v2870_v57  ;;  %v3062_v57 = vld [vmem:[#allocation4 + $0x150] sm:$0xff] }
 0x4d6   :  { %v2902_v16 = vsel %vm1848_vm15, %v2897_v34, %v2899_v13  ;;  %2876 = vst [vmem:[#allocation4 + $0x168] sm:$0xf0] %v2872_v44  ;;  %v3286_v34 = vld [vmem:[%s10000_s4 + $0x650] sm:$0xff]  ;;  %v3287_v44 = vld [vmem:[%s10000_s4 + $0x658] sm:$0xff] }
 0x4d7   :  { %2906 = vst [vmem:[#allocation4 + $0x1e0] sm:$0xf0] %v2902_v16  ;;  %6144 = vmatpush3.bf16.msra.mxu1 %v6143_v29  ;;  %v3303_v29 = vld [vmem:[%s10000_s4 + $0x6d8] sm:$0xff] }
 0x4d8   :  { %v2866_v31 = vpop.permute.xlu0 %2865  ;;  %6146 = vmatprep.subr.bf16.mxu1 %v6145_v27  ;;  %v6167_v27 = vpack.c.bf16 %v3285_v47, %v3284_v37  ;;  %v6169_v53 = vpack.c.bf16 %v3303_v29, %v3302_v56  ;;  %v6191_v37 = vpack.c.bf16 %v3313_v11, %v3312_v1  ;;  %v3332_v56 = vld [vmem:[%s10000_s4 + $0x7c0] sm:$0xff]  ;;  %v3333_v29 = vld [vmem:[%s10000_s4 + $0x7c8] sm:$0xff] }
 0x4d9   :  { %v2932_v26 = vpop.permute.xlu1 %2931  ;;  %v2871_v46 = vsel %vm1848_vm15, %v2866_v31, %v2868_v22  ;;  %v3033_v22 = vld [vmem:[#allocation4 + $0x68] sm:$0xff]  ;;  %v3305_v31 = vld [vmem:[%s10000_s4 + $0x6e8] sm:$0xff] }
 0x4da   :  { %2875 = vst [vmem:[#allocation4 + $0x160] sm:$0xf0] %v2871_v46 }
 0x4db   :  { %6148 = vmatpush3.bf16.msra.mxu1 %v6147_v6  ;;  %v3304_v6 = vld [vmem:[%s10000_s4 + $0x6e0] sm:$0xff] }
 0x4dc   :  { %v2901_v51 = vpop.permute.xlu0 %2900  ;;  %6150 = vmatprep.subr.bf16.mxu1 %v6149_v25  ;;  %v6173_v20 = vpack.c.bf16 %v3305_v31, %v3304_v6 }
 0x4dd   :  { %v2961_v2 = vpop.permute.xlu1 %2960  ;;  %v2903_v21 = vsel %vm1848_vm15, %v2899_v13, %v2901_v51 }
 0x4de   :  { %2907 = vst [vmem:[#allocation4 + $0x1e8] sm:$0xf0] %v2903_v21  ;;  %3830 = vmatmul.mubr.f32.vlgmr.msra.gmra.mrb[40].mxu1 %v3030_v28 }
 0x4df   :  { %3834 = vmatprep.mubr.f32.mxu1 %v3047_v33  ;;  %6152 = vmatpush3.bf16.msra.mxu1 %v6151_v42  ;;  %v5301_v23 = vpop.f32.mrb[0].mxu1  ;;  %v3289_v42 = vld [vmem:[%s10000_s4 + $0x668] sm:$0xff]  ;;  %v3290_v33 = vld [vmem:[%s10000_s4 + $0x670] sm:$0xff] }
 0x4e0   :  { %v2930_v52 = vpop.permute.xlu0 %2929  ;;  %6154 = vmatprep.subr.bf16.mxu1 %v6153_v50  ;;  %v5302_v25 = vpop.f32.mrb[1].mxu1  ;;  %v3306_v50 = vld [vmem:[%s10000_s4 + $0x6f0] sm:$0xff]  ;;  %v6175_v21 = vpack.c.bf16 %v3289_v42, %v3288_v61  ;;  %v3320_v42 = vld [vmem:[%s10000_s4 + $0x760] sm:$0xff] }
 0x4e1   :  { %v2959_v10 = vpop.permute.xlu1 %2958  ;;  %v2934_v5 = vsel %vm1848_vm15, %v2930_v52, %v2932_v26  ;;  %v9158_v55 = vadd.f32 %v5302_v25, %v5301_v23  ;;  %v6171_v26 = vpack.c.bf16 %v3287_v44, %v3286_v34  ;;  %v6177_v60 = vpack.c.bf16 %v3307_v0, %v3306_v50  ;;  %v3317_v34 = vld [vmem:[%s10000_s4 + $0x748] sm:$0xff]  ;;  %v3334_v23 = vld [vmem:[%s10000_s4 + $0x7d0] sm:$0xff]  ;;  %v3339_v0 = vld [vmem:[%s10000_s4 + $0x7f8] sm:$0xff] }
 0x4e2   :  { %v2964_v39 = vsel %vm1848_vm15, %v2959_v10, %v2961_v2  ;;  %2938 = vst [vmem:[#allocation4 + $0x78] sm:$0xf0] %v2934_v5  ;;  %3835 = vmatmul.mubr.f32.gmra.mrb[42].mxu1 %v3046_v63  ;;  %v3308_v5 = vld [vmem:[%s10000_s4 + $0x700] sm:$0xff]  ;;  %v3309_v63 = vld [vmem:[%s10000_s4 + $0x708] sm:$0xff]  ;;  %v3318_v25 = vld [vmem:[%s10000_s4 + $0x750] sm:$0xff] }
 0x4e3   :  { %2968 = vst [vmem:[#allocation4 + $0xf0] sm:$0xf0] %v2964_v39  ;;  %3839 = vmatprep.mubr.f32.mxu1 %v3063_v38  ;;  %6156 = vmatpush3.bf16.msra.mxu1 %v6155_v48  ;;  %v3291_v48 = vld [vmem:[%s10000_s4 + $0x678] sm:$0xff]  ;;  %v6183_v39 = vpack.c.bf16 %v3309_v63, %v3308_v5  ;;  %v6185_v38 = vpack.c.bf16 %v3327_v62, %v3326_v8  ;;  %v3080_v44 = vld [vmem:[#allocation4 + $0x1e0] sm:$0xff]  ;;  %v3338_v50 = vld [vmem:[%s10000_s4 + $0x7f0] sm:$0xff] }
 0x4e4   :  { %v2928_v59 = vpop.permute.xlu0 %2927  ;;  %6158 = vmatprep.subr.bf16.mxu1 %v6157_v7  ;;  %v5304_v12 = vpop.f32.mrb[2].mxu1  ;;  %v3324_v7 = vld [vmem:[%s10000_s4 + $0x780] sm:$0xff]  ;;  %v6179_v3 = vpack.c.bf16 %v3291_v48, %v3290_v33 }
 0x4e5   :  { %v2988_v49 = vpop.permute.xlu1 %2987  ;;  %v2933_v43 = vsel %vm1848_vm15, %v2928_v59, %v2930_v52  ;;  %v6181_v10 = vpack.c.bf16 %v3325_v9, %v3324_v7  ;;  %v3311_v59 = vld [vmem:[%s10000_s4 + $0x718] sm:$0xff] }
 0x4e6   :  { %2937 = vst [vmem:[#allocation4 + $0x70] sm:$0xf0] %v2933_v43  ;;  %3840 = vmatmul.mubr.f32.gmra.mrb[44].mxu1 %v3062_v57  ;;  %v6189_v57 = vpack.c.bf16 %v3329_v41, %v3328_v24 }
 0x4e7   :  { %3844 = vmatprep.mubr.f32.mxu1 %v3079_v19  ;;  %6160 = vmatpush3.bf16.msra.mxu1 %v6159_v45  ;;  %v3310_v45 = vld [vmem:[%s10000_s4 + $0x710] sm:$0xff]  ;;  %v3048_v19 = vld [vmem:[#allocation4 + $0xe0] sm:$0xff] }
 0x4e8   :  { %v2963_v36 = vpop.permute.xlu0 %2962  ;;  %6162 = vmatprep.subr.bf16.mxu1 %v6161_v17  ;;  %v3032_v17 = vld [vmem:[#allocation4 + $0x60] sm:$0xff]  ;;  %v6187_v43 = vpack.c.bf16 %v3311_v59, %v3310_v45 }
 0x4e9   :  { %v3011_v13 = vpop.permute.xlu1 %3010  ;;  %v2965_v15 = vsel %vm1848_vm15, %v2961_v2, %v2963_v36  ;;  %v5305_v2 = vpop.f32.mrb[3].mxu1  ;;  %v3331_v36 = vld [vmem:[%s10000_s4 + $0x7b8] sm:$0xff] }
 0x4ea   :  { %2969 = vst [vmem:[#allocation4 + $0xf8] sm:$0xf0] %v2965_v15  ;;  %3845 = vmatmul.mubr.f32.gmra.mrb[46].mxu1 %v3078_v32  ;;  %v9173_v28 = vadd.f32 %v5305_v2, %v5304_v12  ;;  %v3315_v15 = vld [vmem:[%s10000_s4 + $0x738] sm:$0xff]  ;;  %v3064_v32 = vld [vmem:[#allocation4 + $0x160] sm:$0xff]  ;;  %v6209_v2 = vpack.c.bf16 %v3339_v0, %v3338_v50 }
 0x4eb   :  { %6164 = vmatpush3.bf16.msra.mxu1 %v6163_v4  ;;  %3914 = vmatprep.mubr.f32.mxu1 %v3033_v22  ;;  %v3330_v4 = vld [vmem:[%s10000_s4 + $0x7b0] sm:$0xff] }
 0x4ec   :  { %v2986_v40 = vpop.permute.xlu0 %2985  ;;  %6166 = vmatprep.subr.bf16.mxu1 %v6165_v14  ;;  %v3065_v14 = vld [vmem:[#allocation4 + $0x168] sm:$0xff]  ;;  %v6193_v47 = vpack.c.bf16 %v3331_v36, %v3330_v4 }
 0x4ed   :  { %v3009_v58 = vpop.permute.xlu1 %3008  ;;  %v2990_v16 = vsel %vm1848_vm15, %v2986_v40, %v2988_v49  ;;  %v3049_v49 = vld [vmem:[#allocation4 + $0xe8] sm:$0xff]  ;;  %v3034_v33 = vld [vmem:[#allocation4 + $0x70] sm:$0xff] }
 0x4ee   :  { %v3014_v35 = vsel %vm1848_vm15, %v3009_v58, %v3011_v13  ;;  %2994 = vst [vmem:[#allocation4 + $0x178] sm:$0xf0] %v2990_v16  ;;  %v3081_v22 = vld [vmem:[#allocation4 + $0x1e8] sm:$0xff]  ;;  %v3335_v58 = vld [vmem:[%s10000_s4 + $0x7d8] sm:$0xff]  ;;  %v3035_v16 = vld [vmem:[#allocation4 + $0x78] sm:$0xff] }
 0x4ef   :  { %3018 = vst [vmem:[#allocation4 + $0x1f0] sm:$0xf0] %v3014_v35  ;;  %6168 = vmatpush3.bf16.msra.mxu1 %v6167_v27  ;;  %v6201_v31 = vpack.c.bf16 %v3335_v58, %v3334_v23  ;;  %v3319_v35 = vld [vmem:[%s10000_s4 + $0x758] sm:$0xff] }
 0x4f0   :  { %v2984_v46 = vpop.permute.xlu0 %2983  ;;  %6170 = vmatprep.subr.bf16.mxu1 %v6169_v53  ;;  %v3316_v53 = vld [vmem:[%s10000_s4 + $0x740] sm:$0xff] }
 0x4f1   :  { %v2989_v51 = vsel %vm1848_vm15, %v2984_v46, %v2986_v40  ;;  %v6197_v40 = vpack.c.bf16 %v3333_v29, %v3332_v56  ;;  %v6199_v6 = vpack.c.bf16 %v3317_v34, %v3316_v53  ;;  %v3337_v46 = vld [vmem:[%s10000_s4 + $0x7e8] sm:$0xff]  ;;  %v3051_v48 = vld [vmem:[#allocation4 + $0xf8] sm:$0xff] }
 0x4f2   :  { %2993 = vst [vmem:[#allocation4 + $0x170] sm:$0xf0] %v2989_v51  ;;  %v3321_v51 = vld [vmem:[%s10000_s4 + $0x768] sm:$0xff] }
 0x4f3   :  { %6172 = vmatpush3.bf16.msra.mxu1 %v6171_v26  ;;  %v3336_v26 = vld [vmem:[%s10000_s4 + $0x7e0] sm:$0xff]  ;;  %v6207_v12 = vpack.c.bf16 %v3321_v51, %v3320_v42 }
 0x4f4   :  { %v3013_v30 = vpop.permute.xlu0 %3012  ;;  %6174 = vmatprep.subr.bf16.mxu1 %v6173_v20  ;;  %v6203_v20 = vpack.c.bf16 %v3319_v35, %v3318_v25  ;;  %v6205_v61 = vpack.c.bf16 %v3337_v46, %v3336_v26 }
 0x4f5   :  { %v3015_v52 = vsel %vm1848_vm15, %v3011_v13, %v3013_v30  ;;  %v3314_v13 = vld [vmem:[%s10000_s4 + $0x730] sm:$0xff]  ;;  %v3323_v30 = vld [vmem:[%s10000_s4 + $0x778] sm:$0xff]  ;;  %v3067_v7 = vld [vmem:[#allocation4 + $0x178] sm:$0xff] }
 0x4f6   :  { %3019 = vst [vmem:[#allocation4 + $0x1f8] sm:$0xf0] %v3015_v52  ;;  %v6195_v27 = vpack.c.bf16 %v3315_v15, %v3314_v13  ;;  %v3050_v52 = vld [vmem:[#allocation4 + $0xf0] sm:$0xff] }
 0x4f7   :  { %6176 = vmatpush3.bf16.msra.mxu1 %v6175_v21  ;;  %v3322_v21 = vld [vmem:[%s10000_s4 + $0x770] sm:$0xff]  ;;  %v3082_v5 = vld [vmem:[#allocation4 + $0x1f0] sm:$0xff] }
 0x4f8   :  { %6178 = vmatprep.subr.bf16.mxu1 %v6177_v60  ;;  %v6211_v60 = vpack.c.bf16 %v3323_v30, %v3322_v21 }
 0x4f9   :  { %v3066_v9 = vld [vmem:[#allocation4 + $0x170] sm:$0xff] }
 0x4fb   :  { %6180 = vmatpush3.bf16.msra.mxu1 %v6179_v3 }
 0x4fc   :  { %6182 = vmatprep.subr.bf16.mxu1 %v6181_v10 }
 0x4fd   :  { %v3083_v3 = vld [vmem:[#allocation4 + $0x1f8] sm:$0xff] }
 0x4fe   :  { %3915 = vmatmul.mubr.f32.vlgmr.msra.gmra.mrb[48].mxu1 %v3032_v17 }
 0x4ff   :  { %3919 = vmatprep.mubr.f32.mxu1 %v3049_v49  ;;  %6184 = vmatpush3.bf16.msra.mxu1 %v6183_v39 }
 0x500   :  { %6186 = vmatprep.subr.bf16.mxu1 %v6185_v38 }
 0x502   :  { %3920 = vmatmul.mubr.f32.gmra.mrb[50].mxu1 %v3048_v19 }
 0x503   :  { %3924 = vmatprep.mubr.f32.mxu1 %v3065_v14  ;;  %6188 = vmatpush3.bf16.msra.mxu1 %v6187_v43 }
 0x504   :  { %6190 = vmatprep.subr.bf16.mxu1 %v6189_v57 }
 0x506   :  { %3925 = vmatmul.mubr.f32.gmra.mrb[52].mxu1 %v3064_v32 }
 0x507   :  { %3929 = vmatprep.mubr.f32.mxu1 %v3081_v22  ;;  %6192 = vmatpush3.bf16.msra.mxu1 %v6191_v37 }
 0x508   :  { %6194 = vmatprep.subr.bf16.mxu1 %v6193_v47 }
 0x50a   :  { %3930 = vmatmul.mubr.f32.gmra.mrb[54].mxu1 %v3080_v44 }
 0x50b   :  { %6196 = vmatpush3.bf16.msra.mxu1 %v6195_v27  ;;  %3999 = vmatprep.mubr.f32.mxu1 %v3035_v16 }
 0x50c   :  { %6198 = vmatprep.subr.bf16.mxu1 %v6197_v40 }
 0x50f   :  { %6200 = vmatpush3.bf16.msra.mxu1 %v6199_v6 }
 0x510   :  { %6202 = vmatprep.subr.bf16.mxu1 %v6201_v31 }
 0x513   :  { %6204 = vmatpush3.bf16.msra.mxu1 %v6203_v20 }
 0x514   :  { %6206 = vmatprep.subr.bf16.mxu1 %v6205_v61 }
 0x517   :  { %6208 = vmatpush3.bf16.msra.mxu1 %v6207_v12 }
 0x518   :  { %6210 = vmatprep.subr.bf16.mxu1 %v6209_v2 }
 0x51b   :  { %6212 = vmatpush3.bf16.msra.mxu1 %v6211_v60 }
 0x51e   :  { %4000 = vmatmul.mubr.f32.vlgmr.msra.gmra.mrb[56].mxu1 %v3034_v33 }
 0x51f   :  { %4004 = vmatprep.mubr.f32.mxu1 %v3051_v48 }
 0x522   :  { %4005 = vmatmul.mubr.f32.gmra.mrb[58].mxu1 %v3050_v52 }
 0x523   :  { %4009 = vmatprep.mubr.f32.mxu1 %v3067_v7 }
 0x526   :  { %4010 = vmatmul.mubr.f32.gmra.mrb[60].mxu1 %v3066_v9 }
 0x527   :  { %4014 = vmatprep.mubr.f32.mxu1 %v3083_v3 }
 0x529   :  { %v5307_v10 = vpop.f32.mrb[4].mxu1 }
 0x52a   :  { %4015 = vmatmul.mubr.f32.gmra.mrb[62].mxu1 %v3082_v5  ;;  %v5308_v63 = vpop.f32.mrb[5].mxu1 }
 0x52b   :  { %v5309_v8 = vadd.f32 %v5308_v63, %v5307_v10 }
 0x52d   :  { %v5310_v62 = vpop.f32.mrb[6].mxu1 }
 0x52e   :  { %v5311_v39 = vpop.f32.mrb[7].mxu1 }
 0x52f   :  { %v5312_v38 = vadd.f32 %v5311_v39, %v5310_v62 }
 0x531   :  { %v5345_v45 = vpop.f32.mrb[8].mxu1 }
 0x532   :  { %v5346_v59 = vpop.f32.mrb[9].mxu1 }
 0x533   :  { %v5347_v17 = vadd.f32 %v5346_v59, %v5345_v45 }
 0x535   :  { %v3492_v24 = vadd.f32 %v5347_v17, %v9158_v55 }
 0x537   :  { %v5348_v41 = vpop.f32.mrb[10].mxu1 }
 0x538   :  { %v5349_v49 = vpop.f32.mrb[11].mxu1 }
 0x539   :  { %v5350_v43 = vadd.f32 %v5349_v49, %v5348_v41 }
 0x53b   :  { %v3497_v57 = vadd.f32 %v5350_v43, %v9173_v28 }
 0x541   :  { %v5351_v1 = vpop.f32.mrb[12].mxu1 }
 0x542   :  { %v5352_v11 = vpop.f32.mrb[13].mxu1 }
 0x543   :  { %v5353_v19 = vadd.f32 %v5352_v11, %v5351_v1 }
 0x545   :  { %v3502_v4 = vadd.f32 %v5353_v19, %v5309_v8  ;;  %v5354_v36 = vpop.f32.mrb[14].mxu1 }
 0x546   :  { %v5355_v14 = vpop.f32.mrb[15].mxu1 }
 0x547   :  { %v5356_v37 = vadd.f32 %v5355_v14, %v5354_v36 }
 0x549   :  { %v3507_v47 = vadd.f32 %v5356_v37, %v5312_v38 }
 0x551   :  { %v5389_v13 = vpop.f32.mrb[16].mxu1 }
 0x552   :  { %v5390_v15 = vpop.f32.mrb[17].mxu1 }
 0x553   :  { %v5391_v32 = vadd.f32 %v5390_v15, %v5389_v13 }
 0x555   :  { %v3577_v56 = vadd.f32 %v5391_v32, %v3492_v24  ;;  %v5392_v29 = vpop.f32.mrb[18].mxu1 }
 0x556   :  { %v5393_v22 = vpop.f32.mrb[19].mxu1 }
 0x557   :  { %v5394_v55 = vadd.f32 %v5393_v22, %v5392_v29 }
 0x559   :  { %v3582_v27 = vadd.f32 %v5394_v55, %v3497_v57  ;;  %v5395_v40 = vpop.f32.mrb[20].mxu1 }
 0x55a   :  { %v5396_v53 = vpop.f32.mrb[21].mxu1 }
 0x55b   :  { %v5397_v34 = vadd.f32 %v5396_v53, %v5395_v40  ;;  %v4349_v40 = vld [vmem:[%s10003_s7 + $0x80] sm:$0xff]  ;;  %v4350_v53 = vld [vmem:[%s10003_s7 + $0x88] sm:$0xff] }
 0x55d   :  { %v3587_v28 = vadd.f32 %v5397_v34, %v3502_v4  ;;  %v5398_v44 = vpop.f32.mrb[22].mxu1  ;;  %v4333_v34 = vld [vmem:[%s10003_s7] sm:$0xff] }
 0x55e   :  { %v5399_v23 = vpop.f32.mrb[23].mxu1 }
 0x55f   :  { %v5400_v58 = vadd.f32 %v5399_v23, %v5398_v44  ;;  %v6213_v44 = vpack.c.bf16 %v4350_v53, %v4349_v40  ;;  %v4334_v23 = vld [vmem:[%s10003_s7 + $0x8] sm:$0xff] }
 0x561   :  { %v3592_v16 = vadd.f32 %v5400_v58, %v3507_v47  ;;  %v4351_v58 = vld [vmem:[%s10003_s7 + $0x90] sm:$0xff]  ;;  %6214 = vmatprep.subr.bf16.mxu1 %v6213_v44 }
 0x571   :  { %v5433_v6 = vpop.f32.mrb[24].mxu1 }
 0x572   :  { %v5434_v31 = vpop.f32.mrb[25].mxu1 }
 0x573   :  { %v5435_v25 = vadd.f32 %v5434_v31, %v5433_v6  ;;  %v6215_v6 = vpack.c.bf16 %v4334_v23, %v4333_v34 }
 0x575   :  { %v3662_v35 = vadd.f32 %v5435_v25, %v3577_v56  ;;  %v5436_v26 = vpop.f32.mrb[26].mxu1  ;;  %v4335_v25 = vld [vmem:[%s10003_s7 + $0x10] sm:$0xff]  ;;  %6216 = vmatpush3.bf16.msra.mxu1 %v6215_v6 }
 0x576   :  { %v5437_v46 = vpop.f32.mrb[27].mxu1 }
 0x577   :  { %v5438_v20 = vadd.f32 %v5437_v46, %v5436_v26 }
 0x579   :  { %v3667_v61 = vadd.f32 %v5438_v20, %v3582_v27  ;;  %v5439_v42 = vpop.f32.mrb[28].mxu1 }
 0x57a   :  { %v5440_v51 = vpop.f32.mrb[29].mxu1 }
 0x57b   :  { %v5441_v50 = vadd.f32 %v5440_v51, %v5439_v42 }
 0x57d   :  { %v3672_v0 = vadd.f32 %v5441_v50, %v3587_v28  ;;  %v5442_v12 = vpop.f32.mrb[30].mxu1 }
 0x57e   :  { %v5443_v2 = vpop.f32.mrb[31].mxu1 }
 0x57f   :  { %v5444_v21 = vadd.f32 %v5443_v2, %v5442_v12 }
 0x581   :  { %v3677_v30 = vadd.f32 %v5444_v21, %v3592_v16  ;;  %v4352_v16 = vld [vmem:[%s10003_s7 + $0x98] sm:$0xff] }
 0x582   :  { %v6217_v31 = vpack.c.bf16 %v4352_v16, %v4351_v58 }
 0x584   :  { %6218 = vmatprep.subr.bf16.mxu1 %v6217_v31 }
 0x591   :  { %v5477_v60 = vpop.f32.mrb[32].mxu1 }
 0x592   :  { %v5478_v33 = vpop.f32.mrb[33].mxu1 }
 0x593   :  { %v5479_v48 = vadd.f32 %v5478_v33, %v5477_v60 }
 0x595   :  { %v3747_v52 = vadd.f32 %v5479_v48, %v3662_v35  ;;  %v5480_v7 = vpop.f32.mrb[34].mxu1  ;;  %v4336_v35 = vld [vmem:[%s10003_s7 + $0x18] sm:$0xff] }
 0x596   :  { %v5481_v9 = vpop.f32.mrb[35].mxu1 }
 0x597   :  { %v5482_v3 = vadd.f32 %v5481_v9, %v5480_v7 }
 0x599   :  { %v3752_v10 = vadd.f32 %v5482_v3, %v3667_v61  ;;  %v5483_v5 = vpop.f32.mrb[36].mxu1  ;;  %v6219_v61 = vpack.c.bf16 %v4336_v35, %v4335_v25  ;;  %v4020_v35 = vld [vmem:[%s10001_s5] sm:$0x1] }
 0x59a   :  { %v5484_v63 = vpop.f32.mrb[37].mxu1 }
 0x59b   :  { %v5485_v8 = vadd.f32 %v5484_v63, %v5483_v5  ;;  %6220 = vmatpush3.bf16.msra.mxu1 %v6219_v61 }
 0x59d   :  { %v3757_v62 = vadd.f32 %v5485_v8, %v3672_v0  ;;  %v5486_v39 = vpop.f32.mrb[38].mxu1 }
 0x59e   :  { %v5487_v38 = vpop.f32.mrb[39].mxu1 }
 0x59f   :  { %v5488_v45 = vadd.f32 %v5487_v38, %v5486_v39 }
 0x5a1   :  { %v3762_v59 = vadd.f32 %v5488_v45, %v3677_v30 }
 0x5b1   :  { %v5521_v17 = vpop.f32.mrb[40].mxu1 }
 0x5b2   :  { %v5522_v24 = vpop.f32.mrb[41].mxu1 }
 0x5b3   :  { %v5523_v41 = vadd.f32 %v5522_v24, %v5521_v17 }
 0x5b5   :  { %v3832_v49 = vadd.f32 %v5523_v41, %v3747_v52  ;;  %v5524_v43 = vpop.f32.mrb[42].mxu1 }
 0x5b6   :  { %v5525_v57 = vpop.f32.mrb[43].mxu1 }
 0x5b7   :  { %v5526_v1 = vadd.f32 %v5525_v57, %v5524_v43 }
 0x5b9   :  { %v3837_v11 = vadd.f32 %v5526_v1, %v3752_v10  ;;  %v5527_v19 = vpop.f32.mrb[44].mxu1 }
 0x5ba   :  { %v5528_v4 = vpop.f32.mrb[45].mxu1 }
 0x5bb   :  { %v5529_v36 = vadd.f32 %v5528_v4, %v5527_v19 }
 0x5bd   :  { %v3842_v14 = vadd.f32 %v5529_v36, %v3757_v62  ;;  %v5530_v37 = vpop.f32.mrb[46].mxu1 }
 0x5be   :  { %v5531_v47 = vpop.f32.mrb[47].mxu1 }
 0x5bf   :  { %v5532_v13 = vadd.f32 %v5531_v47, %v5530_v37 }
 0x5c1   :  { %v3847_v15 = vadd.f32 %v5532_v13, %v3762_v59 }
 0x5d1   :  { %v5565_v32 = vpop.f32.mrb[48].mxu1 }
 0x5d2   :  { %v5566_v56 = vpop.f32.mrb[49].mxu1 }
 0x5d3   :  { %v5567_v29 = vadd.f32 %v5566_v56, %v5565_v32 }
 0x5d5   :  { %v3917_v22 = vadd.f32 %v5567_v29, %v3832_v49  ;;  %v5568_v55 = vpop.f32.mrb[50].mxu1 }
 0x5d6   :  { %v5569_v27 = vpop.f32.mrb[51].mxu1 }
 0x5d7   :  { %v5570_v28 = vadd.f32 %v5569_v27, %v5568_v55 }
 0x5d9   :  { %v3922_v26 = vadd.f32 %v5570_v28, %v3837_v11  ;;  %v5571_v46 = vpop.f32.mrb[52].mxu1 }
 0x5da   :  { %v5572_v20 = vpop.f32.mrb[53].mxu1 }
 0x5db   :  { %v5573_v42 = vadd.f32 %v5572_v20, %v5571_v46  ;;  %v4021_v20 = vld [vmem:[%s10002_s6] sm:$0x1] }
 0x5dd   :  { %v3927_v51 = vadd.f32 %v5573_v42, %v3842_v14  ;;  %v5574_v50 = vpop.f32.mrb[54].mxu1 }
 0x5de   :  { %v5575_v0 = vpop.f32.mrb[55].mxu1 }
 0x5df   :  { %v5576_v12 = vadd.f32 %v5575_v0, %v5574_v50 }
 0x5e1   :  { %v3932_v2 = vadd.f32 %v5576_v12, %v3847_v15 }
 0x5f1   :  { %v5609_v21 = vpop.f32.mrb[56].mxu1 }
 0x5f2   :  { %v5610_v30 = vpop.f32.mrb[57].mxu1 }
 0x5f3   :  { %v5611_v60 = vadd.f32 %v5610_v30, %v5609_v21 }
 0x5f5   :  { %v4002_v33 = vadd.f32 %v5611_v60, %v3917_v22  ;;  %v5612_v48 = vpop.f32.mrb[58].mxu1 }
 0x5f6   :  { %v5613_v52 = vpop.f32.mrb[59].mxu1 }
 0x5f7   :  { %v5614_v7 = vadd.f32 %v5613_v52, %v5612_v48  ;;  %v4035_v9 = vmul.f32 %v4002_v33, %v4002_v33  ;;  %v4022_v63 = vsel %vm1848_vm15, %v4002_v33, 0.0 }
 0x5f9   :  { %v4007_v3 = vadd.f32 %v5614_v7, %v3922_v26  ;;  %v5615_v10 = vpop.f32.mrb[60].mxu1  ;;  %v4039_v45 = vsel %vm1848_vm15, %v4035_v9, 0.0  ;;  %v4353_v7 = vld [vmem:[%s10003_s7 + $0xa0] sm:$0xff]  ;;  %v4354_v9 = vld [vmem:[%s10003_s7 + $0xa8] sm:$0xff] }
 0x5fa   :  { %v5616_v5 = vpop.f32.mrb[61].mxu1 }
 0x5fb   :  { %v4023_v8 = vsel %vm1848_vm15, %v4007_v3, 0.0  ;;  %v4036_v62 = vmul.f32 %v4007_v3, %v4007_v3  ;;  %v5617_v39 = vadd.f32 %v5616_v5, %v5615_v10  ;;  %v4338_v10 = vld [vmem:[%s10003_s7 + $0x28] sm:$0xff] }
 0x5fc   :  { %v4024_v38 = vadd.f32 %v4023_v8, %v4022_v63 }
 0x5fd   :  { %v4040_v59 = vsel %vm1848_vm15, %v4036_v62, 0.0  ;;  %v4012_v17 = vadd.f32 %v5617_v39, %v3927_v51  ;;  %v5618_v24 = vpop.f32.mrb[62].mxu1 }
 0x5fe   :  { %v4041_v41 = vadd.f32 %v4040_v59, %v4039_v45  ;;  %v5619_v49 = vpop.f32.mrb[63].mxu1  ;;  %v4356_v45 = vld [vmem:[%s10003_s7 + $0xb8] sm:$0xff]  ;;  %v4339_v59 = vld [vmem:[%s10003_s7 + $0x30] sm:$0xff] }
 0x5ff   :  { %v4025_v43 = vsel %vm1848_vm15, %v4012_v17, 0.0  ;;  %v4037_v57 = vmul.f32 %v4012_v17, %v4012_v17  ;;  %v5620_v1 = vadd.f32 %v5619_v49, %v5618_v24  ;;  %v4340_v24 = vld [vmem:[%s10003_s7 + $0x38] sm:$0xff]  ;;  %v4357_v49 = vld [vmem:[%s10003_s7 + $0xc0] sm:$0xff] }
 0x600   :  { %v4026_v11 = vadd.f32 %v4025_v43, %v4024_v38  ;;  %v4355_v38 = vld [vmem:[%s10003_s7 + $0xb0] sm:$0xff]  ;;  %v4358_v43 = vld [vmem:[%s10003_s7 + $0xc8] sm:$0xff] }
 0x601   :  { %v4042_v19 = vsel %vm1848_vm15, %v4037_v57, 0.0  ;;  %v4017_v4 = vadd.f32 %v5620_v1, %v3932_v2  ;;  %v4341_v57 = vld [vmem:[%s10003_s7 + $0x40] sm:$0xff]  ;;  %v6229_v1 = vpack.c.bf16 %v4358_v43, %v4357_v49 }
 0x602   :  { %v4043_v36 = vadd.f32 %v4042_v19, %v4041_v41  ;;  %v6227_v41 = vpack.c.bf16 %v4340_v24, %v4339_v59 }
 0x603   :  { %v4027_v14 = vsel %vm1848_vm15, %v4017_v4, 0.0  ;;  %v4038_v37 = vmul.f32 %v4017_v4, %v4017_v4 }
 0x604   :  { %v4028_v47 = vadd.f32 %v4027_v14, %v4026_v11  ;;  %v4342_v11 = vld [vmem:[%s10003_s7 + $0x48] sm:$0xff] }
 0x605   :  { %v4044_v13 = vsel %vm1848_vm15, %v4038_v37, 0.0  ;;  %v6231_v19 = vpack.c.bf16 %v4342_v11, %v4341_v57 }
 0x606   :  { %v4029_v15 = vrot.slane %v4028_v47, 4  ;;  %v4045_v32 = vadd.f32 %v4044_v13, %v4043_v36 }
 0x608   :  { %v4030_v56 = vadd.f32 %v4029_v15, %v4028_v47  ;;  %v4046_v29 = vrot.slane %v4045_v32, 4 }
 0x60a   :  { %v4031_v22 = vrot.slane %v4030_v56, 2  ;;  %v4047_v55 = vadd.f32 %v4046_v29, %v4045_v32 }
 0x60c   :  { %v4032_v27 = vadd.f32 %v4031_v22, %v4030_v56  ;;  %v4048_v40 = vrot.slane %v4047_v55, 2 }
 0x60e   :  { %v4033_v53 = vrot.slane %v4032_v27, 1  ;;  %v4049_v34 = vadd.f32 %v4048_v40, %v4047_v55  ;;  %v4359_v40 = vld [vmem:[%s10003_s7 + $0xd0] sm:$0xff] }
 0x610   :  { %v4034_v28 = vadd.f32 %v4033_v53, %v4032_v27  ;;  %v4050_v44 = vrot.slane %v4049_v34, 1  ;;  %v4360_v53 = vld [vmem:[%s10003_s7 + $0xd8] sm:$0xff] }
 0x612   :  { %v4051_v23 = vadd.f32 %v4050_v44, %v4049_v34  ;;  %v4052_v58 = vmul.f32 0.03125, %v4034_v28  ;;  %v6233_v28 = vpack.c.bf16 %v4360_v53, %v4359_v40  ;;  %v4343_v44 = vld [vmem:[%s10003_s7 + $0x50] sm:$0xff]  ;;  %v4384_v40 = vld [vmem:[%s10003_s7 + $0x198] sm:$0xff] }
 0x614   :  { %v4053_v16 = vmul.f32 0.03125, %v4051_v23  ;;  %v4054_v6 = vmul.f32 %v4052_v58, %v4052_v58  ;;  %v4344_v23 = vld [vmem:[%s10003_s7 + $0x58] sm:$0xff] }
 0x616   :  { %v4055_v31 = vsub.f32 %v4053_v16, %v4054_v6 }
 0x618   :  { %v4056_v25 = vadd.f32 1e-05, %v4055_v31 }
 0x61a   :  { %6527 = vrsqrt.f32 %v4056_v25  ;;  %v4361_v25 = vld [vmem:[%s10003_s7 + $0xe0] sm:$0xff] }
 0x624   :  { %v6528_v26 = vpop.eup %6527 }
 0x625   :  { %v4058_v46 = vmul.f32 %v6528_v26, %v4020_v35  ;;  %v4362_v35 = vld [vmem:[%s10003_s7 + $0xe8] sm:$0xff] }
 0x627   :  { %v4059_v61 = vmul.f32 %v4058_v46, %v4052_v58  ;;  %v4065_v42 = vrot.slane %v4058_v46, %v7824_v18  ;;  %v6235_v58 = vpack.c.bf16 %v4344_v23, %v4343_v44  ;;  %v6237_v46 = vpack.c.bf16 %v4362_v35, %v4361_v25  ;;  %v4385_v25 = vld [vmem:[%s10003_s7 + $0x1a0] sm:$0xff]  ;;  %v4386_v35 = vld [vmem:[%s10003_s7 + $0x1a8] sm:$0xff] }
 0x629   :  { %v4060_v51 = vsub.f32 %v4021_v20, %v4059_v61  ;;  %v4067_v50 = vmul.f32 %v4065_v42, %v4002_v33  ;;  %v4068_v0 = vmul.f32 %v4065_v42, %v4007_v3  ;;  %v4069_v12 = vmul.f32 %v4065_v42, %v4012_v17  ;;  %v4337_v33 = vld [vmem:[%s10003_s7 + $0x20] sm:$0xff]  ;;  %v4346_v61 = vld [vmem:[%s10003_s7 + $0x68] sm:$0xff] }
 0x62a   :  { %v4070_v2 = vmul.f32 %v4065_v42, %v4017_v4  ;;  %v6221_v3 = vpack.c.bf16 %v4354_v9, %v4353_v7  ;;  %v6223_v39 = vpack.c.bf16 %v4338_v10, %v4337_v33  ;;  %v6225_v17 = vpack.c.bf16 %v4356_v45, %v4355_v38  ;;  %v4345_v20 = vld [vmem:[%s10003_s7 + $0x60] sm:$0xff] }
 0x62b   :  { %v4075_v21 = vrot.slane %v4060_v51, %v7824_v18  ;;  %v6239_v51 = vpack.c.bf16 %v4346_v61, %v4345_v20  ;;  %v4381_v33 = vld [vmem:[%s10003_s7 + $0x180] sm:$0xff]  ;;  %v6253_v61 = vpack.c.bf16 %v4386_v35, %v4385_v25 }
 0x62c   :  { %6222 = vmatprep.subr.bf16.mxu1 %v6221_v3  ;;  %v4382_v3 = vld [vmem:[%s10003_s7 + $0x188] sm:$0xff] }
 0x62d   :  { %v4077_v30 = vadd.f32 %v4075_v21, %v4067_v50  ;;  %v4078_v60 = vadd.f32 %v4075_v21, %v4068_v0  ;;  %v4079_v48 = vadd.f32 %v4075_v21, %v4069_v12  ;;  %v4080_v52 = vadd.f32 %v4075_v21, %v4070_v2  ;;  %6224 = vmatpush3.bf16.msra.mxu1 %v6223_v39  ;;  %v4363_v2 = vld [vmem:[%s10003_s7 + $0xf0] sm:$0xff]  ;;  %v4364_v21 = vld [vmem:[%s10003_s7 + $0xf8] sm:$0xff] }
 0x62e   :  { %6226 = vmatprep.subr.bf16.mxu1 %v6225_v17  ;;  %v6245_v10 = vpack.c.bf16 %v4382_v3, %v4381_v33  ;;  %v4374_v33 = vld [vmem:[%s10003_s7 + $0x148] sm:$0xff]  ;;  %v4391_v3 = vld [vmem:[%s10003_s7 + $0x1d0] sm:$0xff] }
 0x62f   :  { %v4081_v5 = vmax.f32 %v4077_v30, 0.0  ;;  %v4082_v63 = vmax.f32 %v4078_v60, 0.0  ;;  %v4083_v8 = vmax.f32 %v4079_v48, 0.0  ;;  %v4084_v62 = vmax.f32 %v4080_v52, 0.0  ;;  %v4347_v30 = vld [vmem:[%s10003_s7 + $0x70] sm:$0xff]  ;;  %v4348_v48 = vld [vmem:[%s10003_s7 + $0x78] sm:$0xff] }
 0x630   :  { %v6241_v60 = vpack.c.bf16 %v4364_v21, %v4363_v2  ;;  %v6243_v9 = vpack.c.bf16 %v4348_v48, %v4347_v30  ;;  %v4371_v21 = vld [vmem:[%s10003_s7 + $0x130] sm:$0xff]  ;;  %v4372_v30 = vld [vmem:[%s10003_s7 + $0x138] sm:$0xff]  ;;  %v4390_v48 = vld [vmem:[%s10003_s7 + $0x1c8] sm:$0xff] }
 0x631   :  { %4085 = vst.msk [vmem:[#allocation5] sm:$0xff] %vm1848_vm15, %v4081_v5  ;;  %4086 = vst.msk [vmem:[#allocation5 + $0x8] sm:$0xff] %vm1848_vm15, %v4082_v63  ;;  %6228 = vmatpush3.bf16.msra.mxu1 %v6227_v41 }
 0x632   :  { %4087 = vst.msk [vmem:[#allocation5 + $0x10] sm:$0xff] %vm1848_vm15, %v4083_v8  ;;  %4088 = vst.msk [vmem:[#allocation5 + $0x18] sm:$0xff] %vm1848_vm15, %v4084_v62  ;;  %6230 = vmatprep.subr.bf16.mxu1 %v6229_v1  ;;  %v6559_v1 = vmov 1983009808  }
 0x633   :  { %v4472_v11 = vunpack.c.l.s4 %v6559_v1  ;;  %v4379_v1 = vld [vmem:[%s10003_s7 + $0x170] sm:$0xff] }
 0x635   :  { %6232 = vmatpush3.bf16.msra.mxu1 %v6231_v19 }
 0x636   :  { %6234 = vmatprep.subr.bf16.mxu1 %v6233_v28 }
 0x638   :  { %v5248_v4 = vld.sshfl [vmem:[#allocation5 + $0x3] sm:$0x1 pattern:$0x76325410]  ;;  %v4106_v36 = vld [vmem:[#allocation5 + $0x2] sm:$0x1] }
 0x639   :  { %4117 = vrot.lane.b32.xlu1 %v5248_v4, %s6557_s3  ;;  %v5247_v14 = vld.sshfl [vmem:[#allocation5 + $0x1] sm:$0x1 pattern:$0x76325410]  ;;  %4107 = vst.msk [vmem:[#allocation6 + $0x2] sm:$0x1] %vm4090_vm0, %v4106_v36  ;;  %6236 = vmatpush3.bf16.msra.mxu1 %v6235_v58  ;;  %v4473_v36 = vunpack.c.0.s8 %v4472_v11 }
 0x63a   :  { %v4089_v37 = vld [vmem:[#allocation5] sm:$0x1]  ;;  %4101 = vrot.lane.b32.xlu0 %v5247_v14, %s6557_s3  ;;  %v4136_v47 = vld [vmem:[#allocation5 + $0x6] sm:$0x1]  ;;  %v4121_v13 = vld [vmem:[#allocation5 + $0x4] sm:$0x1]  ;;  %6238 = vmatprep.subr.bf16.mxu1 %v6237_v46 }
 0x63b   :  { %4091 = vst.msk [vmem:[#allocation6] sm:$0x1] %vm4090_vm0, %v4089_v37  ;;  %4137 = vst.msk [vmem:[#allocation6 + $0x6] sm:$0x1] %vm4090_vm0, %v4136_v47  ;;  %v4226_v32 = vld [vmem:[#allocation5 + $0x12] sm:$0x1]  ;;  %v9445_v47 = vsub.s32 %v4473_v36, %v7818_v54 }
 0x63c   :  { %v5250_v15 = vld.sshfl [vmem:[#allocation5 + $0x7] sm:$0x1 pattern:$0x76325410]  ;;  %4122 = vst.msk [vmem:[#allocation6 + $0x4] sm:$0x1] %vm4090_vm0, %v4121_v13 }
 0x63d   :  { %4147 = vrot.lane.b32.xlu1 %v5250_v15, %s6557_s3  ;;  %v5249_v56 = vld.sshfl [vmem:[#allocation5 + $0x5] sm:$0x1 pattern:$0x76325410]  ;;  %4227 = vst.msk [vmem:[#allocation6 + $0x3] sm:$0x1] %vm4090_vm0, %v4226_v32  ;;  %6240 = vmatpush3.bf16.msra.mxu1 %v6239_v51 }
 0x63e   :  { %v4211_v29 = vld [vmem:[#allocation5 + $0x10] sm:$0x1]  ;;  %4132 = vrot.lane.b32.xlu0 %v5249_v56, %s6557_s3  ;;  %v4256_v22 = vld [vmem:[#allocation5 + $0x16] sm:$0x1]  ;;  %v4241_v55 = vld [vmem:[#allocation5 + $0x14] sm:$0x1]  ;;  %6242 = vmatprep.subr.bf16.mxu1 %v6241_v60 }
 0x63f   :  { %4212 = vst.msk [vmem:[#allocation6 + $0x1] sm:$0x1] %vm4090_vm0, %v4211_v29  ;;  %4257 = vst.msk [vmem:[#allocation6 + $0x7] sm:$0x1] %vm4090_vm0, %v4256_v22  ;;  %v4166_v16 = vld [vmem:[#allocation5 + $0xa] sm:$0x1] }
 0x640   :  { %v5256_v27 = vld.sshfl [vmem:[#allocation5 + $0x13] sm:$0x1 pattern:$0x76325410]  ;;  %4242 = vst.msk [vmem:[#allocation6 + $0x5] sm:$0x1] %vm4090_vm0, %v4241_v55 }
 0x641   :  { %4237 = vrot.lane.b32.xlu1 %v5256_v27, %s6557_s3  ;;  %v5255_v34 = vld.sshfl [vmem:[#allocation5 + $0x11] sm:$0x1 pattern:$0x76325410]  ;;  %4167 = vst.msk [vmem:[#allocation6 + $0xa] sm:$0x1] %vm4090_vm0, %v4166_v16  ;;  %6244 = vmatpush3.bf16.msra.mxu1 %v6243_v9 }
 0x642   :  { %4222 = vrot.lane.b32.xlu0 %v5255_v34, %s6557_s3  ;;  %v4151_v6 = vld [vmem:[#allocation5 + $0x8] sm:$0x1]  ;;  %v5258_v31 = vld.sshfl [vmem:[#allocation5 + $0x17] sm:$0x1 pattern:$0x76325410]  ;;  %6246 = vmatprep.subr.bf16.mxu1 %v6245_v10 }
 0x643   :  { %4152 = vst.msk [vmem:[#allocation6 + $0x8] sm:$0x1] %vm4090_vm0, %v4151_v6  ;;  %v5257_v26 = vld.sshfl [vmem:[#allocation5 + $0x15] sm:$0x1 pattern:$0x76325410] }
 0x644   :  { %v5252_v42 = vld.sshfl [vmem:[#allocation5 + $0xb] sm:$0x1 pattern:$0x76325410]  ;;  %v4196_v50 = vld [vmem:[#allocation5 + $0xe] sm:$0x1] }
 0x645   :  { %4267 = vrot.lane.b32.xlu1 %v5258_v31, %s6557_s3  ;;  %v5251_v0 = vld.sshfl [vmem:[#allocation5 + $0x9] sm:$0x1 pattern:$0x76325410]  ;;  %4197 = vst.msk [vmem:[#allocation6 + $0xe] sm:$0x1] %vm4090_vm0, %v4196_v50 }
 0x646   :  { %4252 = vrot.lane.b32.xlu0 %v5257_v26, %s6557_s3  ;;  %v4181_v12 = vld [vmem:[#allocation5 + $0xc] sm:$0x1]  ;;  %v4286_v52 = vld [vmem:[#allocation5 + $0x1a] sm:$0x1]  ;;  %v4271_v7 = vld [vmem:[#allocation5 + $0x18] sm:$0x1] }
 0x647   :  { %4182 = vst.msk [vmem:[#allocation6 + $0xc] sm:$0x1] %vm4090_vm0, %v4181_v12  ;;  %4287 = vst.msk [vmem:[#allocation6 + $0xb] sm:$0x1] %vm4090_vm0, %v4286_v52  ;;  %v4316_v5 = vld [vmem:[#allocation5 + $0x1e] sm:$0x1]  ;;  %v6259_v52 = vpack.c.bf16 %v4372_v30, %v4371_v21 }
 0x648   :  { %4272 = vst.msk [vmem:[#allocation6 + $0x9] sm:$0x1] %vm4090_vm0, %v4271_v7  ;;  %v4301_v63 = vld [vmem:[#allocation5 + $0x1c] sm:$0x1]  ;;  %4317 = vst.msk [vmem:[#allocation6 + $0xf] sm:$0x1] %vm4090_vm0, %v4316_v5 }
 0x649   :  { %4177 = vrot.lane.b32.xlu1 %v5252_v42, %s6557_s3  ;;  %v5254_v8 = vld.sshfl [vmem:[#allocation5 + $0xf] sm:$0x1 pattern:$0x76325410]  ;;  %4302 = vst.msk [vmem:[#allocation6 + $0xd] sm:$0x1] %vm4090_vm0, %v4301_v63 }
 0x64a   :  { %4162 = vrot.lane.b32.xlu0 %v5251_v0, %s6557_s3  ;;  %v5253_v62 = vld.sshfl [vmem:[#allocation5 + $0xd] sm:$0x1 pattern:$0x76325410]  ;;  %v4365_v56 = vld [vmem:[%s10003_s7 + $0x100] sm:$0xff]  ;;  %v4366_v29 = vld [vmem:[%s10003_s7 + $0x108] sm:$0xff] }
 0x64b   :  { %v5260_v39 = vld.sshfl [vmem:[#allocation5 + $0x1b] sm:$0x1 pattern:$0x76325410]  ;;  %v4383_v27 = vld [vmem:[%s10003_s7 + $0x190] sm:$0xff]  ;;  %v6247_v28 = vpack.c.bf16 %v4366_v29, %v4365_v56  ;;  %v4368_v6 = vld [vmem:[%s10003_s7 + $0x118] sm:$0xff] }
 0x64c   :  { %v5259_v38 = vld.sshfl [vmem:[#allocation5 + $0x19] sm:$0x1 pattern:$0x76325410]  ;;  %v6249_v58 = vpack.c.bf16 %v4384_v40, %v4383_v27  ;;  %v4367_v16 = vld [vmem:[%s10003_s7 + $0x110] sm:$0xff]  ;;  %v4370_v51 = vld [vmem:[%s10003_s7 + $0x128] sm:$0xff] }
 0x64d   :  { %4207 = vrot.lane.b32.xlu1 %v5254_v8, %s6557_s3  ;;  %v5262_v45 = vld.sshfl [vmem:[#allocation5 + $0x1f] sm:$0x1 pattern:$0x76325410]  ;;  %v6251_v46 = vpack.c.bf16 %v4368_v6, %v4367_v16  ;;  %v4387_v50 = vld [vmem:[%s10003_s7 + $0x1b0] sm:$0xff]  ;;  %v4388_v0 = vld [vmem:[%s10003_s7 + $0x1b8] sm:$0xff] }
 0x64e   :  { %4192 = vrot.lane.b32.xlu0 %v5253_v62, %s6557_s3  ;;  %v5261_v59 = vld.sshfl [vmem:[#allocation5 + $0x1d] sm:$0x1 pattern:$0x76325410]  ;;  %v6257_v2 = vpack.c.bf16 %v4388_v0, %v4387_v50  ;;  %v4392_v10 = vld [vmem:[%s10003_s7 + $0x1d8] sm:$0xff]  ;;  %v4375_v8 = vld [vmem:[%s10003_s7 + $0x150] sm:$0xff] }
 0x64f   :  { %v4369_v42 = vld [vmem:[%s10003_s7 + $0x120] sm:$0xff]  ;;  %v6265_v63 = vpack.c.bf16 %v4392_v10, %v4391_v3  ;;  %v4376_v62 = vld [vmem:[%s10003_s7 + $0x158] sm:$0xff]  ;;  %v4415_v56 = vld [vmem:[%s10003_s7 + $0x290] sm:$0xff] }
 0x650   :  { %v6255_v12 = vpack.c.bf16 %v4370_v51, %v4369_v42  ;;  %v4389_v60 = vld [vmem:[%s10003_s7 + $0x1c0] sm:$0xff]  ;;  %v4380_v11 = vld [vmem:[%s10003_s7 + $0x178] sm:$0xff]  ;;  %v4399_v27 = vld [vmem:[%s10003_s7 + $0x210] sm:$0xff] }
 0x651   :  { %4297 = vrot.lane.b32.xlu1 %v5260_v39, %s6557_s3  ;;  %v6261_v7 = vpack.c.bf16 %v4390_v48, %v4389_v60  ;;  %v4373_v9 = vld [vmem:[%s10003_s7 + $0x140] sm:$0xff]  ;;  %v4416_v29 = vld [vmem:[%s10003_s7 + $0x298] sm:$0xff]  ;;  %v4402_v6 = vld [vmem:[%s10003_s7 + $0x228] sm:$0xff] }
 0x652   :  { %4282 = vrot.lane.b32.xlu0 %v5259_v38, %s6557_s3  ;;  %v6263_v5 = vpack.c.bf16 %v4374_v33, %v4373_v9  ;;  %v4393_v39 = vld [vmem:[%s10003_s7 + $0x1e0] sm:$0xff]  ;;  %v4394_v38 = vld [vmem:[%s10003_s7 + $0x1e8] sm:$0xff]  ;;  %v4400_v40 = vld [vmem:[%s10003_s7 + $0x218] sm:$0xff] }
 0x653   :  { %v4401_v16 = vld [vmem:[%s10003_s7 + $0x220] sm:$0xff]  ;;  %v4406_v0 = vld [vmem:[%s10003_s7 + $0x248] sm:$0xff]  ;;  %v4407_v60 = vld [vmem:[%s10003_s7 + $0x250] sm:$0xff] }
 0x654   :  { %v6287_v25 = vpack.c.bf16 %v4402_v6, %v4401_v16  ;;  %v4405_v50 = vld [vmem:[%s10003_s7 + $0x240] sm:$0xff]  ;;  %v4408_v48 = vld [vmem:[%s10003_s7 + $0x258] sm:$0xff]  ;;  %v4410_v10 = vld [vmem:[%s10003_s7 + $0x268] sm:$0xff] }
 0x655   :  { %4327 = vrot.lane.b32.xlu1 %v5262_v45, %s6557_s3  ;;  %v6267_v45 = vpack.c.bf16 %v4376_v62, %v4375_v8  ;;  %v6295_v21 = vpack.c.bf16 %v4406_v0, %v4405_v50  ;;  %v6299_v9 = vpack.c.bf16 %v4408_v48, %v4407_v60  ;;  %v4409_v3 = vld [vmem:[%s10003_s7 + $0x260] sm:$0xff]  ;;  %v4443_v48 = vld [vmem:[%s10003_s7 + $0x370] sm:$0xff] }
 0x656   :  { %4312 = vrot.lane.b32.xlu0 %v5261_v59, %s6557_s3  ;;  %v6269_v59 = vpack.c.bf16 %v4394_v38, %v4393_v39  ;;  %v6303_v8 = vpack.c.bf16 %v4410_v10, %v4409_v3  ;;  %v4411_v39 = vld [vmem:[%s10003_s7 + $0x270] sm:$0xff]  ;;  %v4412_v38 = vld [vmem:[%s10003_s7 + $0x278] sm:$0xff]  ;;  %v4437_v6 = vld [vmem:[%s10003_s7 + $0x340] sm:$0xff] }
 0x657   :  { %v4441_v0 = vld [vmem:[%s10003_s7 + $0x360] sm:$0xff] }
 0x658   :  { %v4792_v3 = vld [vmem:[%s10005_s9] sm:$0xff] }
 0x6ab   :  { %v4118_v17 = vpop.permute.xlu1 %4117 }
 0x6ac   :  { %4120 = vst.msk [vmem:[#allocation6 + $0x2] sm:$0x1] %vm4104_vm2, %v4118_v17  ;;  %v4102_v24 = vpop.permute.xlu0 %4101  ;;  %v4377_v17 = vld [vmem:[%s10003_s7 + $0x160] sm:$0xff] }
 0x6ad   :  { %4105 = vst.msk [vmem:[#allocation6] sm:$0x1] %vm4104_vm2, %v4102_v24  ;;  %v4378_v24 = vld [vmem:[%s10003_s7 + $0x168] sm:$0xff] }
 0x6af   :  { %v4148_v41 = vpop.permute.xlu1 %4147 }
 0x6b0   :  { %4150 = vst.msk [vmem:[#allocation6 + $0x6] sm:$0x1] %vm4104_vm2, %v4148_v41  ;;  %v4133_v49 = vpop.permute.xlu0 %4132  ;;  %v4395_v41 = vld [vmem:[%s10003_s7 + $0x1f0] sm:$0xff] }
 0x6b1   :  { %4135 = vst.msk [vmem:[#allocation6 + $0x4] sm:$0x1] %vm4104_vm2, %v4133_v49  ;;  %v4396_v49 = vld [vmem:[%s10003_s7 + $0x1f8] sm:$0xff] }
 0x6b3   :  { %v4238_v43 = vpop.permute.xlu1 %4237 }
 0x6b4   :  { %4240 = vst.msk [vmem:[#allocation6 + $0x3] sm:$0x1] %vm4104_vm2, %v4238_v43  ;;  %v4223_v57 = vpop.permute.xlu0 %4222  ;;  %v6271_v43 = vpack.c.bf16 %v4378_v24, %v4377_v17  ;;  %v6307_v24 = vpack.c.bf16 %v4412_v38, %v4411_v39  ;;  %v4796_v39 = vld [vmem:[%s10005_s9 + $0x20] sm:$0xff] }
 0x6b5   :  { %4225 = vst.msk [vmem:[#allocation6 + $0x1] sm:$0x1] %vm4104_vm2, %v4223_v57  ;;  %v6273_v57 = vpack.c.bf16 %v4396_v49, %v4395_v41  ;;  %v4429_v49 = vld [vmem:[%s10003_s7 + $0x300] sm:$0xff] }
 0x6b7   :  { %v4268_v19 = vpop.permute.xlu1 %4267 }
 0x6b8   :  { %4270 = vst.msk [vmem:[#allocation6 + $0x7] sm:$0x1] %vm4104_vm2, %v4268_v19  ;;  %v4253_v4 = vpop.permute.xlu0 %4252  ;;  %v4413_v19 = vld [vmem:[%s10003_s7 + $0x280] sm:$0xff] }
 0x6b9   :  { %4255 = vst.msk [vmem:[#allocation6 + $0x5] sm:$0x1] %vm4104_vm2, %v4253_v4  ;;  %v4414_v4 = vld [vmem:[%s10003_s7 + $0x288] sm:$0xff] }
 0x6bb   :  { %v4178_v14 = vpop.permute.xlu1 %4177 }
 0x6bc   :  { %4180 = vst.msk [vmem:[#allocation6 + $0xa] sm:$0x1] %vm4104_vm2, %v4178_v14  ;;  %v4163_v37 = vpop.permute.xlu0 %4162  ;;  %v6275_v14 = vpack.c.bf16 %v4380_v11, %v4379_v1  ;;  %v4447_v1 = vld [vmem:[%s10003_s7 + $0x390] sm:$0xff]  ;;  %v4448_v11 = vld [vmem:[%s10003_s7 + $0x398] sm:$0xff] }
 0x6bd   :  { %4165 = vst.msk [vmem:[#allocation6 + $0x8] sm:$0x1] %vm4104_vm2, %v4163_v37  ;;  %v6277_v37 = vpack.c.bf16 %v4414_v4, %v4413_v19  ;;  %v6313_v4 = vpack.c.bf16 %v4448_v11, %v4447_v1  ;;  %v5263_v11 = vld [vmem:[%s10004_s8] ss:$0 sm:$0xff] }
 0x6bf   :  { %v4208_v13 = vpop.permute.xlu1 %4207 }
 0x6c0   :  { %4210 = vst.msk [vmem:[#allocation6 + $0xe] sm:$0x1] %vm4104_vm2, %v4208_v13  ;;  %v4193_v15 = vpop.permute.xlu0 %4192  ;;  %v4331_v32 = vld [vmem:[#allocation6] sm:$0xff]  ;;  %v4397_v13 = vld [vmem:[%s10003_s7 + $0x200] sm:$0xff] }
 0x6c1   :  { %4195 = vst.msk [vmem:[#allocation6 + $0xc] sm:$0x1] %vm4104_vm2, %v4193_v15  ;;  %v4477_v22 = vrot.slane %v4331_v32, %v9445_v47  ;;  %v4470_v55 = vcombine.high %v4331_v32, %v4331_v32  ;;  %v4398_v15 = vld [vmem:[%s10003_s7 + $0x208] sm:$0xff] }
 0x6c3   :  { %v4298_v53 = vpop.permute.xlu1 %4297  ;;  %v4485_v34 = vcombine.high %v4477_v22, %v4477_v22  ;;  %v9463_v44 = vrot.slane %v4470_v55, %v9445_v47  ;;  %v6281_v55 = vpack.c.bf16 %v4416_v29, %v4415_v56  ;;  %v4433_v29 = vld [vmem:[%s10003_s7 + $0x320] sm:$0xff] }
 0x6c4   :  { %4300 = vst.msk [vmem:[#allocation6 + $0xb] sm:$0x1] %vm4104_vm2, %v4298_v53  ;;  %v4283_v23 = vpop.permute.xlu0 %4282 }
 0x6c5   :  { %4285 = vst.msk [vmem:[#allocation6 + $0x9] sm:$0x1] %vm4104_vm2, %v4283_v23  ;;  %4576 = vmatprep.mubr.f32.mxu1 %v4485_v34  ;;  %v4486_v31 = vcombine.high %v9463_v44, %v9463_v44  ;;  %v4417_v34 = vld [vmem:[%s10003_s7 + $0x2a0] sm:$0xff]  ;;  %v6283_v23 = vpack.c.bf16 %v4400_v40, %v4399_v27 }
 0x6c6   :  { %4577 = vmatmul.mubr.f32.vlgmr.msra.gmra.mrb[64].mxu1 %v4477_v22  ;;  %v6279_v22 = vpack.c.bf16 %v4398_v15, %v4397_v13  ;;  %v4450_v13 = vld [vmem:[%s10003_s7 + $0x3a8] sm:$0xff] }
 0x6c7   :  { %6248 = vmatpush3.bf16.msra.mxu1 %v6247_v28  ;;  %4646 = vmatprep.mubr.f32.mxu1 %v4486_v31  ;;  %v4328_v26 = vpop.permute.xlu1 %4327  ;;  %v4418_v28 = vld [vmem:[%s10003_s7 + $0x2a8] sm:$0xff]  ;;  %v4419_v31 = vld [vmem:[%s10003_s7 + $0x2b0] sm:$0xff] }
 0x6c8   :  { %4330 = vst.msk [vmem:[#allocation6 + $0xf] sm:$0x1] %vm4104_vm2, %v4328_v26  ;;  %v4313_v20 = vpop.permute.xlu0 %4312  ;;  %6250 = vmatprep.subr.bf16.mxu1 %v6249_v58  ;;  %v6285_v58 = vpack.c.bf16 %v4418_v28, %v4417_v34  ;;  %v4403_v26 = vld [vmem:[%s10003_s7 + $0x230] sm:$0xff]  ;;  %v4436_v34 = vld [vmem:[%s10003_s7 + $0x338] sm:$0xff]  ;;  %v4453_v28 = vld [vmem:[%s10003_s7 + $0x3c0] sm:$0xff] }
 0x6c9   :  { %4315 = vst.msk [vmem:[#allocation6 + $0xd] sm:$0x1] %vm4104_vm2, %v4313_v20  ;;  %v4421_v20 = vld [vmem:[%s10003_s7 + $0x2c0] sm:$0xff] }
 0x6cb   :  { %6252 = vmatpush3.bf16.msra.mxu1 %v6251_v46  ;;  %v4404_v46 = vld [vmem:[%s10003_s7 + $0x238] sm:$0xff] }
 0x6cc   :  { %6254 = vmatprep.subr.bf16.mxu1 %v6253_v61  ;;  %v4422_v61 = vld [vmem:[%s10003_s7 + $0x2c8] sm:$0xff]  ;;  %v6291_v42 = vpack.c.bf16 %v4404_v46, %v4403_v26  ;;  %v4439_v46 = vld [vmem:[%s10003_s7 + $0x350] sm:$0xff] }
 0x6cd   :  { %v6293_v51 = vpack.c.bf16 %v4422_v61, %v4421_v20  ;;  %v4440_v20 = vld [vmem:[%s10003_s7 + $0x358] sm:$0xff]  ;;  %v4457_v61 = vld [vmem:[%s10003_s7 + $0x3e0] sm:$0xff] }
 0x6cf   :  { %6256 = vmatpush3.bf16.msra.mxu1 %v6255_v12  ;;  %v4423_v12 = vld [vmem:[%s10003_s7 + $0x2d0] sm:$0xff] }
 0x6d0   :  { %6258 = vmatprep.subr.bf16.mxu1 %v6257_v2  ;;  %v9555_v36 = vld [vmem:[#allocation6 + $0x8] sm:$0xff]  ;;  %v4424_v2 = vld [vmem:[%s10003_s7 + $0x2d8] sm:$0xff] }
 0x6d1   :  { %v9565_v32 = vrot.slane %v9555_v36, %v9445_v47  ;;  %v6297_v30 = vpack.c.bf16 %v4424_v2, %v4423_v12  ;;  %v4487_v17 = vcombine.high %v9555_v36, %v9555_v36  ;;  %v4431_v36 = vld [vmem:[%s10003_s7 + $0x310] sm:$0xff]  ;;  %v4442_v12 = vld [vmem:[%s10003_s7 + $0x368] sm:$0xff] }
 0x6d2   :  { %v4459_v2 = vld [vmem:[%s10003_s7 + $0x3f0] sm:$0xff] }
 0x6d3   :  { %6260 = vmatpush3.bf16.msra.mxu1 %v6259_v52  ;;  %v4502_v53 = vcombine.high %v9565_v32, %v9565_v32  ;;  %v4425_v52 = vld [vmem:[%s10003_s7 + $0x2e0] sm:$0xff] }
 0x6d4   :  { %6262 = vmatprep.subr.bf16.mxu1 %v6261_v7  ;;  %v4426_v7 = vld [vmem:[%s10003_s7 + $0x2e8] sm:$0xff] }
 0x6d5   :  { %v6301_v33 = vpack.c.bf16 %v4426_v7, %v4425_v52  ;;  %v4444_v52 = vld [vmem:[%s10003_s7 + $0x378] sm:$0xff] }
 0x6d6   :  { %v6339_v7 = vpack.c.bf16 %v4444_v52, %v4443_v48  ;;  %v4914_v48 = vld [vmem:[%s10007_s11 + $0xd0] sm:$0xff]  ;;  %v4915_v52 = vld [vmem:[%s10007_s11 + $0xd8] sm:$0xff] }
 0x6d7   :  { %6264 = vmatpush3.bf16.msra.mxu1 %v6263_v5  ;;  %v4427_v5 = vld [vmem:[%s10003_s7 + $0x2f0] sm:$0xff] }
 0x6d8   :  { %6266 = vmatprep.subr.bf16.mxu1 %v6265_v63  ;;  %v4428_v63 = vld [vmem:[%s10003_s7 + $0x2f8] sm:$0xff] }
 0x6d9   :  { %v6305_v62 = vpack.c.bf16 %v4428_v63, %v4427_v5  ;;  %v4794_v5 = vld [vmem:[%s10005_s9 + $0x10] sm:$0xff] }
 0x6da   :  { %v6343_v63 = vpack.c.bf16 %v4794_v5, %v4792_v3  ;;  %v4899_v3 = vld [vmem:[%s10007_s11 + $0x58] sm:$0xff]  ;;  %v4917_v5 = vld [vmem:[%s10007_s11 + $0xe8] sm:$0xff] }
 0x6db   :  { %6268 = vmatpush3.bf16.msra.mxu1 %v6267_v45  ;;  %v4445_v45 = vld [vmem:[%s10003_s7 + $0x380] sm:$0xff] }
 0x6dc   :  { %6270 = vmatprep.subr.bf16.mxu1 %v6269_v59  ;;  %v4446_v59 = vld [vmem:[%s10003_s7 + $0x388] sm:$0xff] }
 0x6dd   :  { %v6309_v41 = vpack.c.bf16 %v4446_v59, %v4445_v45  ;;  %v4798_v45 = vld [vmem:[%s10005_s9 + $0x30] sm:$0xff]  ;;  %v6560_v59 = vmov 0.0  }
 0x6df   :  { %6272 = vmatpush3.bf16.msra.mxu1 %v6271_v43  ;;  %v4430_v43 = vld [vmem:[%s10003_s7 + $0x308] sm:$0xff] }
 0x6e0   :  { %6274 = vmatprep.subr.bf16.mxu1 %v6273_v57  ;;  %v9669_v57 = vrot.slane %v4487_v17, %v9445_v47  ;;  %v6311_v19 = vpack.c.bf16 %v4430_v43, %v4429_v49  ;;  %v4432_v47 = vld [vmem:[%s10003_s7 + $0x318] sm:$0xff]  ;;  %v6347_v17 = vpack.c.bf16 %v4798_v45, %v4796_v39  ;;  %v4901_v39 = vld [vmem:[%s10007_s11 + $0x68] sm:$0xff]  ;;  %v4918_v45 = vld [vmem:[%s10007_s11 + $0xf0] sm:$0xff] }
 0x6e1   :  { %v6315_v15 = vpack.c.bf16 %v4432_v47, %v4431_v36 }
 0x6e3   :  { %6276 = vmatpush3.bf16.msra.mxu1 %v6275_v14  ;;  %v4503_v14 = vcombine.high %v9669_v57, %v9669_v57 }
 0x6e4   :  { %6278 = vmatprep.subr.bf16.mxu1 %v6277_v37  ;;  %v4449_v37 = vld [vmem:[%s10003_s7 + $0x3a0] sm:$0xff] }
 0x6e5   :  { %v6317_v56 = vpack.c.bf16 %v4450_v13, %v4449_v37 }
 0x6e6   :  { %4647 = vmatmul.mubr.f32.vlgmr.msra.gmra.mrb[66].mxu1 %v9463_v44  ;;  %v4420_v44 = vld [vmem:[%s10003_s7 + $0x2b8] sm:$0xff] }
 0x6e7   :  { %6280 = vmatpush3.bf16.msra.mxu1 %v6279_v22  ;;  %4716 = vmatprep.mubr.f32.mxu1 %v4502_v53  ;;  %v6289_v35 = vpack.c.bf16 %v4420_v44, %v4419_v31  ;;  %v4434_v22 = vld [vmem:[%s10003_s7 + $0x328] sm:$0xff]  ;;  %v4435_v53 = vld [vmem:[%s10003_s7 + $0x330] sm:$0xff] }
 0x6e8   :  { %6282 = vmatprep.subr.bf16.mxu1 %v6281_v55  ;;  %v4451_v55 = vld [vmem:[%s10003_s7 + $0x3b0] sm:$0xff]  ;;  %v6319_v27 = vpack.c.bf16 %v4434_v22, %v4433_v29  ;;  %v4438_v31 = vld [vmem:[%s10003_s7 + $0x348] sm:$0xff]  ;;  %v4888_v22 = vld [vmem:[%s10007_s11] sm:$0xff] }
 0x6e9   :  { %v4455_v44 = vld [vmem:[%s10003_s7 + $0x3d0] sm:$0xff] }
 0x6eb   :  { %6284 = vmatpush3.bf16.msra.mxu1 %v6283_v23  ;;  %v4454_v23 = vld [vmem:[%s10003_s7 + $0x3c8] sm:$0xff] }
 0x6ec   :  { %6286 = vmatprep.subr.bf16.mxu1 %v6285_v58  ;;  %v6323_v58 = vpack.c.bf16 %v4436_v34, %v4435_v53  ;;  %v6325_v16 = vpack.c.bf16 %v4454_v23, %v4453_v28 }
 0x6ef   :  { %6288 = vmatpush3.bf16.msra.mxu1 %v6287_v25  ;;  %v4456_v25 = vld [vmem:[%s10003_s7 + $0x3d8] sm:$0xff] }
 0x6f0   :  { %6290 = vmatprep.subr.bf16.mxu1 %v6289_v35  ;;  %v6327_v35 = vpack.c.bf16 %v4438_v31, %v4437_v6  ;;  %v6329_v26 = vpack.c.bf16 %v4456_v25, %v4455_v44  ;;  %v4908_v6 = vld [vmem:[%s10007_s11 + $0xa0] sm:$0xff]  ;;  %v4909_v31 = vld [vmem:[%s10007_s11 + $0xa8] sm:$0xff] }
 0x6f1   :  { %v6357_v25 = vpack.c.bf16 %v4909_v31, %v4908_v6  ;;  %v4800_v31 = vld [vmem:[%s10006_s10] sm:$0x3] }
 0x6f3   :  { %6292 = vmatpush3.bf16.msra.mxu1 %v6291_v42  ;;  %v4458_v42 = vld [vmem:[%s10003_s7 + $0x3e8] sm:$0xff] }
 0x6f4   :  { %6294 = vmatprep.subr.bf16.mxu1 %v6293_v51  ;;  %v6331_v51 = vpack.c.bf16 %v4440_v20, %v4439_v46  ;;  %v6333_v50 = vpack.c.bf16 %v4458_v42, %v4457_v61  ;;  %v4910_v46 = vld [vmem:[%s10007_s11 + $0xb0] sm:$0xff]  ;;  %v4911_v20 = vld [vmem:[%s10007_s11 + $0xb8] sm:$0xff] }
 0x6f5   :  { %v6361_v42 = vpack.c.bf16 %v4911_v20, %v4910_v46 }
 0x6f7   :  { %6296 = vmatpush3.bf16.msra.mxu1 %v6295_v21  ;;  %v4460_v21 = vld [vmem:[%s10003_s7 + $0x3f8] sm:$0xff] }
 0x6f8   :  { %6298 = vmatprep.subr.bf16.mxu1 %v6297_v30  ;;  %v6335_v30 = vpack.c.bf16 %v4442_v12, %v4441_v0  ;;  %v6337_v60 = vpack.c.bf16 %v4460_v21, %v4459_v2  ;;  %v4912_v0 = vld [vmem:[%s10007_s11 + $0xc0] sm:$0xff]  ;;  %v4913_v12 = vld [vmem:[%s10007_s11 + $0xc8] sm:$0xff] }
 0x6f9   :  { %v6365_v21 = vpack.c.bf16 %v4913_v12, %v4912_v0  ;;  %v5095_v12 = vld [vmem:[%s10011_s15 + $0x18] sm:$0xff] }
 0x6fb   :  { %6300 = vmatpush3.bf16.msra.mxu1 %v6299_v9  ;;  %v4793_v9 = vld [vmem:[%s10005_s9 + $0x8] sm:$0xff] }
 0x6fc   :  { %6302 = vmatprep.subr.bf16.mxu1 %v6301_v33  ;;  %v4795_v33 = vld [vmem:[%s10005_s9 + $0x18] sm:$0xff] }
 0x6fd   :  { %v6341_v10 = vpack.c.bf16 %v4795_v33, %v4793_v9  ;;  %v6369_v9 = vpack.c.bf16 %v4915_v52, %v4914_v48  ;;  %v4898_v33 = vld [vmem:[%s10007_s11 + $0x50] sm:$0xff]  ;;  %v5265_v48 = vld [vmem:[%s10008_s12] ss:$0 sm:$0xff] }
 0x6ff   :  { %6304 = vmatpush3.bf16.msra.mxu1 %v6303_v8  ;;  %v4797_v8 = vld [vmem:[%s10005_s9 + $0x28] sm:$0xff] }
 0x700   :  { %6306 = vmatprep.subr.bf16.mxu1 %v6305_v62  ;;  %v4799_v62 = vld [vmem:[%s10005_s9 + $0x38] sm:$0xff] }
 0x701   :  { %v6345_v38 = vpack.c.bf16 %v4799_v62, %v4797_v8  ;;  %v4900_v62 = vld [vmem:[%s10007_s11 + $0x60] sm:$0xff] }
 0x703   :  { %6308 = vmatpush3.bf16.msra.mxu1 %v6307_v24  ;;  %v4904_v24 = vld [vmem:[%s10007_s11 + $0x80] sm:$0xff] }
 0x704   :  { %6310 = vmatprep.subr.bf16.mxu1 %v6309_v41  ;;  %v4905_v41 = vld [vmem:[%s10007_s11 + $0x88] sm:$0xff] }
 0x705   :  { %v6349_v49 = vpack.c.bf16 %v4905_v41, %v4904_v24  ;;  %v4902_v24 = vld [vmem:[%s10007_s11 + $0x70] sm:$0xff] }
 0x706   :  { %4717 = vmatmul.mubr.f32.vlgmr.msra.gmra.mrb[68].mxu1 %v9565_v32  ;;  %v4452_v32 = vld [vmem:[%s10003_s7 + $0x3b8] sm:$0xff] }
 0x707   :  { %6312 = vmatpush3.bf16.msra.mxu1 %v6311_v19  ;;  %4786 = vmatprep.mubr.f32.mxu1 %v4503_v14  ;;  %v6321_v40 = vpack.c.bf16 %v4452_v32, %v4451_v55  ;;  %v4889_v55 = vld [vmem:[%s10007_s11 + $0x8] sm:$0xff] }
 0x708   :  { %6314 = vmatprep.subr.bf16.mxu1 %v6313_v4  ;;  %v6351_v34 = vpack.c.bf16 %v4889_v55, %v4888_v22  ;;  %v5006_v22 = vld [vmem:[%s10009_s13 + $0x40] sm:$0xff]  ;;  %v5007_v55 = vld [vmem:[%s10009_s13 + $0x48] sm:$0xff] }
 0x70b   :  { %6316 = vmatpush3.bf16.msra.mxu1 %v6315_v15 }
 0x70c   :  { %6318 = vmatprep.subr.bf16.mxu1 %v6317_v56 }
 0x70f   :  { %6320 = vmatpush3.bf16.msra.mxu1 %v6319_v27  ;;  %v4906_v27 = vld [vmem:[%s10007_s11 + $0x90] sm:$0xff] }
 0x710   :  { %6322 = vmatprep.subr.bf16.mxu1 %v6321_v40  ;;  %v4907_v40 = vld [vmem:[%s10007_s11 + $0x98] sm:$0xff] }
 0x711   :  { %v6353_v23 = vpack.c.bf16 %v4907_v40, %v4906_v27  ;;  %v5008_v27 = vld [vmem:[%s10009_s13 + $0x50] sm:$0xff]  ;;  %v5009_v40 = vld [vmem:[%s10009_s13 + $0x58] sm:$0xff] }
 0x713   :  { %6324 = vmatpush3.bf16.msra.mxu1 %v6323_v58  ;;  %v4890_v58 = vld [vmem:[%s10007_s11 + $0x10] sm:$0xff] }
 0x714   :  { %6326 = vmatprep.subr.bf16.mxu1 %v6325_v16  ;;  %v4891_v16 = vld [vmem:[%s10007_s11 + $0x18] sm:$0xff] }
 0x715   :  { %v6355_v44 = vpack.c.bf16 %v4891_v16, %v4890_v58  ;;  %v5012_v58 = vld [vmem:[%s10009_s13 + $0x70] sm:$0xff]  ;;  %v5013_v16 = vld [vmem:[%s10009_s13 + $0x78] sm:$0xff] }
 0x716   :  { %v6403_v6 = vpack.c.bf16 %v5013_v16, %v5012_v58 }
 0x717   :  { %6328 = vmatpush3.bf16.msra.mxu1 %v6327_v35  ;;  %v4892_v35 = vld [vmem:[%s10007_s11 + $0x20] sm:$0xff] }
 0x718   :  { %6330 = vmatprep.subr.bf16.mxu1 %v6329_v26  ;;  %v4893_v26 = vld [vmem:[%s10007_s11 + $0x28] sm:$0xff] }
 0x719   :  { %v6359_v61 = vpack.c.bf16 %v4893_v26, %v4892_v35 }
 0x71b   :  { %6332 = vmatpush3.bf16.msra.mxu1 %v6331_v51  ;;  %v4894_v51 = vld [vmem:[%s10007_s11 + $0x30] sm:$0xff] }
 0x71c   :  { %6334 = vmatprep.subr.bf16.mxu1 %v6333_v50  ;;  %v4895_v50 = vld [vmem:[%s10007_s11 + $0x38] sm:$0xff] }
 0x71d   :  { %v6363_v2 = vpack.c.bf16 %v4895_v50, %v4894_v51  ;;  %v5094_v50 = vld [vmem:[%s10011_s15 + $0x10] sm:$0xff] }
 0x71f   :  { %6336 = vmatpush3.bf16.msra.mxu1 %v6335_v30  ;;  %v4896_v30 = vld [vmem:[%s10007_s11 + $0x40] sm:$0xff] }
 0x720   :  { %6338 = vmatprep.subr.bf16.mxu1 %v6337_v60  ;;  %v4897_v60 = vld [vmem:[%s10007_s11 + $0x48] sm:$0xff] }
 0x723   :  { %6340 = vmatpush3.bf16.msra.mxu1 %v6339_v7  ;;  %v6367_v7 = vpack.c.bf16 %v4897_v60, %v4896_v30 }
 0x724   :  { %6342 = vmatprep.subr.bf16.mxu1 %v6341_v10  ;;  %v4916_v10 = vld [vmem:[%s10007_s11 + $0xe0] sm:$0xff] }
 0x725   :  { %v6373_v8 = vpack.c.bf16 %v4917_v5, %v4916_v10  ;;  %v5099_v10 = vld [vmem:[%s10011_s15 + $0x38] sm:$0xff] }
 0x726   :  { %4787 = vmatmul.mubr.f32.vlgmr.msra.gmra.mrb[70].mxu1 %v9669_v57 }
 0x727   :  { %6344 = vmatpush1.bf16.msra.mxu1 %v6343_v63  ;;  %4879 = vmatprep.mubr.f32.mxu1 %v6560_v59  ;;  %v6371_v63 = vpack.c.bf16 %v4899_v3, %v4898_v33  ;;  %v5098_v3 = vld [vmem:[%s10011_s15 + $0x30] sm:$0xff] }
 0x728   :  { %6346 = vmatprep.subr.bf16.mxu1 %v6345_v38  ;;  %v6375_v38 = vpack.c.bf16 %v4901_v39, %v4900_v62  ;;  %v6415_v5 = vpack.c.bf16 %v5099_v10, %v5098_v3 }
 0x72b   :  { %6348 = vmatpush1.bf16.msra.mxu1 %v6347_v17  ;;  %v4919_v17 = vld [vmem:[%s10007_s11 + $0xf8] sm:$0xff] }
 0x72c   :  { %6350 = vmatprep.subr.bf16.mxu1 %v6349_v49  ;;  %v6377_v41 = vpack.c.bf16 %v4919_v17, %v4918_v45  ;;  %v4903_v49 = vld [vmem:[%s10007_s11 + $0x78] sm:$0xff]  ;;  %v5267_v45 = vld [vmem:[%s10012_s16] ss:$0 sm:$0xff] }
 0x799   :  { %v5653_v43 = vpop.f32.mrb[64].mxu1 }
 0x79a   :  { %v5654_v57 = vpop.f32.mrb[65].mxu1 }
 0x79b   :  { %v5655_v1 = vadd.f32 %v5654_v57, %v5653_v43  ;;  %v6379_v43 = vpack.c.bf16 %v4903_v49, %v4902_v24  ;;  %v4998_v57 = vld [vmem:[%s10009_s13] sm:$0xff] }
 0x79d   :  { %v4579_v36 = vadd.f32 %v5655_v1, %v5263_v11  ;;  %v4999_v1 = vld [vmem:[%s10009_s13 + $0x8] sm:$0xff]  ;;  %v5000_v11 = vld [vmem:[%s10009_s13 + $0x10] sm:$0xff] }
 0x7b9   :  { %v5688_v19 = vpop.f32.mrb[66].mxu1 }
 0x7ba   :  { %v5689_v4 = vpop.f32.mrb[67].mxu1 }
 0x7bb   :  { %v5690_v47 = vadd.f32 %v5689_v4, %v5688_v19  ;;  %v6382_v19 = vpack.c.bf16 %v4999_v1, %v4998_v57  ;;  %v5001_v4 = vld [vmem:[%s10009_s13 + $0x18] sm:$0xff] }
 0x7bd   :  { %v4649_v14 = vadd.f32 %v5690_v47, %v4579_v36  ;;  %6383 = vmatpush3.bf16.msra.mxu0 %v6382_v19  ;;  %v6385_v36 = vpack.c.bf16 %v5001_v4, %v5000_v11  ;;  %v10046_v47 = vmov 0.0|0.0  }
 0x7be   :  { %6384 = vmatprep.subr.bf16.mxu0 %v10046_v47 }
 0x7c1   :  { %6386 = vmatpush3.bf16.msra.mxu0 %v6385_v36 }
 0x7c2   :  { %6387 = vmatprep.subr.bf16.mxu0 %v10046_v47 }
 0x7d9   :  { %v5723_v37 = vpop.f32.mrb[68].mxu1 }
 0x7da   :  { %v5724_v13 = vpop.f32.mrb[69].mxu1 }
 0x7db   :  { %v5725_v15 = vadd.f32 %v5724_v13, %v5723_v37  ;;  %v5003_v37 = vld [vmem:[%s10009_s13 + $0x28] sm:$0xff] }
 0x7dd   :  { %v4719_v56 = vadd.f32 %v5725_v15, %v4649_v14  ;;  %v5002_v14 = vld [vmem:[%s10009_s13 + $0x20] sm:$0xff]  ;;  %v5004_v15 = vld [vmem:[%s10009_s13 + $0x30] sm:$0xff] }
 0x7de   :  { %v6388_v13 = vpack.c.bf16 %v5003_v37, %v5002_v14 }
 0x7e0   :  { %6389 = vmatpush3.bf16.msra.mxu0 %v6388_v13 }
 0x7e1   :  { %6390 = vmatprep.subr.bf16.mxu0 %v10046_v47 }
 0x7f9   :  { %v5758_v29 = vpop.f32.mrb[70].mxu1 }
 0x7fa   :  { %v5759_v32 = vpop.f32.mrb[71].mxu1 }
 0x7fb   :  { %v5760_v53 = vadd.f32 %v5759_v32, %v5758_v29  ;;  %v6394_v32 = vpack.c.bf16 %v5007_v55, %v5006_v22 }
 0x7fd   :  { %v4789_v28 = vadd.f32 %v5760_v53, %v4719_v56  ;;  %v5005_v56 = vld [vmem:[%s10009_s13 + $0x38] sm:$0xff]  ;;  %v6397_v53 = vpack.c.bf16 %v5009_v40, %v5008_v27 }
 0x7fe   :  { %v6391_v29 = vpack.c.bf16 %v5005_v56, %v5004_v15 }
 0x7ff   :  { %5264 = vmatmul.mubr.msk.f32.vlgmr.msra.gmra.mrb[72].mxu1 %vm1077_vm1, %v4789_v28  ;;  %v5011_v28 = vld [vmem:[%s10009_s13 + $0x68] sm:$0xff]  ;;  %vm6561_vm1 = vmmov 0  }
 0x800   :  { %6352 = vmatpush3.bf16.msra.mxu1 %v6351_v34  ;;  %6392 = vmatpush3.bf16.msra.mxu0 %v6391_v29  ;;  %v5010_v34 = vld [vmem:[%s10009_s13 + $0x60] sm:$0xff] }
 0x801   :  { %6354 = vmatprep.subr.bf16.mxu1 %v6353_v23  ;;  %6393 = vmatprep.subr.bf16.mxu0 %v10046_v47  ;;  %v6400_v23 = vpack.c.bf16 %v5011_v28, %v5010_v34 }
 0x802   :  { %5854 = vmatprep.mubr.msk.f32.mxu0 %vm6561_vm1, %v6560_v59 }
 0x804   :  { %6356 = vmatpush3.bf16.msra.mxu1 %v6355_v44  ;;  %6395 = vmatpush3.bf16.msra.mxu0 %v6394_v32  ;;  %v4808_v44 = vsub.s32 1, %v7818_v54  ;;  %v5092_v54 = vld [vmem:[%s10011_s15] sm:$0xff] }
 0x805   :  { %6358 = vmatprep.subr.bf16.mxu1 %v6357_v25  ;;  %6396 = vmatprep.subr.bf16.mxu0 %v10046_v47  ;;  %v4805_v25 = vrot.slane %v4800_v31, %v7824_v18  ;;  %v5093_v18 = vld [vmem:[%s10011_s15 + $0x8] sm:$0xff] }
 0x806   :  { %v4809_v35 = vrot.slane %v4800_v31, %v4808_v44  ;;  %v6406_v0 = vpack.c.bf16 %v5093_v18, %v5092_v54 }
 0x808   :  { %6360 = vmatpush3.bf16.msra.mxu1 %v6359_v61  ;;  %6398 = vmatpush3.bf16.msra.mxu0 %v6397_v53 }
 0x809   :  { %6362 = vmatprep.subr.bf16.mxu1 %v6361_v42  ;;  %6399 = vmatprep.subr.bf16.mxu0 %v10046_v47 }
 0x80c   :  { %6364 = vmatpush3.bf16.msra.mxu1 %v6363_v2  ;;  %6401 = vmatpush3.bf16.msra.mxu0 %v6400_v23  ;;  %v6409_v2 = vpack.c.bf16 %v5095_v12, %v5094_v50 }
 0x80d   :  { %6366 = vmatprep.subr.bf16.mxu1 %v6365_v21  ;;  %6402 = vmatprep.subr.bf16.mxu0 %v10046_v47  ;;  %v5097_v21 = vld [vmem:[%s10011_s15 + $0x28] sm:$0xff] }
 0x810   :  { %6368 = vmatpush3.bf16.msra.mxu1 %v6367_v7  ;;  %6404 = vmatpush3.bf16.msra.mxu0 %v6403_v6 }
 0x811   :  { %6370 = vmatprep.subr.bf16.mxu1 %v6369_v9 }
 0x814   :  { %6372 = vmatpush3.bf16.msra.mxu1 %v6371_v63  ;;  %v5266_v63 = vld [vmem:[%s10010_s14] ss:$0 sm:$0xff] }
 0x815   :  { %6374 = vmatprep.subr.bf16.mxu1 %v6373_v8 }
 0x818   :  { %6376 = vmatpush3.bf16.msra.mxu1 %v6375_v38 }
 0x819   :  { %6378 = vmatprep.subr.bf16.mxu1 %v6377_v41 }
 0x81c   :  { %6380 = vmatpush3.bf16.msra.mxu1 %v6379_v43 }
 0x81d   :  { %6405 = vmatprep.subr.bf16.mxu1 %v10046_v47 }
 0x8d2   :  { %v4881_v26 = vpop.f32.mrb[72].mxu1 }
 0x8d3   :  { %v4882_v46 = vadd.f32 %v4881_v26, %v4805_v25  ;;  %v4883_v20 = vpop.f32.mrb[73].mxu1 }
 0x8d4   :  { %v4884_v61 = vadd.f32 %v4883_v20, %v4809_v35 }
 0x8d5   :  { %v4886_v51 = vmax.f32 %v4882_v46, 0.0 }
 0x8d6   :  { %v4887_v42 = vmax.f32 %v4884_v61, 0.0 }
 0x8d8   :  { %4991 = vmatprep.mubr.f32.mxu1 %v4887_v42 }
 0x8d9   :  { %4992 = vmatmul.mubr.f32.vlgmr.msra.gmra.mrb[74].mxu1 %v4886_v51 }
 0x8da   :  { %5873 = vmatprep.mubr.msk.f32.mxu1 %vm6561_vm1, %v6560_v59  ;;  %6407 = vmatpush3.bf16.msra.mxu1 %v6406_v0  ;;  %v5096_v59 = vld [vmem:[%s10011_s15 + $0x20] sm:$0xff]  ;;  %s6562_s15 = smov [#allocation7]  }
 0x8db   :  { %6408 = vmatprep.subr.bf16.mxu1 %v10046_v47  ;;  %v6412_v30 = vpack.c.bf16 %v5097_v21, %v5096_v59  ;;  %s5190_s23 = sshll.u32 %s6562_s15, 4  ;;  %s5191_s23 = int_to_ptr.vmem [resolvable:$true] %s5190_s23 }
 0x8dc   :  { %s6531_s14 = scalar_lea.vmem %s5191_s23, 32  ;;  %p6536_p1 = scmp.lt.s32.totalorder %s5191_s23, %s5191_s23 }
 0x8dd   :  { %p6532_p0 = scmp.ne.s32.totalorder %s5191_s23, %s6531_s14  ;;  %p6537_p2 = scmp.lt.s32.totalorder %s6531_s14, %s6531_s14 }
 0x8de   :  { %6410 = vmatpush3.bf16.msra.mxu1 %v6409_v2 }
 0x8df   :  { %6411 = vmatprep.subr.bf16.mxu1 %v10046_v47  ;;  %p6538_p3 = por %p6537_p2, %p6536_p1 }
 0x8e1   :  { %p6539_p4 = pnand %p6538_p3, %p6532_p0 }
 0x8e2   :  { %6413 = vmatpush3.bf16.msra.mxu1 %v6412_v30 }
 0x8e3   :  { %6414 = vmatprep.subr.bf16.mxu1 %v10046_v47 }
 0x8e6   :  { %6416 = vmatpush3.bf16.msra.mxu1 %v6415_v5 }
 0x9ac   :  { %v5793_v60 = vpop.f32.mrb[74].mxu1 }
 0x9ad   :  { %v5794_v52 = vpop.f32.mrb[75].mxu1 }
 0x9ae   :  { %v5795_v7 = vadd.f32 %v5794_v52, %v5793_v60 }
 0x9b0   :  { %v4994_v9 = vadd.f32 %v5795_v7, %v5265_v48 }
 0x9b2   :  { %v4997_v33 = vmax.f32 %v4994_v9, 0.0 }
 0x9b4   :  { %5855 = vmatmul.mubr.f32.vlgmr.msra.gmra.mrb[98].mxu0 %v4997_v33 }
 0xa87   :  { %v5087_v8 = vpop.f32.mrb[98].mxu0 }
 0xa88   :  { %v5088_v62 = vadd.f32 %v5266_v63, %v5087_v8  ;;  %v5856_v39 = vpop.f32.mrb[99].mxu0 }
 0xa8a   :  { %v5091_v38 = vmax.f32 %v5088_v62, 0.0 }
 0xa8c   :  { %5874 = vmatmul.mubr.msk.f32.vlgmr.msra.gmra.mrb[76].mxu1 %vm1848_vm15, %v5091_v38 }
 0xb5f   :  { %v5176_v17 = vpop.f32.mrb[76].mxu1 }
 0xb60   :  { %v5177_v24 = vadd.f32 %v5267_v45, %v5176_v17  ;;  %v5875_v41 = vpop.f32.mrb[77].mxu1 }
 0xb62   :  { %6529 = vtanh.f32 %v5177_v24 }
 0xb6c   :  { %v6530_v49 = vpop.eup %6529 }
 0xb6d   :  { %v5181_v43 = vmul.f32 2.0, %v6530_v49 }
 0xb6f   :  { %5183 = vst.msk [vmem:[#allocation7] sm:$0x3] %vm5182_vm3, %v5181_v43 }
 0xb70   :  { %6542 = shalt.err (!%p6539_p4)
}
 0xb71   :  { %s6543_s9 = scalar_lea.hbm %s10013_s17, 32 }
 0xb72   :  { %p6544_p5 = scmp.ne.s32.totalorder %s10013_s17, %s6543_s9  ;;  %p6547_p6 = scmp.lt.u32.totalorder %s6543_s9, %s10013_s17 }
 0xb74   :  { %p6549_p7 = pnand %p6547_p6, %p6544_p5 }
 0xb76   :  { %6552 = shalt.err (!%p6549_p7)
}
 0xb77   :  { %5193 = dma.vmem_to_hbm [thread:$0]  %s5191_s23, 32, %s10013_s17, [#allocation8]  }
 0xb78   :  { %6553 = dma.done.wait [#allocation8], 32  }
 0xb79   :  { %6554 = vsyncadd [#allocation8], 4294967264 }
 0xb7a   :  { %5197 = vsyncpa [#allocation8], 1 }

</bundles_post_ra>
